<compile_context>
chip_gen: v7x
topology: tpu7x:2x2x1
jax: 0.10.0
libtpu: 0.0.40
codegen_flags: <defaults>
</compile_context>

<pallas_src>
import functools

import jax
import jax.numpy as jnp
from jax.experimental import pallas as pl
from jax.experimental.pallas import tpu as pltpu

BN_EPS = 1e-5


def _conv_stats_kernel(x_ref, w_ref, g_ref, b_ref,
                       y_ref, scale_ref, shift_ref,
                       acc_sum, acc_sq, *, inv_m):
    # x_ref:       (1, Cin, THW)  bf16 NCHW input tile (one image, HW tile)
    # w_ref:       (TCO, Cin)     bf16 1x1 conv weight tile
    # g_ref/b_ref: (TCO, 1)       f32 BN affine params
    # y_ref:       (1, TCO, THW)  bf16 pre-BN conv output tile (streamed to HBM)
    # scale/shift: (TCO, 1)       f32 folded BN, written once per Cout tile
    # acc_sum/sq:  (TCO, 1)       f32 per-channel partial sums (VMEM scratch)
    n = pl.program_id(1)
    hw = pl.program_id(2)
    is_first = jnp.logical_and(n == 0, hw == 0)
    is_last = jnp.logical_and(n == pl.num_programs(1) - 1,
                              hw == pl.num_programs(2) - 1)

    @pl.when(is_first)
    def _():
        acc_sum[...] = jnp.zeros_like(acc_sum)
        acc_sq[...] = jnp.zeros_like(acc_sq)

    # ReLU on the VPU (bf16 in == bf16 out; relu(bf16(x)) == bf16(relu(x))),
    # bf16 operands into the MXU, f32 accumulation.
    x = jnp.maximum(x_ref[0], 0)                                  # (Cin, THW)
    y = jnp.dot(w_ref[...], x, preferred_element_type=jnp.float32)  # (TCO, THW) f32
    y_ref[0] = y.astype(y_ref.dtype)                              # bf16 writeback

    # Per-channel partial sums for training-mode (biased) batch statistics,
    # accumulated in f32 from the f32 MXU result.  Note: E[y^2]-E[y]^2 in f32
    # is fine in this |mean| ~ std regime; for huge N*H*W a shifted/two-pass
    # accumulation would be more robust.
    acc_sum[...] += jnp.sum(y, axis=-1, keepdims=True)            # (TCO, 1)
    acc_sq[...] += jnp.sum(y * y, axis=-1, keepdims=True)         # (TCO, 1)

    @pl.when(is_last)
    def _():
        mean = acc_sum[...] * inv_m
        var = acc_sq[...] * inv_m - mean * mean                   # biased variance
        inv_std = jax.lax.rsqrt(var + BN_EPS)
        scale = g_ref[...] * inv_std
        scale_ref[...] = scale
        shift_ref[...] = b_ref[...] - mean * scale


def _bn_apply_kernel(y_ref, scale_ref, shift_ref, o_ref):
    # Folded BatchNorm: one mul + one add per element (per-channel broadcast).
    y = y_ref[0].astype(jnp.float32)
    o_ref[0] = y * scale_ref[...] + shift_ref[...]


def _pick_co_tile(cout):
    # >=2 co blocks (both v7x TensorCores get work on the 'parallel' axis),
    # each as large as possible (<=256 = MXU width on v6e/v7x) so every x tile
    # read from HBM is reused for as many output channels as possible.
    if cout % 256 == 0 and cout >= 512:
        return 256
    if cout % 128 == 0 and cout >= 256:
        return 128
    return cout


def _pick_hw_tile(hw_pad, bytes_per_col, budget_bytes):
    # Largest multiple-of-128 divisor of hw_pad whose double-buffered footprint
    # (bytes_per_col bytes per HW column) stays within the VMEM budget.
    k = hw_pad // 128
    best = 128
    for d in range(1, k + 1):
        if k % d == 0:
            t = 128 * d
            if 2 * bytes_per_col * t <= budget_bytes:
                best = max(best, t)
    return best


# Budget sized for v7x's 32 MiB default scoped VMEM (64 MiB physical); v5e/v6e
# (128 MiB) trivially satisfy it too.
_VMEM_BUDGET = 20 << 20


@jax.jit
def relu_conv1x1_bn(x_nchw, w_oi, gamma, beta):
    """x_nchw: (N, Cin, H, W); w_oi: (Cout, Cin); gamma/beta: (Cout,). NCHW out."""
    N, Cin, H, W = x_nchw.shape
    Cout = w_oi.shape[0]
    HW = H * W
    M = N * HW                              # true per-channel element count
    HWp = ((HW + 127) // 128) * 128         # lane-dense padded spatial extent

    tile_co = _pick_co_tile(Cout)

    # bf16 operands in HBM: halves x read bytes (the binding HBM term of pass
    # 1) and removes per-tile VPU casts / the f32->bf16 temp in VMEM.
    x3 = x_nchw.reshape(N, Cin, HW).astype(jnp.bfloat16)
    if HWp != HW:
        x3 = jnp.pad(x3, ((0, 0), (0, 0), (0, HWp - HW)))   # relu(0)=0 -> stats exact
    w_bf = w_oi.astype(jnp.bfloat16)
    g2 = gamma.reshape(Cout, 1).astype(jnp.float32)
    b2 = beta.reshape(Cout, 1).astype(jnp.float32)

    # ---- pass 1: conv (MXU) + per-channel stats -> folded scale/shift ----
    tile_hw1 = _pick_hw_tile(HWp, 2 * (Cin + tile_co), _VMEM_BUDGET)
    grid1 = (Cout // tile_co, N, HWp // tile_hw1)

    kernel1 = functools.partial(_conv_stats_kernel, inv_m=1.0 / M)
    y, scale, shift = pl.pallas_call(
        kernel1,
        out_shape=(
            jax.ShapeDtypeStruct((N, Cout, HWp), jnp.bfloat16),
            jax.ShapeDtypeStruct((Cout, 1), jnp.float32),
            jax.ShapeDtypeStruct((Cout, 1), jnp.float32),
        ),
        grid=grid1,
        in_specs=[
            pl.BlockSpec((1, Cin, tile_hw1), lambda co, n, hw: (n, 0, hw)),
            pl.BlockSpec((tile_co, Cin), lambda co, n, hw: (co, 0)),
            pl.BlockSpec((tile_co, 1), lambda co, n, hw: (co, 0)),
            pl.BlockSpec((tile_co, 1), lambda co, n, hw: (co, 0)),
        ],
        out_specs=(
            pl.BlockSpec((1, tile_co, tile_hw1), lambda co, n, hw: (n, co, hw)),
            pl.BlockSpec((tile_co, 1), lambda co, n, hw: (co, 0)),
            pl.BlockSpec((tile_co, 1), lambda co, n, hw: (co, 0)),
        ),
        scratch_shapes=[
            pltpu.VMEM((tile_co, 1), jnp.float32),
            pltpu.VMEM((tile_co, 1), jnp.float32),
        ],
        # co is the only parallel axis: the stats scratch + is_first/is_last
        # finalize require a sequential (n, hw) sweep per co tile.
        compiler_params=pltpu.CompilerParams(
            dimension_semantics=("parallel", "arbitrary", "arbitrary")),
    )(x3, w_bf, g2, b2)

    # ---- pass 2: folded BN, pure streaming, own large lane-dense tiles ----
    tile_co2 = tile_co
    tile_hw2 = _pick_hw_tile(HWp, (2 + 4) * tile_co2, _VMEM_BUDGET)
    grid2 = (Cout // tile_co2, N, HWp // tile_hw2)

    out = pl.pallas_call(
        _bn_apply_kernel,
        out_shape=jax.ShapeDtypeStruct((N, Cout, HWp), jnp.float32),
        grid=grid2,
        in_specs=[
            pl.BlockSpec((1, tile_co2, tile_hw2), lambda co, n, hw: (n, co, hw)),
            pl.BlockSpec((tile_co2, 1), lambda co, n, hw: (co, 0)),
            pl.BlockSpec((tile_co2, 1), lambda co, n, hw: (co, 0)),
        ],
        out_specs=pl.BlockSpec((1, tile_co2, tile_hw2),
                               lambda co, n, hw: (n, co, hw)),
        compiler_params=pltpu.CompilerParams(
            dimension_semantics=("parallel", "parallel", "parallel")),
    )(y, scale, shift)

    if HWp != HW:
        out = out[:, :, :HW]   # drop padded columns (they only hold `shift`)
    return out.reshape(N, Cout, H, W)


def _reference(x_nchw, w_oi, gamma, beta, *, bf16_path=True):
    # Pure-JAX reference: ReLU -> 1x1 conv -> training-mode BN.
    # bf16_path matches the kernel's numeric recipe (bf16 MXU operands, f32
    # accumulation, f32 stats, bf16-rounded pre-BN intermediate).
    if bf16_path:
        xr = jnp.maximum(x_nchw.astype(jnp.bfloat16), 0)
        y = jnp.einsum("nchw,oc->nohw", xr, w_oi.astype(jnp.bfloat16),
                       preferred_element_type=jnp.float32)
        y_app = y.astype(jnp.bfloat16).astype(jnp.float32)
    else:
        xr = jnp.maximum(x_nchw, 0.0)
        y = jnp.einsum("nchw,oc->nohw", xr, w_oi,
                       preferred_element_type=jnp.float32)
        y_app = y
    mean = jnp.mean(y, axis=(0, 2, 3), keepdims=True)
    var = jnp.mean((y - mean) ** 2, axis=(0, 2, 3), keepdims=True)
    g = gamma.reshape(1, -1, 1, 1)
    b = beta.reshape(1, -1, 1, 1)
    return (y_app - mean) * jax.lax.rsqrt(var + BN_EPS) * g + b


if __name__ == "__main__":
    # Shapes from the module spec: Conv2d(1024 -> 256, 1x1) on a 1x1024x28x28
    # input (HW = 784 -> padded to 896 inside the wrapper).
    N, Cin, H, W, Cout = 1, 1024, 28, 28, 256

    key = jax.random.PRNGKey(0)
    kx, kw, kg, kb = jax.random.split(key, 4)
    x = jax.random.normal(kx, (N, Cin, H, W), dtype=jnp.float32)
    w = jax.random.normal(kw, (Cout, Cin), dtype=jnp.float32) * 0.02
    gamma = 1.0 + 0.1 * jax.random.normal(kg, (Cout,), dtype=jnp.float32)
    beta = 0.1 * jax.random.normal(kb, (Cout,), dtype=jnp.float32)

    out = jax.block_until_ready(relu_conv1x1_bn(x, w, gamma, beta))
    assert out.shape == (N, Cout, H, W)
    assert bool(jnp.all(jnp.isfinite(out)))

    # Check against a matched-precision reference (same bf16 recipe).
    ref_bf16 = _reference(x, w, gamma, beta, bf16_path=True)
    assert jnp.allclose(out, ref_bf16, atol=2e-2, rtol=2e-2), \
        float(jnp.max(jnp.abs(out - ref_bf16)))

    # Looser check against the full-f32 reference; the gap is the deliberate
    # bf16 operand / intermediate rounding (perf tradeoff on v5e/v6e/v7x).
    ref_f32 = _reference(x, w, gamma, beta, bf16_path=False)
    assert jnp.allclose(out, ref_f32, atol=1e-1, rtol=1e-1), \
        float(jnp.max(jnp.abs(out - ref_f32)))

    # TODO(synk): PyTorch's BatchNorm2d also updates running_mean/running_var
    # (momentum=0.1) as a side effect; the training-mode forward output does
    # not depend on them, so they are not produced here.
    print("KERNEL_OK")
</pallas_src>

<mosaic_0001>
module attributes {stable_mosaic.version = 11 : i64} {
  func.func @_conv_stats_kernel(%arg0: i32, %arg1: i32, %arg2: i32, %arg3: memref<1x1024x896xbf16, #tpu.memory_space<vmem>>, %arg4: memref<128x1024xbf16, #tpu.memory_space<vmem>>, %arg5: memref<128x1xf32, #tpu.memory_space<vmem>>, %arg6: memref<128x1xf32, #tpu.memory_space<vmem>>, %arg7: memref<1x128x896xbf16, #tpu.memory_space<vmem>>, %arg8: memref<128x1xf32, #tpu.memory_space<vmem>>, %arg9: memref<128x1xf32, #tpu.memory_space<vmem>>, %arg10: memref<128x1xf32, #tpu.memory_space<vmem>>, %arg11: memref<128x1xf32, #tpu.memory_space<vmem>>) attributes {dimension_semantics = [#tpu.dimension_semantics<parallel>, #tpu.dimension_semantics<arbitrary>, #tpu.dimension_semantics<arbitrary>], iteration_bounds = array<i64: 2, 1, 1>, scalar_prefetch = 0 : i64, scratch_operands = 2 : i64, tpu.core_type = #tpu.core_type<tc>, window_params = [{transform_indices = @transform_0, window_bounds = array<i64: 1, 1024, 896>}, {transform_indices = @transform_1, window_bounds = array<i64: 128, 1024>}, {transform_indices = @transform_2, window_bounds = array<i64: 128, 1>}, {transform_indices = @transform_3, window_bounds = array<i64: 128, 1>}, {transform_indices = @transform_4, window_bounds = array<i64: 1, 128, 896>}, {transform_indices = @transform_5, window_bounds = array<i64: 128, 1>}, {transform_indices = @transform_6, window_bounds = array<i64: 128, 1>}]} {
    %c0_i32 = arith.constant 0 : i32
    %0 = arith.cmpi eq, %arg1, %c0_i32 : i32
    %c0_i32_0 = arith.constant 0 : i32
    %1 = arith.cmpi eq, %arg2, %c0_i32_0 : i32
    %2 = arith.andi %0, %1 : i1
    %c0_i32_1 = arith.constant 0 : i32
    %3 = arith.cmpi eq, %arg1, %c0_i32_1 : i32
    %c0_i32_2 = arith.constant 0 : i32
    %4 = arith.cmpi eq, %arg2, %c0_i32_2 : i32
    %5 = arith.andi %3, %4 : i1
    %6 = arith.extui %2 : i1 to i32
    %c0_i32_3 = arith.constant 0 : i32
    %7 = arith.cmpi ne, %6, %c0_i32_3 : i32
    scf.if %7 {
      %cst_23 = arith.constant 0.000000e+00 : f32
      %31 = vector.broadcast %cst_23 : f32 to vector<128x1xf32>
      %c0_24 = arith.constant 0 : index
      %c0_25 = arith.constant 0 : index
      %32 = vector.load %arg10[%c0_24, %c0_25] : memref<128x1xf32, #tpu.memory_space<vmem>>, vector<128x1xf32>
      tpu.vector_store %arg10[%c0_24, %c0_25], %31 {strides = array<i32>} : memref<128x1xf32, #tpu.memory_space<vmem>>, vector<128x1xf32>,
      %cst_26 = arith.constant 0.000000e+00 : f32
      %33 = vector.broadcast %cst_26 : f32 to vector<128x1xf32>
      %c0_27 = arith.constant 0 : index
      %c0_28 = arith.constant 0 : index
      %34 = vector.load %arg11[%c0_27, %c0_28] : memref<128x1xf32, #tpu.memory_space<vmem>>, vector<128x1xf32>
      tpu.vector_store %arg11[%c0_27, %c0_28], %33 {strides = array<i32>} : memref<128x1xf32, #tpu.memory_space<vmem>>, vector<128x1xf32>,
    } else {
    }
    %c0 = arith.constant 0 : index
    %c0_4 = arith.constant 0 : index
    %c0_5 = arith.constant 0 : index
    %8 = vector.load %arg3[%c0, %c0_4, %c0_5] : memref<1x1024x896xbf16, #tpu.memory_space<vmem>>, vector<1x1024x896xbf16>
    %9 = vector.shape_cast %8 : vector<1x1024x896xbf16> to vector<1024x896xbf16>
    %cst = arith.constant 0.000000e+00 : bf16
    %10 = vector.broadcast %cst : bf16 to vector<1024x896xbf16>
    %11 = arith.maximumf %9, %10 : vector<1024x896xbf16>
    %c0_6 = arith.constant 0 : index
    %c0_7 = arith.constant 0 : index
    %12 = vector.load %arg4[%c0_6, %c0_7] : memref<128x1024xbf16, #tpu.memory_space<vmem>>, vector<128x1024xbf16>
    %cst_8 = arith.constant dense<0.000000e+00> : vector<128x896xf32>
    %13 = tpu.matmul %12, %11, %cst_8 {dimension_numbers = #tpu.dot_dimension_numbers<[1], [0], [0], [1], [0, 0, 1, 1], [], []>} : vector<128x1024xbf16>, vector<1024x896xbf16>, vector<128x896xf32> -> vector<128x896xf32>
    %14 = arith.truncf %13 : vector<128x896xf32> to vector<128x896xbf16>
    %c0_9 = arith.constant 0 : index
    %c0_10 = arith.constant 0 : index
    %c0_11 = arith.constant 0 : index
    %15 = vector.load %arg7[%c0_9, %c0_10, %c0_11] : memref<1x128x896xbf16, #tpu.memory_space<vmem>>, vector<1x128x896xbf16>
    %16 = vector.shape_cast %15 : vector<1x128x896xbf16> to vector<128x896xbf16>
    %17 = vector.shape_cast %14 : vector<128x896xbf16> to vector<1x128x896xbf16>
    tpu.vector_store %arg7[%c0_9, %c0_10, %c0_11], %17 {strides = array<i32>} : memref<1x128x896xbf16, #tpu.memory_space<vmem>>, vector<1x128x896xbf16>,
    %c0_12 = arith.constant 0 : index
    %c0_13 = arith.constant 0 : index
    %18 = vector.load %arg10[%c0_12, %c0_13] : memref<128x1xf32, #tpu.memory_space<vmem>>, vector<128x1xf32>
    %cst_14 = arith.constant dense<0.000000e+00> : vector<128xf32>
    %19 = vector.multi_reduction <add>, %13, %cst_14 [1] : vector<128x896xf32> to vector<128xf32>
    %20 = vector.shape_cast %19 : vector<128xf32> to vector<128x1xf32>
    %21 = arith.addf %18, %20 : vector<128x1xf32>
    %c0_15 = arith.constant 0 : index
    %c0_16 = arith.constant 0 : index
    %22 = vector.load %arg10[%c0_15, %c0_16] : memref<128x1xf32, #tpu.memory_space<vmem>>, vector<128x1xf32>
    tpu.vector_store %arg10[%c0_15, %c0_16], %21 {strides = array<i32>} : memref<128x1xf32, #tpu.memory_space<vmem>>, vector<128x1xf32>,
    %c0_17 = arith.constant 0 : index
    %c0_18 = arith.constant 0 : index
    %23 = vector.load %arg11[%c0_17, %c0_18] : memref<128x1xf32, #tpu.memory_space<vmem>>, vector<128x1xf32>
    %24 = arith.mulf %13, %13 : vector<128x896xf32>
    %cst_19 = arith.constant dense<0.000000e+00> : vector<128xf32>
    %25 = vector.multi_reduction <add>, %24, %cst_19 [1] : vector<128x896xf32> to vector<128xf32>
    %26 = vector.shape_cast %25 : vector<128xf32> to vector<128x1xf32>
    %27 = arith.addf %23, %26 : vector<128x1xf32>
    %c0_20 = arith.constant 0 : index
    %c0_21 = arith.constant 0 : index
    %28 = vector.load %arg11[%c0_20, %c0_21] : memref<128x1xf32, #tpu.memory_space<vmem>>, vector<128x1xf32>
    tpu.vector_store %arg11[%c0_20, %c0_21], %27 {strides = array<i32>} : memref<128x1xf32, #tpu.memory_space<vmem>>, vector<128x1xf32>,
    %29 = arith.extui %5 : i1 to i32
    %c0_i32_22 = arith.constant 0 : i32
    %30 = arith.cmpi ne, %29, %c0_i32_22 : i32
    scf.if %30 {
      %c0_23 = arith.constant 0 : index
      %c0_24 = arith.constant 0 : index
      %31 = vector.load %arg10[%c0_23, %c0_24] : memref<128x1xf32, #tpu.memory_space<vmem>>, vector<128x1xf32>
      %cst_25 = arith.constant 0.00127551018 : f32
      %32 = vector.broadcast %cst_25 : f32 to vector<128x1xf32>
      %33 = arith.mulf %31, %32 : vector<128x1xf32>
      %c0_26 = arith.constant 0 : index
      %c0_27 = arith.constant 0 : index
      %34 = vector.load %arg11[%c0_26, %c0_27] : memref<128x1xf32, #tpu.memory_space<vmem>>, vector<128x1xf32>
      %cst_28 = arith.constant 0.00127551018 : f32
      %35 = vector.broadcast %cst_28 : f32 to vector<128x1xf32>
      %36 = arith.mulf %34, %35 : vector<128x1xf32>
      %37 = arith.mulf %33, %33 : vector<128x1xf32>
      %38 = arith.subf %36, %37 : vector<128x1xf32>
      %cst_29 = arith.constant 9.99999974E-6 : f32
      %39 = vector.broadcast %cst_29 : f32 to vector<128x1xf32>
      %40 = arith.addf %38, %39 : vector<128x1xf32>
      %41 = math.rsqrt %40 : vector<128x1xf32>
      %c0_30 = arith.constant 0 : index
      %c0_31 = arith.constant 0 : index
      %42 = vector.load %arg5[%c0_30, %c0_31] : memref<128x1xf32, #tpu.memory_space<vmem>>, vector<128x1xf32>
      %43 = arith.mulf %42, %41 : vector<128x1xf32>
      %c0_32 = arith.constant 0 : index
      %c0_33 = arith.constant 0 : index
      %44 = vector.load %arg8[%c0_32, %c0_33] : memref<128x1xf32, #tpu.memory_space<vmem>>, vector<128x1xf32>
      tpu.vector_store %arg8[%c0_32, %c0_33], %43 {strides = array<i32>} : memref<128x1xf32, #tpu.memory_space<vmem>>, vector<128x1xf32>,
      %c0_34 = arith.constant 0 : index
      %c0_35 = arith.constant 0 : index
      %45 = vector.load %arg6[%c0_34, %c0_35] : memref<128x1xf32, #tpu.memory_space<vmem>>, vector<128x1xf32>
      %46 = arith.mulf %33, %43 : vector<128x1xf32>
      %47 = arith.subf %45, %46 : vector<128x1xf32>
      %c0_36 = arith.constant 0 : index
      %c0_37 = arith.constant 0 : index
      %48 = vector.load %arg9[%c0_36, %c0_37] : memref<128x1xf32, #tpu.memory_space<vmem>>, vector<128x1xf32>
      tpu.vector_store %arg9[%c0_36, %c0_37], %47 {strides = array<i32>} : memref<128x1xf32, #tpu.memory_space<vmem>>, vector<128x1xf32>,
    } else {
    }
    return
  }
  func.func @transform_0(%arg0: i32, %arg1: i32, %arg2: i32) -> (i32, i32, i32) {
    %c0_i32 = arith.constant 0 : i32
    %c0_i32_0 = arith.constant 0 : i32
    return %arg1, %c0_i32, %arg2 : i32, i32, i32
  }
  func.func @transform_1(%arg0: i32, %arg1: i32, %arg2: i32) -> (i32, i32) {
    %c0_i32 = arith.constant 0 : i32
    %c0_i32_0 = arith.constant 0 : i32
    return %arg0, %c0_i32 : i32, i32
  }
  func.func @transform_2(%arg0: i32, %arg1: i32, %arg2: i32) -> (i32, i32) {
    %c0_i32 = arith.constant 0 : i32
    %c0_i32_0 = arith.constant 0 : i32
    return %arg0, %c0_i32 : i32, i32
  }
  func.func @transform_3(%arg0: i32, %arg1: i32, %arg2: i32) -> (i32, i32) {
    %c0_i32 = arith.constant 0 : i32
    %c0_i32_0 = arith.constant 0 : i32
    return %arg0, %c0_i32 : i32, i32
  }
  func.func @transform_4(%arg0: i32, %arg1: i32, %arg2: i32) -> (i32, i32, i32) {
    %c0_i32 = arith.constant 0 : i32
    return %arg1, %arg0, %arg2 : i32, i32, i32
  }
  func.func @transform_5(%arg0: i32, %arg1: i32, %arg2: i32) -> (i32, i32) {
    %c0_i32 = arith.constant 0 : i32
    %c0_i32_0 = arith.constant 0 : i32
    return %arg0, %c0_i32 : i32, i32
  }
  func.func @transform_6(%arg0: i32, %arg1: i32, %arg2: i32) -> (i32, i32) {
    %c0_i32 = arith.constant 0 : i32
    %c0_i32_0 = arith.constant 0 : i32
    return %arg0, %c0_i32 : i32, i32
  }
}

module attributes {stable_mosaic.version = 11 : i64} {
  func.func @_bn_apply_kernel(%arg0: i32, %arg1: i32, %arg2: i32, %arg3: memref<1x128x896xbf16, #tpu.memory_space<vmem>>, %arg4: memref<128x1xf32, #tpu.memory_space<vmem>>, %arg5: memref<128x1xf32, #tpu.memory_space<vmem>>, %arg6: memref<1x128x896xf32, #tpu.memory_space<vmem>>) attributes {dimension_semantics = [#tpu.dimension_semantics<parallel>, #tpu.dimension_semantics<parallel>, #tpu.dimension_semantics<parallel>], iteration_bounds = array<i64: 2, 1, 1>, scalar_prefetch = 0 : i64, scratch_operands = 0 : i64, tpu.core_type = #tpu.core_type<tc>, window_params = [{transform_indices = @transform_0, window_bounds = array<i64: 1, 128, 896>}, {transform_indices = @transform_1, window_bounds = array<i64: 128, 1>}, {transform_indices = @transform_2, window_bounds = array<i64: 128, 1>}, {transform_indices = @transform_3, window_bounds = array<i64: 1, 128, 896>}]} {
    %c0 = arith.constant 0 : index
    %c0_0 = arith.constant 0 : index
    %c0_1 = arith.constant 0 : index
    %0 = vector.load %arg3[%c0, %c0_0, %c0_1] : memref<1x128x896xbf16, #tpu.memory_space<vmem>>, vector<1x128x896xbf16>
    %1 = vector.shape_cast %0 : vector<1x128x896xbf16> to vector<128x896xbf16>
    %2 = arith.extf %1 : vector<128x896xbf16> to vector<128x896xf32>
    %c0_2 = arith.constant 0 : index
    %c0_3 = arith.constant 0 : index
    %3 = vector.load %arg4[%c0_2, %c0_3] : memref<128x1xf32, #tpu.memory_space<vmem>>, vector<128x1xf32>
    %4 = vector.broadcast %3 : vector<128x1xf32> to vector<128x896xf32>
    %5 = arith.mulf %2, %4 : vector<128x896xf32>
    %c0_4 = arith.constant 0 : index
    %c0_5 = arith.constant 0 : index
    %6 = vector.load %arg5[%c0_4, %c0_5] : memref<128x1xf32, #tpu.memory_space<vmem>>, vector<128x1xf32>
    %7 = vector.broadcast %6 : vector<128x1xf32> to vector<128x896xf32>
    %8 = arith.addf %5, %7 : vector<128x896xf32>
    %c0_6 = arith.constant 0 : index
    %c0_7 = arith.constant 0 : index
    %c0_8 = arith.constant 0 : index
    %9 = vector.load %arg6[%c0_6, %c0_7, %c0_8] : memref<1x128x896xf32, #tpu.memory_space<vmem>>, vector<1x128x896xf32>
    %10 = vector.shape_cast %9 : vector<1x128x896xf32> to vector<128x896xf32>
    %11 = vector.shape_cast %8 : vector<128x896xf32> to vector<1x128x896xf32>
    tpu.vector_store %arg6[%c0_6, %c0_7, %c0_8], %11 {strides = array<i32>} : memref<1x128x896xf32, #tpu.memory_space<vmem>>, vector<1x128x896xf32>,
    return
  }
  func.func @transform_0(%arg0: i32, %arg1: i32, %arg2: i32) -> (i32, i32, i32) {
    %c0_i32 = arith.constant 0 : i32
    return %arg1, %arg0, %arg2 : i32, i32, i32
  }
  func.func @transform_1(%arg0: i32, %arg1: i32, %arg2: i32) -> (i32, i32) {
    %c0_i32 = arith.constant 0 : i32
    %c0_i32_0 = arith.constant 0 : i32
    return %arg0, %c0_i32 : i32, i32
  }
  func.func @transform_2(%arg0: i32, %arg1: i32, %arg2: i32) -> (i32, i32) {
    %c0_i32 = arith.constant 0 : i32
    %c0_i32_0 = arith.constant 0 : i32
    return %arg0, %c0_i32 : i32, i32
  }
  func.func @transform_3(%arg0: i32, %arg1: i32, %arg2: i32) -> (i32, i32, i32) {
    %c0_i32 = arith.constant 0 : i32
    return %arg1, %arg0, %arg2 : i32, i32, i32
  }
}

</mosaic_0001>

<bundles_post_ra>
// kernel: relu_conv1x1_bn.3
= control target key start
LH: loop header
LB: loop body
LE: loop exit
PB: predicated region body
PF: predicated region fallthrough
CT: control target
= control target key end

     0   :  { %s1225_s12 = smov 0   ;;  %s1227_s13 = smov 0   ;;  %s2262_s0 = inlined_call_operand.vmem [shape: bf16[1,256,896], index: 0, kind: input, shape index: {}]   ;;  %s2263_s1 = inlined_call_operand.vmem [shape: f32[256,1], index: 1, kind: input, shape index: {}]   ;;  %s2264_s2 = inlined_call_operand.vmem [shape: f32[256,1], index: 2, kind: input, shape index: {}]   ;;  %s2265_s3 = inlined_call_operand.vmem [shape: f32[1,256,896], index: 3, kind: output, shape index: {}]  }
   0x1   :  { %s1229_s14 = smov 0  }
   0x2 LB: > { %s32_s15 = sadd.s32 1, %s1198_s13  ;;  %p1140_p0 = scmp.ge.s32.totalorder %s1202_s14, 1  ;;  %s1202_s14 = sphi %s1229_s14, %s13_s14   ;;  %s1198_s13 = sphi %s1227_s13, %s2525_s13   ;;  %s1194_s12 = sphi %s1225_s12, %s2524_s12  }
   0x3   : > { %p34_p1 = scmp.ge.s32.totalorder %s32_s15, 2  ;;  %p197_p2 = scmp.lt.s32.totalorder %s1202_s14, 3 }
   0x5   : > { %s2527_s15 = smov (%p34_p1, %s32_s15), 0  ;;  %p198_p3 = pnand %p1140_p0, %p197_p2 }
   0x7   : > { %201 = sbr.rel (%p198_p3) target bundleno = 258 (0x102), region = 32 }
   0xe   : > { %s1141_s16 = sshll.u32 %s1194_s12, 4  ;;  %v1204_v0 = vmov 0  }
   0xf   : > { %1179 = vset.pattern.permute.xlu1 %v1204_v0  ;;  %1178 = vset.pattern.permute.xlu0 %v1204_v0  ;;  %p253_p4 = scmp.lt.s32.totalorder %s1141_s16, 31 }
  0x11   : > { %s2529_s16 = smov (!%p253_p4, %s1141_s16), 31 }
  0x12   : > { %s1144_s17 = sshll.u32 %s2529_s16, 3  ;;  %s1151_s24 = smul.u32 28, %s2529_s16 }
  0x13   : > { %s269_s20 = scalar_lea.vmem %s2263_s1, %s1144_s17  ;;  %s1256_s23 = scalar_lea.vmem %s2264_s2, %s1144_s17 }
  0x14   : > { %v471_v1 = vld [vmem:[%s269_s20 + $0x10] sm:$0xff]  ;;  %v469_v2 = vld [vmem:[%s269_s20] sm:$0xff]  ;;  %v472_v3 = vld [vmem:[%s269_s20 + $0x18] sm:$0xff]  ;;  %s1278_s27 = scalar_lea.vmem %s2262_s0, %s1151_s24  ;;  %s1152_s28 = smul.u32 56, %s2529_s16 }
  0x15   : > { %497 = vperm.xlu1 %1179, %v471_v1   ;;  %487 = vperm.xlu0 %1178, %v469_v2   ;;  %v470_v4 = vld [vmem:[%s269_s20 + $0x8] sm:$0xff]  ;;  %v473_v6 = vld [vmem:[%s269_s20 + $0x20] sm:$0xff]  ;;  %v476_v7 = vld [vmem:[%s269_s20 + $0x38] sm:$0xff] }
  0x16   : > { %v474_v5 = vld [vmem:[%s269_s20 + $0x28] sm:$0xff]  ;;  %v475_v8 = vld [vmem:[%s269_s20 + $0x30] sm:$0xff]  ;;  %v477_v10 = vld [vmem:[%s269_s20 + $0x40] sm:$0xff]  ;;  %s1953_s4 = scalar_lea.vmem %s2265_s3, %s1152_s28 }
  0x17   : > { %v478_v9 = vld [vmem:[%s269_s20 + $0x48] sm:$0xff]  ;;  %v480_v11 = vld [vmem:[%s269_s20 + $0x58] sm:$0xff]  ;;  %v479_v12 = vld [vmem:[%s269_s20 + $0x50] sm:$0xff] }
  0x18   : > { %v482_v13 = vld [vmem:[%s269_s20 + $0x68] sm:$0xff]  ;;  %v481_v14 = vld [vmem:[%s269_s20 + $0x60] sm:$0xff]  ;;  %v484_v15 = vld [vmem:[%s269_s20 + $0x78] sm:$0xff] }
  0x19   : > { %502 = vperm.xlu1 %1179, %v472_v3   ;;  %492 = vperm.xlu0 %1178, %v470_v4   ;;  %v483_v16 = vld [vmem:[%s269_s20 + $0x70] sm:$0xff]  ;;  %v678_v17 = vld [vmem:[%s1256_s23 + $0x8] sm:$0xff]  ;;  %v677_v18 = vld [vmem:[%s1256_s23] sm:$0xff] }
  0x1a   : > { %v680_v19 = vld [vmem:[%s1256_s23 + $0x18] sm:$0xff]  ;;  %v679_v20 = vld [vmem:[%s1256_s23 + $0x10] sm:$0xff]  ;;  %v682_v21 = vld [vmem:[%s1256_s23 + $0x28] sm:$0xff] }
  0x1b   : > { %v681_v22 = vld [vmem:[%s1256_s23 + $0x20] sm:$0xff]  ;;  %v684_v23 = vld [vmem:[%s1256_s23 + $0x38] sm:$0xff]  ;;  %v683_v24 = vld [vmem:[%s1256_s23 + $0x30] sm:$0xff] }
  0x1c   : > { %v686_v25 = vld [vmem:[%s1256_s23 + $0x48] sm:$0xff]  ;;  %v685_v26 = vld [vmem:[%s1256_s23 + $0x40] sm:$0xff]  ;;  %v688_v27 = vld [vmem:[%s1256_s23 + $0x58] sm:$0xff] }
  0x1d   : > { %512 = vperm.xlu1 %1179, %v474_v5   ;;  %507 = vperm.xlu0 %1178, %v473_v6   ;;  %v687_v28 = vld [vmem:[%s1256_s23 + $0x50] sm:$0xff]  ;;  %v690_v29 = vld [vmem:[%s1256_s23 + $0x68] sm:$0xff]  ;;  %v689_v30 = vld [vmem:[%s1256_s23 + $0x60] sm:$0xff] }
  0x1e   : > { %v692_v31 = vld [vmem:[%s1256_s23 + $0x78] sm:$0xff]  ;;  %v691_v32 = vld [vmem:[%s1256_s23 + $0x70] sm:$0xff]  ;;  %v1284_v34 = vld [vmem:[%s1278_s27 + $0x40] sm:$0xff] }
  0x1f   : > { %v1281_v33 = vld [vmem:[%s1278_s27 + $0x38] sm:$0xff]  ;;  %v1287_v35 = vld [vmem:[%s1278_s27 + $0x48] sm:$0xff]  ;;  %v1293_v37 = vld [vmem:[%s1278_s27] sm:$0xff] }
  0x20   : > { %v1290_v36 = vld [vmem:[%s1278_s27 + $0x18] ss:$56 sps:$4 sm:$0xff]   ;;  %v1296_v38 = vld [vmem:[%s1278_s27 + $0x8] sm:$0xff]  ;;  %v1311_v47 = vld [vmem:[%s1278_s27 + $0x5c] sm:$0xff]  ;;  %v2307_v40 = vunpack.c.h.bf16 %v1281_v33 }
  0x21   : > { %522 = vperm.xlu1 %1179, %v476_v7   ;;  %517 = vperm.xlu0 %1178, %v475_v8   ;;  %v1301_v41 = vld [vmem:[%s1278_s27 + $0x10] sm:$0xff]  ;;  %v1318_v52 = vld [vmem:[%s1278_s27 + $0x64] sm:$0xff]  ;;  %v1324_v54 = vld [vmem:[%s1278_s27 + $0x1c] sm:$0xff]  ;;  %v2317_v50 = vunpack.c.h.bf16 %v1290_v36 }
  0x22   : > { %v1308_v46 = vld [vmem:[%s1278_s27 + $0x54] sm:$0xff]  ;;  %v1331_v59 = vld [vmem:[%s1278_s27 + $0x24] sm:$0xff]  ;;  %v1334_v60 = vld [vmem:[%s1278_s27 + $0x2c] sm:$0xff] }
  0x23   : > { %v1321_v53 = vld [vmem:[%s1278_s27 + $0x34] ss:$56 sps:$4 sm:$0xff]   ;;  %v1351_v7 = vld [vmem:[%s1278_s27 + $0x9c] sm:$0xff]  ;;  %v1520_v51 = vld [vmem:[%s1278_s27 + $0x1a4] sm:$0xff] }
  0x24   : > { %v1341_v1 = vld [vmem:[%s1278_s27 + $0x8c] sm:$0xff]  ;;  %v1348_v6 = vld [vmem:[%s1278_s27 + $0x94] sm:$0xff]  ;;  %v1471_v0 = vld [vmem:[%s1278_s27 + $0x120] sm:$0xff]  ;;  %2298 = vst [vmem:[#allocation8_spill] sm:$0xff] %v1520_v51 }
  0x25   : > { %532 = vperm.xlu1 %1179, %v478_v9   ;;  %527 = vperm.xlu0 %1178, %v477_v10   ;;  %v1448_v5 = vld [vmem:[%s1278_s27 + $0x134] sm:$0xff]  ;;  %v1458_v9 = vld [vmem:[%s1278_s27 + $0x144] sm:$0xff]  ;;  %v1461_v3 = vld [vmem:[%s1278_s27 + $0x130] ss:$28 sps:$4 sm:$0xff]  }
  0x26   : > { %v1464_v8 = vld [vmem:[%s1278_s27 + $0x118] sm:$0xff]  ;;  %v1474_v4 = vld [vmem:[%s1278_s27 + $0x128] sm:$0xff]  ;;  %v1503_v58 = vld [vmem:[%s1278_s27 + $0x150] sm:$0xff] }
  0x27   : > { %v1481_v2 = vld [vmem:[%s1278_s27 + $0x16c] sm:$0xff]  ;;  %v1491_v63 = vld [vmem:[%s1278_s27 + $0x17c] sm:$0xff]  ;;  %2295 = vst [vmem:[#allocation5_spill] sm:$0xff] %v1503_v58  ;;  %v1530_v43 = vld [vmem:[%s1278_s27 + $0x1b4] sm:$0xff]  ;;  %v2311_v58 = vunpack.c.h.bf16 %v1284_v34 }
  0x28   : > { %2292 = vst [vmem:[#allocation2_spill] sm:$0xff] %v1481_v2  ;;  %2294 = vst [vmem:[#allocation4_spill] sm:$0xff] %v1491_v63  ;;  %v1506_v55 = vld [vmem:[%s1278_s27 + $0x158] sm:$0xff]  ;;  %v1513_v10 = vld [vmem:[%s1278_s27 + $0x160] sm:$0xff] }
  0x29   : > { %542 = vperm.xlu1 %1179, %v480_v11   ;;  %537 = vperm.xlu0 %1178, %v479_v12   ;;  %v1358_v12 = vld [vmem:[%s1278_s27 + $0x88] ss:$28 sps:$4 sm:$0xff]   ;;  %2296 = vst [vmem:[#allocation6_spill] sm:$0xff] %v1506_v55  ;;  %2297 = vst [vmem:[#allocation7_spill] sm:$0xff] %v1513_v10  ;;  %v1533_v49 = vld [vmem:[%s1278_s27 + $0x1a0] ss:$28 sps:$4 sm:$0xff]   ;;  %v2309_v55 = vunpack.c.l.bf16 %v1284_v34  ;;  %v2319_v10 = vunpack.c.l.bf16 %v1293_v37  ;;  %v2320_v34 = vunpack.c.h.bf16 %v1293_v37  ;;  %v2324_v37 = vunpack.c.h.bf16 %v1301_v41 }
  0x2a   : > { %v1431_v11 = vld [vmem:[%s1278_s27 + $0xe0] sm:$0xff]  ;;  %2300 = vst [vmem:[#allocation10_spill] sm:$0xff] %v1530_v43  ;;  %2301 = vst [vmem:[#allocation11_spill] sm:$0xff] %v1533_v49  ;;  %v1536_v48 = vld [vmem:[%s1278_s27 + $0x188] sm:$0xff]  ;;  %v2325_v49 = vunpack.c.l.bf16 %v1290_v36 }
  0x2b   : > { %2302 = vst [vmem:[#allocation12_spill] sm:$0xff] %v1536_v48  ;;  %v1543_v63 = vld [vmem:[%s1278_s27 + $0x190] sm:$0xff]  ;;  %v1546_v44 = vld [vmem:[%s1278_s27 + $0x198] sm:$0xff] }
  0x2c   : > { %2303 = vst [vmem:[#allocation13_spill] sm:$0xff] %v1543_v63  ;;  %2304 = vst [vmem:[#allocation14_spill] sm:$0xff] %v1546_v44 }
  0x2d   : > { %552 = vperm.xlu1 %1179, %v482_v13   ;;  %547 = vperm.xlu0 %1178, %v481_v14   ;;  %v1361_v13 = vld [vmem:[%s1278_s27 + $0x70] sm:$0xff]  ;;  %v1364_v14 = vld [vmem:[%s1278_s27 + $0x78] sm:$0xff] }
  0x31   : > { %562 = vperm.xlu1 %1179, %v484_v15   ;;  %557 = vperm.xlu0 %1178, %v483_v16   ;;  %v1421_v15 = vld [vmem:[%s1278_s27 + $0x10c] sm:$0xff] }
  0x32   : > { %v1523_v16 = vld [vmem:[%s1278_s27 + $0x1ac] sm:$0xff] }
  0x33   : > { %2299 = vst [vmem:[#allocation9_spill] sm:$0xff] %v1523_v16 }
  0x35   : > { %700 = vperm.xlu1 %1179, %v678_v17   ;;  %695 = vperm.xlu0 %1178, %v677_v18   ;;  %v1434_v17 = vld [vmem:[%s1278_s27 + $0xe8] sm:$0xff] }
  0x36   : > { %v1500_v18 = vld [vmem:[%s1278_s27 + $0x168] ss:$28 sps:$4 sm:$0xff]  }
  0x39   : > { %710 = vperm.xlu1 %1179, %v680_v19   ;;  %705 = vperm.xlu0 %1178, %v679_v20   ;;  %v1371_v19 = vld [vmem:[%s1278_s27 + $0x80] sm:$0xff] }
  0x3a   : > { %v1451_v20 = vld [vmem:[%s1278_s27 + $0x13c] sm:$0xff] }
  0x3d   : > { %720 = vperm.xlu1 %1179, %v682_v21   ;;  %715 = vperm.xlu0 %1178, %v681_v22   ;;  %v1401_v21 = vld [vmem:[%s1278_s27 + $0xb0] sm:$0xff]  ;;  %v1411_v22 = vld [vmem:[%s1278_s27 + $0xfc] sm:$0xff] }
  0x41   : > { %730 = vperm.xlu1 %1179, %v684_v23   ;;  %725 = vperm.xlu0 %1178, %v683_v24   ;;  %v1378_v24 = vld [vmem:[%s1278_s27 + $0xc4] sm:$0xff]  ;;  %v1441_v23 = vld [vmem:[%s1278_s27 + $0xf0] sm:$0xff] }
  0x45   : > { %740 = vperm.xlu1 %1179, %v686_v25   ;;  %735 = vperm.xlu0 %1178, %v685_v26   ;;  %v1381_v25 = vld [vmem:[%s1278_s27 + $0xcc] sm:$0xff]  ;;  %v1488_v26 = vld [vmem:[%s1278_s27 + $0x174] sm:$0xff] }
  0x46   : > { %2293 = vst [vmem:[#allocation3_spill] sm:$0xff] %v1488_v26  ;;  %v2305_v26 = vunpack.c.l.bf16 %v1281_v33  ;;  %v2315_v33 = vunpack.c.h.bf16 %v1287_v35 }
  0x49   : > { %750 = vperm.xlu1 %1179, %v688_v27   ;;  %745 = vperm.xlu0 %1178, %v687_v28   ;;  %v1404_v28 = vld [vmem:[%s1278_s27 + $0xb8] sm:$0xff] }
  0x4a   : > { %v1428_v27 = vld [vmem:[%s1278_s27 + $0xf8] ss:$28 sps:$4 sm:$0xff]  }
  0x4d   : > { %760 = vperm.xlu1 %1179, %v690_v29   ;;  %755 = vperm.xlu0 %1178, %v689_v30   ;;  %v1388_v30 = vld [vmem:[%s1278_s27 + $0xd4] sm:$0xff]  ;;  %v1418_v29 = vld [vmem:[%s1278_s27 + $0x104] sm:$0xff] }
  0x51   : > { %770 = vperm.xlu1 %1179, %v692_v31   ;;  %765 = vperm.xlu0 %1178, %v691_v32   ;;  %v1391_v31 = vld [vmem:[%s1278_s27 + $0xc0] ss:$28 sps:$4 sm:$0xff]   ;;  %v1394_v32 = vld [vmem:[%s1278_s27 + $0xa8] sm:$0xff] }
  0x94   : > { %v498_v62 = vpop.permute.xlu1 %497  ;;  %v1493_v57 = vpop.permute.xlu0 %487 }
  0x95   : > { %v1562_v51 = vmul.f32 %v498_v62, %v2305_v26  ;;  %v1566_v2 = vmul.f32 %v498_v62, %v2307_v40  ;;  %v1572_v48 = vmul.f32 %v498_v62, %v2309_v55  ;;  %v1576_v61 = vmul.f32 %v498_v62, %v2311_v58 }
  0x96   : > { %v2313_v26 = vunpack.c.l.bf16 %v1287_v35  ;;  %v1584_v40 = vmul.f32 %v498_v62, %v2315_v33  ;;  %v1588_v44 = vmul.f32 %v498_v62, %v2317_v50  ;;  %v1593_v55 = vmul.f32 %v1493_v57, %v2319_v10 }
  0x97   : > { %2306 = vst [vmem:[#allocation15_spill] sm:$0xff] %v1562_v51  ;;  %2308 = vst [vmem:[#allocation16_spill] sm:$0xff] %v1566_v2  ;;  %v1598_v58 = vmul.f32 %v1493_v57, %v2320_v34  ;;  %v2322_v33 = vunpack.c.h.bf16 %v1296_v38  ;;  %v1618_v34 = vmul.f32 %v1493_v57, %v2324_v37  ;;  %v2338_v2 = vunpack.c.l.bf16 %v1334_v60 }
  0x98   : > { %v503_v45 = vpop.permute.xlu1 %502  ;;  %v493_v42 = vpop.permute.xlu0 %492  ;;  %2310 = vst [vmem:[#allocation17_spill] sm:$0xff] %v1572_v48  ;;  %2312 = vst [vmem:[#allocation18_spill] sm:$0xff] %v1576_v61  ;;  %v1580_v63 = vmul.f32 %v498_v62, %v2313_v26  ;;  %v2321_v26 = vunpack.c.l.bf16 %v1296_v38  ;;  %v2323_v62 = vunpack.c.l.bf16 %v1301_v41  ;;  %v2326_v38 = vunpack.c.l.bf16 %v1308_v46 }
  0x99   : > { %2316 = vst [vmem:[#allocation20_spill] sm:$0xff] %v1584_v40  ;;  %2318 = vst [vmem:[#allocation21_spill] sm:$0xff] %v1588_v44  ;;  %v1608_v50 = vmul.f32 %v1493_v57, %v2322_v33  ;;  %v2327_v33 = vunpack.c.h.bf16 %v1308_v46  ;;  %v2329_v41 = vunpack.c.h.bf16 %v1311_v47  ;;  %v2332_v46 = vunpack.c.h.bf16 %v1321_v53 }
  0x9a   : > { %2314 = vst [vmem:[#allocation19_spill] sm:$0xff] %v1580_v63  ;;  %v1603_v35 = vmul.f32 %v1493_v57, %v2321_v26  ;;  %v1613_v10 = vmul.f32 %v1493_v57, %v2323_v62  ;;  %v1623_v26 = vmul.f32 %v1493_v57, %v2325_v49  ;;  %v1627_v43 = vmul.f32 %v503_v45, %v2326_v38 }
  0x9b   : > { %v1631_v16 = vmul.f32 %v503_v45, %v2327_v33  ;;  %v2328_v62 = vunpack.c.l.bf16 %v1311_v47  ;;  %v1639_v37 = vmul.f32 %v503_v45, %v2329_v41  ;;  %v2330_v49 = vunpack.c.l.bf16 %v1318_v52 }
  0x9c   : > { %v513_v39 = vpop.permute.xlu1 %512  ;;  %v508_v56 = vpop.permute.xlu0 %507  ;;  %v2331_v38 = vunpack.c.h.bf16 %v1318_v52  ;;  %v1651_v33 = vmul.f32 %v503_v45, %v2332_v46  ;;  %v2335_v47 = vunpack.c.h.bf16 %v1324_v54  ;;  %v2336_v48 = vunpack.c.l.bf16 %v1331_v59 }
  0x9d   : > { %v1635_v44 = vmul.f32 %v503_v45, %v2328_v62  ;;  %v1643_v57 = vmul.f32 %v503_v45, %v2330_v49  ;;  %v2334_v62 = vunpack.c.l.bf16 %v1324_v54  ;;  %v2337_v52 = vunpack.c.h.bf16 %v1331_v59 }
  0x9e   : > { %v1647_v63 = vmul.f32 %v503_v45, %v2331_v38  ;;  %2333 = vst [vmem:[#allocation22_spill] sm:$0xff] %v1651_v33  ;;  %v1659_v41 = vmul.f32 %v493_v42, %v2335_v47  ;;  %v1663_v49 = vmul.f32 %v493_v42, %v2336_v48  ;;  %v1671_v45 = vmul.f32 %v493_v42, %v2338_v2 }
  0x9f   : > { %v1655_v61 = vmul.f32 %v493_v42, %v2334_v62  ;;  %v1667_v38 = vmul.f32 %v493_v42, %v2337_v52  ;;  %v2339_v46 = vunpack.c.h.bf16 %v1334_v60  ;;  %v2340_v54 = vunpack.c.l.bf16 %v1321_v53 }
  0xa0   : > { %v523_v36 = vpop.permute.xlu1 %522  ;;  %v518_v40 = vpop.permute.xlu0 %517  ;;  %v2341_v51 = vunpack.c.l.bf16 %v1341_v1  ;;  %v2343_v59 = vunpack.c.h.bf16 %v1341_v1  ;;  %v2345_v33 = vunpack.c.l.bf16 %v1348_v6  ;;  %v2347_v60 = vunpack.c.h.bf16 %v1348_v6 }
  0xa1   : > { %v1675_v62 = vmul.f32 %v493_v42, %v2339_v46  ;;  %v1679_v47 = vmul.f32 %v493_v42, %v2340_v54  ;;  %v2348_v53 = vunpack.c.l.bf16 %v1351_v7  ;;  %v2350_v54 = vunpack.c.h.bf16 %v1351_v7 }
  0xa2   : > { %v1683_v48 = vmul.f32 %v513_v39, %v2341_v51  ;;  %v1687_v52 = vmul.f32 %v513_v39, %v2343_v59  ;;  %v1691_v2 = vmul.f32 %v513_v39, %v2345_v33  ;;  %v1695_v46 = vmul.f32 %v513_v39, %v2347_v60 }
  0xa3   : > { %v1699_v42 = vmul.f32 %v513_v39, %v2348_v53  ;;  %v1703_v51 = vmul.f32 %v513_v39, %v2350_v54  ;;  %v2352_v59 = vunpack.c.h.bf16 %v1358_v12  ;;  %v2353_v33 = vunpack.c.l.bf16 %v1361_v13 }
  0xa4   : > { %2342 = vst [vmem:[#allocation23_spill] sm:$0xff] %v1683_v48  ;;  %2344 = vst [vmem:[#allocation24_spill] sm:$0xff] %v1687_v52  ;;  %v533_v48 = vpop.permute.xlu1 %532  ;;  %v528_v1 = vpop.permute.xlu0 %527  ;;  %v2354_v6 = vunpack.c.h.bf16 %v1361_v13  ;;  %v2356_v53 = vunpack.c.l.bf16 %v1364_v14  ;;  %v2357_v7 = vunpack.c.h.bf16 %v1364_v14  ;;  %v2361_v13 = vunpack.c.l.bf16 %v1358_v12 }
  0xa5   : > { %2346 = vst [vmem:[#allocation25_spill] sm:$0xff] %v1691_v2  ;;  %2349 = vst [vmem:[#allocation26_spill] sm:$0xff] %v1699_v42  ;;  %v1707_v52 = vmul.f32 %v513_v39, %v2352_v59  ;;  %v1711_v2 = vmul.f32 %v508_v56, %v2353_v33  ;;  %v2360_v59 = vunpack.c.h.bf16 %v1371_v19  ;;  %v2363_v14 = vunpack.c.h.bf16 %v1378_v24 }
  0xa6   : > { %2351 = vst [vmem:[#allocation27_spill] sm:$0xff] %v1703_v51  ;;  %v1715_v60 = vmul.f32 %v508_v56, %v2354_v6  ;;  %v1719_v42 = vmul.f32 %v508_v56, %v2356_v53  ;;  %v1723_v54 = vmul.f32 %v508_v56, %v2357_v7  ;;  %v2359_v51 = vunpack.c.l.bf16 %v1371_v19 }
  0xa7   : > { %v1731_v33 = vmul.f32 %v508_v56, %v2360_v59  ;;  %v1735_v6 = vmul.f32 %v508_v56, %v2361_v13  ;;  %v1743_v7 = vmul.f32 %v523_v36, %v2363_v14  ;;  %v2367_v19 = vunpack.c.h.bf16 %v1381_v25 }
  0xa8   : > { %2355 = vst [vmem:[#allocation28_spill] sm:$0xff] %v1715_v60  ;;  %2358 = vst [vmem:[#allocation29_spill] sm:$0xff] %v1723_v54  ;;  %v1727_v39 = vmul.f32 %v508_v56, %v2359_v51  ;;  %v2362_v60 = vunpack.c.l.bf16 %v1378_v24  ;;  %v2365_v54 = vunpack.c.l.bf16 %v1381_v25  ;;  %v2369_v12 = vunpack.c.l.bf16 %v1388_v30  ;;  %v538_v25 = vpop.permute.xlu0 %537 }
  0xa9   : > { %2364 = vst [vmem:[#allocation30_spill] sm:$0xff] %v1743_v7  ;;  %v1751_v59 = vmul.f32 %v523_v36, %v2367_v19  ;;  %v2371_v13 = vunpack.c.h.bf16 %v1388_v30  ;;  %v2372_v24 = vunpack.c.h.bf16 %v1391_v31  ;;  %v2373_v7 = vunpack.c.l.bf16 %v1394_v32 }
  0xaa   : > { %v1739_v53 = vmul.f32 %v523_v36, %v2362_v60  ;;  %v1747_v51 = vmul.f32 %v523_v36, %v2365_v54  ;;  %v1755_v56 = vmul.f32 %v523_v36, %v2369_v12  ;;  %v2375_v19 = vunpack.c.h.bf16 %v1394_v32 }
  0xab   : > { %2368 = vst [vmem:[#allocation32_spill] sm:$0xff] %v1751_v59  ;;  %v1759_v60 = vmul.f32 %v523_v36, %v2371_v13  ;;  %v1763_v14 = vmul.f32 %v523_v36, %v2372_v24  ;;  %v1767_v54 = vmul.f32 %v518_v40, %v2373_v7  ;;  %v2377_v12 = vunpack.c.l.bf16 %v1401_v21 }
  0xac   : > { %2366 = vst [vmem:[#allocation31_spill] sm:$0xff] %v1747_v51  ;;  %2370 = vst [vmem:[#allocation33_spill] sm:$0xff] %v1755_v56  ;;  %v543_v51 = vpop.permute.xlu1 %542  ;;  %v1771_v59 = vmul.f32 %v518_v40, %v2375_v19  ;;  %v2378_v30 = vunpack.c.h.bf16 %v1401_v21  ;;  %v2380_v36 = vunpack.c.l.bf16 %v1404_v28  ;;  %v2381_v7 = vunpack.c.h.bf16 %v1404_v28 }
  0xad   : > { %2374 = vst [vmem:[#allocation34_spill] sm:$0xff] %v1767_v54  ;;  %v1775_v56 = vmul.f32 %v518_v40, %v2377_v12  ;;  %v2382_v32 = vunpack.c.l.bf16 %v1391_v31  ;;  %v2384_v21 = vunpack.c.h.bf16 %v1411_v22  ;;  %v2387_v28 = vunpack.c.h.bf16 %v1418_v29 }
  0xae   : > { %2376 = vst [vmem:[#allocation35_spill] sm:$0xff] %v1771_v59  ;;  %v1779_v13 = vmul.f32 %v518_v40, %v2378_v30  ;;  %v1783_v24 = vmul.f32 %v518_v40, %v2380_v36  ;;  %v1787_v54 = vmul.f32 %v518_v40, %v2381_v7  ;;  %v2383_v59 = vunpack.c.l.bf16 %v1411_v22 }
  0xaf   : > { %v1791_v19 = vmul.f32 %v518_v40, %v2382_v32  ;;  %v1799_v30 = vmul.f32 %v533_v48, %v2384_v21  ;;  %v1807_v7 = vmul.f32 %v533_v48, %v2387_v28  ;;  %v2389_v31 = vunpack.c.l.bf16 %v1421_v15 }
  0xb0   : > { %2379 = vst [vmem:[#allocation36_spill] sm:$0xff] %v1779_v13  ;;  %v1795_v12 = vmul.f32 %v533_v48, %v2383_v59  ;;  %v2386_v13 = vunpack.c.l.bf16 %v1418_v29  ;;  %v2391_v32 = vunpack.c.h.bf16 %v1421_v15  ;;  %v2393_v22 = vunpack.c.h.bf16 %v1428_v27  ;;  %v553_v15 = vpop.permute.xlu1 %552 }
  0xb1   : > { %2385 = vst [vmem:[#allocation37_spill] sm:$0xff] %v1799_v30  ;;  %2388 = vst [vmem:[#allocation38_spill] sm:$0xff] %v1807_v7  ;;  %v1811_v40 = vmul.f32 %v533_v48, %v2389_v31  ;;  %v2394_v30 = vunpack.c.l.bf16 %v1431_v11  ;;  %v2395_v29 = vunpack.c.h.bf16 %v1431_v11  ;;  %v2397_v7 = vunpack.c.l.bf16 %v1434_v17 }
  0xb2   : > { %v1803_v36 = vmul.f32 %v533_v48, %v2386_v13  ;;  %v1815_v59 = vmul.f32 %v533_v48, %v2391_v32  ;;  %v1819_v21 = vmul.f32 %v533_v48, %v2393_v22  ;;  %v548_v32 = vpop.permute.xlu0 %547  ;;  %v2401_v48 = vunpack.c.l.bf16 %v1441_v23 }
  0xb3   : > { %2390 = vst [vmem:[#allocation39_spill] sm:$0xff] %v1811_v40  ;;  %v1823_v13 = vmul.f32 %v528_v1, %v2394_v30  ;;  %v1827_v28 = vmul.f32 %v528_v1, %v2395_v29  ;;  %v1831_v31 = vmul.f32 %v528_v1, %v2397_v7  ;;  %v2402_v30 = vunpack.c.h.bf16 %v1441_v23 }
  0xb4   : > { %2392 = vst [vmem:[#allocation40_spill] sm:$0xff] %v1815_v59  ;;  %v2399_v59 = vunpack.c.h.bf16 %v1434_v17  ;;  %v1839_v22 = vmul.f32 %v528_v1, %v2401_v48  ;;  %v2403_v29 = vunpack.c.l.bf16 %v1428_v27  ;;  %v2404_v7 = vunpack.c.l.bf16 %v1448_v5 }
  0xb5   : > { %2396 = vst [vmem:[#allocation41_spill] sm:$0xff] %v1827_v28  ;;  %2398 = vst [vmem:[#allocation42_spill] sm:$0xff] %v1831_v31  ;;  %v1843_v11 = vmul.f32 %v528_v1, %v2402_v30  ;;  %v2405_v17 = vunpack.c.h.bf16 %v1448_v5  ;;  %v2408_v23 = vunpack.c.h.bf16 %v1451_v20  ;;  %v2409_v27 = vunpack.c.l.bf16 %v1458_v9 }
  0xb6   : > { %v1835_v40 = vmul.f32 %v528_v1, %v2399_v59  ;;  %v1847_v28 = vmul.f32 %v528_v1, %v2403_v29  ;;  %v1851_v31 = vmul.f32 %v543_v51, %v2404_v7  ;;  %v2411_v29 = vunpack.c.h.bf16 %v1458_v9 }
  0xb7   : > { %v1855_v59 = vmul.f32 %v543_v51, %v2405_v17  ;;  %v1863_v30 = vmul.f32 %v543_v51, %v2408_v23  ;;  %v1867_v1 = vmul.f32 %v543_v51, %v2409_v27  ;;  %v2413_v5 = vunpack.c.h.bf16 %v1461_v3 }
  0xb8   : > { %2400 = vst [vmem:[#allocation43_spill] sm:$0xff] %v1835_v40  ;;  %v2407_v40 = vunpack.c.l.bf16 %v1451_v20  ;;  %v1871_v7 = vmul.f32 %v543_v51, %v2411_v29  ;;  %v2417_v20 = vunpack.c.h.bf16 %v1464_v8  ;;  %v2419_v27 = vunpack.c.l.bf16 %v1471_v0 }
  0xb9   : > { %2406 = vst [vmem:[#allocation44_spill] sm:$0xff] %v1855_v59  ;;  %2410 = vst [vmem:[#allocation45_spill] sm:$0xff] %v1867_v1  ;;  %v1875_v17 = vmul.f32 %v543_v51, %v2413_v5  ;;  %v2415_v59 = vunpack.c.l.bf16 %v1464_v8  ;;  %v2421_v9 = vunpack.c.h.bf16 %v1471_v0  ;;  %v2425_v8 = vunpack.c.h.bf16 %v1474_v4 }
  0xba   : > { %v1859_v48 = vmul.f32 %v543_v51, %v2407_v40  ;;  %2412 = vst [vmem:[#allocation46_spill] sm:$0xff] %v1871_v7  ;;  %v1884_v23 = vmul.f32 %v538_v25, %v2417_v20  ;;  %v1888_v1 = vmul.f32 %v538_v25, %v2419_v27  ;;  %v2423_v51 = vunpack.c.l.bf16 %v1474_v4 }
  0xbb   : > { %2414 = vst [vmem:[#allocation47_spill] sm:$0xff] %v1875_v17  ;;  %v1879_v40 = vmul.f32 %v538_v25, %v2415_v59  ;;  %v1892_v29 = vmul.f32 %v538_v25, %v2421_v9  ;;  %v1898_v17 = vpop.permute.xlu1 %562  ;;  %v1900_v59 = vpop.permute.xlu0 %557  ;;  %v1904_v20 = vmul.f32 %v538_v25, %v2425_v8 }
  0xbc   : > { %2418 = vst [vmem:[#allocation49_spill] sm:$0xff] %v1884_v23  ;;  %2420 = vst [vmem:[#allocation50_spill] sm:$0xff] %v1888_v1  ;;  %v1896_v5 = vmul.f32 %v538_v25, %v2423_v51  ;;  %v2427_v23 = vunpack.c.l.bf16 %v1461_v3  ;;  %v2428_v1 = vld [vmem:[#allocation2_spill] sm:$0xff] }
  0xbd   : > { %2416 = vst [vmem:[#allocation48_spill] sm:$0xff] %v1879_v40  ;;  %2422 = vst [vmem:[#allocation51_spill] sm:$0xff] %v1892_v29  ;;  %v2429_v0 = vunpack.c.l.bf16 %v2428_v1  ;;  %v2431_v29 = vunpack.c.h.bf16 %v2428_v1  ;;  %v2441_v1 = vunpack.c.h.bf16 %v1500_v18 }
  0xbe   : > { %2424 = vst [vmem:[#allocation52_spill] sm:$0xff] %v1896_v5  ;;  %2426 = vst [vmem:[#allocation53_spill] sm:$0xff] %v1904_v20  ;;  %v1908_v27 = vmul.f32 %v538_v25, %v2427_v23  ;;  %v2433_v5 = vld [vmem:[#allocation3_spill] sm:$0xff]  ;;  %v2438_v20 = vld [vmem:[#allocation4_spill] sm:$0xff] }
  0xbf   : > { %v1912_v9 = vmul.f32 %v553_v15, %v2429_v0  ;;  %v1916_v51 = vmul.f32 %v553_v15, %v2431_v29  ;;  %v2434_v40 = vunpack.c.l.bf16 %v2433_v5  ;;  %v2436_v4 = vunpack.c.h.bf16 %v2433_v5 }
  0xc0   : > { %v2439_v3 = vunpack.c.l.bf16 %v2438_v20  ;;  %v2440_v23 = vunpack.c.h.bf16 %v2438_v20  ;;  %v1936_v29 = vmul.f32 %v553_v15, %v2441_v1 }
  0xc1   : > { %2430 = vst [vmem:[#allocation2_spill] sm:$0xff] %v1912_v9  ;;  %2432 = vst [vmem:[#allocation54_spill] sm:$0xff] %v1916_v51  ;;  %v1920_v7 = vmul.f32 %v553_v15, %v2434_v40  ;;  %v1924_v8 = vmul.f32 %v553_v15, %v2436_v4  ;;  %v2442_v51 = vld [vmem:[#allocation5_spill] sm:$0xff] }
  0xc2   : > { %v1928_v25 = vmul.f32 %v553_v15, %v2439_v3  ;;  %v1932_v0 = vmul.f32 %v553_v15, %v2440_v23  ;;  %v2443_v9 = vunpack.c.l.bf16 %v2442_v51  ;;  %v2445_v5 = vunpack.c.h.bf16 %v2442_v51 }
  0xc3   : > { %2435 = vst [vmem:[#allocation3_spill] sm:$0xff] %v1920_v7  ;;  %2437 = vst [vmem:[#allocation55_spill] sm:$0xff] %v1924_v8  ;;  %v2447_v8 = vld [vmem:[#allocation6_spill] sm:$0xff] }
  0xc4   : > { %v1940_v40 = vmul.f32 %v548_v32, %v2443_v9  ;;  %v1944_v4 = vmul.f32 %v548_v32, %v2445_v5  ;;  %v2448_v7 = vunpack.c.l.bf16 %v2447_v8  ;;  %v2450_v15 = vunpack.c.h.bf16 %v2447_v8  ;;  %v2451_v9 = vld [vmem:[#allocation7_spill] sm:$0xff]  ;;  %v696_v8 = vpop.permute.xlu0 %695 }
  0xc5   : > { %v2452_v23 = vunpack.c.l.bf16 %v2451_v9  ;;  %v2453_v1 = vunpack.c.h.bf16 %v2451_v9  ;;  %v2455_v5 = vunpack.c.l.bf16 %v1500_v18 }
  0xc6   : > { %2444 = vst [vmem:[#allocation4_spill] sm:$0xff] %v1940_v40  ;;  %2446 = vst [vmem:[#allocation5_spill] sm:$0xff] %v1944_v4  ;;  %v1948_v3 = vmul.f32 %v548_v32, %v2448_v7  ;;  %v1957_v20 = vmul.f32 %v548_v32, %v2450_v15  ;;  %v701_v4 = vpop.permute.xlu1 %700 }
  0xc7   : > { %v1961_v51 = vmul.f32 %v548_v32, %v2452_v23  ;;  %v1965_v7 = vmul.f32 %v548_v32, %v2453_v1  ;;  %v780_v40 = vadd.f32 %v701_v4, %v1655_v61  ;;  %v781_v15 = vadd.f32 %v701_v4, %v1659_v41 }
  0xc8   : > { %2449 = vst [vmem:[#allocation6_spill] sm:$0xff] %v1948_v3  ;;  %v1969_v3 = vmul.f32 %v548_v32, %v2455_v5  ;;  %v782_v23 = vadd.f32 %v701_v4, %v1663_v49  ;;  %v783_v9 = vadd.f32 %v701_v4, %v1667_v38  ;;  %v784_v1 = vadd.f32 %v701_v4, %v1671_v45 }
  0xc9   : > { %2454 = vst [vmem:[#allocation7_spill] sm:$0xff] %v1965_v7  ;;  %v785_v7 = vadd.f32 %v701_v4, %v1675_v62  ;;  %v786_v18 = vadd.f32 %v701_v4, %v1679_v47  ;;  %v773_v32 = vadd.f32 %v696_v8, %v1593_v55  ;;  %892 = vst [vmem:[%s1953_s4 + $0x38] sm:$0xff] %v780_v40  ;;  %v2456_v47 = vld [vmem:[#allocation8_spill] sm:$0xff] }
  0xca   : > { %893 = vst [vmem:[%s1953_s4 + $0x40] sm:$0xff] %v781_v15  ;;  %894 = vst [vmem:[%s1953_s4 + $0x48] sm:$0xff] %v782_v23  ;;  %v774_v61 = vadd.f32 %v696_v8, %v1598_v58  ;;  %v775_v41 = vadd.f32 %v696_v8, %v1603_v35  ;;  %v776_v49 = vadd.f32 %v696_v8, %v1608_v50  ;;  %v711_v62 = vpop.permute.xlu1 %710  ;;  %v706_v58 = vpop.permute.xlu0 %705  ;;  %v2457_v40 = vunpack.c.l.bf16 %v2456_v47  ;;  %v2459_v15 = vld [vmem:[#allocation22_spill] sm:$0xff] }
  0xcb   : > { %895 = vst [vmem:[%s1953_s4 + $0x50] sm:$0xff] %v783_v9  ;;  %v777_v38 = vadd.f32 %v696_v8, %v1613_v10  ;;  %896 = vst [vmem:[%s1953_s4 + $0x58] sm:$0xff] %v784_v1  ;;  %v778_v55 = vadd.f32 %v696_v8, %v1618_v34  ;;  %v779_v45 = vadd.f32 %v696_v8, %v1623_v26  ;;  %v2458_v50 = vunpack.c.h.bf16 %v2456_v47  ;;  %v2460_v9 = vld [vmem:[#allocation15_spill] sm:$0xff] }
  0xcc   : > { %897 = vst [vmem:[%s1953_s4 + $0x60] sm:$0xff] %v785_v7  ;;  %898 = vst [vmem:[%s1953_s4 + $0x68] sm:$0xff] %v786_v18  ;;  %v1996_v35 = vmul.f32 %v1898_v17, %v2457_v40  ;;  %v794_v34 = vadd.f32 %v711_v62, %v1627_v43  ;;  %v795_v26 = vadd.f32 %v711_v62, %v1631_v16  ;;  %v2463_v18 = vld [vmem:[#allocation18_spill] sm:$0xff] }
  0xcd   : > { %885 = vst [vmem:[%s1953_s4] sm:$0xff] %v773_v32  ;;  %v2001_v10 = vmul.f32 %v1898_v17, %v2458_v50  ;;  %886 = vst [vmem:[%s1953_s4 + $0x8] sm:$0xff] %v774_v61  ;;  %v796_v4 = vadd.f32 %v711_v62, %v1635_v44  ;;  %v797_v7 = vadd.f32 %v711_v62, %v1639_v37  ;;  %v2461_v44 = vld [vmem:[#allocation16_spill] sm:$0xff]  ;;  %v2462_v37 = vld [vmem:[#allocation17_spill] sm:$0xff] }
  0xce   : > { %887 = vst [vmem:[%s1953_s4 + $0x10] sm:$0xff] %v775_v41  ;;  %888 = vst [vmem:[%s1953_s4 + $0x18] sm:$0xff] %v776_v49  ;;  %v798_v5 = vadd.f32 %v711_v62, %v1643_v57  ;;  %v799_v8 = vadd.f32 %v711_v62, %v1647_v63  ;;  %v800_v23 = vadd.f32 %v711_v62, %v2459_v15  ;;  %v2464_v63 = vld [vmem:[#allocation19_spill] sm:$0xff]  ;;  %v2465_v61 = vld [vmem:[#allocation20_spill] sm:$0xff] }
  0xcf   : > { %889 = vst [vmem:[%s1953_s4 + $0x20] sm:$0xff] %v777_v38  ;;  %890 = vst [vmem:[%s1953_s4 + $0x28] sm:$0xff] %v778_v55  ;;  %v787_v43 = vadd.f32 %v706_v58, %v2460_v9  ;;  %v788_v16 = vadd.f32 %v706_v58, %v2461_v44  ;;  %v789_v1 = vadd.f32 %v706_v58, %v2462_v37  ;;  %v2466_v49 = vld [vmem:[#allocation21_spill] sm:$0xff]  ;;  %v721_v55 = vpop.permute.xlu1 %720 }
  0xd0   : > { %891 = vst [vmem:[%s1953_s4 + $0x30] sm:$0xff] %v779_v45  ;;  %906 = vst [vmem:[%s1953_s4 + $0xa8] sm:$0xff] %v794_v34  ;;  %v790_v57 = vadd.f32 %v706_v58, %v2463_v18  ;;  %v791_v32 = vadd.f32 %v706_v58, %v2464_v63  ;;  %v792_v41 = vadd.f32 %v706_v58, %v2465_v61  ;;  %v716_v45 = vpop.permute.xlu0 %715  ;;  %v2467_v62 = vld [vmem:[#allocation9_spill] sm:$0xff] }
  0xd1   : > { %907 = vst [vmem:[%s1953_s4 + $0xb0] sm:$0xff] %v795_v26  ;;  %908 = vst [vmem:[%s1953_s4 + $0xb8] sm:$0xff] %v796_v4  ;;  %v793_v38 = vadd.f32 %v706_v58, %v2466_v49  ;;  %v2468_v47 = vunpack.c.l.bf16 %v2467_v62  ;;  %v2469_v50 = vunpack.c.h.bf16 %v2467_v62  ;;  %v2470_v58 = vld [vmem:[#allocation23_spill] sm:$0xff]  ;;  %v2471_v4 = vld [vmem:[#allocation24_spill] sm:$0xff]  ;;  %v811_v15 = vadd.f32 %v721_v55, %v1695_v46 }
  0xd2   : > { %909 = vst [vmem:[%s1953_s4 + $0xc0] sm:$0xff] %v797_v7  ;;  %910 = vst [vmem:[%s1953_s4 + $0xc8] sm:$0xff] %v798_v5  ;;  %v808_v26 = vadd.f32 %v721_v55, %v2470_v58  ;;  %v809_v7 = vadd.f32 %v721_v55, %v2471_v4  ;;  %v2472_v5 = vld [vmem:[#allocation25_spill] sm:$0xff]  ;;  %v801_v37 = vadd.f32 %v716_v45, %v1711_v2  ;;  %v2477_v49 = vld [vmem:[#allocation10_spill] sm:$0xff] }
  0xd3   : > { %911 = vst [vmem:[%s1953_s4 + $0xd0] sm:$0xff] %v799_v8  ;;  %912 = vst [vmem:[%s1953_s4 + $0xd8] sm:$0xff] %v800_v23  ;;  %v2034_v40 = vmul.f32 %v1898_v17, %v2468_v47  ;;  %v2039_v34 = vmul.f32 %v1898_v17, %v2469_v50  ;;  %v810_v8 = vadd.f32 %v721_v55, %v2472_v5  ;;  %v2473_v23 = vld [vmem:[#allocation26_spill] sm:$0xff]  ;;  %v731_v61 = vpop.permute.xlu1 %730  ;;  %v2481_v62 = vld [vmem:[#allocation31_spill] sm:$0xff] }
  0xd4   : > { %899 = vst [vmem:[%s1953_s4 + $0x70] sm:$0xff] %v787_v43  ;;  %900 = vst [vmem:[%s1953_s4 + $0x78] sm:$0xff] %v788_v16  ;;  %v812_v9 = vadd.f32 %v721_v55, %v2473_v23  ;;  %v2474_v43 = vld [vmem:[#allocation27_spill] sm:$0xff]  ;;  %v814_v16 = vadd.f32 %v721_v55, %v1707_v52  ;;  %v803_v18 = vadd.f32 %v716_v45, %v1719_v42  ;;  %v2482_v50 = vld [vmem:[#allocation32_spill] sm:$0xff] }
  0xd5   : > { %901 = vst [vmem:[%s1953_s4 + $0x80] sm:$0xff] %v789_v1  ;;  %902 = vst [vmem:[%s1953_s4 + $0x88] sm:$0xff] %v790_v57  ;;  %v813_v44 = vadd.f32 %v721_v55, %v2474_v43  ;;  %v2475_v1 = vld [vmem:[#allocation28_spill] sm:$0xff]  ;;  %v2476_v57 = vld [vmem:[#allocation29_spill] sm:$0xff]  ;;  %v806_v52 = vadd.f32 %v716_v45, %v1731_v33  ;;  %v807_v2 = vadd.f32 %v716_v45, %v1735_v6  ;;  %v2479_v55 = vunpack.c.h.bf16 %v2477_v49 }
  0xd6   : > { %903 = vst [vmem:[%s1953_s4 + $0x90] sm:$0xff] %v791_v32  ;;  %904 = vst [vmem:[%s1953_s4 + $0x98] sm:$0xff] %v792_v41  ;;  %v802_v46 = vadd.f32 %v716_v45, %v2475_v1  ;;  %v804_v63 = vadd.f32 %v716_v45, %v2476_v57  ;;  %v805_v32 = vadd.f32 %v716_v45, %v1727_v39  ;;  %v726_v41 = vpop.permute.xlu0 %725  ;;  %v2480_v6 = vld [vmem:[#allocation30_spill] sm:$0xff]  ;;  %v2486_v43 = vld [vmem:[#allocation36_spill] sm:$0xff] }
  0xd7   : > { %905 = vst [vmem:[%s1953_s4 + $0xa0] sm:$0xff] %v793_v38  ;;  %920 = vst [vmem:[%s1953_s4 + $0x118] sm:$0xff] %v808_v26  ;;  %v2478_v38 = vunpack.c.l.bf16 %v2477_v49  ;;  %v2077_v39 = vmul.f32 %v1898_v17, %v2479_v55  ;;  %v822_v33 = vadd.f32 %v731_v61, %v1739_v53  ;;  %v823_v45 = vadd.f32 %v731_v61, %v2480_v6  ;;  %v2483_v26 = vld [vmem:[#allocation33_spill] sm:$0xff]  ;;  %v2489_v57 = vld [vmem:[#allocation12_spill] sm:$0xff] }
  0xd8   : > { %921 = vst [vmem:[%s1953_s4 + $0x120] sm:$0xff] %v809_v7  ;;  %922 = vst [vmem:[%s1953_s4 + $0x128] sm:$0xff] %v810_v8  ;;  %v824_v47 = vadd.f32 %v731_v61, %v2481_v62  ;;  %v825_v58 = vadd.f32 %v731_v61, %v2482_v50  ;;  %v826_v4 = vadd.f32 %v731_v61, %v2483_v26  ;;  %v2484_v8 = vld [vmem:[#allocation34_spill] sm:$0xff]  ;;  %v2494_v49 = vld [vmem:[#allocation40_spill] sm:$0xff] }
  0xd9   : > { %923 = vst [vmem:[%s1953_s4 + $0x130] sm:$0xff] %v811_v15  ;;  %924 = vst [vmem:[%s1953_s4 + $0x138] sm:$0xff] %v812_v9  ;;  %v2072_v42 = vmul.f32 %v1898_v17, %v2478_v38  ;;  %v827_v7 = vadd.f32 %v731_v61, %v1759_v60  ;;  %v828_v5 = vadd.f32 %v731_v61, %v1763_v14  ;;  %v2485_v15 = vld [vmem:[#allocation35_spill] sm:$0xff]  ;;  %v2496_v6 = vld [vmem:[#allocation42_spill] sm:$0xff] }
  0xda   : > { %925 = vst [vmem:[%s1953_s4 + $0x140] sm:$0xff] %v813_v44  ;;  %926 = vst [vmem:[%s1953_s4 + $0x148] sm:$0xff] %v814_v16  ;;  %v815_v53 = vadd.f32 %v726_v41, %v2484_v8  ;;  %v816_v23 = vadd.f32 %v726_v41, %v2485_v15  ;;  %v817_v9 = vadd.f32 %v726_v41, %v1775_v56  ;;  %v736_v1 = vpop.permute.xlu0 %735  ;;  %v2493_v61 = vld [vmem:[#allocation39_spill] sm:$0xff] }
  0xdb   : > { %913 = vst [vmem:[%s1953_s4 + $0xe0] sm:$0xff] %v801_v37  ;;  %914 = vst [vmem:[%s1953_s4 + $0xe8] sm:$0xff] %v802_v46  ;;  %v818_v44 = vadd.f32 %v726_v41, %v2486_v43  ;;  %v819_v60 = vadd.f32 %v726_v41, %v1783_v24  ;;  %v820_v14 = vadd.f32 %v726_v41, %v1787_v54  ;;  %v741_v37 = vpop.permute.xlu1 %740  ;;  %v2487_v46 = vld [vmem:[#allocation11_spill] sm:$0xff] }
  0xdc   : > { %915 = vst [vmem:[%s1953_s4 + $0xf0] sm:$0xff] %v803_v18  ;;  %916 = vst [vmem:[%s1953_s4 + $0xf8] sm:$0xff] %v804_v63  ;;  %v821_v16 = vadd.f32 %v726_v41, %v1791_v19  ;;  %v2488_v18 = vunpack.c.h.bf16 %v2487_v46  ;;  %v2490_v63 = vunpack.c.l.bf16 %v2489_v57  ;;  %v836_v54 = vadd.f32 %v741_v37, %v1795_v12  ;;  %v2491_v19 = vld [vmem:[#allocation37_spill] sm:$0xff]  ;;  %v2497_v62 = vld [vmem:[#allocation43_spill] sm:$0xff] }
  0xdd   : > { %917 = vst [vmem:[%s1953_s4 + $0x100] sm:$0xff] %v805_v32  ;;  %918 = vst [vmem:[%s1953_s4 + $0x108] sm:$0xff] %v806_v52  ;;  %v837_v32 = vadd.f32 %v741_v37, %v2491_v19  ;;  %v2492_v52 = vld [vmem:[#allocation38_spill] sm:$0xff]  ;;  %v840_v41 = vadd.f32 %v741_v37, %v2493_v61  ;;  %v841_v38 = vadd.f32 %v741_v37, %v2494_v49 }
  0xde   : > { %919 = vst [vmem:[%s1953_s4 + $0x110] sm:$0xff] %v807_v2  ;;  %934 = vst [vmem:[%s1953_s4 + $0x188] sm:$0xff] %v822_v33  ;;  %v2110_v56 = vmul.f32 %v1898_v17, %v2488_v18  ;;  %v2115_v24 = vmul.f32 %v1900_v59, %v2490_v63  ;;  %v838_v17 = vadd.f32 %v741_v37, %v1803_v36  ;;  %v2495_v36 = vld [vmem:[#allocation41_spill] sm:$0xff]  ;;  %v746_v26 = vpop.permute.xlu0 %745 }
  0xdf   : > { %935 = vst [vmem:[%s1953_s4 + $0x190] sm:$0xff] %v823_v45  ;;  %936 = vst [vmem:[%s1953_s4 + $0x198] sm:$0xff] %v824_v47  ;;  %v839_v2 = vadd.f32 %v741_v37, %v2492_v52  ;;  %v842_v55 = vadd.f32 %v741_v37, %v1819_v21  ;;  %v829_v12 = vadd.f32 %v736_v1, %v1823_v13  ;;  %v2505_v37 = vld [vmem:[#allocation48_spill] sm:$0xff] }
  0xe0   : > { %937 = vst [vmem:[%s1953_s4 + $0x1a0] sm:$0xff] %v825_v58  ;;  %938 = vst [vmem:[%s1953_s4 + $0x1a8] sm:$0xff] %v826_v4  ;;  %v830_v33 = vadd.f32 %v736_v1, %v2495_v36  ;;  %v831_v45 = vadd.f32 %v736_v1, %v2496_v6  ;;  %v832_v47 = vadd.f32 %v736_v1, %v2497_v62  ;;  %v751_v58 = vpop.permute.xlu1 %750  ;;  %v2498_v4 = vunpack.c.h.bf16 %v2489_v57  ;;  %v2508_v57 = vld [vmem:[#allocation51_spill] sm:$0xff] }
  0xe1   : > { %939 = vst [vmem:[%s1953_s4 + $0x1b0] sm:$0xff] %v827_v7  ;;  %940 = vst [vmem:[%s1953_s4 + $0x1b8] sm:$0xff] %v828_v5  ;;  %v833_v50 = vadd.f32 %v736_v1, %v1839_v22  ;;  %v834_v21 = vadd.f32 %v736_v1, %v1843_v11  ;;  %v835_v13 = vadd.f32 %v736_v1, %v1847_v28  ;;  %v2499_v5 = vld [vmem:[#allocation13_spill] sm:$0xff]  ;;  %v2501_v11 = vld [vmem:[#allocation44_spill] sm:$0xff] }
  0xe2   : > { %927 = vst [vmem:[%s1953_s4 + $0x150] sm:$0xff] %v815_v53  ;;  %928 = vst [vmem:[%s1953_s4 + $0x158] sm:$0xff] %v816_v23  ;;  %v2148_v7 = vmul.f32 %v1900_v59, %v2498_v4  ;;  %v2500_v8 = vunpack.c.l.bf16 %v2499_v5  ;;  %v850_v28 = vadd.f32 %v751_v58, %v1851_v31  ;;  %v851_v53 = vadd.f32 %v751_v58, %v2501_v11  ;;  %v2507_v1 = vld [vmem:[#allocation50_spill] sm:$0xff]  ;;  %v756_v61 = vpop.permute.xlu0 %755 }
  0xe3   : > { %929 = vst [vmem:[%s1953_s4 + $0x160] sm:$0xff] %v817_v9  ;;  %930 = vst [vmem:[%s1953_s4 + $0x168] sm:$0xff] %v818_v44  ;;  %v852_v15 = vadd.f32 %v751_v58, %v1859_v48  ;;  %v853_v23 = vadd.f32 %v751_v58, %v1863_v30  ;;  %v2502_v9 = vld [vmem:[#allocation45_spill] sm:$0xff]  ;;  %v2503_v44 = vld [vmem:[#allocation46_spill] sm:$0xff]  ;;  %v843_v31 = vadd.f32 %v746_v26, %v2505_v37 }
  0xe4   : > { %931 = vst [vmem:[%s1953_s4 + $0x170] sm:$0xff] %v819_v60  ;;  %932 = vst [vmem:[%s1953_s4 + $0x178] sm:$0xff] %v820_v14  ;;  %v2153_v22 = vmul.f32 %v1900_v59, %v2500_v8  ;;  %v854_v43 = vadd.f32 %v751_v58, %v2502_v9  ;;  %v855_v60 = vadd.f32 %v751_v58, %v2503_v44  ;;  %v2504_v14 = vld [vmem:[#allocation47_spill] sm:$0xff]  ;;  %v2506_v48 = vld [vmem:[#allocation49_spill] sm:$0xff] }
  0xe5   : > { %933 = vst [vmem:[%s1953_s4 + $0x180] sm:$0xff] %v821_v16  ;;  %948 = vst [vmem:[%s1953_s4 + $0x1f8] sm:$0xff] %v836_v54  ;;  %v856_v16 = vadd.f32 %v751_v58, %v2504_v14  ;;  %v844_v30 = vadd.f32 %v746_v26, %v2506_v48  ;;  %v845_v18 = vadd.f32 %v746_v26, %v2507_v1  ;;  %v2509_v54 = vld [vmem:[#allocation52_spill] sm:$0xff] }
  0xe6   : > { %949 = vst [vmem:[%s1953_s4 + $0x200] sm:$0xff] %v837_v32  ;;  %950 = vst [vmem:[%s1953_s4 + $0x208] sm:$0xff] %v838_v17  ;;  %v846_v63 = vadd.f32 %v746_v26, %v2508_v57  ;;  %v847_v19 = vadd.f32 %v746_v26, %v2509_v54  ;;  %v2510_v32 = vld [vmem:[#allocation53_spill] sm:$0xff]  ;;  %v849_v52 = vadd.f32 %v746_v26, %v1908_v27  ;;  %v2514_v27 = vld [vmem:[#allocation2_spill] sm:$0xff]  ;;  %v766_v9 = vpop.permute.xlu0 %765 }
  0xe7   : > { %951 = vst [vmem:[%s1953_s4 + $0x210] sm:$0xff] %v839_v2  ;;  %952 = vst [vmem:[%s1953_s4 + $0x218] sm:$0xff] %v840_v41  ;;  %v848_v17 = vadd.f32 %v746_v26, %v2510_v32  ;;  %v761_v2 = vpop.permute.xlu1 %760  ;;  %v2511_v41 = vunpack.c.h.bf16 %v2499_v5  ;;  %v2518_v26 = vld [vmem:[#allocation4_spill] sm:$0xff]  ;;  %v2519_v5 = vld [vmem:[#allocation5_spill] sm:$0xff] }
  0xe8   : > { %953 = vst [vmem:[%s1953_s4 + $0x220] sm:$0xff] %v841_v38  ;;  %954 = vst [vmem:[%s1953_s4 + $0x228] sm:$0xff] %v842_v55  ;;  %v2512_v38 = vld [vmem:[#allocation14_spill] sm:$0xff]  ;;  %v864_v36 = vadd.f32 %v761_v2, %v2514_v27  ;;  %v870_v58 = vadd.f32 %v761_v2, %v1936_v29  ;;  %v857_v4 = vadd.f32 %v756_v61, %v2518_v26  ;;  %v2521_v29 = vld [vmem:[#allocation7_spill] sm:$0xff] }
  0xe9   : > { %941 = vst [vmem:[%s1953_s4 + $0x1c0] sm:$0xff] %v829_v12  ;;  %942 = vst [vmem:[%s1953_s4 + $0x1c8] sm:$0xff] %v830_v33  ;;  %v666_v49 = vmul.f32 %v1900_v59, %v2511_v41  ;;  %v2513_v55 = vunpack.c.l.bf16 %v2512_v38  ;;  %v2515_v33 = vld [vmem:[#allocation54_spill] sm:$0xff]  ;;  %v858_v8 = vadd.f32 %v756_v61, %v2519_v5 }
  0xea   : > { %943 = vst [vmem:[%s1953_s4 + $0x1d0] sm:$0xff] %v831_v45  ;;  %944 = vst [vmem:[%s1953_s4 + $0x1d8] sm:$0xff] %v832_v47  ;;  %v865_v6 = vadd.f32 %v761_v2, %v2515_v33  ;;  %v2516_v45 = vld [vmem:[#allocation3_spill] sm:$0xff] }
  0xeb   : > { %945 = vst [vmem:[%s1953_s4 + $0x1e0] sm:$0xff] %v833_v50  ;;  %946 = vst [vmem:[%s1953_s4 + $0x1e8] sm:$0xff] %v834_v21  ;;  %v667_v12 = vmul.f32 %v1900_v59, %v2513_v55  ;;  %v866_v62 = vadd.f32 %v761_v2, %v2516_v45  ;;  %v2517_v47 = vld [vmem:[#allocation55_spill] sm:$0xff]  ;;  %v868_v21 = vadd.f32 %v761_v2, %v1928_v25 }
  0xec   : > { %947 = vst [vmem:[%s1953_s4 + $0x1f0] sm:$0xff] %v835_v13  ;;  %962 = vst [vmem:[%s1953_s4 + $0x268] sm:$0xff] %v850_v28  ;;  %v867_v50 = vadd.f32 %v761_v2, %v2517_v47  ;;  %v869_v13 = vadd.f32 %v761_v2, %v1932_v0  ;;  %v2520_v28 = vld [vmem:[#allocation6_spill] sm:$0xff]  ;;  %v860_v25 = vadd.f32 %v756_v61, %v1957_v20  ;;  %v2523_v20 = vunpack.c.l.bf16 %v2487_v46 }
  0xed   : > { %963 = vst [vmem:[%s1953_s4 + $0x270] sm:$0xff] %v851_v53  ;;  %964 = vst [vmem:[%s1953_s4 + $0x278] sm:$0xff] %v852_v15  ;;  %v859_v11 = vadd.f32 %v756_v61, %v2520_v28  ;;  %v861_v0 = vadd.f32 %v756_v61, %v1961_v51  ;;  %v862_v53 = vadd.f32 %v756_v61, %v2521_v29 }
  0xee   : > { %965 = vst [vmem:[%s1953_s4 + $0x280] sm:$0xff] %v853_v23  ;;  %966 = vst [vmem:[%s1953_s4 + $0x288] sm:$0xff] %v854_v43  ;;  %v863_v15 = vadd.f32 %v756_v61, %v1969_v3  ;;  %v771_v23 = vpop.permute.xlu1 %770  ;;  %v2522_v43 = vunpack.c.h.bf16 %v2512_v38  ;;  %v669_v51 = vmul.f32 %v1900_v59, %v2523_v20 }
  0xef   : > { %967 = vst [vmem:[%s1953_s4 + $0x290] sm:$0xff] %v855_v60  ;;  %968 = vst [vmem:[%s1953_s4 + $0x298] sm:$0xff] %v856_v16  ;;  %v878_v3 = vadd.f32 %v771_v23, %v1996_v35  ;;  %v879_v60 = vadd.f32 %v771_v23, %v2001_v10  ;;  %v880_v14 = vadd.f32 %v771_v23, %v2034_v40 }
  0xf0   : > { %955 = vst [vmem:[%s1953_s4 + $0x230] sm:$0xff] %v843_v31  ;;  %956 = vst [vmem:[%s1953_s4 + $0x238] sm:$0xff] %v844_v30  ;;  %v668_v44 = vmul.f32 %v1900_v59, %v2522_v43  ;;  %v881_v16 = vadd.f32 %v771_v23, %v2039_v34  ;;  %v882_v59 = vadd.f32 %v771_v23, %v2072_v42 }
  0xf1   : > { %957 = vst [vmem:[%s1953_s4 + $0x240] sm:$0xff] %v845_v18  ;;  %958 = vst [vmem:[%s1953_s4 + $0x248] sm:$0xff] %v846_v63  ;;  %v883_v46 = vadd.f32 %v771_v23, %v2077_v39  ;;  %v884_v37 = vadd.f32 %v771_v23, %v2110_v56  ;;  %v871_v35 = vadd.f32 %v766_v9, %v2115_v24 }
  0xf2   : > { %959 = vst [vmem:[%s1953_s4 + $0x250] sm:$0xff] %v847_v19  ;;  %960 = vst [vmem:[%s1953_s4 + $0x258] sm:$0xff] %v848_v17  ;;  %v872_v10 = vadd.f32 %v766_v9, %v2148_v7  ;;  %v873_v40 = vadd.f32 %v766_v9, %v2153_v22  ;;  %v874_v34 = vadd.f32 %v766_v9, %v666_v49 }
  0xf3   : > { %961 = vst [vmem:[%s1953_s4 + $0x260] sm:$0xff] %v849_v52  ;;  %976 = vst [vmem:[%s1953_s4 + $0x2d8] sm:$0xff] %v864_v36  ;;  %v875_v42 = vadd.f32 %v766_v9, %v667_v12  ;;  %v876_v39 = vadd.f32 %v766_v9, %v668_v44  ;;  %v877_v56 = vadd.f32 %v766_v9, %v669_v51 }
  0xf4   : > { %977 = vst [vmem:[%s1953_s4 + $0x2e0] sm:$0xff] %v865_v6  ;;  %978 = vst [vmem:[%s1953_s4 + $0x2e8] sm:$0xff] %v866_v62 }
  0xf5   : > { %979 = vst [vmem:[%s1953_s4 + $0x2f0] sm:$0xff] %v867_v50  ;;  %980 = vst [vmem:[%s1953_s4 + $0x2f8] sm:$0xff] %v868_v21 }
  0xf6   : > { %981 = vst [vmem:[%s1953_s4 + $0x300] sm:$0xff] %v869_v13  ;;  %982 = vst [vmem:[%s1953_s4 + $0x308] sm:$0xff] %v870_v58 }
  0xf7   : > { %969 = vst [vmem:[%s1953_s4 + $0x2a0] sm:$0xff] %v857_v4  ;;  %970 = vst [vmem:[%s1953_s4 + $0x2a8] sm:$0xff] %v858_v8 }
  0xf8   : > { %971 = vst [vmem:[%s1953_s4 + $0x2b0] sm:$0xff] %v859_v11  ;;  %972 = vst [vmem:[%s1953_s4 + $0x2b8] sm:$0xff] %v860_v25 }
  0xf9   : > { %973 = vst [vmem:[%s1953_s4 + $0x2c0] sm:$0xff] %v861_v0  ;;  %974 = vst [vmem:[%s1953_s4 + $0x2c8] sm:$0xff] %v862_v53 }
  0xfa   : > { %975 = vst [vmem:[%s1953_s4 + $0x2d0] sm:$0xff] %v863_v15  ;;  %990 = vst [vmem:[%s1953_s4 + $0x348] sm:$0xff] %v878_v3 }
  0xfb   : > { %991 = vst [vmem:[%s1953_s4 + $0x350] sm:$0xff] %v879_v60  ;;  %992 = vst [vmem:[%s1953_s4 + $0x358] sm:$0xff] %v880_v14 }
  0xfc   : > { %993 = vst [vmem:[%s1953_s4 + $0x360] sm:$0xff] %v881_v16  ;;  %994 = vst [vmem:[%s1953_s4 + $0x368] sm:$0xff] %v882_v59 }
  0xfd   : > { %995 = vst [vmem:[%s1953_s4 + $0x370] sm:$0xff] %v883_v46  ;;  %996 = vst [vmem:[%s1953_s4 + $0x378] sm:$0xff] %v884_v37 }
  0xfe   : > { %983 = vst [vmem:[%s1953_s4 + $0x310] sm:$0xff] %v871_v35  ;;  %984 = vst [vmem:[%s1953_s4 + $0x318] sm:$0xff] %v872_v10 }
  0xff   : > { %985 = vst [vmem:[%s1953_s4 + $0x320] sm:$0xff] %v873_v40  ;;  %986 = vst [vmem:[%s1953_s4 + $0x328] sm:$0xff] %v874_v34 }
 0x100   : > { %987 = vst [vmem:[%s1953_s4 + $0x330] sm:$0xff] %v875_v42  ;;  %988 = vst [vmem:[%s1953_s4 + $0x338] sm:$0xff] %v876_v39 }
 0x101   : > { %989 = vst [vmem:[%s1953_s4 + $0x340] sm:$0xff] %v877_v56 }
 0x102 PF: > { %s13_s14 = sadd.s32 1, %s1202_s14   ;;  %s2524_s12 = smov %s1198_s13 }
 0x103   : > { %p10_p5 = scmp.ge.s32.totalorder %s13_s14, 4   ;;  %s2525_s13 = smov %s2527_s15 }
 0x105   :  { %12 = sbr.rel (!%p10_p5) target bundleno = 2 (0x2), region = 68 }

// kernel: relu_conv1x1_bn.2
= control target key start
LH: loop header
LB: loop body
LE: loop exit
PB: predicated region body
PF: predicated region fallthrough
CT: control target
= control target key end

     0   :  { %s8568_s21 = smov 0   ;;  %s8570_s22 = smov 0   ;;  %s11888_s0 = inlined_call_operand.vmem [shape: bf16[1,1024,896], index: 0, kind: input, shape index: {}]   ;;  %s11889_s1 = inlined_call_operand.vmem [shape: bf16[256,1024], index: 1, kind: input, shape index: {}]   ;;  %s11890_s2 = inlined_call_operand.vmem [shape: f32[256,1], index: 2, kind: input, shape index: {}]   ;;  %s11891_s3 = inlined_call_operand.vmem [shape: f32[256,1], index: 3, kind: input, shape index: {}]   ;;  %s11892_s4 = inlined_call_operand.vmem [shape: bf16[1,256,896], index: 4, kind: output, shape index: {0}]   ;;  %s11893_s5 = inlined_call_operand.vmem [shape: f32[256,1], index: 5, kind: output, shape index: {1}]   ;;  %s11894_s6 = inlined_call_operand.vmem [shape: f32[256,1], index: 6, kind: output, shape index: {2}]  }
   0x1   :  { %s8572_s23 = smov 0  }
   0x2 LB: > { %s36_s24 = sadd.s32 1, %s8525_s22  ;;  %p7247_p0 = scmp.ge.s32.totalorder %s8529_s23, 1  ;;  %s8529_s23 = sphi %s8572_s23, %s17_s23   ;;  %s8525_s22 = sphi %s8570_s22, %s12007_s22   ;;  %s8521_s21 = sphi %s8568_s21, %s12006_s21  }
   0x3   : > { %p38_p1 = scmp.ge.s32.totalorder %s36_s24, 2  ;;  %p281_p2 = scmp.lt.s32.totalorder %s8529_s23, 3 }
   0x5   : > { %s12009_s24 = smov (%p38_p1, %s36_s24), 0  ;;  %p282_p3 = pnand %p7247_p0, %p281_p2 }
   0x7   : > { %285 = sbr.rel (%p282_p3) target bundleno = 995 (0x3e3), region = 36 }
   0xe   : > { %v447_v0 = vld [vmem:[%s11888_s0] sm:$0xff]  ;;  %v448_v2 = vld [vmem:[%s11888_s0 + $0x8] sm:$0xff]  ;;  %v8531_v3 = vmov 0   ;;  %v455_v8 = vld [vmem:[%s11888_s0 + $0x38] sm:$0xff]  ;;  %s7248_s9 = sshll.u32 %s8521_s21, 4  ;;  %vm414_vm0 = vcmask 7168  }
   0xf   : > { %v451_v1 = vld [vmem:[%s11888_s0 + $0x1c] sm:$0xff]  ;;  %v959_v4 = vmax.bf16 %v8531_v3, %v447_v0  ;;  %v452_v6 = vld [vmem:[%s11888_s0 + $0x24] sm:$0xff]  ;;  %v960_v7 = vmax.bf16 %v8531_v3, %v448_v2  ;;  %v459_v9 = vld [vmem:[%s11888_s0 + $0x54] sm:$0xff]  ;;  %v967_v11 = vmax.bf16 %v8531_v3, %v455_v8  ;;  %p8699_p4 = scmp.lt.s32.totalorder %s7248_s9, 31 }
  0x10   : > { %v963_v5 = vmax.bf16 %v8531_v3, %v451_v1  ;;  %v964_v10 = vmax.bf16 %v8531_v3, %v452_v6  ;;  %v971_v12 = vmax.bf16 %v8531_v3, %v459_v9  ;;  %v456_v13 = vld [vmem:[%s11888_s0 + $0x40] sm:$0xff]  ;;  %v463_v15 = vld [vmem:[%s11888_s0 + $0x70] sm:$0xff]  ;;  %v464_v21 = vld [vmem:[%s11888_s0 + $0x78] sm:$0xff] }
  0x11   : > { %v460_v14 = vld [vmem:[%s11888_s0 + $0x5c] sm:$0xff]  ;;  %v968_v18 = vmax.bf16 %v8531_v3, %v456_v13  ;;  %v467_v20 = vld [vmem:[%s11888_s0 + $0x8c] sm:$0xff]  ;;  %v468_v22 = vld [vmem:[%s11888_s0 + $0x94] sm:$0xff]  ;;  %v975_v30 = vmax.bf16 %v8531_v3, %v463_v15  ;;  %v976_v35 = vmax.bf16 %v8531_v3, %v464_v21  ;;  %s12011_s9 = smov (!%p8699_p4, %s7248_s9), 31 }
  0x12   : > { %v7326_v16 = vcombine.high %v959_v4, %v963_v5  ;;  %v7325_v17 = vcombine.low %v959_v4, %v963_v5  ;;  %v972_v19 = vmax.bf16 %v8531_v3, %v460_v14  ;;  %v7328_v23 = vcombine.high %v960_v7, %v964_v10  ;;  %v471_v26 = vld [vmem:[%s11888_s0 + $0xa8] sm:$0xff]  ;;  %v472_v32 = vld [vmem:[%s11888_s0 + $0xb0] sm:$0xff]  ;;  %v479_v43 = vld [vmem:[%s11888_s0 + $0xe0] sm:$0xff]  ;;  %s7839_s15 = sshll.u32 %s12011_s9, 5  ;;  %s8448_s16 = smul.u32 28, %s12011_s9 }
  0x13   : > { %v7327_v24 = vcombine.low %v960_v7, %v964_v10  ;;  %v7333_v25 = vcombine.high %v967_v11, %v971_v12  ;;  %v475_v27 = vld [vmem:[%s11888_s0 + $0xc4] sm:$0xff]  ;;  %v7332_v29 = vcombine.low %v967_v11, %v971_v12  ;;  %v979_v31 = vmax.bf16 %v8531_v3, %v467_v20  ;;  %v476_v33 = vld [vmem:[%s11888_s0 + $0xcc] sm:$0xff]  ;;  %v483_v44 = vld [vmem:[%s11888_s0 + $0xfc] sm:$0xff]  ;;  %s8755_s26 = scalar_lea.vmem %s11889_s1, %s7839_s15  ;;  %s11675_s28 = sshll.u32 %s12011_s9, 3 }
  0x14   : > { %4159 = vmatprep.subr.bf16.mxu0 %v7326_v16  ;;  %v7335_v28 = vcombine.high %v968_v18, %v972_v19  ;;  %4611 = vmatprep.subr.bf16.mxu1 %v7328_v23  ;;  %v7334_v34 = vcombine.low %v968_v18, %v972_v19  ;;  %v980_v36 = vmax.bf16 %v8531_v3, %v468_v22  ;;  %v480_v45 = vld [vmem:[%s11888_s0 + $0xe8] sm:$0xff]  ;;  %v487_v55 = vld [vmem:[%s11888_s0 + $0x118] sm:$0xff]  ;;  %v488_v57 = vld [vmem:[%s11888_s0 + $0x120] sm:$0xff]  ;;  %s11149_s29 = scalar_lea.vmem %s11892_s4, %s8448_s16  ;;  %s11686_s30 = scalar_lea.vmem %s11890_s2, %s11675_s28 }
  0x15   : > { %4160 = vmatpush1.bf16.msra.mxu0 %v7325_v17  ;;  %4612 = vmatpush1.bf16.msra.mxu1 %v7327_v24  ;;  %v7340_v37 = vcombine.high %v975_v30, %v979_v31  ;;  %v983_v38 = vmax.bf16 %v8531_v3, %v471_v26  ;;  %v987_v39 = vmax.bf16 %v8531_v3, %v475_v27  ;;  %v484_v46 = vld [vmem:[%s11888_s0 + $0x104] sm:$0xff]  ;;  %v491_v56 = vld [vmem:[%s11888_s0 + $0x134] sm:$0xff]  ;;  %v492_v58 = vld [vmem:[%s11888_s0 + $0x13c] sm:$0xff]  ;;  %s11697_s8 = scalar_lea.vmem %s11891_s3, %s11675_s28  ;;  %s11706_s12 = scalar_lea.vmem %s11893_s5, %s11675_s28 }
  0x16   : > { %4161 = vmatprep.subr.bf16.mxu0 %v7333_v25  ;;  %4613 = vmatprep.subr.bf16.mxu1 %v7335_v28  ;;  %v7342_v40 = vcombine.high %v976_v35, %v980_v36  ;;  %v984_v41 = vmax.bf16 %v8531_v3, %v472_v32  ;;  %v988_v42 = vmax.bf16 %v8531_v3, %v476_v33  ;;  %v495_v4 = vld [vmem:[%s11888_s0 + $0x150] sm:$0xff]  ;;  %v496_v6 = vld [vmem:[%s11888_s0 + $0x158] sm:$0xff]  ;;  %v503_v13 = vld [vmem:[%s11888_s0 + $0x188] sm:$0xff]  ;;  %s11723_s15 = scalar_lea.vmem %s11894_s6, %s11675_s28 }
  0x17   : > { %v7339_v47 = vcombine.low %v975_v30, %v979_v31  ;;  %v7341_v48 = vcombine.low %v976_v35, %v980_v36  ;;  %v7347_v49 = vcombine.high %v983_v38, %v987_v39  ;;  %v991_v50 = vmax.bf16 %v8531_v3, %v479_v43  ;;  %v499_v5 = vld [vmem:[%s11888_s0 + $0x16c] sm:$0xff]  ;;  %v500_v7 = vld [vmem:[%s11888_s0 + $0x174] sm:$0xff]  ;;  %v507_v17 = vld [vmem:[%s11888_s0 + $0x1a4] sm:$0xff] }
  0x18   : > { %v995_v51 = vmax.bf16 %v8531_v3, %v483_v44  ;;  %v7349_v52 = vcombine.high %v984_v41, %v988_v42  ;;  %v992_v53 = vmax.bf16 %v8531_v3, %v480_v45  ;;  %v996_v54 = vmax.bf16 %v8531_v3, %v484_v46  ;;  %v504_v18 = vld [vmem:[%s11888_s0 + $0x190] sm:$0xff]  ;;  %v511_v28 = vld [vmem:[%s11888_s0 + $0x1c0] sm:$0xff]  ;;  %v512_v30 = vld [vmem:[%s11888_s0 + $0x1c8] sm:$0xff] }
  0x19   : > { %4162 = vmatpush1.bf16.msra.mxu0 %v7332_v29  ;;  %4614 = vmatpush1.bf16.msra.mxu1 %v7334_v34  ;;  %v7346_v59 = vcombine.low %v983_v38, %v987_v39  ;;  %v7348_v60 = vcombine.low %v984_v41, %v988_v42  ;;  %v999_v62 = vmax.bf16 %v8531_v3, %v487_v55  ;;  %v508_v19 = vld [vmem:[%s11888_s0 + $0x1ac] sm:$0xff]  ;;  %v515_v29 = vld [vmem:[%s11888_s0 + $0x1dc] sm:$0xff]  ;;  %v516_v31 = vld [vmem:[%s11888_s0 + $0x1e4] sm:$0xff] }
  0x1a   : > { %4163 = vmatprep.subr.bf16.mxu0 %v7340_v37  ;;  %4615 = vmatprep.subr.bf16.mxu1 %v7342_v40  ;;  %v7354_v61 = vcombine.high %v991_v50, %v995_v51  ;;  %v1003_v63 = vmax.bf16 %v8531_v3, %v491_v56  ;;  %v7356_v0 = vcombine.high %v992_v53, %v996_v54  ;;  %v519_v40 = vld [vmem:[%s11888_s0 + $0x1f8] sm:$0xff]  ;;  %v520_v42 = vld [vmem:[%s11888_s0 + $0x200] sm:$0xff]  ;;  %v531_v55 = vld [vmem:[%s11888_s0 + $0x24c] sm:$0xff] }
  0x1b   : > { %v1000_v1 = vmax.bf16 %v8531_v3, %v488_v57  ;;  %v1004_v2 = vmax.bf16 %v8531_v3, %v492_v58  ;;  %v7353_v8 = vcombine.low %v991_v50, %v995_v51  ;;  %v7355_v9 = vcombine.low %v992_v53, %v996_v54  ;;  %v523_v41 = vld [vmem:[%s11888_s0 + $0x214] sm:$0xff]  ;;  %v524_v43 = vld [vmem:[%s11888_s0 + $0x21c] sm:$0xff] }
  0x1c   : > { %v7361_v10 = vcombine.high %v999_v62, %v1003_v63  ;;  %v1007_v11 = vmax.bf16 %v8531_v3, %v495_v4  ;;  %v1011_v12 = vmax.bf16 %v8531_v3, %v499_v5  ;;  %v1008_v15 = vmax.bf16 %v8531_v3, %v496_v6  ;;  %v8769_v50 = vld [vmem:[%s8755_s26 + $0x20] sm:$0xff]  ;;  %v527_v54 = vld [vmem:[%s11888_s0 + $0x230] sm:$0xff]  ;;  %v528_v56 = vld [vmem:[%s11888_s0 + $0x238] sm:$0xff] }
  0x1d   : > { %4164 = vmatpush1.bf16.msra.mxu0 %v7339_v47  ;;  %4616 = vmatpush1.bf16.msra.mxu1 %v7341_v48  ;;  %v7363_v14 = vcombine.high %v1000_v1, %v1004_v2  ;;  %v1012_v16 = vmax.bf16 %v8531_v3, %v500_v7  ;;  %v7360_v20 = vcombine.low %v999_v62, %v1003_v63  ;;  %v532_v57 = vld [vmem:[%s11888_s0 + $0x254] sm:$0xff]  ;;  %v539_v5 = vld [vmem:[%s11888_s0 + $0x284] sm:$0xff]  ;;  %v540_v7 = vld [vmem:[%s11888_s0 + $0x28c] sm:$0xff] }
  0x1e   : > { %4165 = vmatprep.subr.bf16.mxu0 %v7347_v49  ;;  %4617 = vmatprep.subr.bf16.mxu1 %v7349_v52  ;;  %v1015_v21 = vmax.bf16 %v8531_v3, %v503_v13  ;;  %v7362_v22 = vcombine.low %v1000_v1, %v1004_v2  ;;  %v7368_v23 = vcombine.high %v1007_v11, %v1011_v12  ;;  %v8766_v49 = vld [vmem:[%s8755_s26] sm:$0xff]  ;;  %v536_v6 = vld [vmem:[%s11888_s0 + $0x270] sm:$0xff] }
  0x1f   : > { %v1019_v24 = vmax.bf16 %v8531_v3, %v507_v17  ;;  %v7370_v25 = vcombine.high %v1008_v15, %v1012_v16  ;;  %v1016_v26 = vmax.bf16 %v8531_v3, %v504_v18  ;;  %v1020_v27 = vmax.bf16 %v8531_v3, %v508_v19  ;;  %v547_v17 = vld [vmem:[%s11888_s0 + $0x2bc] sm:$0xff]  ;;  %v544_v18 = vld [vmem:[%s11888_s0 + $0x2a8] sm:$0xff] }
  0x20   : > { %v7367_v32 = vcombine.low %v1007_v11, %v1011_v12  ;;  %v7369_v33 = vcombine.low %v1008_v15, %v1012_v16  ;;  %v1023_v35 = vmax.bf16 %v8531_v3, %v511_v28  ;;  %v1027_v36 = vmax.bf16 %v8531_v3, %v515_v29  ;;  %v543_v16 = vld [vmem:[%s11888_s0 + $0x2a0] sm:$0xff]  ;;  %v551_v28 = vld [vmem:[%s11888_s0 + $0x2d8] sm:$0xff] }
  0x21   : > { %4166 = vmatpush1.bf16.msra.mxu0 %v7346_v59  ;;  %4618 = vmatpush1.bf16.msra.mxu1 %v7348_v60  ;;  %v7375_v34 = vcombine.high %v1015_v21, %v1019_v24  ;;  %v7377_v37 = vcombine.high %v1016_v26, %v1020_v27  ;;  %v1024_v38 = vmax.bf16 %v8531_v3, %v512_v30  ;;  %v548_v19 = vld [vmem:[%s11888_s0 + $0x2c4] sm:$0xff]  ;;  %v555_v29 = vld [vmem:[%s11888_s0 + $0x2f4] sm:$0xff] }
  0x22   : > { %4167 = vmatprep.subr.bf16.mxu0 %v7354_v61  ;;  %4619 = vmatprep.subr.bf16.mxu1 %v7356_v0  ;;  %v1028_v39 = vmax.bf16 %v8531_v3, %v516_v31  ;;  %v7374_v44 = vcombine.low %v1015_v21, %v1019_v24  ;;  %v7376_v45 = vcombine.low %v1016_v26, %v1020_v27  ;;  %v535_v0 = vld [vmem:[%s11888_s0 + $0x268] sm:$0xff]  ;;  %v552_v30 = vld [vmem:[%s11888_s0 + $0x2e0] sm:$0xff] }
  0x23   : > { %v7382_v46 = vcombine.high %v1023_v35, %v1027_v36  ;;  %v1031_v47 = vmax.bf16 %v8531_v3, %v519_v40  ;;  %v1035_v48 = vmax.bf16 %v8531_v3, %v523_v41  ;;  %v1032_v52 = vmax.bf16 %v8531_v3, %v520_v42  ;;  %v556_v31 = vld [vmem:[%s11888_s0 + $0x2fc] sm:$0xff]  ;;  %v559_v40 = vld [vmem:[%s11888_s0 + $0x310] sm:$0xff] }
  0x24   : > { %v7384_v51 = vcombine.high %v1024_v38, %v1028_v39  ;;  %v1036_v53 = vmax.bf16 %v8531_v3, %v524_v43  ;;  %v7381_v58 = vcombine.low %v1023_v35, %v1027_v36  ;;  %v7383_v59 = vcombine.low %v1024_v38, %v1028_v39  ;;  %v563_v41 = vld [vmem:[%s11888_s0 + $0x32c] sm:$0xff]  ;;  %v560_v42 = vld [vmem:[%s11888_s0 + $0x318] sm:$0xff] }
  0x25   : > { %4168 = vmatpush1.bf16.msra.mxu0 %v7353_v8  ;;  %4620 = vmatpush1.bf16.msra.mxu1 %v7355_v9  ;;  %v8787_v60 = vcombine.high %v8766_v49, %v8769_v50  ;;  %v7389_v61 = vcombine.high %v1031_v47, %v1035_v48  ;;  %v1039_v62 = vmax.bf16 %v8531_v3, %v527_v54  ;;  %v564_v43 = vld [vmem:[%s11888_s0 + $0x334] sm:$0xff]  ;;  %v567_v54 = vld [vmem:[%s11888_s0 + $0x348] sm:$0xff] }
  0x26   : > { %4169 = vmatprep.subr.bf16.mxu0 %v7361_v10  ;;  %4621 = vmatprep.subr.bf16.mxu1 %v7363_v14  ;;  %v1043_v63 = vmax.bf16 %v8531_v3, %v531_v55  ;;  %v7391_v1 = vcombine.high %v1032_v52, %v1036_v53  ;;  %v1040_v2 = vmax.bf16 %v8531_v3, %v528_v56  ;;  %v571_v55 = vld [vmem:[%s11888_s0 + $0x364] sm:$0xff]  ;;  %v568_v56 = vld [vmem:[%s11888_s0 + $0x350] sm:$0xff] }
  0x27   : > { %v1044_v4 = vmax.bf16 %v8531_v3, %v532_v57  ;;  %4191 = vmatprep.mubr.bf16.mxu0 %v8787_v60  ;;  %4643 = vmatprep.mubr.bf16.mxu1 %v8787_v60  ;;  %v7388_v8 = vcombine.low %v1031_v47, %v1035_v48  ;;  %v1047_v9 = vmax.bf16 %v8531_v3, %v535_v0  ;;  %v572_v57 = vld [vmem:[%s11888_s0 + $0x36c] sm:$0xff] }
  0x28   : > { %v7390_v10 = vcombine.low %v1032_v52, %v1036_v53  ;;  %v7396_v11 = vcombine.high %v1039_v62, %v1043_v63  ;;  %v1051_v12 = vmax.bf16 %v8531_v3, %v539_v5  ;;  %v1048_v14 = vmax.bf16 %v8531_v3, %v536_v6  ;;  %v579_v5 = vld [vmem:[%s11888_s0 + $0x39c] sm:$0xff]  ;;  %v576_v6 = vld [vmem:[%s11888_s0 + $0x388] sm:$0xff] }
  0x29   : > { %4170 = vmatpush1.bf16.msra.mxu0 %v7360_v20  ;;  %4622 = vmatpush1.bf16.msra.mxu1 %v7362_v22  ;;  %v7398_v13 = vcombine.high %v1040_v2, %v1044_v4  ;;  %v1052_v15 = vmax.bf16 %v8531_v3, %v540_v7  ;;  %v7395_v20 = vcombine.low %v1039_v62, %v1043_v63  ;;  %v580_v7 = vld [vmem:[%s11888_s0 + $0x3a4] sm:$0xff] }
  0x2a   : > { %4171 = vmatprep.subr.bf16.mxu0 %v7368_v23  ;;  %4623 = vmatprep.subr.bf16.mxu1 %v7370_v25  ;;  %v7397_v21 = vcombine.low %v1040_v2, %v1044_v4  ;;  %v7403_v22 = vcombine.high %v1047_v9, %v1051_v12  ;;  %v1055_v23 = vmax.bf16 %v8531_v3, %v543_v16  ;;  %v575_v4 = vld [vmem:[%s11888_s0 + $0x380] sm:$0xff]  ;;  %v583_v16 = vld [vmem:[%s11888_s0 + $0x3b8] sm:$0xff] }
  0x2b   : > { %v1059_v24 = vmax.bf16 %v8531_v3, %v547_v17  ;;  %v7405_v25 = vcombine.high %v1048_v14, %v1052_v15  ;;  %v1056_v26 = vmax.bf16 %v8531_v3, %v544_v18  ;;  %v1060_v27 = vmax.bf16 %v8531_v3, %v548_v19  ;;  %v587_v17 = vld [vmem:[%s11888_s0 + $0x3d4] sm:$0xff]  ;;  %v584_v18 = vld [vmem:[%s11888_s0 + $0x3c0] sm:$0xff] }
  0x2c   : > { %v1063_v35 = vmax.bf16 %v8531_v3, %v551_v28  ;;  %v1067_v36 = vmax.bf16 %v8531_v3, %v555_v29  ;;  %v1064_v38 = vmax.bf16 %v8531_v3, %v552_v30  ;;  %v1068_v39 = vmax.bf16 %v8531_v3, %v556_v31  ;;  %v588_v19 = vld [vmem:[%s11888_s0 + $0x3dc] sm:$0xff]  ;;  %v591_v29 = vld [vmem:[%s11888_s0 + $0x3f0] sm:$0xff] }
  0x2d   : > { %4172 = vmatpush1.bf16.msra.mxu0 %v7367_v32  ;;  %4624 = vmatpush1.bf16.msra.mxu1 %v7369_v33  ;;  %v7402_v32 = vcombine.low %v1047_v9, %v1051_v12  ;;  %v7404_v33 = vcombine.low %v1048_v14, %v1052_v15  ;;  %v1071_v47 = vmax.bf16 %v8531_v3, %v559_v40  ;;  %v1479_v28 = vld [vmem:[%s8755_s26 + $0x40] sm:$0xff]  ;;  %v595_v30 = vld [vmem:[%s11888_s0 + $0x40c] sm:$0xff] }
  0x2e   : > { %4173 = vmatprep.subr.bf16.mxu0 %v7375_v34  ;;  %4625 = vmatprep.subr.bf16.mxu1 %v7377_v37  ;;  %v7410_v34 = vcombine.high %v1055_v23, %v1059_v24  ;;  %v7412_v37 = vcombine.high %v1056_v26, %v1060_v27  ;;  %v1075_v48 = vmax.bf16 %v8531_v3, %v563_v41 }
  0x2f   : > { %v1072_v52 = vmax.bf16 %v8531_v3, %v560_v42  ;;  %v1076_v53 = vmax.bf16 %v8531_v3, %v564_v43  ;;  %v1079_v62 = vmax.bf16 %v8531_v3, %v567_v54  ;;  %v1083_v63 = vmax.bf16 %v8531_v3, %v571_v55  ;;  %v599_v42 = vld [vmem:[%s11888_s0 + $0x428] sm:$0xff] }
  0x30   : > { %v1084_v2 = vmax.bf16 %v8531_v3, %v572_v57  ;;  %v1091_v12 = vmax.bf16 %v8531_v3, %v579_v5  ;;  %v1088_v14 = vmax.bf16 %v8531_v3, %v576_v6  ;;  %v1092_v15 = vmax.bf16 %v8531_v3, %v580_v7  ;;  %v603_v43 = vld [vmem:[%s11888_s0 + $0x444] sm:$0xff] }
  0x31   : > { %4174 = vmatpush1.bf16.msra.mxu0 %v7374_v44  ;;  %4626 = vmatpush1.bf16.msra.mxu1 %v7376_v45  ;;  %v7409_v44 = vcombine.low %v1055_v23, %v1059_v24  ;;  %v7411_v45 = vcombine.low %v1056_v26, %v1060_v27  ;;  %v7426_v0 = vcombine.high %v1072_v52, %v1076_v53  ;;  %v607_v57 = vld [vmem:[%s11888_s0 + $0x460] sm:$0xff] }
  0x32   : > { %4175 = vmatprep.subr.bf16.mxu0 %v7382_v46  ;;  %4627 = vmatprep.subr.bf16.mxu1 %v7384_v51  ;;  %v7417_v46 = vcombine.high %v1063_v35, %v1067_v36  ;;  %v7419_v51 = vcombine.high %v1064_v38, %v1068_v39  ;;  %v7425_v9 = vcombine.low %v1072_v52, %v1076_v53 }
  0x33   : > { %v1095_v23 = vmax.bf16 %v8531_v3, %v583_v16  ;;  %v1099_v24 = vmax.bf16 %v8531_v3, %v587_v17  ;;  %v1096_v26 = vmax.bf16 %v8531_v3, %v584_v18  ;;  %v1100_v27 = vmax.bf16 %v8531_v3, %v588_v19 }
  0x34   : > { %v8916_v31 = vcombine.low %v8766_v49, %v8769_v50  ;;  %v1107_v49 = vmax.bf16 %v8531_v3, %v595_v30  ;;  %v1115_v52 = vmax.bf16 %v8531_v3, %v603_v43 }
  0x35   : > { %4176 = vmatpush1.bf16.msra.mxu0 %v7381_v58  ;;  %4628 = vmatpush1.bf16.msra.mxu1 %v7383_v59  ;;  %v7416_v58 = vcombine.low %v1063_v35, %v1067_v36  ;;  %v7418_v59 = vcombine.low %v1064_v38, %v1068_v39  ;;  %v7439_v36 = vcombine.low %v1088_v14, %v1092_v15 }
  0x36   : > { %4177 = vmatprep.subr.bf16.mxu0 %v7389_v61  ;;  %4629 = vmatprep.subr.bf16.mxu1 %v7391_v1  ;;  %v7424_v61 = vcombine.high %v1071_v47, %v1075_v48  ;;  %v1080_v1 = vmax.bf16 %v8531_v3, %v568_v56  ;;  %v1103_v38 = vmax.bf16 %v8531_v3, %v591_v29  ;;  %v1487_v56 = vld [vmem:[%s8755_s26 + $0x80] sm:$0xff] }
  0x37   : > { %v7447_v50 = vcombine.high %v1096_v26, %v1100_v27 }
  0x39   : > { %4178 = vmatpush1.bf16.msra.mxu0 %v7388_v8  ;;  %4630 = vmatpush1.bf16.msra.mxu1 %v7390_v10  ;;  %v7423_v8 = vcombine.low %v1071_v47, %v1075_v48  ;;  %v7431_v10 = vcombine.high %v1079_v62, %v1083_v63  ;;  %v7446_v47 = vcombine.low %v1096_v26, %v1100_v27  ;;  %v1499_v26 = vld [vmem:[%s8755_s26 + $0xe0] sm:$0xff]  ;;  %v624_v27 = vld [vmem:[%s11888_s0 + $0x4d8] sm:$0xff] }
  0x3a   : > { %4179 = vmatprep.subr.bf16.mxu0 %v7396_v11  ;;  %4631 = vmatprep.subr.bf16.mxu1 %v7398_v13  ;;  %v1087_v11 = vmax.bf16 %v8531_v3, %v575_v4  ;;  %v7433_v13 = vcombine.high %v1080_v1, %v1084_v2  ;;  %v7452_v48 = vcombine.high %v1103_v38, %v1107_v49 }
  0x3b   : > { %v1119_v4 = vmax.bf16 %v8531_v3, %v607_v57  ;;  %v640_v57 = vld [vmem:[%s11888_s0 + $0x548] sm:$0xff] }
  0x3c   : > { %v7437_v35 = vcombine.low %v1087_v11, %v1091_v12 }
  0x3d   : > { %4180 = vmatpush1.bf16.msra.mxu0 %v7395_v20  ;;  %4632 = vmatpush1.bf16.msra.mxu1 %v7397_v21  ;;  %v7430_v20 = vcombine.low %v1079_v62, %v1083_v63  ;;  %v7432_v21 = vcombine.low %v1080_v1, %v1084_v2  ;;  %v608_v62 = vld [vmem:[%s11888_s0 + $0x468] sm:$0xff] }
  0x3e   : > { %4181 = vmatprep.subr.bf16.mxu0 %v7403_v22  ;;  %4633 = vmatprep.subr.bf16.mxu1 %v7405_v25  ;;  %v7438_v22 = vcombine.high %v1087_v11, %v1091_v12  ;;  %v7440_v25 = vcombine.high %v1088_v14, %v1092_v15  ;;  %v612_v63 = vld [vmem:[%s11888_s0 + $0x484] sm:$0xff]  ;;  %v619_v11 = vld [vmem:[%s11888_s0 + $0x4b4] sm:$0xff] }
  0x3f   : > { %v616_v12 = vld [vmem:[%s11888_s0 + $0x4a0] sm:$0xff]  ;;  %v1131_v18 = vmax.bf16 %v8531_v3, %v619_v11 }
  0x40   : > { %v652_v11 = vld [vmem:[%s11888_s0 + $0x59c] sm:$0xff] }
  0x41   : > { %4182 = vmatpush1.bf16.msra.mxu0 %v7402_v32  ;;  %4634 = vmatpush1.bf16.msra.mxu1 %v7404_v33  ;;  %v1483_v32 = vld [vmem:[%s8755_s26 + $0x60] sm:$0xff]  ;;  %v592_v33 = vld [vmem:[%s11888_s0 + $0x3f8] sm:$0xff] }
  0x42   : > { %4183 = vmatprep.subr.bf16.mxu0 %v7410_v34  ;;  %4635 = vmatprep.subr.bf16.mxu1 %v7412_v37  ;;  %v596_v34 = vld [vmem:[%s11888_s0 + $0x414] sm:$0xff]  ;;  %v7445_v37 = vcombine.high %v1095_v23, %v1099_v24  ;;  %v8927_v39 = vcombine.high %v1479_v28, %v1483_v32  ;;  %v1104_v40 = vmax.bf16 %v8531_v3, %v592_v33 }
  0x43   : > { %v1108_v41 = vmax.bf16 %v8531_v3, %v596_v34 }
  0x45   : > { %4184 = vmatpush1.bf16.msra.mxu0 %v7409_v44  ;;  %4636 = vmatpush1.bf16.msra.mxu1 %v7411_v45  ;;  %v600_v44 = vld [vmem:[%s11888_s0 + $0x430] sm:$0xff]  ;;  %v7454_v53 = vcombine.high %v1104_v40, %v1108_v41  ;;  %v7453_v1 = vcombine.low %v1104_v40, %v1108_v41 }
  0x46   : > { %4185 = vmatprep.subr.bf16.mxu0 %v7417_v46  ;;  %4637 = vmatprep.subr.bf16.mxu1 %v7419_v51  ;;  %v604_v45 = vld [vmem:[%s11888_s0 + $0x44c] sm:$0xff]  ;;  %v7444_v46 = vcombine.low %v1095_v23, %v1099_v24  ;;  %v1111_v51 = vmax.bf16 %v8531_v3, %v599_v42  ;;  %v1112_v54 = vmax.bf16 %v8531_v3, %v600_v44 }
  0x47   : > { %v1116_v55 = vmax.bf16 %v8531_v3, %v604_v45  ;;  %v623_v23 = vld [vmem:[%s11888_s0 + $0x4d0] sm:$0xff] }
  0x48   : > { %v7459_v2 = vcombine.high %v1111_v51, %v1115_v52  ;;  %v7458_v14 = vcombine.low %v1111_v51, %v1115_v52  ;;  %v627_v24 = vld [vmem:[%s11888_s0 + $0x4ec] sm:$0xff]  ;;  %v1135_v33 = vmax.bf16 %v8531_v3, %v623_v23  ;;  %v1503_v52 = vld [vmem:[%s8755_s26 + $0x100] sm:$0xff] }
  0x49   : > { %4186 = vmatpush1.bf16.msra.mxu0 %v7416_v58  ;;  %4638 = vmatpush1.bf16.msra.mxu1 %v7418_v59  ;;  %v611_v58 = vld [vmem:[%s11888_s0 + $0x47c] sm:$0xff]  ;;  %v8958_v59 = vcombine.low %v1479_v28, %v1483_v32  ;;  %v7461_v6 = vcombine.high %v1112_v54, %v1116_v55  ;;  %v7460_v15 = vcombine.low %v1112_v54, %v1116_v55  ;;  %v628_v28 = vld [vmem:[%s11888_s0 + $0x4f4] sm:$0xff]  ;;  %v636_v41 = vld [vmem:[%s11888_s0 + $0x52c] sm:$0xff] }
  0x4a   : > { %4187 = vmatprep.subr.bf16.mxu0 %v7424_v61  ;;  %4639 = vmatprep.subr.bf16.mxu1 %v7426_v0  ;;  %v1491_v61 = vld [vmem:[%s8755_s26 + $0xa0] sm:$0xff]  ;;  %v7451_v0 = vcombine.low %v1103_v38, %v1107_v49  ;;  %v1123_v5 = vmax.bf16 %v8531_v3, %v611_v58  ;;  %v1139_v34 = vmax.bf16 %v8531_v3, %v627_v24  ;;  %v631_v49 = vld [vmem:[%s11888_s0 + $0x508] sm:$0xff]  ;;  %v632_v40 = vld [vmem:[%s11888_s0 + $0x510] sm:$0xff] }
  0x4b   : > { %v8969_v7 = vcombine.high %v1487_v56, %v1491_v61  ;;  %v1140_v38 = vmax.bf16 %v8531_v3, %v628_v28  ;;  %v1143_v45 = vmax.bf16 %v8531_v3, %v631_v49  ;;  %v1148_v51 = vmax.bf16 %v8531_v3, %v636_v41  ;;  %v643_v54 = vld [vmem:[%s11888_s0 + $0x55c] sm:$0xff]  ;;  %v644_v58 = vld [vmem:[%s11888_s0 + $0x564] sm:$0xff]  ;;  %v668_v41 = vld [vmem:[%s11888_s0 + $0x60c] sm:$0xff] }
  0x4c   : > { %v7466_v16 = vcombine.high %v1119_v4, %v1123_v5  ;;  %v7465_v29 = vcombine.low %v1119_v4, %v1123_v5  ;;  %v7480_v44 = vcombine.high %v1135_v33, %v1139_v34  ;;  %v1152_v5 = vmax.bf16 %v8531_v3, %v640_v57  ;;  %v1515_v24 = vld [vmem:[%s8755_s26 + $0x160] sm:$0xff]  ;;  %v663_v49 = vld [vmem:[%s11888_s0 + $0x5e8] sm:$0xff] }
  0x4d   : > { %4188 = vmatpush1.bf16.msra.mxu0 %v7423_v8  ;;  %4640 = vmatpush1.bf16.msra.mxu1 %v7425_v9  ;;  %v1120_v8 = vmax.bf16 %v8531_v3, %v608_v62  ;;  %v1124_v9 = vmax.bf16 %v8531_v3, %v612_v63  ;;  %v1523_v57 = vld [vmem:[%s8755_s26 + $0x1a0] sm:$0xff] }
  0x4e   : > { %4189 = vmatprep.subr.bf16.mxu0 %v7431_v10  ;;  %4641 = vmatprep.subr.bf16.mxu1 %v7433_v13  ;;  %v615_v10 = vld [vmem:[%s11888_s0 + $0x498] sm:$0xff] }
  0x4f   : > { %v620_v13 = vld [vmem:[%s11888_s0 + $0x4bc] sm:$0xff]  ;;  %v1127_v17 = vmax.bf16 %v8531_v3, %v615_v10  ;;  %v7468_v19 = vcombine.high %v1120_v8, %v1124_v9  ;;  %v7467_v30 = vcombine.low %v1120_v8, %v1124_v9  ;;  %v651_v9 = vld [vmem:[%s11888_s0 + $0x594] sm:$0xff] }
  0x50   : > { %v647_v8 = vld [vmem:[%s11888_s0 + $0x578] sm:$0xff]  ;;  %v648_v10 = vld [vmem:[%s11888_s0 + $0x580] sm:$0xff] }
  0x51   : > { %4190 = vmatpush1.bf16.msra.mxu0 %v7430_v20  ;;  %4642 = vmatpush1.bf16.msra.mxu1 %v7432_v21  ;;  %v1128_v20 = vmax.bf16 %v8531_v3, %v616_v12  ;;  %v1132_v21 = vmax.bf16 %v8531_v3, %v620_v13  ;;  %v7473_v32 = vcombine.high %v1127_v17, %v1131_v18 }
  0x52   : > { %4272 = vmatprep.subr.bf16.mxu0 %v7438_v22  ;;  %4724 = vmatprep.subr.bf16.mxu1 %v7440_v25  ;;  %v1495_v22 = vld [vmem:[%s8755_s26 + $0xc0] sm:$0xff]  ;;  %v9000_v25 = vcombine.low %v1487_v56, %v1491_v61  ;;  %v7472_v42 = vcombine.low %v1127_v17, %v1131_v18  ;;  %v7479_v61 = vcombine.low %v1135_v33, %v1139_v34 }
  0x53   : > { %v7474_v43 = vcombine.low %v1128_v20, %v1132_v21  ;;  %v9042_v55 = vcombine.low %v1495_v22, %v1499_v26  ;;  %v1507_v56 = vld [vmem:[%s8755_s26 + $0x120] sm:$0xff]  ;;  %v1160_v18 = vmax.bf16 %v8531_v3, %v648_v10  ;;  %v679_v10 = vld [vmem:[%s11888_s0 + $0x658] sm:$0xff] }
  0x54   : > { %4192 = vmatmul.mubr.bf16.vlgmr.msra.gmra.mrb[0].mxu0 %v8916_v31  ;;  %4644 = vmatmul.mubr.bf16.vlgmr.msra.gmra.mrb[0].mxu1 %v8916_v31  ;;  %v9053_v4 = vcombine.high %v1503_v52, %v1507_v56  ;;  %v9084_v23 = vcombine.low %v1503_v52, %v1507_v56  ;;  %v1519_v52 = vld [vmem:[%s8755_s26 + $0x180] sm:$0xff] }
  0x55   : > { %4273 = vmatpush1.bf16.msra.mxu0 %v7437_v35  ;;  %4725 = vmatpush1.bf16.msra.mxu1 %v7439_v36  ;;  %v7475_v35 = vcombine.high %v1128_v20, %v1132_v21  ;;  %v9011_v36 = vcombine.high %v1495_v22, %v1499_v26  ;;  %v1511_v20 = vld [vmem:[%s8755_s26 + $0x140] sm:$0xff]  ;;  %v655_v21 = vld [vmem:[%s11888_s0 + $0x5b0] sm:$0xff]  ;;  %v656_v26 = vld [vmem:[%s11888_s0 + $0x5b8] sm:$0xff] }
  0x56   : > { %4274 = vmatprep.subr.bf16.mxu0 %v7445_v37  ;;  %4726 = vmatprep.subr.bf16.mxu1 %v7447_v50  ;;  %v1136_v37 = vmax.bf16 %v8531_v3, %v624_v27  ;;  %v635_v50 = vld [vmem:[%s11888_s0 + $0x524] sm:$0xff]  ;;  %v659_v22 = vld [vmem:[%s11888_s0 + $0x5cc] sm:$0xff]  ;;  %v660_v27 = vld [vmem:[%s11888_s0 + $0x5d4] sm:$0xff]  ;;  %v9126_v56 = vcombine.low %v1511_v20, %v1515_v24 }
  0x57   : > { %4201 = vmatprep.mubr.bf16.mxu0 %v8927_v39  ;;  %4653 = vmatprep.mubr.bf16.mxu1 %v8927_v39  ;;  %v1171_v33 = vmax.bf16 %v8531_v3, %v659_v22  ;;  %v1527_v22 = vld [vmem:[%s8755_s26 + $0x1c0] sm:$0xff] }
  0x58   : > { %v7481_v62 = vcombine.low %v1136_v37, %v1140_v38 }
  0x59   : > { %4275 = vmatpush1.bf16.msra.mxu0 %v7444_v46  ;;  %4727 = vmatpush1.bf16.msra.mxu1 %v7446_v47  ;;  %v1147_v46 = vmax.bf16 %v8531_v3, %v635_v50  ;;  %v7482_v47 = vcombine.high %v1136_v37, %v1140_v38  ;;  %v1168_v37 = vmax.bf16 %v8531_v3, %v656_v26  ;;  %v667_v50 = vld [vmem:[%s11888_s0 + $0x604] sm:$0xff]  ;;  %v691_v26 = vld [vmem:[%s11888_s0 + $0x6ac] sm:$0xff] }
  0x5a   : > { %4276 = vmatprep.subr.bf16.mxu0 %v7452_v48  ;;  %4728 = vmatprep.subr.bf16.mxu1 %v7454_v53  ;;  %v1144_v48 = vmax.bf16 %v8531_v3, %v632_v40  ;;  %v639_v53 = vld [vmem:[%s11888_s0 + $0x540] sm:$0xff]  ;;  %v1172_v38 = vmax.bf16 %v8531_v3, %v660_v27  ;;  %v664_v40 = vld [vmem:[%s11888_s0 + $0x5f0] sm:$0xff]  ;;  %v9168_v27 = vcombine.low %v1519_v52, %v1523_v57 }
  0x5b   : > { %v7487_v63 = vcombine.high %v1143_v45, %v1147_v46  ;;  %v7486_v12 = vcombine.low %v1143_v45, %v1147_v46  ;;  %v1175_v45 = vmax.bf16 %v8531_v3, %v663_v49  ;;  %v1179_v46 = vmax.bf16 %v8531_v3, %v667_v50 }
  0x5c   : > { %4202 = vmatmul.mubr.bf16.gmra.mrb[4].mxu0 %v8958_v59  ;;  %4654 = vmatmul.mubr.bf16.gmra.mrb[4].mxu1 %v8958_v59  ;;  %v7488_v13 = vcombine.low %v1144_v48, %v1148_v51 }
  0x5d   : > { %4277 = vmatpush1.bf16.msra.mxu0 %v7451_v0  ;;  %4729 = vmatpush1.bf16.msra.mxu1 %v7453_v1  ;;  %v1151_v0 = vmax.bf16 %v8531_v3, %v639_v53  ;;  %v1155_v1 = vmax.bf16 %v8531_v3, %v643_v54  ;;  %v671_v53 = vld [vmem:[%s11888_s0 + $0x620] sm:$0xff] }
  0x5e   : > { %4278 = vmatprep.subr.bf16.mxu0 %v7459_v2  ;;  %4730 = vmatprep.subr.bf16.mxu1 %v7461_v6  ;;  %v7489_v2 = vcombine.high %v1144_v48, %v1148_v51  ;;  %v1156_v6 = vmax.bf16 %v8531_v3, %v644_v58  ;;  %v1176_v48 = vmax.bf16 %v8531_v3, %v664_v40  ;;  %v675_v54 = vld [vmem:[%s11888_s0 + $0x63c] sm:$0xff]  ;;  %v672_v58 = vld [vmem:[%s11888_s0 + $0x628] sm:$0xff] }
  0x5f   : > { %4211 = vmatprep.mubr.bf16.mxu0 %v8969_v7  ;;  %4663 = vmatprep.mubr.bf16.mxu1 %v8969_v7  ;;  %v7493_v28 = vcombine.low %v1151_v0, %v1155_v1  ;;  %v1180_v51 = vmax.bf16 %v8531_v3, %v668_v41 }
  0x60   : > { %v7496_v17 = vcombine.high %v1152_v5, %v1156_v6 }
  0x61   : > { %4279 = vmatpush1.bf16.msra.mxu0 %v7458_v14  ;;  %4731 = vmatpush1.bf16.msra.mxu1 %v7460_v15  ;;  %v7494_v14 = vcombine.high %v1151_v0, %v1155_v1  ;;  %v1159_v15 = vmax.bf16 %v8531_v3, %v647_v8  ;;  %v7515_v0 = vcombine.high %v1175_v45, %v1179_v46 }
  0x62   : > { %4280 = vmatprep.subr.bf16.mxu0 %v7466_v16  ;;  %4732 = vmatprep.subr.bf16.mxu1 %v7468_v19  ;;  %v1163_v16 = vmax.bf16 %v8531_v3, %v651_v9  ;;  %v1164_v19 = vmax.bf16 %v8531_v3, %v652_v11  ;;  %v1183_v1 = vmax.bf16 %v8531_v3, %v671_v53  ;;  %v683_v11 = vld [vmem:[%s11888_s0 + $0x674] sm:$0xff] }
  0x63   : > { %v1184_v8 = vmax.bf16 %v8531_v3, %v672_v58  ;;  %v1472_v58 = vld [vmem:[%s8755_s26 + $0x8] sm:$0xff] }
  0x64   : > { %4212 = vmatmul.mubr.bf16.gmra.mrb[8].mxu0 %v9000_v25  ;;  %4664 = vmatmul.mubr.bf16.gmra.mrb[8].mxu1 %v9000_v25  ;;  %v7503_v34 = vcombine.high %v1160_v18, %v1164_v19 }
  0x65   : > { %4281 = vmatpush1.bf16.msra.mxu0 %v7465_v29  ;;  %4733 = vmatpush1.bf16.msra.mxu1 %v7467_v30  ;;  %v7495_v29 = vcombine.low %v1152_v5, %v1156_v6  ;;  %v7501_v30 = vcombine.high %v1159_v15, %v1163_v16  ;;  %v7517_v5 = vcombine.high %v1176_v48, %v1180_v51 }
  0x66   : > { %4282 = vmatprep.subr.bf16.mxu0 %v7473_v32  ;;  %4734 = vmatprep.subr.bf16.mxu1 %v7475_v35  ;;  %v1167_v32 = vmax.bf16 %v8531_v3, %v655_v21  ;;  %v9095_v35 = vcombine.high %v1511_v20, %v1515_v24  ;;  %v9137_v6 = vcombine.high %v1519_v52, %v1523_v57  ;;  %v687_v24 = vld [vmem:[%s11888_s0 + $0x690] sm:$0xff] }
  0x67   : > { %4221 = vmatprep.mubr.bf16.mxu0 %v9011_v36  ;;  %4673 = vmatprep.mubr.bf16.mxu1 %v9011_v36 }
  0x69   : > { %4283 = vmatpush1.bf16.msra.mxu0 %v7472_v42  ;;  %4735 = vmatpush1.bf16.msra.mxu1 %v7474_v43  ;;  %v7500_v42 = vcombine.low %v1159_v15, %v1163_v16  ;;  %v7502_v43 = vcombine.low %v1160_v18, %v1164_v19  ;;  %v7516_v15 = vcombine.low %v1176_v48, %v1180_v51 }
  0x6a   : > { %4284 = vmatprep.subr.bf16.mxu0 %v7480_v44  ;;  %4736 = vmatprep.subr.bf16.mxu1 %v7482_v47  ;;  %v7508_v44 = vcombine.high %v1167_v32, %v1171_v33  ;;  %v7510_v47 = vcombine.high %v1168_v37, %v1172_v38  ;;  %v1195_v18 = vmax.bf16 %v8531_v3, %v683_v11 }
  0x6c   : > { %4222 = vmatmul.mubr.bf16.gmra.mrb[12].mxu0 %v9042_v55  ;;  %4674 = vmatmul.mubr.bf16.gmra.mrb[12].mxu1 %v9042_v55 }
  0x6d   : > { %4285 = vmatpush1.bf16.msra.mxu0 %v7479_v61  ;;  %4737 = vmatpush1.bf16.msra.mxu1 %v7481_v62  ;;  %v676_v61 = vld [vmem:[%s11888_s0 + $0x644] sm:$0xff]  ;;  %v7507_v62 = vcombine.low %v1167_v32, %v1171_v33 }
  0x6e   : > { %4286 = vmatprep.subr.bf16.mxu0 %v7487_v63  ;;  %4738 = vmatprep.subr.bf16.mxu1 %v7489_v2  ;;  %v7509_v63 = vcombine.low %v1168_v37, %v1172_v38  ;;  %v1187_v2 = vmax.bf16 %v8531_v3, %v675_v54  ;;  %v1188_v9 = vmax.bf16 %v8531_v3, %v676_v61  ;;  %v703_v61 = vld [vmem:[%s11888_s0 + $0x700] sm:$0xff] }
  0x6f   : > { %4231 = vmatprep.mubr.bf16.mxu0 %v9053_v4  ;;  %4683 = vmatprep.mubr.bf16.mxu1 %v9053_v4  ;;  %v1199_v37 = vmax.bf16 %v8531_v3, %v687_v24  ;;  %v1203_v38 = vmax.bf16 %v8531_v3, %v691_v26 }
  0x70   : > { %v7522_v16 = vcombine.high %v1183_v1, %v1187_v2  ;;  %v7524_v19 = vcombine.high %v1184_v8, %v1188_v9  ;;  %v7521_v32 = vcombine.low %v1183_v1, %v1187_v2  ;;  %v7523_v33 = vcombine.low %v1184_v8, %v1188_v9  ;;  %v704_v1 = vld [vmem:[%s11888_s0 + $0x708] sm:$0xff] }
  0x71   : > { %4287 = vmatpush1.bf16.msra.mxu0 %v7486_v12  ;;  %4739 = vmatpush1.bf16.msra.mxu1 %v7488_v13  ;;  %v680_v12 = vld [vmem:[%s11888_s0 + $0x660] sm:$0xff]  ;;  %v7536_v48 = vcombine.high %v1199_v37, %v1203_v38 }
  0x72   : > { %4288 = vmatprep.subr.bf16.mxu0 %v7494_v14  ;;  %4740 = vmatprep.subr.bf16.mxu1 %v7496_v17  ;;  %v684_v13 = vld [vmem:[%s11888_s0 + $0x67c] sm:$0xff]  ;;  %v7514_v14 = vcombine.low %v1175_v45, %v1179_v46  ;;  %v1191_v17 = vmax.bf16 %v8531_v3, %v679_v10  ;;  %v1192_v20 = vmax.bf16 %v8531_v3, %v680_v12  ;;  %v700_v45 = vld [vmem:[%s11888_s0 + $0x6ec] sm:$0xff]  ;;  %v708_v2 = vld [vmem:[%s11888_s0 + $0x724] sm:$0xff] }
  0x73   : > { %v1196_v21 = vmax.bf16 %v8531_v3, %v684_v13  ;;  %v1212_v57 = vmax.bf16 %v8531_v3, %v700_v45  ;;  %v1215_v10 = vmax.bf16 %v8531_v3, %v703_v61 }
  0x74   : > { %4232 = vmatmul.mubr.bf16.gmra.mrb[16].mxu0 %v9084_v23  ;;  %4684 = vmatmul.mubr.bf16.gmra.mrb[16].mxu1 %v9084_v23  ;;  %v7528_v46 = vcombine.low %v1191_v17, %v1195_v18 }
  0x75   : > { %4289 = vmatpush1.bf16.msra.mxu0 %v7493_v28  ;;  %4741 = vmatpush1.bf16.msra.mxu1 %v7495_v29  ;;  %v1531_v28 = vld [vmem:[%s8755_s26 + $0x1e0] sm:$0xff]  ;;  %v688_v29 = vld [vmem:[%s11888_s0 + $0x698] sm:$0xff]  ;;  %v7531_v49 = vcombine.high %v1192_v20, %v1196_v21 }
  0x76   : > { %4290 = vmatprep.subr.bf16.mxu0 %v7501_v30  ;;  %4742 = vmatprep.subr.bf16.mxu1 %v7503_v34  ;;  %v692_v30 = vld [vmem:[%s11888_s0 + $0x6b4] sm:$0xff]  ;;  %v7529_v34 = vcombine.high %v1191_v17, %v1195_v18  ;;  %v9179_v50 = vcombine.high %v1527_v22, %v1531_v28  ;;  %v1200_v40 = vmax.bf16 %v8531_v3, %v688_v29  ;;  %v712_v18 = vld [vmem:[%s11888_s0 + $0x740] sm:$0xff] }
  0x77   : > { %4241 = vmatprep.mubr.bf16.mxu0 %v9095_v35  ;;  %4693 = vmatprep.mubr.bf16.mxu1 %v9095_v35  ;;  %v1204_v41 = vmax.bf16 %v8531_v3, %v692_v30  ;;  %v715_v17 = vld [vmem:[%s11888_s0 + $0x754] sm:$0xff]  ;;  %v1224_v29 = vmax.bf16 %v8531_v3, %v712_v18 }
  0x78   : > { %v1227_v26 = vmax.bf16 %v8531_v3, %v715_v17 }
  0x79   : > { %4291 = vmatpush1.bf16.msra.mxu0 %v7500_v42  ;;  %4743 = vmatpush1.bf16.msra.mxu1 %v7502_v43  ;;  %v695_v42 = vld [vmem:[%s11888_s0 + $0x6c8] sm:$0xff]  ;;  %v7538_v53 = vcombine.high %v1200_v40, %v1204_v41  ;;  %v7537_v8 = vcombine.low %v1200_v40, %v1204_v41  ;;  %v724_v40 = vld [vmem:[%s11888_s0 + $0x794] sm:$0xff] }
  0x7a   : > { %4292 = vmatprep.subr.bf16.mxu0 %v7508_v44  ;;  %4744 = vmatprep.subr.bf16.mxu1 %v7510_v47  ;;  %v699_v43 = vld [vmem:[%s11888_s0 + $0x6e4] sm:$0xff]  ;;  %v696_v44 = vld [vmem:[%s11888_s0 + $0x6d0] sm:$0xff]  ;;  %v7530_v47 = vcombine.low %v1192_v20, %v1196_v21  ;;  %v1207_v51 = vmax.bf16 %v8531_v3, %v695_v42 }
  0x7b   : > { %v1211_v52 = vmax.bf16 %v8531_v3, %v699_v43  ;;  %v1208_v54 = vmax.bf16 %v8531_v3, %v696_v44 }
  0x7c   : > { %4242 = vmatmul.mubr.bf16.gmra.mrb[20].mxu0 %v9126_v56  ;;  %4694 = vmatmul.mubr.bf16.gmra.mrb[20].mxu1 %v9126_v56 }
  0x7d   : > { %4293 = vmatpush1.bf16.msra.mxu0 %v7507_v62  ;;  %4745 = vmatpush1.bf16.msra.mxu1 %v7509_v63  ;;  %v707_v62 = vld [vmem:[%s11888_s0 + $0x71c] sm:$0xff]  ;;  %v9210_v63 = vcombine.low %v1527_v22, %v1531_v28  ;;  %v7543_v9 = vcombine.high %v1207_v51, %v1211_v52  ;;  %v7545_v12 = vcombine.high %v1208_v54, %v1212_v57 }
  0x7e   : > { %4294 = vmatprep.subr.bf16.mxu0 %v7515_v0  ;;  %4746 = vmatprep.subr.bf16.mxu1 %v7517_v5  ;;  %v1476_v0 = vld [vmem:[%s8755_s26 + $0x28] sm:$0xff]  ;;  %v7535_v5 = vcombine.low %v1199_v37, %v1203_v38  ;;  %v1219_v11 = vmax.bf16 %v8531_v3, %v707_v62  ;;  %v7542_v20 = vcombine.low %v1207_v51, %v1211_v52 }
  0x7f   : > { %4251 = vmatprep.mubr.bf16.mxu0 %v9137_v6  ;;  %4703 = vmatprep.mubr.bf16.mxu1 %v9137_v6  ;;  %v9221_v13 = vcombine.high %v1472_v58, %v1476_v0  ;;  %v7544_v21 = vcombine.low %v1208_v54, %v1212_v57  ;;  %v9251_v37 = vcombine.low %v1472_v58, %v1476_v0  ;;  %v1484_v38 = vld [vmem:[%s8755_s26 + $0x68] sm:$0xff]  ;;  %v728_v54 = vld [vmem:[%s11888_s0 + $0x7b0] sm:$0xff] }
  0x80   : > { %v7550_v22 = vcombine.high %v1215_v10, %v1219_v11  ;;  %v7549_v41 = vcombine.low %v1215_v10, %v1219_v11  ;;  %v1236_v51 = vmax.bf16 %v8531_v3, %v724_v40  ;;  %v727_v52 = vld [vmem:[%s11888_s0 + $0x7a8] sm:$0xff]  ;;  %v735_v10 = vld [vmem:[%s11888_s0 + $0x7e0] sm:$0xff] }
  0x81   : > { %4295 = vmatpush1.bf16.msra.mxu0 %v7514_v14  ;;  %4747 = vmatpush1.bf16.msra.mxu1 %v7516_v15  ;;  %v1216_v14 = vmax.bf16 %v8531_v3, %v704_v1  ;;  %v1220_v15 = vmax.bf16 %v8531_v3, %v708_v2  ;;  %v732_v57 = vld [vmem:[%s11888_s0 + $0x7cc] sm:$0xff]  ;;  %v1239_v0 = vmax.bf16 %v8531_v3, %v727_v52  ;;  %v739_v11 = vld [vmem:[%s11888_s0 + $0x7fc] sm:$0xff] }
  0x82   : > { %4296 = vmatprep.subr.bf16.mxu0 %v7522_v16  ;;  %4748 = vmatprep.subr.bf16.mxu1 %v7524_v19  ;;  %v711_v16 = vld [vmem:[%s11888_s0 + $0x738] sm:$0xff]  ;;  %v1500_v52 = vld [vmem:[%s8755_s26 + $0xe8] sm:$0xff] }
  0x83   : > { %v716_v19 = vld [vmem:[%s11888_s0 + $0x75c] sm:$0xff]  ;;  %v1223_v24 = vmax.bf16 %v8531_v3, %v711_v16  ;;  %v7552_v28 = vcombine.high %v1216_v14, %v1220_v15  ;;  %v7551_v42 = vcombine.low %v1216_v14, %v1220_v15  ;;  %v1492_v14 = vld [vmem:[%s8755_s26 + $0xa8] sm:$0xff] }
  0x84   : > { %4252 = vmatmul.mubr.bf16.gmra.mrb[24].mxu0 %v9168_v27  ;;  %4704 = vmatmul.mubr.bf16.gmra.mrb[24].mxu1 %v9168_v27  ;;  %v1228_v30 = vmax.bf16 %v8531_v3, %v716_v19  ;;  %v736_v15 = vld [vmem:[%s11888_s0 + $0x7e8] sm:$0xff] }
  0x85   : > { %4297 = vmatpush1.bf16.msra.mxu0 %v7521_v32  ;;  %4749 = vmatpush1.bf16.msra.mxu1 %v7523_v33  ;;  %v1480_v32 = vld [vmem:[%s8755_s26 + $0x48] sm:$0xff]  ;;  %v719_v33 = vld [vmem:[%s11888_s0 + $0x770] sm:$0xff]  ;;  %v7557_v43 = vcombine.high %v1223_v24, %v1227_v26  ;;  %v7556_v58 = vcombine.low %v1223_v24, %v1227_v26  ;;  %v1248_v26 = vmax.bf16 %v8531_v3, %v736_v15 }
  0x86   : > { %4298 = vmatprep.subr.bf16.mxu0 %v7529_v34  ;;  %4750 = vmatprep.subr.bf16.mxu1 %v7531_v49  ;;  %v723_v34 = vld [vmem:[%s11888_s0 + $0x78c] sm:$0xff]  ;;  %v720_v49 = vld [vmem:[%s11888_s0 + $0x778] sm:$0xff]  ;;  %v1231_v44 = vmax.bf16 %v8531_v3, %v719_v33  ;;  %v7558_v61 = vcombine.low %v1224_v29, %v1228_v30  ;;  %v740_v16 = vld [vmem:[%s11888_s0 + $0x804] sm:$0xff] }
  0x87   : > { %4261 = vmatprep.mubr.bf16.mxu0 %v9179_v50  ;;  %4713 = vmatprep.mubr.bf16.mxu1 %v9179_v50  ;;  %v1235_v45 = vmax.bf16 %v8531_v3, %v723_v34  ;;  %v748_v33 = vld [vmem:[%s11888_s0 + $0x83c] sm:$0xff] }
  0x89   : > { %4299 = vmatpush1.bf16.msra.mxu0 %v7528_v46  ;;  %4751 = vmatpush1.bf16.msra.mxu1 %v7530_v47  ;;  %v7559_v46 = vcombine.high %v1224_v29, %v1228_v30  ;;  %v9263_v47 = vcombine.high %v1480_v32, %v1484_v38  ;;  %v7564_v62 = vcombine.high %v1231_v44, %v1235_v45  ;;  %v743_v29 = vld [vmem:[%s11888_s0 + $0x818] sm:$0xff] }
  0x8a   : > { %4300 = vmatprep.subr.bf16.mxu0 %v7536_v48  ;;  %4752 = vmatprep.subr.bf16.mxu1 %v7538_v53  ;;  %v1232_v48 = vmax.bf16 %v8531_v3, %v720_v49  ;;  %v731_v53 = vld [vmem:[%s11888_s0 + $0x7c4] sm:$0xff]  ;;  %v7563_v17 = vcombine.low %v1231_v44, %v1235_v45  ;;  %v747_v30 = vld [vmem:[%s11888_s0 + $0x834] sm:$0xff]  ;;  %v1255_v40 = vmax.bf16 %v8531_v3, %v743_v29  ;;  %v771_v29 = vld [vmem:[%s11888_s0 + $0x8dc] sm:$0xff] }
  0x8b   : > { %v1243_v1 = vmax.bf16 %v8531_v3, %v731_v53  ;;  %v1260_v44 = vmax.bf16 %v8531_v3, %v748_v33  ;;  %v1496_v45 = vld [vmem:[%s8755_s26 + $0xc8] sm:$0xff]  ;;  %v752_v53 = vld [vmem:[%s11888_s0 + $0x858] sm:$0xff] }
  0x8c   : > { %4262 = vmatmul.mubr.bf16.gmra.mrb[28].mxu0 %v9210_v63  ;;  %4714 = vmatmul.mubr.bf16.gmra.mrb[28].mxu1 %v9210_v63  ;;  %v7566_v2 = vcombine.high %v1232_v48, %v1236_v51  ;;  %v7565_v18 = vcombine.low %v1232_v48, %v1236_v51  ;;  %v755_v48 = vld [vmem:[%s11888_s0 + $0x86c] sm:$0xff] }
  0x8d   : > { %4301 = vmatpush1.bf16.msra.mxu0 %v7535_v5  ;;  %4753 = vmatpush1.bf16.msra.mxu1 %v7537_v8  ;;  %v1240_v5 = vmax.bf16 %v8531_v3, %v728_v54  ;;  %v1244_v8 = vmax.bf16 %v8531_v3, %v732_v57  ;;  %v7571_v19 = vcombine.high %v1239_v0, %v1243_v1  ;;  %v756_v54 = vld [vmem:[%s11888_s0 + $0x874] sm:$0xff]  ;;  %v768_v33 = vld [vmem:[%s11888_s0 + $0x8c8] sm:$0xff] }
  0x8e   : > { %4302 = vmatprep.subr.bf16.mxu0 %v7543_v9  ;;  %4754 = vmatprep.subr.bf16.mxu1 %v7545_v12  ;;  %v1488_v9 = vld [vmem:[%s8755_s26 + $0x88] sm:$0xff]  ;;  %v9294_v12 = vcombine.low %v1480_v32, %v1484_v38  ;;  %v744_v32 = vld [vmem:[%s11888_s0 + $0x820] sm:$0xff]  ;;  %v7570_v34 = vcombine.low %v1239_v0, %v1243_v1  ;;  %v1267_v0 = vmax.bf16 %v8531_v3, %v755_v48  ;;  %v775_v48 = vld [vmem:[%s11888_s0 + $0x8f8] sm:$0xff] }
  0x8f   : > { %4304 = vmatprep.mubr.bf16.mxu0 %v9221_v13  ;;  %4756 = vmatprep.mubr.bf16.mxu1 %v9221_v13  ;;  %v9305_v24 = vcombine.high %v1488_v9, %v1492_v14  ;;  %v7572_v38 = vcombine.low %v1240_v5, %v1244_v8  ;;  %v9336_v51 = vcombine.low %v1488_v9, %v1492_v14  ;;  %v759_v9 = vld [vmem:[%s11888_s0 + $0x888] sm:$0xff] }
  0x90   : > { %v764_v14 = vld [vmem:[%s11888_s0 + $0x8ac] sm:$0xff] }
  0x91   : > { %4303 = vmatpush1.bf16.msra.mxu0 %v7542_v20  ;;  %4755 = vmatpush1.bf16.msra.mxu1 %v7544_v21  ;;  %v1247_v20 = vmax.bf16 %v8531_v3, %v735_v10  ;;  %v1251_v21 = vmax.bf16 %v8531_v3, %v739_v11  ;;  %v763_v10 = vld [vmem:[%s11888_s0 + $0x8a4] sm:$0xff]  ;;  %v760_v11 = vld [vmem:[%s11888_s0 + $0x890] sm:$0xff] }
  0x92   : > { %4385 = vmatprep.subr.bf16.mxu0 %v7550_v22  ;;  %4837 = vmatprep.subr.bf16.mxu1 %v7552_v28  ;;  %v7573_v22 = vcombine.high %v1240_v5, %v1244_v8  ;;  %v1252_v28 = vmax.bf16 %v8531_v3, %v740_v16  ;;  %v1264_v5 = vmax.bf16 %v8531_v3, %v752_v53  ;;  %v776_v53 = vld [vmem:[%s11888_s0 + $0x900] sm:$0xff] }
  0x93   : > { %v7578_v49 = vcombine.high %v1247_v20, %v1251_v21  ;;  %v7577_v57 = vcombine.low %v1247_v20, %v1251_v21  ;;  %v1268_v8 = vmax.bf16 %v8531_v3, %v756_v54  ;;  %v1272_v21 = vmax.bf16 %v8531_v3, %v760_v11  ;;  %v780_v54 = vld [vmem:[%s11888_s0 + $0x91c] sm:$0xff]  ;;  %v787_v11 = vld [vmem:[%s11888_s0 + $0x94c] sm:$0xff] }
  0x94   : > { %4305 = vmatmul.mubr.bf16.vlgmr.msra.gmra.mrb[0].mxu0 %v9251_v37  ;;  %4757 = vmatmul.mubr.bf16.vlgmr.msra.gmra.mrb[0].mxu1 %v9251_v37 }
  0x95   : > { %4386 = vmatpush1.bf16.msra.mxu0 %v7549_v41  ;;  %4838 = vmatpush1.bf16.msra.mxu1 %v7551_v42  ;;  %v1259_v41 = vmax.bf16 %v8531_v3, %v747_v30  ;;  %v7580_v42 = vcombine.high %v1248_v26, %v1252_v28  ;;  %v7594_v20 = vcombine.high %v1264_v5, %v1268_v8 }
  0x96   : > { %4387 = vmatprep.subr.bf16.mxu0 %v7557_v43  ;;  %4839 = vmatprep.subr.bf16.mxu1 %v7559_v46  ;;  %v1256_v43 = vmax.bf16 %v8531_v3, %v744_v32  ;;  %v751_v46 = vld [vmem:[%s11888_s0 + $0x850] sm:$0xff]  ;;  %v9378_v30 = vcombine.low %v1496_v45, %v1500_v52  ;;  %v1508_v32 = vld [vmem:[%s8755_s26 + $0x128] sm:$0xff] }
  0x97   : > { %4314 = vmatprep.mubr.bf16.mxu0 %v9263_v47  ;;  %4766 = vmatprep.mubr.bf16.mxu1 %v9263_v47  ;;  %v7584_v15 = vcombine.low %v1255_v40, %v1259_v41 }
  0x98   : > { %v7587_v1 = vcombine.high %v1256_v43, %v1260_v44  ;;  %v7586_v16 = vcombine.low %v1256_v43, %v1260_v44 }
  0x99   : > { %4388 = vmatpush1.bf16.msra.mxu0 %v7556_v58  ;;  %4840 = vmatpush1.bf16.msra.mxu1 %v7558_v61  ;;  %v7579_v58 = vcombine.low %v1248_v26, %v1252_v28  ;;  %v7585_v61 = vcombine.high %v1255_v40, %v1259_v41  ;;  %v1504_v26 = vld [vmem:[%s8755_s26 + $0x108] sm:$0xff]  ;;  %v767_v28 = vld [vmem:[%s11888_s0 + $0x8c0] sm:$0xff] }
  0x9a   : > { %4389 = vmatprep.subr.bf16.mxu0 %v7564_v62  ;;  %4841 = vmatprep.subr.bf16.mxu1 %v7566_v2  ;;  %v1263_v62 = vmax.bf16 %v8531_v3, %v751_v46  ;;  %v9347_v2 = vcombine.high %v1496_v45, %v1500_v52  ;;  %v1279_v41 = vmax.bf16 %v8531_v3, %v767_v28  ;;  %v779_v52 = vld [vmem:[%s11888_s0 + $0x914] sm:$0xff] }
  0x9b   : > { %v9389_v44 = vcombine.high %v1504_v26, %v1508_v32  ;;  %v1280_v45 = vmax.bf16 %v8531_v3, %v768_v33  ;;  %v791_v33 = vld [vmem:[%s11888_s0 + $0x968] sm:$0xff] }
  0x9c   : > { %4315 = vmatmul.mubr.bf16.gmra.mrb[4].mxu0 %v9294_v12  ;;  %4767 = vmatmul.mubr.bf16.gmra.mrb[4].mxu1 %v9294_v12 }
  0x9d   : > { %4390 = vmatpush1.bf16.msra.mxu0 %v7563_v17  ;;  %4842 = vmatpush1.bf16.msra.mxu1 %v7565_v18  ;;  %v7592_v17 = vcombine.high %v1263_v62, %v1267_v0  ;;  %v1271_v18 = vmax.bf16 %v8531_v3, %v759_v9  ;;  %v1512_v9 = vld [vmem:[%s8755_s26 + $0x148] sm:$0xff] }
  0x9e   : > { %4391 = vmatprep.subr.bf16.mxu0 %v7571_v19  ;;  %4843 = vmatprep.subr.bf16.mxu1 %v7573_v22  ;;  %v1275_v19 = vmax.bf16 %v8531_v3, %v763_v10  ;;  %v1276_v22 = vmax.bf16 %v8531_v3, %v764_v14  ;;  %v783_v10 = vld [vmem:[%s11888_s0 + $0x930] sm:$0xff]  ;;  %v9420_v14 = vcombine.low %v1504_v26, %v1508_v32 }
  0x9f   : > { %4324 = vmatprep.mubr.bf16.mxu0 %v9305_v24  ;;  %4776 = vmatprep.mubr.bf16.mxu1 %v9305_v24 }
  0xa0   : > { %v7599_v40 = vcombine.high %v1271_v18, %v1275_v19  ;;  %v7601_v43 = vcombine.high %v1272_v21, %v1276_v22 }
  0xa1   : > { %4392 = vmatpush1.bf16.msra.mxu0 %v7570_v34  ;;  %4844 = vmatpush1.bf16.msra.mxu1 %v7572_v38  ;;  %v772_v34 = vld [vmem:[%s11888_s0 + $0x8e4] sm:$0xff]  ;;  %v7591_v38 = vcombine.low %v1263_v62, %v1267_v0  ;;  %v1287_v62 = vmax.bf16 %v8531_v3, %v775_v48  ;;  %v1291_v0 = vmax.bf16 %v8531_v3, %v779_v52 }
  0xa2   : > { %4393 = vmatprep.subr.bf16.mxu0 %v7578_v49  ;;  %4845 = vmatprep.subr.bf16.mxu1 %v7580_v42  ;;  %v7593_v49 = vcombine.low %v1264_v5, %v1268_v8  ;;  %v1283_v42 = vmax.bf16 %v8531_v3, %v771_v29  ;;  %v1284_v46 = vmax.bf16 %v8531_v3, %v772_v34  ;;  %v795_v34 = vld [vmem:[%s11888_s0 + $0x984] sm:$0xff] }
  0xa3   : > { %v1288_v5 = vmax.bf16 %v8531_v3, %v776_v53  ;;  %v1292_v8 = vmax.bf16 %v8531_v3, %v780_v54  ;;  %v1520_v53 = vld [vmem:[%s8755_s26 + $0x188] sm:$0xff]  ;;  %v799_v54 = vld [vmem:[%s11888_s0 + $0x9a0] sm:$0xff] }
  0xa4   : > { %4325 = vmatmul.mubr.bf16.gmra.mrb[8].mxu0 %v9336_v51  ;;  %4777 = vmatmul.mubr.bf16.gmra.mrb[8].mxu1 %v9336_v51 }
  0xa5   : > { %4394 = vmatpush1.bf16.msra.mxu0 %v7577_v57  ;;  %4846 = vmatpush1.bf16.msra.mxu1 %v7579_v58  ;;  %v7598_v57 = vcombine.low %v1271_v18, %v1275_v19  ;;  %v7600_v58 = vcombine.low %v1272_v21, %v1276_v22  ;;  %v7605_v18 = vcombine.low %v1279_v41, %v1283_v42 }
  0xa6   : > { %4395 = vmatprep.subr.bf16.mxu0 %v7585_v61  ;;  %4847 = vmatprep.subr.bf16.mxu1 %v7587_v1  ;;  %v7606_v61 = vcombine.high %v1279_v41, %v1283_v42  ;;  %v7608_v1 = vcombine.high %v1280_v45, %v1284_v46  ;;  %v7607_v19 = vcombine.low %v1280_v45, %v1284_v46 }
  0xa7   : > { %4334 = vmatprep.mubr.bf16.mxu0 %v9347_v2  ;;  %4786 = vmatprep.mubr.bf16.mxu1 %v9347_v2  ;;  %v1295_v21 = vmax.bf16 %v8531_v3, %v783_v10  ;;  %v1299_v22 = vmax.bf16 %v8531_v3, %v787_v11  ;;  %v7615_v26 = vcombine.high %v1288_v5, %v1292_v8 }
  0xa8   : > { %v7614_v41 = vcombine.low %v1288_v5, %v1292_v8  ;;  %v1307_v45 = vmax.bf16 %v8531_v3, %v795_v34  ;;  %v1311_v10 = vmax.bf16 %v8531_v3, %v799_v54 }
  0xa9   : > { %4396 = vmatpush1.bf16.msra.mxu0 %v7584_v15  ;;  %4848 = vmatpush1.bf16.msra.mxu1 %v7586_v16  ;;  %v1516_v15 = vld [vmem:[%s8755_s26 + $0x168] sm:$0xff]  ;;  %v784_v16 = vld [vmem:[%s11888_s0 + $0x938] sm:$0xff]  ;;  %v7620_v42 = vcombine.high %v1295_v21, %v1299_v22 }
  0xaa   : > { %4397 = vmatprep.subr.bf16.mxu0 %v7592_v17  ;;  %4849 = vmatprep.subr.bf16.mxu1 %v7594_v20  ;;  %v788_v17 = vld [vmem:[%s11888_s0 + $0x954] sm:$0xff]  ;;  %v7613_v20 = vcombine.high %v1287_v62, %v1291_v0  ;;  %v9431_v28 = vcombine.high %v1512_v9, %v1516_v15  ;;  %v1296_v29 = vmax.bf16 %v8531_v3, %v784_v16 }
  0xab   : > { %v1300_v32 = vmax.bf16 %v8531_v3, %v788_v17 }
  0xac   : > { %4335 = vmatmul.mubr.bf16.gmra.mrb[12].mxu0 %v9378_v30  ;;  %4787 = vmatmul.mubr.bf16.gmra.mrb[12].mxu1 %v9378_v30 }
  0xad   : > { %4398 = vmatpush1.bf16.msra.mxu0 %v7591_v38  ;;  %4850 = vmatpush1.bf16.msra.mxu1 %v7593_v49  ;;  %v792_v38 = vld [vmem:[%s11888_s0 + $0x970] sm:$0xff]  ;;  %v7622_v46 = vcombine.high %v1296_v29, %v1300_v32  ;;  %v7621_v5 = vcombine.low %v1296_v29, %v1300_v32 }
  0xae   : > { %4399 = vmatprep.subr.bf16.mxu0 %v7599_v40  ;;  %4851 = vmatprep.subr.bf16.mxu1 %v7601_v43  ;;  %v796_v49 = vld [vmem:[%s11888_s0 + $0x98c] sm:$0xff]  ;;  %v7612_v40 = vcombine.low %v1287_v62, %v1291_v0  ;;  %v1303_v43 = vmax.bf16 %v8531_v3, %v791_v33  ;;  %v1304_v48 = vmax.bf16 %v8531_v3, %v792_v38  ;;  %v804_v0 = vld [vmem:[%s11888_s0 + $0x9c4] sm:$0xff] }
  0xaf   : > { %4344 = vmatprep.mubr.bf16.mxu0 %v9389_v44  ;;  %4796 = vmatprep.mubr.bf16.mxu1 %v9389_v44  ;;  %v1308_v52 = vmax.bf16 %v8531_v3, %v796_v49  ;;  %v800_v62 = vld [vmem:[%s11888_s0 + $0x9a8] sm:$0xff]  ;;  %v1316_v17 = vmax.bf16 %v8531_v3, %v804_v0 }
  0xb0   : > { %v7627_v8 = vcombine.high %v1303_v43, %v1307_v45  ;;  %v1312_v16 = vmax.bf16 %v8531_v3, %v800_v62 }
  0xb1   : > { %4400 = vmatpush1.bf16.msra.mxu0 %v7598_v57  ;;  %4852 = vmatpush1.bf16.msra.mxu1 %v7600_v58  ;;  %v803_v57 = vld [vmem:[%s11888_s0 + $0x9bc] sm:$0xff]  ;;  %v9462_v58 = vcombine.low %v1512_v9, %v1516_v15  ;;  %v7629_v11 = vcombine.high %v1304_v48, %v1308_v52 }
  0xb2   : > { %4401 = vmatprep.subr.bf16.mxu0 %v7606_v61  ;;  %4853 = vmatprep.subr.bf16.mxu1 %v7608_v1  ;;  %v1524_v61 = vld [vmem:[%s8755_s26 + $0x1a8] sm:$0xff]  ;;  %v7619_v1 = vcombine.low %v1295_v21, %v1299_v22  ;;  %v1315_v9 = vmax.bf16 %v8531_v3, %v803_v57  ;;  %v812_v21 = vld [vmem:[%s11888_s0 + $0x9fc] sm:$0xff]  ;;  %v7626_v22 = vcombine.low %v1303_v43, %v1307_v45 }
  0xb3   : > { %v9473_v15 = vcombine.high %v1520_v53, %v1524_v61  ;;  %v7636_v34 = vcombine.high %v1312_v16, %v1316_v17  ;;  %v1324_v49 = vmax.bf16 %v8531_v3, %v812_v21  ;;  %v9504_v43 = vcombine.low %v1520_v53, %v1524_v61  ;;  %v1532_v45 = vld [vmem:[%s8755_s26 + $0x1e8] sm:$0xff] }
  0xb4   : > { %4345 = vmatmul.mubr.bf16.gmra.mrb[16].mxu0 %v9420_v14  ;;  %4797 = vmatmul.mubr.bf16.gmra.mrb[16].mxu1 %v9420_v14  ;;  %v7634_v29 = vcombine.high %v1311_v10, %v1315_v9  ;;  %v7635_v54 = vcombine.low %v1312_v16, %v1316_v17 }
  0xb5   : > { %4402 = vmatpush1.bf16.msra.mxu0 %v7605_v18  ;;  %4854 = vmatpush1.bf16.msra.mxu1 %v7607_v19  ;;  %v807_v18 = vld [vmem:[%s11888_s0 + $0x9d8] sm:$0xff] }
  0xb6   : > { %4403 = vmatprep.subr.bf16.mxu0 %v7613_v20  ;;  %4855 = vmatprep.subr.bf16.mxu1 %v7615_v26  ;;  %v811_v19 = vld [vmem:[%s11888_s0 + $0x9f4] sm:$0xff]  ;;  %v808_v20 = vld [vmem:[%s11888_s0 + $0x9e0] sm:$0xff]  ;;  %v7628_v26 = vcombine.low %v1304_v48, %v1308_v52  ;;  %v1319_v32 = vmax.bf16 %v8531_v3, %v807_v18  ;;  %v7633_v52 = vcombine.low %v1311_v10, %v1315_v9 }
  0xb7   : > { %4354 = vmatprep.mubr.bf16.mxu0 %v9431_v28  ;;  %4806 = vmatprep.mubr.bf16.mxu1 %v9431_v28  ;;  %v1323_v33 = vmax.bf16 %v8531_v3, %v811_v19  ;;  %v1320_v38 = vmax.bf16 %v8531_v3, %v808_v20  ;;  %v820_v48 = vld [vmem:[%s11888_s0 + $0xa34] sm:$0xff]  ;;  %v827_v10 = vld [vmem:[%s11888_s0 + $0xa64] sm:$0xff] }
  0xb8   : > { %v824_v9 = vld [vmem:[%s11888_s0 + $0xa50] sm:$0xff]  ;;  %v1339_v20 = vmax.bf16 %v8531_v3, %v827_v10 }
  0xb9   : > { %4404 = vmatpush1.bf16.msra.mxu0 %v7612_v40  ;;  %4856 = vmatpush1.bf16.msra.mxu1 %v7614_v41  ;;  %v1528_v40 = vld [vmem:[%s8755_s26 + $0x1c8] sm:$0xff]  ;;  %v815_v41 = vld [vmem:[%s11888_s0 + $0xa10] sm:$0xff]  ;;  %v7641_v57 = vcombine.high %v1319_v32, %v1323_v33  ;;  %v7643_v61 = vcombine.high %v1320_v38, %v1324_v49  ;;  %v7640_v16 = vcombine.low %v1319_v32, %v1323_v33  ;;  %v831_v32 = vld [vmem:[%s11888_s0 + $0xa80] sm:$0xff] }
  0xba   : > { %4405 = vmatprep.subr.bf16.mxu0 %v7620_v42  ;;  %4857 = vmatprep.subr.bf16.mxu1 %v7622_v46  ;;  %v819_v42 = vld [vmem:[%s11888_s0 + $0xa2c] sm:$0xff]  ;;  %v816_v46 = vld [vmem:[%s11888_s0 + $0xa18] sm:$0xff]  ;;  %v1327_v62 = vmax.bf16 %v8531_v3, %v815_v41  ;;  %v9515_v0 = vcombine.high %v1528_v40, %v1532_v45  ;;  %v7642_v17 = vcombine.low %v1320_v38, %v1324_v49  ;;  %v836_v41 = vld [vmem:[%s11888_s0 + $0xaa4] sm:$0xff] }
  0xbb   : > { %v1331_v53 = vmax.bf16 %v8531_v3, %v819_v42  ;;  %v835_v33 = vld [vmem:[%s11888_s0 + $0xa9c] sm:$0xff]  ;;  %v1477_v38 = vld [vmem:[%s8755_s26 + $0x30] sm:$0xff]  ;;  %v832_v49 = vld [vmem:[%s11888_s0 + $0xa88] sm:$0xff] }
  0xbc   : > { %4355 = vmatmul.mubr.bf16.gmra.mrb[20].mxu0 %v9462_v58  ;;  %4807 = vmatmul.mubr.bf16.gmra.mrb[20].mxu1 %v9462_v58 }
  0xbd   : > { %4406 = vmatpush1.bf16.msra.mxu0 %v7619_v1  ;;  %4858 = vmatpush1.bf16.msra.mxu1 %v7621_v5  ;;  %v1328_v1 = vmax.bf16 %v8531_v3, %v816_v46  ;;  %v1332_v5 = vmax.bf16 %v8531_v3, %v820_v48  ;;  %v7648_v18 = vcombine.high %v1327_v62, %v1331_v53 }
  0xbe   : > { %4407 = vmatprep.subr.bf16.mxu0 %v7627_v8  ;;  %4859 = vmatprep.subr.bf16.mxu1 %v7629_v11  ;;  %v823_v8 = vld [vmem:[%s11888_s0 + $0xa48] sm:$0xff]  ;;  %v7647_v42 = vcombine.low %v1327_v62, %v1331_v53  ;;  %v839_v62 = vld [vmem:[%s11888_s0 + $0xab8] sm:$0xff] }
  0xbf   : > { %4364 = vmatprep.mubr.bf16.mxu0 %v9473_v15  ;;  %4816 = vmatprep.mubr.bf16.mxu1 %v9473_v15  ;;  %v828_v11 = vld [vmem:[%s11888_s0 + $0xa6c] sm:$0xff]  ;;  %v1335_v19 = vmax.bf16 %v8531_v3, %v823_v8  ;;  %v7650_v21 = vcombine.high %v1328_v1, %v1332_v5  ;;  %v7649_v46 = vcombine.low %v1328_v1, %v1332_v5  ;;  %v843_v53 = vld [vmem:[%s11888_s0 + $0xad4] sm:$0xff]  ;;  %v840_v1 = vld [vmem:[%s11888_s0 + $0xac0] sm:$0xff] }
  0xc0   : > { %v844_v5 = vld [vmem:[%s11888_s0 + $0xadc] sm:$0xff] }
  0xc1   : > { %4408 = vmatpush1.bf16.msra.mxu0 %v7626_v22  ;;  %4860 = vmatpush1.bf16.msra.mxu1 %v7628_v26  ;;  %v1336_v22 = vmax.bf16 %v8531_v3, %v824_v9  ;;  %v1340_v26 = vmax.bf16 %v8531_v3, %v828_v11  ;;  %v7655_v48 = vcombine.high %v1335_v19, %v1339_v20 }
  0xc2   : > { %4409 = vmatprep.subr.bf16.mxu0 %v7634_v29  ;;  %4861 = vmatprep.subr.bf16.mxu1 %v7636_v34  ;;  %v1473_v29 = vld [vmem:[%s8755_s26 + $0x10] sm:$0xff]  ;;  %v9546_v34 = vcombine.low %v1528_v40, %v1532_v45  ;;  %v1347_v40 = vmax.bf16 %v8531_v3, %v835_v33  ;;  %v7654_v8 = vcombine.low %v1335_v19, %v1339_v20  ;;  %v848_v33 = vld [vmem:[%s11888_s0 + $0xaf8] sm:$0xff] }
  0xc3   : > { %v7657_v45 = vcombine.high %v1336_v22, %v1340_v26  ;;  %v7656_v10 = vcombine.low %v1336_v22, %v1340_v26  ;;  %v1351_v11 = vmax.bf16 %v8531_v3, %v839_v62  ;;  %v847_v19 = vld [vmem:[%s11888_s0 + $0xaf0] sm:$0xff]  ;;  %v9587_v22 = vcombine.low %v1473_v29, %v1477_v38 }
  0xc4   : > { %4365 = vmatmul.mubr.bf16.gmra.mrb[24].mxu0 %v9504_v43  ;;  %4817 = vmatmul.mubr.bf16.gmra.mrb[24].mxu1 %v9504_v43  ;;  %v851_v20 = vld [vmem:[%s11888_s0 + $0xb0c] sm:$0xff]  ;;  %v1360_v62 = vmax.bf16 %v8531_v3, %v848_v33 }
  0xc5   : > { %4410 = vmatpush1.bf16.msra.mxu0 %v7633_v52  ;;  %4862 = vmatpush1.bf16.msra.mxu1 %v7635_v54  ;;  %v1343_v52 = vmax.bf16 %v8531_v3, %v831_v32  ;;  %v9557_v54 = vcombine.high %v1473_v29, %v1477_v38  ;;  %v1481_v32 = vld [vmem:[%s8755_s26 + $0x50] sm:$0xff]  ;;  %11944 = vst [vmem:[#allocation4_spill] sm:$0xff] %v9587_v22 }
  0xc6   : > { %4411 = vmatprep.subr.bf16.mxu0 %v7641_v57  ;;  %4863 = vmatprep.subr.bf16.mxu1 %v7643_v61  ;;  %v1344_v57 = vmax.bf16 %v8531_v3, %v832_v49  ;;  %v1348_v61 = vmax.bf16 %v8531_v3, %v836_v41  ;;  %v1485_v26 = vld [vmem:[%s8755_s26 + $0x70] sm:$0xff]  ;;  %v1359_v29 = vmax.bf16 %v8531_v3, %v847_v19 }
  0xc7   : > { %4374 = vmatprep.mubr.bf16.mxu0 %v9515_v0  ;;  %4826 = vmatprep.mubr.bf16.mxu1 %v9515_v0  ;;  %v7662_v9 = vcombine.high %v1343_v52, %v1347_v40  ;;  %v852_v49 = vld [vmem:[%s11888_s0 + $0xb14] sm:$0xff]  ;;  %v7661_v41 = vcombine.low %v1343_v52, %v1347_v40  ;;  %v1363_v38 = vmax.bf16 %v8531_v3, %v851_v20  ;;  %v855_v52 = vld [vmem:[%s11888_s0 + $0xb28] sm:$0xff] }
  0xc8   : > { %v859_v40 = vld [vmem:[%s11888_s0 + $0xb44] sm:$0xff]  ;;  %v1489_v33 = vld [vmem:[%s8755_s26 + $0x90] sm:$0xff] }
  0xc9   : > { %4412 = vmatpush1.bf16.msra.mxu0 %v7640_v16  ;;  %4864 = vmatpush1.bf16.msra.mxu1 %v7642_v17  ;;  %v1355_v16 = vmax.bf16 %v8531_v3, %v843_v53  ;;  %v7664_v17 = vcombine.high %v1344_v57, %v1348_v61  ;;  %v1364_v53 = vmax.bf16 %v8531_v3, %v852_v49  ;;  %v864_v49 = vld [vmem:[%s11888_s0 + $0xb68] sm:$0xff] }
  0xca   : > { %4413 = vmatprep.subr.bf16.mxu0 %v7648_v18  ;;  %4865 = vmatprep.subr.bf16.mxu1 %v7650_v21  ;;  %v1352_v18 = vmax.bf16 %v8531_v3, %v840_v1  ;;  %v1356_v21 = vmax.bf16 %v8531_v3, %v844_v5 }
  0xcb   : > { %v7668_v1 = vcombine.low %v1351_v11, %v1355_v16 }
  0xcc   : > { %4375 = vmatmul.mubr.bf16.gmra.mrb[28].mxu0 %v9546_v34  ;;  %4827 = vmatmul.mubr.bf16.gmra.mrb[28].mxu1 %v9546_v34  ;;  %v7670_v5 = vcombine.low %v1352_v18, %v1356_v21 }
  0xcd   : > { %4414 = vmatpush1.bf16.msra.mxu0 %v7647_v42  ;;  %4866 = vmatpush1.bf16.msra.mxu1 %v7649_v46  ;;  %v7663_v42 = vcombine.low %v1344_v57, %v1348_v61  ;;  %v7669_v46 = vcombine.high %v1351_v11, %v1355_v16  ;;  %v856_v57 = vld [vmem:[%s11888_s0 + $0xb30] sm:$0xff]  ;;  %v863_v11 = vld [vmem:[%s11888_s0 + $0xb60] sm:$0xff] }
  0xce   : > { %4415 = vmatprep.subr.bf16.mxu0 %v7655_v48  ;;  %4867 = vmatprep.subr.bf16.mxu1 %v7657_v45  ;;  %v7671_v48 = vcombine.high %v1352_v18, %v1356_v21  ;;  %v9599_v45 = vcombine.high %v1481_v32, %v1485_v26  ;;  %v860_v61 = vld [vmem:[%s11888_s0 + $0xb4c] sm:$0xff]  ;;  %v1368_v19 = vmax.bf16 %v8531_v3, %v856_v57  ;;  %v867_v16 = vld [vmem:[%s11888_s0 + $0xb7c] sm:$0xff] }
  0xcf   : > { %4417 = vmatprep.mubr.bf16.mxu0 %v9557_v54  ;;  %4869 = vmatprep.mubr.bf16.mxu1 %v9557_v54  ;;  %v1372_v20 = vmax.bf16 %v8531_v3, %v860_v61  ;;  %v9630_v18 = vcombine.low %v1481_v32, %v1485_v26  ;;  %v1493_v21 = vld [vmem:[%s8755_s26 + $0xb0] sm:$0xff]  ;;  %v1379_v32 = vmax.bf16 %v8531_v3, %v867_v16 }
  0xd0   : > { %11945 = vst [vmem:[#allocation5_spill] sm:$0xff] %v9599_v45  ;;  %v1376_v57 = vmax.bf16 %v8531_v3, %v864_v49 }
  0xd1   : > { %4416 = vmatpush1.bf16.msra.mxu0 %v7654_v8  ;;  %4868 = vmatpush1.bf16.msra.mxu1 %v7656_v10  ;;  %v7676_v8 = vcombine.high %v1359_v29, %v1363_v38  ;;  %v1367_v10 = vmax.bf16 %v8531_v3, %v855_v52  ;;  %11946 = vst [vmem:[#allocation6_spill] sm:$0xff] %v9630_v18 }
  0xd2   : > { %4498 = vmatprep.subr.bf16.mxu0 %v7662_v9  ;;  %4950 = vmatprep.subr.bf16.mxu1 %v7664_v17  ;;  %v1371_v9 = vmax.bf16 %v8531_v3, %v859_v40  ;;  %v7678_v17 = vcombine.high %v1360_v62, %v1364_v53  ;;  %v1375_v52 = vmax.bf16 %v8531_v3, %v863_v11 }
  0xd3   : > { %v7685_v26 = vcombine.high %v1368_v19, %v1372_v20  ;;  %v9641_v40 = vcombine.high %v1489_v33, %v1493_v21 }
  0xd4   : > { %4418 = vmatmul.mubr.bf16.vlgmr.msra.gmra.mrb[0].mxu0 %v9587_v22  ;;  %4870 = vmatmul.mubr.bf16.vlgmr.msra.gmra.mrb[0].mxu1 %v9587_v22  ;;  %v506_v22 = vld [vmem:[%s11888_s0 + $0x1a0] sm:$0xf] }
  0xd5   : > { %4499 = vmatpush1.bf16.msra.mxu0 %v7661_v41  ;;  %4951 = vmatpush1.bf16.msra.mxu1 %v7663_v42  ;;  %v868_v41 = vld [vmem:[%s11888_s0 + $0xb84] sm:$0xff]  ;;  %v7675_v42 = vcombine.low %v1359_v29, %v1363_v38  ;;  %11947 = vst [vmem:[#allocation7_spill] sm:$0xff] %v9641_v40  ;;  %v871_v29 = vld [vmem:[%s11888_s0 + $0xb98] sm:$0xff] }
  0xd6   : > { %4500 = vmatprep.subr.bf16.mxu0 %v7669_v46  ;;  %4952 = vmatprep.subr.bf16.mxu1 %v7671_v48  ;;  %v7677_v46 = vcombine.low %v1360_v62, %v1364_v53  ;;  %v7683_v48 = vcombine.high %v1367_v10, %v1371_v9  ;;  %v1380_v61 = vmax.bf16 %v8531_v3, %v868_v41  ;;  %v875_v38 = vld [vmem:[%s11888_s0 + $0xbb4] sm:$0xff]  ;;  %v872_v62 = vld [vmem:[%s11888_s0 + $0xba0] sm:$0xff] }
  0xd7   : > { %4427 = vmatprep.mubr.bf16.mxu0 %v9599_v45  ;;  %4879 = vmatprep.mubr.bf16.mxu1 %v9599_v45  ;;  %v876_v53 = vld [vmem:[%s11888_s0 + $0xbbc] sm:$0xff]  ;;  %v1387_v11 = vmax.bf16 %v8531_v3, %v875_v38  ;;  %v1384_v49 = vmax.bf16 %v8531_v3, %v872_v62 }
  0xd8   : > { %v7692_v16 = vcombine.high %v1376_v57, %v1380_v61  ;;  %v1388_v41 = vmax.bf16 %v8531_v3, %v876_v53 }
  0xd9   : > { %4501 = vmatpush1.bf16.msra.mxu0 %v7668_v1  ;;  %4953 = vmatpush1.bf16.msra.mxu1 %v7670_v5  ;;  %v7682_v1 = vcombine.low %v1367_v10, %v1371_v9  ;;  %v7684_v5 = vcombine.low %v1368_v19, %v1372_v20  ;;  %v879_v10 = vld [vmem:[%s11888_s0 + $0xbd0] sm:$0xff]  ;;  %v880_v19 = vld [vmem:[%s11888_s0 + $0xbd8] sm:$0xff]  ;;  %v9674_v20 = vcombine.low %v1489_v33, %v1493_v21 }
  0xda   : > { %4502 = vmatprep.subr.bf16.mxu0 %v7676_v8  ;;  %4954 = vmatprep.subr.bf16.mxu1 %v7678_v17  ;;  %v7690_v8 = vcombine.high %v1375_v52, %v1379_v32  ;;  %v1383_v17 = vmax.bf16 %v8531_v3, %v871_v29  ;;  %v883_v9 = vld [vmem:[%s11888_s0 + $0xbec] sm:$0xff]  ;;  %v7691_v29 = vcombine.low %v1376_v57, %v1380_v61 }
  0xdb   : > { %11948 = vst [vmem:[#allocation8_spill] sm:$0xff] %v9674_v20  ;;  %v1391_v62 = vmax.bf16 %v8531_v3, %v879_v10  ;;  %v1395_v53 = vmax.bf16 %v8531_v3, %v883_v9  ;;  %v1392_v21 = vmax.bf16 %v8531_v3, %v880_v19  ;;  %v888_v57 = vld [vmem:[%s11888_s0 + $0xc10] sm:$0xff] }
  0xdc   : > { %4428 = vmatmul.mubr.bf16.gmra.mrb[4].mxu0 %v9630_v18  ;;  %4880 = vmatmul.mubr.bf16.gmra.mrb[4].mxu1 %v9630_v18  ;;  %v7697_v38 = vcombine.high %v1383_v17, %v1387_v11  ;;  %v892_v61 = vld [vmem:[%s11888_s0 + $0xc2c] sm:$0xff]  ;;  %v1400_v19 = vmax.bf16 %v8531_v3, %v888_v57 }
  0xdd   : > { %4503 = vmatpush1.bf16.msra.mxu0 %v7675_v42  ;;  %4955 = vmatpush1.bf16.msra.mxu1 %v7677_v46  ;;  %v1497_v42 = vld [vmem:[%s8755_s26 + $0xd0] sm:$0xff] }
  0xde   : > { %4504 = vmatprep.subr.bf16.mxu0 %v7683_v48  ;;  %4956 = vmatprep.subr.bf16.mxu1 %v7685_v26  ;;  %v1501_v46 = vld [vmem:[%s8755_s26 + $0xf0] sm:$0xff]  ;;  %v7689_v26 = vcombine.low %v1375_v52, %v1379_v32  ;;  %v887_v52 = vld [vmem:[%s11888_s0 + $0xc08] sm:$0xff] }
  0xdf   : > { %4437 = vmatprep.mubr.bf16.mxu0 %v9641_v40  ;;  %4889 = vmatprep.mubr.bf16.mxu1 %v9641_v40  ;;  %v884_v48 = vld [vmem:[%s11888_s0 + $0xbf4] sm:$0xff]  ;;  %v7699_v40 = vcombine.high %v1384_v49, %v1388_v41  ;;  %v9683_v33 = vcombine.high %v1497_v42, %v1501_v46  ;;  %v891_v32 = vld [vmem:[%s11888_s0 + $0xc24] sm:$0xff] }
  0xe0   : > { %v1396_v18 = vmax.bf16 %v8531_v3, %v884_v48  ;;  %v1403_v10 = vmax.bf16 %v8531_v3, %v891_v32  ;;  %v1404_v48 = vmax.bf16 %v8531_v3, %v892_v61 }
  0xe1   : > { %4505 = vmatpush1.bf16.msra.mxu0 %v7682_v1  ;;  %4957 = vmatpush1.bf16.msra.mxu1 %v7684_v5  ;;  %11949 = vst [vmem:[#allocation9_spill] sm:$0xff] %v9683_v33  ;;  %v7696_v1 = vcombine.low %v1383_v17, %v1387_v11  ;;  %v7698_v5 = vcombine.low %v1384_v49, %v1388_v41  ;;  %v895_v17 = vld [vmem:[%s11888_s0 + $0xc40] sm:$0xff]  ;;  %v896_v49 = vld [vmem:[%s11888_s0 + $0xc48] sm:$0xff]  ;;  %v1505_v41 = vld [vmem:[%s8755_s26 + $0x110] sm:$0xff] }
  0xe2   : > { %4506 = vmatprep.subr.bf16.mxu0 %v7690_v8  ;;  %4958 = vmatprep.subr.bf16.mxu1 %v7692_v16  ;;  %v7704_v8 = vcombine.high %v1391_v62, %v1395_v53  ;;  %v1399_v16 = vmax.bf16 %v8531_v3, %v887_v52  ;;  %v7706_v9 = vcombine.high %v1392_v21, %v1396_v18  ;;  %v899_v11 = vld [vmem:[%s11888_s0 + $0xc5c] sm:$0xff] }
  0xe3   : > { %v7705_v52 = vcombine.low %v1392_v21, %v1396_v18  ;;  %v1407_v57 = vmax.bf16 %v8531_v3, %v895_v17  ;;  %v1411_v61 = vmax.bf16 %v8531_v3, %v899_v11  ;;  %v907_v18 = vld [vmem:[%s11888_s0 + $0xc94] sm:$0xff]  ;;  %v908_v21 = vld [vmem:[%s11888_s0 + $0xc9c] sm:$0xff] }
  0xe4   : > { %4438 = vmatmul.mubr.bf16.gmra.mrb[8].mxu0 %v9674_v20  ;;  %4890 = vmatmul.mubr.bf16.gmra.mrb[8].mxu1 %v9674_v20  ;;  %v7711_v32 = vcombine.high %v1399_v16, %v1403_v10  ;;  %v1419_v17 = vmax.bf16 %v8531_v3, %v907_v18 }
  0xe5   : > { %4507 = vmatpush1.bf16.msra.mxu0 %v7689_v26  ;;  %4959 = vmatpush1.bf16.msra.mxu1 %v7691_v29  ;;  %v1509_v26 = vld [vmem:[%s8755_s26 + $0x130] sm:$0xff]  ;;  %v900_v29 = vld [vmem:[%s11888_s0 + $0xc64] sm:$0xff] }
  0xe6   : > { %4508 = vmatprep.subr.bf16.mxu0 %v7697_v38  ;;  %4960 = vmatprep.subr.bf16.mxu1 %v7699_v40  ;;  %v9716_v40 = vcombine.low %v1497_v42, %v1501_v46  ;;  %v7703_v38 = vcombine.low %v1391_v62, %v1395_v53  ;;  %v9725_v42 = vcombine.high %v1505_v41, %v1509_v26  ;;  %v903_v62 = vld [vmem:[%s11888_s0 + $0xc78] sm:$0xff]  ;;  %v904_v53 = vld [vmem:[%s11888_s0 + $0xc80] sm:$0xff] }
  0xe7   : > { %4447 = vmatprep.mubr.bf16.mxu0 %v9683_v33  ;;  %4899 = vmatprep.mubr.bf16.mxu1 %v9683_v33  ;;  %v7713_v33 = vcombine.high %v1400_v19, %v1404_v48  ;;  %v1408_v46 = vmax.bf16 %v8531_v3, %v896_v49  ;;  %v1412_v20 = vmax.bf16 %v8531_v3, %v900_v29 }
  0xe8   : > { %11950 = vst [vmem:[#allocation10_spill] sm:$0xff] %v9716_v40  ;;  %11951 = vst [vmem:[#allocation11_spill] sm:$0xff] %v9725_v42  ;;  %v1416_v49 = vmax.bf16 %v8531_v3, %v904_v53  ;;  %v1420_v29 = vmax.bf16 %v8531_v3, %v908_v21 }
  0xe9   : > { %4509 = vmatpush1.bf16.msra.mxu0 %v7696_v1  ;;  %4961 = vmatpush1.bf16.msra.mxu1 %v7698_v5  ;;  %v7710_v1 = vcombine.low %v1399_v16, %v1403_v10  ;;  %v7712_v5 = vcombine.low %v1400_v19, %v1404_v48  ;;  %v7720_v11 = vcombine.high %v1408_v46, %v1412_v20  ;;  %v911_v16 = vld [vmem:[%s11888_s0 + $0xcb0] sm:$0xff]  ;;  %v912_v19 = vld [vmem:[%s11888_s0 + $0xcb8] sm:$0xff] }
  0xea   : > { %4510 = vmatprep.subr.bf16.mxu0 %v7704_v8  ;;  %4962 = vmatprep.subr.bf16.mxu1 %v7706_v9  ;;  %v7718_v8 = vcombine.high %v1407_v57, %v1411_v61  ;;  %v1415_v9 = vmax.bf16 %v8531_v3, %v903_v62  ;;  %v915_v10 = vld [vmem:[%s11888_s0 + $0xccc] sm:$0xff]  ;;  %v7719_v62 = vcombine.low %v1408_v46, %v1412_v20  ;;  %v923_v20 = vld [vmem:[%s11888_s0 + $0xd04] sm:$0xff] }
  0xeb   : > { %v1513_v48 = vld [vmem:[%s8755_s26 + $0x150] sm:$0xff]  ;;  %v1423_v53 = vmax.bf16 %v8531_v3, %v911_v16  ;;  %v1427_v21 = vmax.bf16 %v8531_v3, %v915_v10  ;;  %v1435_v16 = vmax.bf16 %v8531_v3, %v923_v20 }
  0xec   : > { %4448 = vmatmul.mubr.bf16.gmra.mrb[12].mxu0 %v9716_v40  ;;  %4900 = vmatmul.mubr.bf16.gmra.mrb[12].mxu1 %v9716_v40  ;;  %v7725_v18 = vcombine.high %v1415_v9, %v1419_v17  ;;  %v924_v46 = vld [vmem:[%s11888_s0 + $0xd0c] sm:$0xff] }
  0xed   : > { %4511 = vmatpush1.bf16.msra.mxu0 %v7703_v38  ;;  %4963 = vmatpush1.bf16.msra.mxu1 %v7705_v52  ;;  %v1517_v38 = vld [vmem:[%s8755_s26 + $0x170] sm:$0xff] }
  0xee   : > { %4512 = vmatprep.subr.bf16.mxu0 %v7711_v32  ;;  %4964 = vmatprep.subr.bf16.mxu1 %v7713_v33  ;;  %v9758_v33 = vcombine.low %v1505_v41, %v1509_v26  ;;  %v916_v52 = vld [vmem:[%s11888_s0 + $0xcd4] sm:$0xff]  ;;  %v7717_v32 = vcombine.low %v1407_v57, %v1411_v61  ;;  %v9767_v41 = vcombine.high %v1513_v48, %v1517_v38  ;;  %v919_v57 = vld [vmem:[%s11888_s0 + $0xce8] sm:$0xff] }
  0xef   : > { %4457 = vmatprep.mubr.bf16.mxu0 %v9725_v42  ;;  %4909 = vmatprep.mubr.bf16.mxu1 %v9725_v42  ;;  %v7727_v42 = vcombine.high %v1416_v49, %v1420_v29  ;;  %v1424_v26 = vmax.bf16 %v8531_v3, %v912_v19  ;;  %v1428_v40 = vmax.bf16 %v8531_v3, %v916_v52  ;;  %v920_v61 = vld [vmem:[%s11888_s0 + $0xcf0] sm:$0xff] }
  0xf0   : > { %11952 = vst [vmem:[#allocation12_spill] sm:$0xff] %v9758_v33  ;;  %11953 = vst [vmem:[#allocation13_spill] sm:$0xff] %v9767_v41  ;;  %v1432_v19 = vmax.bf16 %v8531_v3, %v920_v61  ;;  %v1436_v52 = vmax.bf16 %v8531_v3, %v924_v46 }
  0xf1   : > { %4513 = vmatpush1.bf16.msra.mxu0 %v7710_v1  ;;  %4965 = vmatpush1.bf16.msra.mxu1 %v7712_v5  ;;  %v7724_v1 = vcombine.low %v1415_v9, %v1419_v17  ;;  %v7726_v5 = vcombine.low %v1416_v49, %v1420_v29  ;;  %v7734_v10 = vcombine.high %v1424_v26, %v1428_v40  ;;  %v927_v9 = vld [vmem:[%s11888_s0 + $0xd20] sm:$0xff]  ;;  %v928_v49 = vld [vmem:[%s11888_s0 + $0xd28] sm:$0xff]  ;;  %v1521_v29 = vld [vmem:[%s8755_s26 + $0x190] sm:$0xff] }
  0xf2   : > { %4514 = vmatprep.subr.bf16.mxu0 %v7718_v8  ;;  %4966 = vmatprep.subr.bf16.mxu1 %v7720_v11  ;;  %v7732_v8 = vcombine.high %v1423_v53, %v1427_v21  ;;  %v1431_v11 = vmax.bf16 %v8531_v3, %v919_v57  ;;  %v931_v17 = vld [vmem:[%s11888_s0 + $0xd3c] sm:$0xff]  ;;  %v7733_v57 = vcombine.low %v1424_v26, %v1428_v40  ;;  %v939_v40 = vld [vmem:[%s11888_s0 + $0xd74] sm:$0xff] }
  0xf3   : > { %v1439_v61 = vmax.bf16 %v8531_v3, %v927_v9  ;;  %v1443_v46 = vmax.bf16 %v8531_v3, %v931_v17  ;;  %v940_v26 = vld [vmem:[%s11888_s0 + $0xd7c] sm:$0xff]  ;;  %v1451_v9 = vmax.bf16 %v8531_v3, %v939_v40 }
  0xf4   : > { %4458 = vmatmul.mubr.bf16.gmra.mrb[16].mxu0 %v9758_v33  ;;  %4910 = vmatmul.mubr.bf16.gmra.mrb[16].mxu1 %v9758_v33  ;;  %v7739_v20 = vcombine.high %v1431_v11, %v1435_v16 }
  0xf5   : > { %4515 = vmatpush1.bf16.msra.mxu0 %v7717_v32  ;;  %4967 = vmatpush1.bf16.msra.mxu1 %v7719_v62  ;;  %v1525_v32 = vld [vmem:[%s8755_s26 + $0x1b0] sm:$0xff]  ;;  %v932_v62 = vld [vmem:[%s11888_s0 + $0xd44] sm:$0xff] }
  0xf6   : > { %4516 = vmatprep.subr.bf16.mxu0 %v7725_v18  ;;  %4968 = vmatprep.subr.bf16.mxu1 %v7727_v42  ;;  %v9800_v42 = vcombine.low %v1513_v48, %v1517_v38  ;;  %v7731_v18 = vcombine.low %v1423_v53, %v1427_v21  ;;  %v9809_v48 = vcombine.high %v1521_v29, %v1525_v32  ;;  %v935_v53 = vld [vmem:[%s11888_s0 + $0xd58] sm:$0xff]  ;;  %v936_v21 = vld [vmem:[%s11888_s0 + $0xd60] sm:$0xff] }
  0xf7   : > { %4467 = vmatprep.mubr.bf16.mxu0 %v9767_v41  ;;  %4919 = vmatprep.mubr.bf16.mxu1 %v9767_v41  ;;  %v7741_v41 = vcombine.high %v1432_v19, %v1436_v52  ;;  %v1440_v38 = vmax.bf16 %v8531_v3, %v928_v49  ;;  %v1444_v33 = vmax.bf16 %v8531_v3, %v932_v62 }
  0xf8   : > { %11954 = vst [vmem:[#allocation14_spill] sm:$0xff] %v9800_v42  ;;  %11955 = vst [vmem:[#allocation15_spill] sm:$0xff] %v9809_v48  ;;  %v1448_v49 = vmax.bf16 %v8531_v3, %v936_v21  ;;  %v1452_v62 = vmax.bf16 %v8531_v3, %v940_v26 }
  0xf9   : > { %4517 = vmatpush1.bf16.msra.mxu0 %v7724_v1  ;;  %4969 = vmatpush1.bf16.msra.mxu1 %v7726_v5  ;;  %v7738_v1 = vcombine.low %v1431_v11, %v1435_v16  ;;  %v7740_v5 = vcombine.low %v1432_v19, %v1436_v52  ;;  %v7748_v17 = vcombine.high %v1440_v38, %v1444_v33  ;;  %v943_v11 = vld [vmem:[%s11888_s0 + $0xd90] sm:$0xff]  ;;  %v944_v19 = vld [vmem:[%s11888_s0 + $0xd98] sm:$0xff] }
  0xfa   : > { %4518 = vmatprep.subr.bf16.mxu0 %v7732_v8  ;;  %4970 = vmatprep.subr.bf16.mxu1 %v7734_v10  ;;  %v7746_v8 = vcombine.high %v1439_v61, %v1443_v46  ;;  %v1447_v10 = vmax.bf16 %v8531_v3, %v935_v53  ;;  %v947_v16 = vld [vmem:[%s11888_s0 + $0xdac] sm:$0xff]  ;;  %v7747_v53 = vcombine.low %v1440_v38, %v1444_v33  ;;  %v955_v33 = vld [vmem:[%s11888_s0 + $0xde4] sm:$0xff] }
  0xfb   : > { %v1529_v52 = vld [vmem:[%s8755_s26 + $0x1d0] sm:$0xff]  ;;  %v1455_v21 = vmax.bf16 %v8531_v3, %v943_v11  ;;  %v1459_v26 = vmax.bf16 %v8531_v3, %v947_v16  ;;  %v1467_v11 = vmax.bf16 %v8531_v3, %v955_v33 }
  0xfc   : > { %4468 = vmatmul.mubr.bf16.gmra.mrb[20].mxu0 %v9800_v42  ;;  %4920 = vmatmul.mubr.bf16.gmra.mrb[20].mxu1 %v9800_v42  ;;  %v7753_v40 = vcombine.high %v1447_v10, %v1451_v9  ;;  %v956_v38 = vld [vmem:[%s11888_s0 + $0xdec] sm:$0xff] }
  0xfd   : > { %4519 = vmatpush1.bf16.msra.mxu0 %v7731_v18  ;;  %4971 = vmatpush1.bf16.msra.mxu1 %v7733_v57  ;;  %v1533_v18 = vld [vmem:[%s8755_s26 + $0x1f0] sm:$0xff] }
  0xfe   : > { %4520 = vmatprep.subr.bf16.mxu0 %v7739_v20  ;;  %4972 = vmatprep.subr.bf16.mxu1 %v7741_v41  ;;  %v9842_v41 = vcombine.low %v1521_v29, %v1525_v32  ;;  %v948_v57 = vld [vmem:[%s11888_s0 + $0xdb4] sm:$0xff]  ;;  %v7745_v20 = vcombine.low %v1439_v61, %v1443_v46  ;;  %v9851_v29 = vcombine.high %v1529_v52, %v1533_v18  ;;  %v951_v61 = vld [vmem:[%s11888_s0 + $0xdc8] sm:$0xff] }
  0xff   : > { %4477 = vmatprep.mubr.bf16.mxu0 %v9809_v48  ;;  %4929 = vmatprep.mubr.bf16.mxu1 %v9809_v48  ;;  %v7755_v48 = vcombine.high %v1448_v49, %v1452_v62  ;;  %v1456_v32 = vmax.bf16 %v8531_v3, %v944_v19  ;;  %v1460_v42 = vmax.bf16 %v8531_v3, %v948_v57  ;;  %v952_v46 = vld [vmem:[%s11888_s0 + $0xdd0] sm:$0xff] }
 0x100   : > { %11956 = vst [vmem:[#allocation16_spill] sm:$0xff] %v9842_v41  ;;  %11957 = vst [vmem:[#allocation17_spill] sm:$0xff] %v9851_v29  ;;  %v1464_v19 = vmax.bf16 %v8531_v3, %v952_v46  ;;  %v1468_v57 = vmax.bf16 %v8531_v3, %v956_v38  ;;  %v454_v46 = vld [vmem:[%s11888_s0 + $0x34] sm:$0xf] }
 0x101   : > { %4521 = vmatpush1.bf16.msra.mxu0 %v7738_v1  ;;  %4973 = vmatpush1.bf16.msra.mxu1 %v7740_v5  ;;  %v7752_v1 = vcombine.low %v1447_v10, %v1451_v9  ;;  %v7754_v5 = vcombine.low %v1448_v49, %v1452_v62  ;;  %v7762_v16 = vcombine.high %v1456_v32, %v1460_v42  ;;  %v449_v10 = vld [vmem:[%s11888_s0 + $0x10] sm:$0xff]  ;;  %v514_v62 = vld [vmem:[%s11888_s0 + $0x1d8] sm:$0xf] }
 0x102   : > { %4522 = vmatprep.subr.bf16.mxu0 %v7746_v8  ;;  %4974 = vmatprep.subr.bf16.mxu1 %v7748_v17  ;;  %v7760_v8 = vcombine.high %v1455_v21, %v1459_v26  ;;  %v1463_v17 = vmax.bf16 %v8531_v3, %v951_v61  ;;  %v453_v9 = vld [vmem:[%s11888_s0 + $0x2c] sm:$0xff]  ;;  %v9882_v49 = vcombine.low %v1529_v52, %v1533_v18  ;;  %v450_v18 = vld [vmem:[%s11888_s0 + $0x18] sm:$0xf] }
 0x103   : > { %v961_v33 = vmax.bf16 %v8531_v3, %v449_v10  ;;  %v965_v52 = vmax.bf16 %v8531_v3, %v453_v9  ;;  %v7769_v38 = vcombine.high %v1464_v19, %v1468_v57  ;;  %v966_v10 = vmax.bf16 %v8531_v3, %v454_v46  ;;  %v522_v9 = vld [vmem:[%s11888_s0 + $0x210] sm:$0xf] }
 0x104   : > { %4478 = vmatmul.mubr.bf16.gmra.mrb[24].mxu0 %v9842_v41  ;;  %4930 = vmatmul.mubr.bf16.gmra.mrb[24].mxu1 %v9842_v41  ;;  %v1474_v41 = vld [vmem:[%s8755_s26 + $0x18] sm:$0xff]  ;;  %11958 = vst [vmem:[#allocation18_spill] sm:$0xff] %v9882_v49  ;;  %v7767_v61 = vcombine.high %v1463_v17, %v1467_v11 }
 0x105   : > { %4523 = vmatpush1.bf16.msra.mxu0 %v7745_v20  ;;  %4975 = vmatpush1.bf16.msra.mxu1 %v7747_v53  ;;  %v518_v20 = vld [vmem:[%s11888_s0 + $0x1f4] sm:$0xf]  ;;  %v7759_v53 = vcombine.low %v1455_v21, %v1459_v26  ;;  %v457_v26 = vld [vmem:[%s11888_s0 + $0x48] sm:$0xff] }
 0x106   : > { %4524 = vmatprep.subr.bf16.mxu0 %v7753_v40  ;;  %4976 = vmatprep.subr.bf16.mxu1 %v7755_v48  ;;  %v1478_v48 = vld [vmem:[%s8755_s26 + $0x38] sm:$0xff]  ;;  %v7761_v40 = vcombine.low %v1456_v32, %v1460_v42  ;;  %v1026_v42 = vmax.bf16 %v8531_v3, %v514_v62  ;;  %v1030_v21 = vmax.bf16 %v8531_v3, %v518_v20  ;;  %v461_v32 = vld [vmem:[%s11888_s0 + $0x64] sm:$0xff]  ;;  %v526_v62 = vld [vmem:[%s11888_s0 + $0x22c] sm:$0xf] }
 0x107   : > { %4487 = vmatprep.mubr.bf16.mxu0 %v9851_v29  ;;  %4939 = vmatprep.mubr.bf16.mxu1 %v9851_v29  ;;  %v469_v20 = vld [vmem:[%s11888_s0 + $0x9c] sm:$0xff]  ;;  %v9937_v46 = vcombine.low %v1474_v41, %v1478_v48 }
 0x109   : > { %4525 = vmatpush1.bf16.msra.mxu0 %v7752_v1  ;;  %4977 = vmatpush1.bf16.msra.mxu1 %v7754_v5  ;;  %v9899_v1 = vcombine.high %v1474_v41, %v1478_v48  ;;  %v7766_v5 = vcombine.low %v1463_v17, %v1467_v11  ;;  %v7330_v17 = vcombine.high %v961_v33, %v965_v52 }
 0x10a   : > { %4526 = vmatprep.subr.bf16.mxu0 %v7760_v8  ;;  %4978 = vmatprep.subr.bf16.mxu1 %v7762_v16  ;;  %v7768_v8 = vcombine.low %v1464_v19, %v1468_v57  ;;  %v962_v16 = vmax.bf16 %v8531_v3, %v450_v18  ;;  %v9920_v11 = vmax.bf16 %v8531_v3, %v457_v26  ;;  %v465_v57 = vld [vmem:[%s11888_s0 + $0x80] sm:$0xff]  ;;  %v462_v18 = vld [vmem:[%s11888_s0 + $0x6c] sm:$0xf]  ;;  %v1486_v26 = vld [vmem:[%s8755_s26 + $0x78] sm:$0xff] }
 0x10b   : > { %11959 = vst [vmem:[#allocation19_spill] sm:$0xff] %v9899_v1  ;;  %v973_v19 = vmax.bf16 %v8531_v3, %v461_v32  ;;  %11960 = vst [vmem:[#allocation20_spill] sm:$0xff] %v9937_v46  ;;  %v1034_v32 = vmax.bf16 %v8531_v3, %v522_v9  ;;  %v9950_v41 = vmax.bf16 %v8531_v3, %v465_v57 }
 0x10c   : > { %4488 = vmatmul.mubr.bf16.gmra.mrb[28].mxu0 %v9882_v49  ;;  %4940 = vmatmul.mubr.bf16.gmra.mrb[28].mxu1 %v9882_v49  ;;  %v7329_v49 = vcombine.low %v961_v33, %v965_v52  ;;  %v7331_v29 = vcombine.low %v962_v16, %v966_v10  ;;  %v9953_v48 = vmax.bf16 %v8531_v3, %v469_v20  ;;  %v473_v33 = vld [vmem:[%s11888_s0 + $0xb8] sm:$0xff]  ;;  %v466_v10 = vld [vmem:[%s11888_s0 + $0x88] sm:$0xf] }
 0x10d   : > { %4527 = vmatpush1.bf16.msra.mxu0 %v7759_v53  ;;  %4979 = vmatpush1.bf16.msra.mxu1 %v7761_v40  ;;  %v7387_v53 = vcombine.low %v1026_v42, %v1030_v21  ;;  %v1482_v40 = vld [vmem:[%s8755_s26 + $0x58] sm:$0xff]  ;;  %v530_v42 = vld [vmem:[%s11888_s0 + $0x248] sm:$0xf]  ;;  %v534_v21 = vld [vmem:[%s11888_s0 + $0x264] sm:$0xf]  ;;  %v7337_v9 = vcombine.high %v9920_v11, %v973_v19  ;;  %v7336_v57 = vcombine.low %v9920_v11, %v973_v19 }
 0x10e   : > { %4528 = vmatprep.subr.bf16.mxu0 %v7767_v61  ;;  %4980 = vmatprep.subr.bf16.mxu1 %v7769_v38  ;;  %v458_v61 = vld [vmem:[%s11888_s0 + $0x50] sm:$0xf]  ;;  %v1038_v38 = vmax.bf16 %v8531_v3, %v526_v62  ;;  %v9958_v45 = vcombine.high %v1482_v40, %v1486_v26  ;;  %v477_v52 = vld [vmem:[%s11888_s0 + $0xd4] sm:$0xff]  ;;  %v7344_v20 = vcombine.high %v9950_v41, %v9953_v48 }
 0x10f   : > { %4530 = vmatprep.mubr.bf16.mxu0 %v9899_v1  ;;  %4982 = vmatprep.mubr.bf16.mxu1 %v9899_v1  ;;  %v970_v62 = vmax.bf16 %v8531_v3, %v458_v61  ;;  %v974_v1 = vmax.bf16 %v8531_v3, %v462_v18  ;;  %v542_v61 = vld [vmem:[%s11888_s0 + $0x29c] sm:$0xf] }
 0x110   : > { %11961 = vst [vmem:[#allocation21_spill] sm:$0xff] %v9958_v45  ;;  %v7394_v16 = vcombine.low %v1034_v32, %v1038_v38  ;;  %v9986_v32 = vmax.bf16 %v8531_v3, %v473_v33  ;;  %v1490_v11 = vld [vmem:[%s8755_s26 + $0x98] sm:$0xff]  ;;  %v481_v38 = vld [vmem:[%s11888_s0 + $0xf0] sm:$0xff]  ;;  %v1054_v33 = vmax.bf16 %v8531_v3, %v542_v61 }
 0x111   : > { %4529 = vmatpush1.bf16.msra.mxu0 %v7766_v5  ;;  %4981 = vmatpush1.bf16.msra.mxu1 %v7768_v8  ;;  %v1042_v5 = vmax.bf16 %v8531_v3, %v530_v42  ;;  %v1046_v8 = vmax.bf16 %v8531_v3, %v534_v21  ;;  %v7338_v18 = vcombine.low %v970_v62, %v974_v1  ;;  %v1494_v19 = vld [vmem:[%s8755_s26 + $0xb8] sm:$0xff] }
 0x112   : > { %5063 = vmatprep.subr.bf16.mxu0 %v7330_v17  ;;  %7904 = vmatprep.subr.bf16.mxu1 %v7387_v53  ;;  %v470_v17 = vld [vmem:[%s11888_s0 + $0xa4] sm:$0xf]  ;;  %v538_v53 = vld [vmem:[%s11888_s0 + $0x280] sm:$0xf]  ;;  %v978_v42 = vmax.bf16 %v8531_v3, %v466_v10  ;;  %v10026_v10 = vmax.bf16 %v8531_v3, %v481_v38 }
 0x113   : > { %v7401_v1 = vcombine.low %v1042_v5, %v1046_v8  ;;  %v982_v21 = vmax.bf16 %v8531_v3, %v470_v17  ;;  %v1050_v62 = vmax.bf16 %v8531_v3, %v538_v53  ;;  %v7343_v5 = vcombine.low %v9950_v41, %v9953_v48  ;;  %v489_v17 = vld [vmem:[%s11888_s0 + $0x128] sm:$0xff] }
 0x114   : > { %4531 = vmatmul.mubr.bf16.vlgmr.msra.gmra.mrb[0].mxu0 %v9937_v46  ;;  %4983 = vmatmul.mubr.bf16.vlgmr.msra.gmra.mrb[0].mxu1 %v9937_v46  ;;  %v10015_v8 = vcombine.high %v1490_v11, %v1494_v19 }
 0x115   : > { %5064 = vmatpush1.bf16.msra.mxu0 %v7329_v49  ;;  %7905 = vmatpush3.bf16.msra.mxu1 %v7331_v29  ;;  %v9989_v49 = vmax.bf16 %v8531_v3, %v477_v52  ;;  %v485_v29 = vld [vmem:[%s11888_s0 + $0x10c] sm:$0xff]  ;;  %v474_v52 = vld [vmem:[%s11888_s0 + $0xc0] sm:$0xf]  ;;  %v7345_v48 = vcombine.low %v978_v42, %v982_v21  ;;  %v7408_v61 = vcombine.low %v1050_v62, %v1054_v33 }
 0x116   : > { %5065 = vmatprep.subr.bf16.mxu0 %v7337_v9  ;;  %4540 = vmatprep.mubr.bf16.mxu0 %v9958_v45  ;;  %v10003_v9 = vcombine.low %v1482_v40, %v1486_v26  ;;  %11963 = vst [vmem:[#allocation23_spill] sm:$0xff] %v10015_v8  ;;  %v546_v40 = vld [vmem:[%s11888_s0 + $0x2b8] sm:$0xf]  ;;  %v550_v26 = vld [vmem:[%s11888_s0 + $0x2d4] sm:$0xf]  ;;  %v997_v41 = vmax.bf16 %v8531_v3, %v485_v29 }
 0x117   : > { %4992 = vmatprep.mubr.bf16.mxu1 %v9958_v45  ;;  %7906 = vmatprep.subr.bf16.mxu1 %v7394_v16  ;;  %v478_v45 = vld [vmem:[%s11888_s0 + $0xdc] sm:$0xf]  ;;  %v7351_v16 = vcombine.high %v9986_v32, %v9989_v49  ;;  %v1062_v38 = vmax.bf16 %v8531_v3, %v550_v26  ;;  %v482_v29 = vld [vmem:[%s11888_s0 + $0xf8] sm:$0xf]  ;;  %v554_v42 = vld [vmem:[%s11888_s0 + $0x2f0] sm:$0xf]  ;;  %v10058_v33 = vmax.bf16 %v8531_v3, %v489_v17 }
 0x118   : > { %11962 = vst [vmem:[#allocation22_spill] sm:$0xff] %v10003_v9  ;;  %v990_v53 = vmax.bf16 %v8531_v3, %v478_v45  ;;  %v7350_v45 = vcombine.low %v9986_v32, %v9989_v49  ;;  %v558_v21 = vld [vmem:[%s11888_s0 + $0x30c] sm:$0xf]  ;;  %v7358_v62 = vcombine.high %v10026_v10, %v997_v41  ;;  %v497_v32 = vld [vmem:[%s11888_s0 + $0x160] sm:$0xff]  ;;  %v1498_v49 = vld [vmem:[%s8755_s26 + $0xd8] sm:$0xff]  ;;  %v1066_v46 = vmax.bf16 %v8531_v3, %v554_v42 }
 0x119   : > { %5066 = vmatpush1.bf16.msra.mxu0 %v7336_v57  ;;  %7907 = vmatpush3.bf16.msra.mxu1 %v7338_v18  ;;  %v493_v57 = vld [vmem:[%s11888_s0 + $0x144] sm:$0xff]  ;;  %v1058_v18 = vmax.bf16 %v8531_v3, %v546_v40  ;;  %v501_v40 = vld [vmem:[%s11888_s0 + $0x17c] sm:$0xff] }
 0x11a   : > { %5067 = vmatprep.subr.bf16.mxu0 %v7344_v20  ;;  %7908 = vmatprep.subr.bf16.mxu1 %v7401_v1  ;;  %v986_v20 = vmax.bf16 %v8531_v3, %v474_v52  ;;  %v486_v1 = vld [vmem:[%s11888_s0 + $0x114] sm:$0xf]  ;;  %v10061_v52 = vmax.bf16 %v8531_v3, %v493_v57  ;;  %v10074_v57 = vcombine.low %v1490_v11, %v1494_v19  ;;  %v562_v11 = vld [vmem:[%s11888_s0 + $0x328] sm:$0xf]  ;;  %v566_v19 = vld [vmem:[%s11888_s0 + $0x344] sm:$0xf] }
 0x11b   : > { %v998_v17 = vmax.bf16 %v8531_v3, %v486_v1 }
 0x11c   : > { %4541 = vmatmul.mubr.bf16.gmra.mrb[4].mxu0 %v10003_v9  ;;  %4993 = vmatmul.mubr.bf16.gmra.mrb[4].mxu1 %v10003_v9  ;;  %v7352_v26 = vcombine.low %v986_v20, %v990_v53  ;;  %11964 = vst [vmem:[#allocation24_spill] sm:$0xff] %v10074_v57  ;;  %v7415_v9 = vcombine.low %v1058_v18, %v1062_v38  ;;  %v494_v20 = vld [vmem:[%s11888_s0 + $0x14c] sm:$0xf] }
 0x11d   : > { %5068 = vmatpush1.bf16.msra.mxu0 %v7343_v5  ;;  %4550 = vmatprep.mubr.bf16.mxu0 %v10015_v8  ;;  %v1502_v5 = vld [vmem:[%s8755_s26 + $0xf8] sm:$0xff]  ;;  %v7357_v53 = vcombine.low %v10026_v10, %v997_v41  ;;  %v1009_v38 = vmax.bf16 %v8531_v3, %v497_v32  ;;  %v1006_v42 = vmax.bf16 %v8531_v3, %v494_v20 }
 0x11e   : > { %5069 = vmatprep.subr.bf16.mxu0 %v7351_v16  ;;  %5002 = vmatprep.mubr.bf16.mxu1 %v10015_v8  ;;  %v994_v16 = vmax.bf16 %v8531_v3, %v482_v29  ;;  %v1070_v8 = vmax.bf16 %v8531_v3, %v558_v21  ;;  %v10093_v18 = vcombine.high %v1498_v49, %v1502_v5  ;;  %v505_v10 = vld [vmem:[%s11888_s0 + $0x198] sm:$0xff] }
 0x11f   : > { %7909 = vmatpush3.bf16.msra.mxu1 %v7345_v48  ;;  %v490_v48 = vld [vmem:[%s11888_s0 + $0x130] sm:$0xf]  ;;  %v1013_v29 = vmax.bf16 %v8531_v3, %v501_v40  ;;  %v509_v41 = vld [vmem:[%s11888_s0 + $0x1b4] sm:$0xff]  ;;  %v1078_v32 = vmax.bf16 %v8531_v3, %v566_v19  ;;  %v498_v40 = vld [vmem:[%s11888_s0 + $0x168] sm:$0xf] }
 0x120   : > { %7910 = vmatprep.subr.bf16.mxu1 %v7408_v61  ;;  %v7365_v61 = vcombine.high %v10058_v33, %v10061_v52  ;;  %11965 = vst [vmem:[#allocation25_spill] sm:$0xff] %v10093_v18  ;;  %v7359_v1 = vcombine.low %v994_v16, %v998_v17  ;;  %v7422_v21 = vcombine.low %v1066_v46, %v1070_v8  ;;  %v574_v8 = vld [vmem:[%s11888_s0 + $0x37c] sm:$0xf] }
 0x121   : > { %5070 = vmatpush1.bf16.msra.mxu0 %v7350_v45  ;;  %v1002_v45 = vmax.bf16 %v8531_v3, %v490_v48  ;;  %v7364_v46 = vcombine.low %v10058_v33, %v10061_v52  ;;  %v7372_v16 = vcombine.high %v1009_v38, %v1013_v29  ;;  %v1017_v17 = vmax.bf16 %v8531_v3, %v505_v10  ;;  %v513_v33 = vld [vmem:[%s11888_s0 + $0x1d0] sm:$0xff]  ;;  %v1506_v52 = vld [vmem:[%s8755_s26 + $0x118] sm:$0xff] }
 0x122   : > { %5071 = vmatprep.subr.bf16.mxu0 %v7358_v62  ;;  %v1074_v62 = vmax.bf16 %v8531_v3, %v562_v11  ;;  %v1021_v48 = vmax.bf16 %v8531_v3, %v509_v41  ;;  %v1510_v20 = vld [vmem:[%s8755_s26 + $0x138] sm:$0xff]  ;;  %v1010_v19 = vmax.bf16 %v8531_v3, %v498_v40  ;;  %v10137_v10 = vcombine.low %v1498_v49, %v1502_v5  ;;  %v646_v5 = vld [vmem:[%s11888_s0 + $0x574] sm:$0xf] }
 0x123   : > { %7911 = vmatpush3.bf16.msra.mxu1 %v7352_v26  ;;  %v502_v26 = vld [vmem:[%s11888_s0 + $0x184] sm:$0xf]  ;;  %v7366_v11 = vcombine.low %v1002_v45, %v1006_v42  ;;  %v7371_v45 = vcombine.low %v1009_v38, %v1013_v29  ;;  %v642_v49 = vld [vmem:[%s11888_s0 + $0x558] sm:$0xf]  ;;  %v521_v38 = vld [vmem:[%s11888_s0 + $0x208] sm:$0xff] }
 0x124   : > { %4551 = vmatmul.mubr.bf16.gmra.mrb[8].mxu0 %v10074_v57  ;;  %7912 = vmatprep.subr.bf16.mxu1 %v7415_v9  ;;  %v570_v9 = vld [vmem:[%s11888_s0 + $0x360] sm:$0xf]  ;;  %v7429_v41 = vcombine.low %v1074_v62, %v1078_v32  ;;  %v7379_v42 = vcombine.high %v1017_v17, %v1021_v48  ;;  %v1025_v62 = vmax.bf16 %v8531_v3, %v513_v33  ;;  %v525_v29 = vld [vmem:[%s11888_s0 + $0x224] sm:$0xff] }
 0x125   : > { %5003 = vmatmul.mubr.bf16.gmra.mrb[8].mxu1 %v10074_v57  ;;  %5072 = vmatpush1.bf16.msra.mxu0 %v7357_v53  ;;  %v517_v53 = vld [vmem:[%s11888_s0 + $0x1ec] sm:$0xff]  ;;  %v1082_v57 = vmax.bf16 %v8531_v3, %v570_v9  ;;  %v7378_v33 = vcombine.low %v1017_v17, %v1021_v48  ;;  %v533_v17 = vld [vmem:[%s11888_s0 + $0x25c] sm:$0xff] }
 0x126   : > { %5073 = vmatprep.subr.bf16.mxu0 %v7365_v61  ;;  %4560 = vmatprep.mubr.bf16.mxu0 %v10093_v18  ;;  %v1014_v61 = vmax.bf16 %v8531_v3, %v502_v26  ;;  %v1029_v32 = vmax.bf16 %v8531_v3, %v517_v53  ;;  %v1018_v26 = vmax.bf16 %v8531_v3, %v506_v22 }
 0x127   : > { %5012 = vmatprep.mubr.bf16.mxu1 %v10093_v18  ;;  %7913 = vmatpush3.bf16.msra.mxu1 %v7359_v1  ;;  %v1086_v18 = vmax.bf16 %v8531_v3, %v574_v8  ;;  %v510_v1 = vld [vmem:[%s11888_s0 + $0x1bc] sm:$0xf]  ;;  %v1154_v8 = vmax.bf16 %v8531_v3, %v642_v49  ;;  %v1033_v53 = vmax.bf16 %v8531_v3, %v521_v38 }
 0x128   : > { %7914 = vmatprep.subr.bf16.mxu1 %v7422_v21  ;;  %v10153_v21 = vcombine.high %v1506_v52, %v1510_v20  ;;  %v7373_v40 = vcombine.low %v1010_v19, %v1014_v61  ;;  %v7386_v22 = vcombine.high %v1025_v62, %v1029_v32  ;;  %v1518_v19 = vld [vmem:[%s8755_s26 + $0x178] sm:$0xff]  ;;  %v10181_v61 = vcombine.low %v1506_v52, %v1510_v20 }
 0x129   : > { %5074 = vmatpush1.bf16.msra.mxu0 %v7364_v46  ;;  %v1022_v46 = vmax.bf16 %v8531_v3, %v510_v1  ;;  %v7436_v9 = vcombine.low %v1082_v57, %v1086_v18  ;;  %v529_v57 = vld [vmem:[%s11888_s0 + $0x240] sm:$0xff]  ;;  %v1514_v18 = vld [vmem:[%s8755_s26 + $0x158] sm:$0xff]  ;;  %v7385_v1 = vcombine.low %v1025_v62, %v1029_v32 }
 0x12a   : > { %5075 = vmatprep.subr.bf16.mxu0 %v7372_v16  ;;  %v1158_v16 = vmax.bf16 %v8531_v3, %v646_v5  ;;  %v10183_v49 = vcombine.high %v1514_v18, %v1518_v19  ;;  %v1041_v5 = vmax.bf16 %v8531_v3, %v529_v57  ;;  %v537_v38 = vld [vmem:[%s11888_s0 + $0x278] sm:$0xff]  ;;  %v553_v57 = vld [vmem:[%s11888_s0 + $0x2e8] sm:$0xff] }
 0x12b   : > { %7915 = vmatpush3.bf16.msra.mxu1 %v7366_v11  ;;  %v1037_v11 = vmax.bf16 %v8531_v3, %v525_v29  ;;  %v7380_v48 = vcombine.low %v1018_v26, %v1022_v46  ;;  %v541_v52 = vld [vmem:[%s11888_s0 + $0x294] sm:$0xff]  ;;  %v1049_v32 = vmax.bf16 %v8531_v3, %v537_v38 }
 0x12c   : > { %4561 = vmatmul.mubr.bf16.gmra.mrb[12].mxu0 %v10137_v10  ;;  %7916 = vmatprep.subr.bf16.mxu1 %v7429_v41  ;;  %v7499_v41 = vcombine.low %v1154_v8, %v1158_v16  ;;  %v1053_v29 = vmax.bf16 %v8531_v3, %v541_v52  ;;  %v1522_v26 = vld [vmem:[%s8755_s26 + $0x198] sm:$0xff]  ;;  %v10207_v8 = vcombine.low %v1514_v18, %v1518_v19  ;;  %v557_v18 = vld [vmem:[%s11888_s0 + $0x304] sm:$0xff] }
 0x12d   : > { %5013 = vmatmul.mubr.bf16.gmra.mrb[12].mxu1 %v10137_v10  ;;  %5076 = vmatpush1.bf16.msra.mxu0 %v7371_v45  ;;  %v7393_v45 = vcombine.high %v1033_v53, %v1037_v11  ;;  %v7392_v20 = vcombine.low %v1033_v53, %v1037_v11  ;;  %v1526_v46 = vld [vmem:[%s8755_s26 + $0x1b8] sm:$0xff] }
 0x12e   : > { %5077 = vmatprep.subr.bf16.mxu0 %v7379_v42  ;;  %4570 = vmatprep.mubr.bf16.mxu0 %v10153_v21  ;;  %v1045_v42 = vmax.bf16 %v8531_v3, %v533_v17  ;;  %v7406_v19 = vcombine.low %v1049_v32, %v1053_v29  ;;  %v10233_v38 = vcombine.low %v1522_v26, %v1526_v46 }
 0x12f   : > { %5022 = vmatprep.mubr.bf16.mxu1 %v10153_v21  ;;  %7917 = vmatpush3.bf16.msra.mxu1 %v7373_v40  ;;  %v545_v40 = vld [vmem:[%s11888_s0 + $0x2b0] sm:$0xff] }
 0x130   : > { %7918 = vmatprep.subr.bf16.mxu1 %v7436_v9  ;;  %v7400_v62 = vcombine.high %v1041_v5, %v1045_v42  ;;  %v549_v9 = vld [vmem:[%s11888_s0 + $0x2cc] sm:$0xff]  ;;  %v7399_v16 = vcombine.low %v1041_v5, %v1045_v42  ;;  %v1057_v53 = vmax.bf16 %v8531_v3, %v545_v40  ;;  %v1534_v5 = vld [vmem:[%s8755_s26 + $0x1f8] sm:$0xff] }
 0x131   : > { %5078 = vmatpush1.bf16.msra.mxu0 %v7378_v33  ;;  %v7407_v33 = vcombine.high %v1049_v32, %v1053_v29  ;;  %v1061_v11 = vmax.bf16 %v8531_v3, %v549_v9  ;;  %v565_v42 = vld [vmem:[%s11888_s0 + $0x33c] sm:$0xff]  ;;  %v573_v9 = vld [vmem:[%s11888_s0 + $0x374] sm:$0xff] }
 0x132   : > { %5079 = vmatprep.subr.bf16.mxu0 %v7386_v22  ;;  %v10209_v22 = vcombine.high %v1522_v26, %v1526_v46  ;;  %v1077_v29 = vmax.bf16 %v8531_v3, %v565_v42  ;;  %v569_v40 = vld [vmem:[%s11888_s0 + $0x358] sm:$0xff] }
 0x133   : > { %7919 = vmatpush3.bf16.msra.mxu1 %v7380_v48  ;;  %v7414_v17 = vcombine.high %v1057_v53, %v1061_v11  ;;  %v1065_v48 = vmax.bf16 %v8531_v3, %v553_v57  ;;  %v7413_v52 = vcombine.low %v1057_v53, %v1061_v11  ;;  %v577_v53 = vld [vmem:[%s11888_s0 + $0x390] sm:$0xff] }
 0x134   : > { %4571 = vmatmul.mubr.bf16.gmra.mrb[16].mxu0 %v10181_v61  ;;  %7968 = vmatprep.subr.bf16.mxu1 %v7499_v41  ;;  %v1069_v41 = vmax.bf16 %v8531_v3, %v557_v18  ;;  %v581_v11 = vld [vmem:[%s11888_s0 + $0x3ac] sm:$0xff] }
 0x135   : > { %5023 = vmatmul.mubr.bf16.gmra.mrb[16].mxu1 %v10181_v61  ;;  %5080 = vmatpush1.bf16.msra.mxu0 %v7385_v1  ;;  %v561_v1 = vld [vmem:[%s11888_s0 + $0x320] sm:$0xff] }
 0x136   : > { %5081 = vmatprep.subr.bf16.mxu0 %v7393_v45  ;;  %4580 = vmatprep.mubr.bf16.mxu0 %v10183_v49  ;;  %v1530_v45 = vld [vmem:[%s8755_s26 + $0x1d8] sm:$0xff]  ;;  %v1073_v32 = vmax.bf16 %v8531_v3, %v561_v1  ;;  %v7420_v26 = vcombine.low %v1065_v48, %v1069_v41 }
 0x137   : > { %5032 = vmatprep.mubr.bf16.mxu1 %v10183_v49  ;;  %v10257_v57 = vcombine.low %v1530_v45, %v1534_v5  ;;  %v578_v1 = vld [vmem:[%s11888_s0 + $0x398] sm:$0xf] }
 0x138   : > { %v7428_v46 = vcombine.high %v1073_v32, %v1077_v29  ;;  %v7427_v18 = vcombine.low %v1073_v32, %v1077_v29  ;;  %v650_v32 = vld [vmem:[%s11888_s0 + $0x590] sm:$0xf]  ;;  %v654_v29 = vld [vmem:[%s11888_s0 + $0x5ac] sm:$0xf] }
 0x139   : > { %5082 = vmatpush1.bf16.msra.mxu0 %v7392_v20  ;;  %v7421_v20 = vcombine.high %v1065_v48, %v1069_v41  ;;  %11967 = vst [vmem:[#allocation27_spill] sm:$0xff] %v10257_v57  ;;  %v585_v41 = vld [vmem:[%s11888_s0 + $0x3c8] sm:$0xff] }
 0x13a   : > { %5083 = vmatprep.subr.bf16.mxu0 %v7400_v62  ;;  %v10235_v62 = vcombine.high %v1530_v45, %v1534_v5  ;;  %v582_v45 = vld [vmem:[%s11888_s0 + $0x3b4] sm:$0xf]  ;;  %v589_v5 = vld [vmem:[%s11888_s0 + $0x3e4] sm:$0xff] }
 0x13c   : > { %4581 = vmatmul.mubr.bf16.gmra.mrb[20].mxu0 %v10207_v8  ;;  %11966 = vst [vmem:[#allocation26_spill] sm:$0xff] %v10235_v62 }
 0x13d   : > { %5033 = vmatmul.mubr.bf16.gmra.mrb[20].mxu1 %v10207_v8  ;;  %5084 = vmatpush1.bf16.msra.mxu0 %v7399_v16  ;;  %v1081_v16 = vmax.bf16 %v8531_v3, %v569_v40  ;;  %v1090_v40 = vmax.bf16 %v8531_v3, %v578_v1 }
 0x13e   : > { %5085 = vmatprep.subr.bf16.mxu0 %v7407_v33  ;;  %4590 = vmatprep.mubr.bf16.mxu0 %v10209_v22  ;;  %v1085_v33 = vmax.bf16 %v8531_v3, %v573_v9  ;;  %v1094_v9 = vmax.bf16 %v8531_v3, %v582_v45 }
 0x13f   : > { %5042 = vmatprep.mubr.bf16.mxu1 %v10209_v22 }
 0x140   : > { %v7435_v48 = vcombine.high %v1081_v16, %v1085_v33  ;;  %v7434_v42 = vcombine.low %v1081_v16, %v1085_v33  ;;  %v597_v16 = vld [vmem:[%s11888_s0 + $0x41c] sm:$0xff]  ;;  %v586_v33 = vld [vmem:[%s11888_s0 + $0x3d0] sm:$0xf] }
 0x141   : > { %5086 = vmatpush1.bf16.msra.mxu0 %v7406_v19  ;;  %v1089_v19 = vmax.bf16 %v8531_v3, %v577_v53  ;;  %v590_v53 = vld [vmem:[%s11888_s0 + $0x3ec] sm:$0xf]  ;;  %v1109_v45 = vmax.bf16 %v8531_v3, %v597_v16 }
 0x142   : > { %5087 = vmatprep.subr.bf16.mxu0 %v7414_v17  ;;  %v1093_v17 = vmax.bf16 %v8531_v3, %v581_v11  ;;  %v1162_v11 = vmax.bf16 %v8531_v3, %v650_v32  ;;  %v1098_v32 = vmax.bf16 %v8531_v3, %v586_v33  ;;  %v666_v33 = vld [vmem:[%s11888_s0 + $0x600] sm:$0xf] }
 0x144   : > { %4591 = vmatmul.mubr.bf16.gmra.mrb[24].mxu0 %v10233_v38 }
 0x145   : > { %5043 = vmatmul.mubr.bf16.gmra.mrb[24].mxu1 %v10233_v38  ;;  %5088 = vmatpush1.bf16.msra.mxu0 %v7413_v52  ;;  %v7442_v52 = vcombine.high %v1089_v19, %v1093_v17 }
 0x146   : > { %5089 = vmatprep.subr.bf16.mxu0 %v7421_v20  ;;  %4600 = vmatprep.mubr.bf16.mxu0 %v10235_v62  ;;  %v1097_v20 = vmax.bf16 %v8531_v3, %v585_v41  ;;  %v7441_v41 = vcombine.low %v1089_v19, %v1093_v17 }
 0x147   : > { %5052 = vmatprep.mubr.bf16.mxu1 %v10235_v62  ;;  %v601_v62 = vld [vmem:[%s11888_s0 + $0x438] sm:$0xff] }
 0x149   : > { %5090 = vmatpush1.bf16.msra.mxu0 %v7420_v26  ;;  %v1101_v26 = vmax.bf16 %v8531_v3, %v589_v5  ;;  %v7443_v5 = vcombine.low %v1090_v40, %v1094_v9  ;;  %v594_v40 = vld [vmem:[%s11888_s0 + $0x408] sm:$0xf]  ;;  %v598_v9 = vld [vmem:[%s11888_s0 + $0x424] sm:$0xf] }
 0x14a   : > { %5091 = vmatprep.subr.bf16.mxu0 %v7428_v46  ;;  %v593_v46 = vld [vmem:[%s11888_s0 + $0x400] sm:$0xff] }
 0x14b   : > { %v1105_v1 = vmax.bf16 %v8531_v3, %v593_v46  ;;  %v7448_v46 = vcombine.low %v1097_v20, %v1101_v26 }
 0x14c   : > { %4601 = vmatmul.mubr.bf16.gmra.mrb[28].mxu0 %v10257_v57 }
 0x14d   : > { %5053 = vmatmul.mubr.bf16.gmra.mrb[28].mxu1 %v10257_v57  ;;  %5092 = vmatpush1.bf16.msra.mxu0 %v7427_v18  ;;  %v1166_v18 = vmax.bf16 %v8531_v3, %v654_v29  ;;  %v7449_v57 = vcombine.high %v1097_v20, %v1101_v26  ;;  %v1102_v29 = vmax.bf16 %v8531_v3, %v590_v53  ;;  %v670_v53 = vld [vmem:[%s11888_s0 + $0x61c] sm:$0xf]  ;;  %v613_v20 = vld [vmem:[%s11888_s0 + $0x48c] sm:$0xff] }
 0x14e   : > { %5093 = vmatprep.subr.bf16.mxu0 %v7435_v48  ;;  %5095 = vmatprep.mubr.bf16.mxu0 %v8787_v60  ;;  %v658_v48 = vld [vmem:[%s11888_s0 + $0x5c8] sm:$0xf]  ;;  %v7456_v16 = vcombine.high %v1105_v1, %v1109_v45 }
 0x14f   : > { %5547 = vmatprep.mubr.bf16.mxu1 %v8787_v60  ;;  %v662_v60 = vld [vmem:[%s11888_s0 + $0x5e4] sm:$0xf]  ;;  %v1170_v19 = vmax.bf16 %v8531_v3, %v658_v48 }
 0x150   : > { %v1174_v17 = vmax.bf16 %v8531_v3, %v662_v60  ;;  %v1110_v60 = vmax.bf16 %v8531_v3, %v598_v9 }
 0x151   : > { %5094 = vmatpush1.bf16.msra.mxu0 %v7434_v42  ;;  %v605_v42 = vld [vmem:[%s11888_s0 + $0x454] sm:$0xff] }
 0x152   : > { %5176 = vmatprep.subr.bf16.mxu0 %v7442_v52  ;;  %v7506_v52 = vcombine.low %v1162_v11, %v1166_v18  ;;  %v7450_v11 = vcombine.low %v1098_v32, %v1102_v29  ;;  %v1113_v18 = vmax.bf16 %v8531_v3, %v601_v62  ;;  %v1117_v48 = vmax.bf16 %v8531_v3, %v605_v42  ;;  %v674_v29 = vld [vmem:[%s11888_s0 + $0x638] sm:$0xf]  ;;  %v678_v42 = vld [vmem:[%s11888_s0 + $0x654] sm:$0xf] }
 0x153   : > { %v7513_v26 = vcombine.low %v1170_v19, %v1174_v17  ;;  %v1178_v62 = vmax.bf16 %v8531_v3, %v666_v33  ;;  %v7455_v32 = vcombine.low %v1105_v1, %v1109_v45  ;;  %v617_v1 = vld [vmem:[%s11888_s0 + $0x4a8] sm:$0xff]  ;;  %v1186_v33 = vmax.bf16 %v8531_v3, %v674_v29 }
 0x154   : > { %5096 = vmatmul.mubr.bf16.vlgmr.msra.gmra.mrb[32].mxu0 %v8916_v31  ;;  %v7463_v19 = vcombine.high %v1113_v18, %v1117_v48  ;;  %v621_v45 = vld [vmem:[%s11888_s0 + $0x4c4] sm:$0xff] }
 0x155   : > { %5548 = vmatmul.mubr.bf16.vlgmr.msra.gmra.mrb[32].mxu1 %v8916_v31  ;;  %5177 = vmatpush1.bf16.msra.mxu0 %v7441_v41  ;;  %v609_v31 = vld [vmem:[%s11888_s0 + $0x470] sm:$0xff]  ;;  %v1182_v41 = vmax.bf16 %v8531_v3, %v670_v53  ;;  %v1190_v53 = vmax.bf16 %v8531_v3, %v678_v42 }
 0x156   : > { %7969 = vmatpush3.bf16.msra.mxu1 %v7443_v5  ;;  %5178 = vmatprep.subr.bf16.mxu0 %v7449_v57  ;;  %v1106_v57 = vmax.bf16 %v8531_v3, %v594_v40  ;;  %v606_v5 = vld [vmem:[%s11888_s0 + $0x45c] sm:$0xf]  ;;  %v1121_v17 = vmax.bf16 %v8531_v3, %v609_v31  ;;  %v614_v31 = vld [vmem:[%s11888_s0 + $0x494] sm:$0xf]  ;;  %v618_v42 = vld [vmem:[%s11888_s0 + $0x4b0] sm:$0xf] }
 0x157   : > { %5105 = vmatprep.mubr.bf16.mxu0 %v8927_v39  ;;  %5555 = vmatprep.mubr.bf16.mxu1 %v8927_v39  ;;  %v602_v39 = vld [vmem:[%s11888_s0 + $0x440] sm:$0xf] }
 0x158   : > { %7970 = vmatprep.subr.bf16.mxu1 %v7506_v52  ;;  %v1125_v52 = vmax.bf16 %v8531_v3, %v613_v20  ;;  %v7457_v40 = vcombine.low %v1106_v57, %v1110_v60  ;;  %v1114_v9 = vmax.bf16 %v8531_v3, %v602_v39  ;;  %v7462_v20 = vcombine.low %v1113_v18, %v1117_v48  ;;  %v686_v57 = vld [vmem:[%s11888_s0 + $0x68c] sm:$0xf]  ;;  %v629_v18 = vld [vmem:[%s11888_s0 + $0x4fc] sm:$0xff] }
 0x159   : > { %5179 = vmatpush1.bf16.msra.mxu0 %v7448_v46  ;;  %v1118_v46 = vmax.bf16 %v8531_v3, %v606_v5  ;;  %v1126_v5 = vmax.bf16 %v8531_v3, %v614_v31 }
 0x15a   : > { %5180 = vmatprep.subr.bf16.mxu0 %v7456_v16  ;;  %7971 = vmatpush3.bf16.msra.mxu1 %v7450_v11  ;;  %v7520_v16 = vcombine.low %v1178_v62, %v1182_v41  ;;  %v610_v11 = vld [vmem:[%s11888_s0 + $0x478] sm:$0xf]  ;;  %v7470_v60 = vcombine.high %v1121_v17, %v1125_v52  ;;  %v1129_v62 = vmax.bf16 %v8531_v3, %v617_v1  ;;  %v690_v1 = vld [vmem:[%s11888_s0 + $0x6a8] sm:$0xf] }
 0x15b   : > { %7972 = vmatprep.subr.bf16.mxu1 %v7513_v26  ;;  %v682_v26 = vld [vmem:[%s11888_s0 + $0x670] sm:$0xf]  ;;  %v1133_v41 = vmax.bf16 %v8531_v3, %v621_v45  ;;  %v7464_v48 = vcombine.low %v1114_v9, %v1118_v46  ;;  %v1122_v39 = vmax.bf16 %v8531_v3, %v610_v11  ;;  %v694_v45 = vld [vmem:[%s11888_s0 + $0x6c4] sm:$0xf] }
 0x15c   : > { %5106 = vmatmul.mubr.bf16.gmra.mrb[36].mxu0 %v8958_v59  ;;  %v1194_v29 = vmax.bf16 %v8531_v3, %v682_v26  ;;  %v1206_v26 = vmax.bf16 %v8531_v3, %v694_v45 }
 0x15d   : > { %5556 = vmatmul.mubr.bf16.gmra.mrb[36].mxu1 %v8958_v59  ;;  %5181 = vmatpush1.bf16.msra.mxu0 %v7455_v32  ;;  %v625_v59 = vld [vmem:[%s11888_s0 + $0x4e0] sm:$0xff]  ;;  %v7527_v32 = vcombine.low %v1186_v33, %v1190_v53  ;;  %v7477_v9 = vcombine.high %v1129_v62, %v1133_v41  ;;  %v633_v33 = vld [vmem:[%s11888_s0 + $0x518] sm:$0xff]  ;;  %v1130_v53 = vmax.bf16 %v8531_v3, %v618_v42 }
 0x15e   : > { %5182 = vmatprep.subr.bf16.mxu0 %v7463_v19  ;;  %5115 = vmatprep.mubr.bf16.mxu0 %v8969_v7  ;;  %v622_v19 = vld [vmem:[%s11888_s0 + $0x4cc] sm:$0xf]  ;;  %v1137_v46 = vmax.bf16 %v8531_v3, %v625_v59  ;;  %v7476_v59 = vcombine.low %v1129_v62, %v1133_v41 }
 0x15f   : > { %5563 = vmatprep.mubr.bf16.mxu1 %v8969_v7  ;;  %7973 = vmatpush3.bf16.msra.mxu1 %v7457_v40  ;;  %v1198_v7 = vmax.bf16 %v8531_v3, %v686_v57  ;;  %v7469_v40 = vcombine.low %v1121_v17, %v1125_v52  ;;  %v637_v17 = vld [vmem:[%s11888_s0 + $0x534] sm:$0xff]  ;;  %v7471_v52 = vcombine.low %v1122_v39, %v1126_v5  ;;  %v626_v57 = vld [vmem:[%s11888_s0 + $0x4e8] sm:$0xf]  ;;  %v645_v62 = vld [vmem:[%s11888_s0 + $0x56c] sm:$0xff] }
 0x160   : > { %7974 = vmatprep.subr.bf16.mxu1 %v7520_v16  ;;  %v1141_v16 = vmax.bf16 %v8531_v3, %v629_v18  ;;  %v1134_v11 = vmax.bf16 %v8531_v3, %v622_v19  ;;  %v698_v18 = vld [vmem:[%s11888_s0 + $0x6e0] sm:$0xf]  ;;  %v1145_v5 = vmax.bf16 %v8531_v3, %v633_v33  ;;  %v774_v33 = vld [vmem:[%s11888_s0 + $0x8f4] sm:$0xf] }
 0x161   : > { %5183 = vmatpush1.bf16.msra.mxu0 %v7462_v20  ;;  %v7534_v31 = vcombine.low %v1194_v29, %v1198_v7  ;;  %v1202_v20 = vmax.bf16 %v8531_v3, %v690_v1  ;;  %v1138_v29 = vmax.bf16 %v8531_v3, %v626_v57  ;;  %v1210_v19 = vmax.bf16 %v8531_v3, %v698_v18  ;;  %v638_v1 = vld [vmem:[%s11888_s0 + $0x53c] sm:$0xf] }
 0x162   : > { %5184 = vmatprep.subr.bf16.mxu0 %v7470_v60  ;;  %v630_v60 = vld [vmem:[%s11888_s0 + $0x504] sm:$0xf]  ;;  %v7484_v39 = vcombine.high %v1137_v46, %v1141_v16  ;;  %v7478_v41 = vcombine.low %v1130_v53, %v1134_v11  ;;  %v7483_v45 = vcombine.low %v1137_v46, %v1141_v16  ;;  %v1157_v53 = vmax.bf16 %v8531_v3, %v645_v62  ;;  %v649_v11 = vld [vmem:[%s11888_s0 + $0x588] sm:$0xff] }
 0x163   : > { %7975 = vmatpush3.bf16.msra.mxu1 %v7464_v48  ;;  %v702_v48 = vld [vmem:[%s11888_s0 + $0x6fc] sm:$0xf]  ;;  %v1142_v7 = vmax.bf16 %v8531_v3, %v630_v60  ;;  %v7541_v42 = vcombine.low %v1202_v20, %v1206_v26  ;;  %v653_v46 = vld [vmem:[%s11888_s0 + $0x5a4] sm:$0xff]  ;;  %v1150_v20 = vmax.bf16 %v8531_v3, %v638_v1  ;;  %v1286_v60 = vmax.bf16 %v8531_v3, %v774_v33 }
 0x164   : > { %5116 = vmatmul.mubr.bf16.gmra.mrb[40].mxu0 %v9000_v25  ;;  %7976 = vmatprep.subr.bf16.mxu1 %v7527_v32  ;;  %v1149_v32 = vmax.bf16 %v8531_v3, %v637_v17 }
 0x165   : > { %5564 = vmatmul.mubr.bf16.gmra.mrb[40].mxu1 %v9000_v25  ;;  %5185 = vmatpush1.bf16.msra.mxu0 %v7469_v40  ;;  %v641_v25 = vld [vmem:[%s11888_s0 + $0x550] sm:$0xff]  ;;  %v634_v40 = vld [vmem:[%s11888_s0 + $0x520] sm:$0xf]  ;;  %v7485_v16 = vcombine.low %v1138_v29, %v1142_v7  ;;  %v665_v7 = vld [vmem:[%s11888_s0 + $0x5f8] sm:$0xff] }
 0x166   : > { %5186 = vmatprep.subr.bf16.mxu0 %v7477_v9  ;;  %5125 = vmatprep.mubr.bf16.mxu0 %v9011_v36  ;;  %v770_v9 = vld [vmem:[%s11888_s0 + $0x8d8] sm:$0xf]  ;;  %v7491_v17 = vcombine.high %v1145_v5, %v1149_v32 }
 0x167   : > { %5571 = vmatprep.mubr.bf16.mxu1 %v9011_v36  ;;  %7977 = vmatpush3.bf16.msra.mxu1 %v7471_v52  ;;  %v1214_v36 = vmax.bf16 %v8531_v3, %v702_v48  ;;  %v1153_v52 = vmax.bf16 %v8531_v3, %v641_v25  ;;  %v1282_v57 = vmax.bf16 %v8531_v3, %v770_v9  ;;  %v657_v25 = vld [vmem:[%s11888_s0 + $0x5c0] sm:$0xff] }
 0x168   : > { %7978 = vmatprep.subr.bf16.mxu1 %v7534_v31  ;;  %v1146_v31 = vmax.bf16 %v8531_v3, %v634_v40  ;;  %v1161_v48 = vmax.bf16 %v8531_v3, %v649_v11  ;;  %v1169_v29 = vmax.bf16 %v8531_v3, %v657_v25  ;;  %v1177_v40 = vmax.bf16 %v8531_v3, %v665_v7  ;;  %v706_v7 = vld [vmem:[%s11888_s0 + $0x718] sm:$0xf] }
 0x169   : > { %5187 = vmatpush1.bf16.msra.mxu0 %v7476_v59  ;;  %v7548_v26 = vcombine.low %v1210_v19, %v1214_v36  ;;  %v7490_v59 = vcombine.low %v1145_v5, %v1149_v32  ;;  %v7498_v18 = vcombine.high %v1153_v52, %v1157_v53  ;;  %v7611_v32 = vcombine.low %v1282_v57, %v1286_v60 }
 0x16a   : > { %5188 = vmatprep.subr.bf16.mxu0 %v7484_v39  ;;  %v1165_v39 = vmax.bf16 %v8531_v3, %v653_v46  ;;  %v7492_v5 = vcombine.low %v1146_v31, %v1150_v20  ;;  %v7497_v62 = vcombine.low %v1153_v52, %v1157_v53  ;;  %v685_v53 = vld [vmem:[%s11888_s0 + $0x684] sm:$0xff] }
 0x16b   : > { %7979 = vmatpush3.bf16.msra.mxu1 %v7478_v41  ;;  %v1197_v31 = vmax.bf16 %v8531_v3, %v685_v53  ;;  %v689_v20 = vld [vmem:[%s11888_s0 + $0x6a0] sm:$0xff] }
 0x16c   : > { %5126 = vmatmul.mubr.bf16.gmra.mrb[44].mxu0 %v9042_v55  ;;  %7980 = vmatprep.subr.bf16.mxu1 %v7541_v42  ;;  %v7505_v41 = vcombine.high %v1161_v48, %v1165_v39  ;;  %v669_v42 = vld [vmem:[%s11888_s0 + $0x614] sm:$0xff]  ;;  %v7504_v19 = vcombine.low %v1161_v48, %v1165_v39  ;;  %v1201_v60 = vmax.bf16 %v8531_v3, %v689_v20 }
 0x16d   : > { %5572 = vmatmul.mubr.bf16.gmra.mrb[44].mxu1 %v9042_v55  ;;  %5189 = vmatpush1.bf16.msra.mxu0 %v7483_v45  ;;  %v661_v55 = vld [vmem:[%s11888_s0 + $0x5dc] sm:$0xff]  ;;  %v1181_v1 = vmax.bf16 %v8531_v3, %v669_v42  ;;  %v673_v45 = vld [vmem:[%s11888_s0 + $0x630] sm:$0xff]  ;;  %v717_v42 = vld [vmem:[%s11888_s0 + $0x764] sm:$0xff] }
 0x16e   : > { %5190 = vmatprep.subr.bf16.mxu0 %v7491_v17  ;;  %5135 = vmatprep.mubr.bf16.mxu0 %v9053_v4  ;;  %v1185_v17 = vmax.bf16 %v8531_v3, %v673_v45  ;;  %v782_v45 = vld [vmem:[%s11888_s0 + $0x92c] sm:$0xf] }
 0x16f   : > { %5579 = vmatprep.mubr.bf16.mxu1 %v9053_v4  ;;  %7981 = vmatpush3.bf16.msra.mxu1 %v7485_v16  ;;  %v1173_v4 = vmax.bf16 %v8531_v3, %v661_v55  ;;  %v7519_v33 = vcombine.high %v1177_v40, %v1181_v1  ;;  %v7518_v11 = vcombine.low %v1177_v40, %v1181_v1  ;;  %v778_v1 = vld [vmem:[%s11888_s0 + $0x910] sm:$0xf] }
 0x170   : > { %7982 = vmatprep.subr.bf16.mxu1 %v7548_v26  ;;  %v1290_v53 = vmax.bf16 %v8531_v3, %v778_v1  ;;  %v734_v1 = vld [vmem:[%s11888_s0 + $0x7dc] sm:$0xf] }
 0x171   : > { %5191 = vmatpush1.bf16.msra.mxu0 %v7490_v59  ;;  %v7512_v36 = vcombine.high %v1169_v29, %v1173_v4  ;;  %v7511_v9 = vcombine.low %v1169_v29, %v1173_v4  ;;  %v713_v4 = vld [vmem:[%s11888_s0 + $0x748] sm:$0xff] }
 0x172   : > { %5192 = vmatprep.subr.bf16.mxu0 %v7498_v18  ;;  %v701_v18 = vld [vmem:[%s11888_s0 + $0x6f4] sm:$0xff]  ;;  %v1225_v40 = vmax.bf16 %v8531_v3, %v713_v4 }
 0x173   : > { %7983 = vmatpush3.bf16.msra.mxu1 %v7492_v5  ;;  %v1213_v55 = vmax.bf16 %v8531_v3, %v701_v18  ;;  %v705_v5 = vld [vmem:[%s11888_s0 + $0x710] sm:$0xff] }
 0x174   : > { %5136 = vmatmul.mubr.bf16.gmra.mrb[48].mxu0 %v9084_v23  ;;  %8032 = vmatprep.subr.bf16.mxu1 %v7611_v32  ;;  %v709_v32 = vld [vmem:[%s11888_s0 + $0x72c] sm:$0xff] }
 0x175   : > { %5580 = vmatmul.mubr.bf16.gmra.mrb[48].mxu1 %v9084_v23  ;;  %5193 = vmatpush1.bf16.msra.mxu0 %v7497_v62  ;;  %v677_v23 = vld [vmem:[%s11888_s0 + $0x64c] sm:$0xff]  ;;  %v1217_v62 = vmax.bf16 %v8531_v3, %v705_v5 }
 0x176   : > { %5194 = vmatprep.subr.bf16.mxu0 %v7505_v41  ;;  %5145 = vmatprep.mubr.bf16.mxu0 %v9095_v35  ;;  %v1189_v52 = vmax.bf16 %v8531_v3, %v677_v23  ;;  %v1221_v41 = vmax.bf16 %v8531_v3, %v709_v32  ;;  %v1218_v23 = vmax.bf16 %v8531_v3, %v706_v7  ;;  %v741_v7 = vld [vmem:[%s11888_s0 + $0x80c] sm:$0xff] }
 0x177   : > { %5587 = vmatprep.mubr.bf16.mxu1 %v9095_v35  ;;  %v681_v35 = vld [vmem:[%s11888_s0 + $0x668] sm:$0xff] }
 0x178   : > { %v7526_v46 = vcombine.high %v1185_v17, %v1189_v52  ;;  %v1193_v16 = vmax.bf16 %v8531_v3, %v681_v35  ;;  %v7525_v26 = vcombine.low %v1185_v17, %v1189_v52  ;;  %v725_v17 = vld [vmem:[%s11888_s0 + $0x79c] sm:$0xff]  ;;  %v714_v52 = vld [vmem:[%s11888_s0 + $0x750] sm:$0xf]  ;;  %v718_v35 = vld [vmem:[%s11888_s0 + $0x76c] sm:$0xf] }
 0x179   : > { %5195 = vmatpush1.bf16.msra.mxu0 %v7504_v19  ;;  %v1237_v20 = vmax.bf16 %v8531_v3, %v725_v17  ;;  %v1253_v17 = vmax.bf16 %v8531_v3, %v741_v7 }
 0x17a   : > { %5196 = vmatprep.subr.bf16.mxu0 %v7512_v36  ;;  %v7533_v57 = vcombine.high %v1193_v16, %v1197_v31  ;;  %v7532_v48 = vcombine.low %v1193_v16, %v1197_v31  ;;  %v7554_v36 = vcombine.high %v1217_v62, %v1221_v41  ;;  %v7553_v16 = vcombine.low %v1217_v62, %v1221_v41  ;;  %v798_v62 = vld [vmem:[%s11888_s0 + $0x99c] sm:$0xf] }
 0x17c   : > { %5146 = vmatmul.mubr.bf16.gmra.mrb[52].mxu0 %v9126_v56 }
 0x17d   : > { %5588 = vmatmul.mubr.bf16.gmra.mrb[52].mxu1 %v9126_v56  ;;  %5197 = vmatpush1.bf16.msra.mxu0 %v7511_v9  ;;  %v693_v56 = vld [vmem:[%s11888_s0 + $0x6bc] sm:$0xff]  ;;  %v1229_v9 = vmax.bf16 %v8531_v3, %v717_v42 }
 0x17e   : > { %5198 = vmatprep.subr.bf16.mxu0 %v7519_v33  ;;  %5155 = vmatprep.mubr.bf16.mxu0 %v9137_v6  ;;  %v1205_v59 = vmax.bf16 %v8531_v3, %v693_v56  ;;  %v721_v33 = vld [vmem:[%s11888_s0 + $0x780] sm:$0xff] }
 0x17f   : > { %5595 = vmatprep.mubr.bf16.mxu1 %v9137_v6  ;;  %v697_v6 = vld [vmem:[%s11888_s0 + $0x6d8] sm:$0xff]  ;;  %v1233_v31 = vmax.bf16 %v8531_v3, %v721_v33  ;;  %v7560_v5 = vcombine.low %v1225_v40, %v1229_v9 }
 0x180   : > { %v7540_v39 = vcombine.high %v1201_v60, %v1205_v59  ;;  %v1209_v25 = vmax.bf16 %v8531_v3, %v697_v6  ;;  %v733_v6 = vld [vmem:[%s11888_s0 + $0x7d4] sm:$0xff] }
 0x181   : > { %5199 = vmatpush1.bf16.msra.mxu0 %v7518_v11  ;;  %v1294_v11 = vmax.bf16 %v8531_v3, %v782_v45  ;;  %v7568_v32 = vcombine.high %v1233_v31, %v1237_v20  ;;  %v1245_v4 = vmax.bf16 %v8531_v3, %v733_v6  ;;  %v7567_v45 = vcombine.low %v1233_v31, %v1237_v20  ;;  %v738_v20 = vld [vmem:[%s11888_s0 + $0x7f8] sm:$0xf] }
 0x182   : > { %5200 = vmatprep.subr.bf16.mxu0 %v7526_v46  ;;  %v7547_v29 = vcombine.high %v1209_v25, %v1213_v55  ;;  %v7546_v19 = vcombine.low %v1209_v25, %v1213_v55  ;;  %v786_v46 = vld [vmem:[%s11888_s0 + $0x948] sm:$0xf]  ;;  %v726_v55 = vld [vmem:[%s11888_s0 + $0x7a4] sm:$0xf] }
 0x183   : > { %v1298_v18 = vmax.bf16 %v8531_v3, %v786_v46  ;;  %v722_v25 = vld [vmem:[%s11888_s0 + $0x788] sm:$0xf]  ;;  %v1246_v46 = vmax.bf16 %v8531_v3, %v734_v1 }
 0x184   : > { %5156 = vmatmul.mubr.bf16.gmra.mrb[56].mxu0 %v9168_v27  ;;  %v1234_v42 = vmax.bf16 %v8531_v3, %v722_v25  ;;  %v1250_v25 = vmax.bf16 %v8531_v3, %v738_v20 }
 0x185   : > { %5596 = vmatmul.mubr.bf16.gmra.mrb[56].mxu1 %v9168_v27  ;;  %5201 = vmatpush1.bf16.msra.mxu0 %v7525_v26  ;;  %v7539_v27 = vcombine.low %v1201_v60, %v1205_v59  ;;  %v7561_v26 = vcombine.high %v1225_v40, %v1229_v9  ;;  %v1230_v60 = vmax.bf16 %v8531_v3, %v718_v35  ;;  %v729_v59 = vld [vmem:[%s11888_s0 + $0x7b8] sm:$0xff]  ;;  %v745_v35 = vld [vmem:[%s11888_s0 + $0x828] sm:$0xff] }
 0x186   : > { %5202 = vmatprep.subr.bf16.mxu0 %v7533_v57  ;;  %5165 = vmatprep.mubr.bf16.mxu0 %v9179_v50  ;;  %v1226_v57 = vmax.bf16 %v8531_v3, %v714_v52  ;;  %v1310_v40 = vmax.bf16 %v8531_v3, %v798_v62  ;;  %v1257_v6 = vmax.bf16 %v8531_v3, %v745_v35  ;;  %v750_v62 = vld [vmem:[%s11888_s0 + $0x84c] sm:$0xf] }
 0x187   : > { %5603 = vmatprep.mubr.bf16.mxu1 %v9179_v50  ;;  %v710_v50 = vld [vmem:[%s11888_s0 + $0x734] sm:$0xf] }
 0x188   : > { %v7562_v41 = vcombine.low %v1226_v57, %v1230_v60  ;;  %v810_v57 = vld [vmem:[%s11888_s0 + $0x9f0] sm:$0xf]  ;;  %v814_v60 = vld [vmem:[%s11888_s0 + $0xa0c] sm:$0xf] }
 0x189   : > { %5203 = vmatpush1.bf16.msra.mxu0 %v7532_v48 }
 0x18a   : > { %5204 = vmatprep.subr.bf16.mxu0 %v7540_v39  ;;  %v7618_v39 = vcombine.low %v1290_v53, %v1294_v11  ;;  %v749_v53 = vld [vmem:[%s11888_s0 + $0x844] sm:$0xff] }
 0x18c   : > { %5166 = vmatmul.mubr.bf16.gmra.mrb[60].mxu0 %v9210_v63 }
 0x18d   : > { %5604 = vmatmul.mubr.bf16.gmra.mrb[60].mxu1 %v9210_v63  ;;  %5205 = vmatpush1.bf16.msra.mxu0 %v7539_v27  ;;  %v1222_v63 = vmax.bf16 %v8531_v3, %v710_v50  ;;  %v794_v27 = vld [vmem:[%s11888_s0 + $0x980] sm:$0xf] }
 0x18e   : > { %5206 = vmatprep.subr.bf16.mxu0 %v7547_v29  ;;  %5208 = vmatprep.mubr.bf16.mxu0 %v9221_v13  ;;  %v1241_v29 = vmax.bf16 %v8531_v3, %v729_v59 }
 0x18f   : > { %5644 = vmatprep.mubr.bf16.mxu1 %v9221_v13  ;;  %v790_v13 = vld [vmem:[%s11888_s0 + $0x964] sm:$0xf]  ;;  %v7555_v56 = vcombine.low %v1218_v23, %v1222_v63  ;;  %v802_v23 = vld [vmem:[%s11888_s0 + $0x9b8] sm:$0xf]  ;;  %v806_v63 = vld [vmem:[%s11888_s0 + $0x9d4] sm:$0xf] }
 0x190   : > { %v1302_v48 = vmax.bf16 %v8531_v3, %v790_v13  ;;  %v7575_v9 = vcombine.high %v1241_v29, %v1245_v4  ;;  %v1318_v31 = vmax.bf16 %v8531_v3, %v806_v63  ;;  %v754_v63 = vld [vmem:[%s11888_s0 + $0x868] sm:$0xf] }
 0x191   : > { %5207 = vmatpush1.bf16.msra.mxu0 %v7546_v19  ;;  %v1238_v19 = vmax.bf16 %v8531_v3, %v726_v55 }
 0x192   : > { %5289 = vmatprep.subr.bf16.mxu0 %v7554_v36  ;;  %v7625_v50 = vcombine.low %v1298_v18, %v1302_v48  ;;  %v1306_v36 = vmax.bf16 %v8531_v3, %v794_v27  ;;  %v1261_v18 = vmax.bf16 %v8531_v3, %v749_v53  ;;  %v757_v48 = vld [vmem:[%s11888_s0 + $0x87c] sm:$0xff]  ;;  %v746_v27 = vld [vmem:[%s11888_s0 + $0x830] sm:$0xf] }
 0x193   : > { %v7569_v52 = vcombine.low %v1234_v42, %v1238_v19  ;;  %v761_v42 = vld [vmem:[%s11888_s0 + $0x898] sm:$0xff] }
 0x194   : > { %5209 = vmatmul.mubr.bf16.vlgmr.msra.gmra.mrb[32].mxu0 %v9251_v37  ;;  %v7632_v13 = vcombine.low %v1306_v36, %v1310_v40  ;;  %v765_v19 = vld [vmem:[%s11888_s0 + $0x8b4] sm:$0xff]  ;;  %v1258_v40 = vmax.bf16 %v8531_v3, %v746_v27  ;;  %v1273_v53 = vmax.bf16 %v8531_v3, %v761_v42 }
 0x195   : > { %5645 = vmatmul.mubr.bf16.vlgmr.msra.gmra.mrb[64].mxu1 %v9251_v37  ;;  %5290 = vmatpush1.bf16.msra.mxu0 %v7553_v16  ;;  %v737_v37 = vld [vmem:[%s11888_s0 + $0x7f0] sm:$0xff]  ;;  %v1314_v16 = vmax.bf16 %v8531_v3, %v802_v23 }
 0x196   : > { %8033 = vmatpush3.bf16.msra.mxu1 %v7555_v56  ;;  %5291 = vmatprep.subr.bf16.mxu0 %v7561_v26  ;;  %v1249_v33 = vmax.bf16 %v8531_v3, %v737_v37  ;;  %v742_v56 = vld [vmem:[%s11888_s0 + $0x814] sm:$0xf]  ;;  %v7574_v26 = vcombine.low %v1241_v29, %v1245_v4  ;;  %v818_v29 = vld [vmem:[%s11888_s0 + $0xa28] sm:$0xf]  ;;  %v822_v4 = vld [vmem:[%s11888_s0 + $0xa44] sm:$0xf]  ;;  %v7589_v37 = vcombine.high %v1257_v6, %v1261_v18 }
 0x197   : > { %5218 = vmatprep.mubr.bf16.mxu0 %v9263_v47  ;;  %5652 = vmatprep.mubr.bf16.mxu1 %v9263_v47  ;;  %v730_v47 = vld [vmem:[%s11888_s0 + $0x7c0] sm:$0xf]  ;;  %v1254_v55 = vmax.bf16 %v8531_v3, %v742_v56  ;;  %v1334_v23 = vmax.bf16 %v8531_v3, %v822_v4 }
 0x198   : > { %8034 = vmatprep.subr.bf16.mxu1 %v7618_v39  ;;  %v1242_v11 = vmax.bf16 %v8531_v3, %v730_v47  ;;  %v7582_v59 = vcombine.high %v1249_v33, %v1253_v17  ;;  %v1262_v47 = vmax.bf16 %v8531_v3, %v750_v62 }
 0x199   : > { %5292 = vmatpush1.bf16.msra.mxu0 %v7560_v5  ;;  %v7639_v5 = vcombine.low %v1314_v16, %v1318_v31  ;;  %v7583_v36 = vcombine.low %v1250_v25, %v1254_v55  ;;  %v1266_v16 = vmax.bf16 %v8531_v3, %v754_v63  ;;  %v781_v25 = vld [vmem:[%s11888_s0 + $0x924] sm:$0xff] }
 0x19a   : > { %5293 = vmatprep.subr.bf16.mxu0 %v7568_v32  ;;  %8035 = vmatpush3.bf16.msra.mxu1 %v7562_v41  ;;  %v7576_v39 = vcombine.low %v1242_v11, %v1246_v46  ;;  %v1322_v32 = vmax.bf16 %v8531_v3, %v810_v57  ;;  %v7581_v41 = vcombine.low %v1249_v33, %v1253_v17  ;;  %v826_v17 = vld [vmem:[%s11888_s0 + $0xa60] sm:$0xf]  ;;  %v773_v46 = vld [vmem:[%s11888_s0 + $0x8ec] sm:$0xff]  ;;  %v766_v57 = vld [vmem:[%s11888_s0 + $0x8bc] sm:$0xf] }
 0x19b   : > { %8036 = vmatprep.subr.bf16.mxu1 %v7625_v50  ;;  %v1269_v50 = vmax.bf16 %v8531_v3, %v757_v48  ;;  %v7588_v33 = vcombine.low %v1257_v6, %v1261_v18  ;;  %v1277_v11 = vmax.bf16 %v8531_v3, %v765_v19  ;;  %v1338_v56 = vmax.bf16 %v8531_v3, %v826_v17  ;;  %v902_v6 = vld [vmem:[%s11888_s0 + $0xc74] sm:$0xf] }
 0x19c   : > { %5219 = vmatmul.mubr.bf16.gmra.mrb[36].mxu0 %v9294_v12  ;;  %v1285_v48 = vmax.bf16 %v8531_v3, %v773_v46  ;;  %v1414_v62 = vmax.bf16 %v8531_v3, %v902_v6 }
 0x19d   : > { %5653 = vmatmul.mubr.bf16.gmra.mrb[68].mxu1 %v9294_v12  ;;  %5294 = vmatpush1.bf16.msra.mxu0 %v7567_v45  ;;  %v753_v12 = vld [vmem:[%s11888_s0 + $0x860] sm:$0xff]  ;;  %v1330_v45 = vmax.bf16 %v8531_v3, %v818_v29  ;;  %v7603_v18 = vcombine.high %v1273_v53, %v1277_v11 }
 0x19e   : > { %5295 = vmatprep.subr.bf16.mxu0 %v7575_v9  ;;  %5228 = vmatprep.mubr.bf16.mxu0 %v9305_v24  ;;  %v1265_v7 = vmax.bf16 %v8531_v3, %v753_v12  ;;  %v758_v9 = vld [vmem:[%s11888_s0 + $0x884] sm:$0xf] }
 0x19f   : > { %5660 = vmatprep.mubr.bf16.mxu1 %v9305_v24  ;;  %8037 = vmatpush3.bf16.msra.mxu1 %v7569_v52  ;;  %v1326_v24 = vmax.bf16 %v8531_v3, %v814_v60  ;;  %v830_v52 = vld [vmem:[%s11888_s0 + $0xa7c] sm:$0xf]  ;;  %v1270_v31 = vmax.bf16 %v8531_v3, %v758_v9  ;;  %v7653_v20 = vcombine.low %v1330_v45, %v1334_v23 }
 0x1a0   : > { %8038 = vmatprep.subr.bf16.mxu1 %v7632_v13  ;;  %v7596_v35 = vcombine.high %v1265_v7, %v1269_v50  ;;  %v7590_v13 = vcombine.low %v1258_v40, %v1262_v47  ;;  %v7595_v60 = vcombine.low %v1265_v7, %v1269_v50  ;;  %v785_v7 = vld [vmem:[%s11888_s0 + $0x940] sm:$0xff]  ;;  %v793_v47 = vld [vmem:[%s11888_s0 + $0x978] sm:$0xff] }
 0x1a1   : > { %5296 = vmatpush1.bf16.msra.mxu0 %v7574_v26  ;;  %v7646_v1 = vcombine.low %v1322_v32, %v1326_v24  ;;  %v762_v26 = vld [vmem:[%s11888_s0 + $0x8a0] sm:$0xf]  ;;  %v7597_v55 = vcombine.low %v1266_v16, %v1270_v31  ;;  %v1278_v32 = vmax.bf16 %v8531_v3, %v766_v57  ;;  %v1297_v40 = vmax.bf16 %v8531_v3, %v785_v7  ;;  %v829_v57 = vld [vmem:[%s11888_s0 + $0xa74] sm:$0xff] }
 0x1a2   : > { %5297 = vmatprep.subr.bf16.mxu0 %v7582_v59  ;;  %v898_v59 = vld [vmem:[%s11888_s0 + $0xc58] sm:$0xf]  ;;  %v1305_v63 = vmax.bf16 %v8531_v3, %v793_v47  ;;  %v817_v31 = vld [vmem:[%s11888_s0 + $0xa20] sm:$0xff] }
 0x1a3   : > { %8039 = vmatpush3.bf16.msra.mxu1 %v7576_v39  ;;  %v777_v39 = vld [vmem:[%s11888_s0 + $0x908] sm:$0xff]  ;;  %v1410_v27 = vmax.bf16 %v8531_v3, %v898_v59 }
 0x1a4   : > { %5229 = vmatmul.mubr.bf16.gmra.mrb[40].mxu0 %v9336_v51  ;;  %8040 = vmatprep.subr.bf16.mxu1 %v7639_v5  ;;  %v1274_v5 = vmax.bf16 %v8531_v3, %v762_v26  ;;  %v1289_v4 = vmax.bf16 %v8531_v3, %v777_v39 }
 0x1a5   : > { %5661 = vmatmul.mubr.bf16.gmra.mrb[72].mxu1 %v9336_v51  ;;  %5298 = vmatpush1.bf16.msra.mxu0 %v7581_v41  ;;  %v769_v51 = vld [vmem:[%s11888_s0 + $0x8d0] sm:$0xff]  ;;  %v7602_v41 = vcombine.low %v1273_v53, %v1277_v11  ;;  %v7723_v42 = vcombine.low %v1410_v27, %v1414_v62  ;;  %v813_v11 = vld [vmem:[%s11888_s0 + $0xa04] sm:$0xff] }
 0x1a6   : > { %5299 = vmatprep.subr.bf16.mxu0 %v7589_v37  ;;  %5238 = vmatprep.mubr.bf16.mxu0 %v9347_v2  ;;  %v1281_v12 = vmax.bf16 %v8531_v3, %v769_v51  ;;  %v1293_v37 = vmax.bf16 %v8531_v3, %v781_v25  ;;  %v7604_v50 = vcombine.low %v1274_v5, %v1278_v32  ;;  %v841_v5 = vld [vmem:[%s11888_s0 + $0xac8] sm:$0xff]  ;;  %v834_v32 = vld [vmem:[%s11888_s0 + $0xa98] sm:$0xf] }
 0x1a7   : > { %5668 = vmatprep.mubr.bf16.mxu1 %v9347_v2  ;;  %8041 = vmatpush3.bf16.msra.mxu1 %v7583_v36  ;;  %v1342_v2 = vmax.bf16 %v8531_v3, %v830_v52  ;;  %v1325_v16 = vmax.bf16 %v8531_v3, %v813_v11  ;;  %v11968_v11 = vld [vmem:[#allocation4_spill] sm:$0xff] }
 0x1a8   : > { %8042 = vmatprep.subr.bf16.mxu1 %v7646_v1  ;;  %v7610_v29 = vcombine.high %v1281_v12, %v1285_v48  ;;  %v7609_v19 = vcombine.low %v1281_v12, %v1285_v48  ;;  %v7617_v36 = vcombine.high %v1289_v4, %v1293_v37  ;;  %v797_v1 = vld [vmem:[%s11888_s0 + $0x994] sm:$0xff]  ;;  %v7616_v45 = vcombine.low %v1289_v4, %v1293_v37  ;;  %v837_v48 = vld [vmem:[%s11888_s0 + $0xaac] sm:$0xff] }
 0x1a9   : > { %5300 = vmatpush1.bf16.msra.mxu0 %v7588_v33  ;;  %v7660_v24 = vcombine.low %v1338_v56, %v1342_v2  ;;  %v1309_v9 = vmax.bf16 %v8531_v3, %v797_v1  ;;  %v801_v33 = vld [vmem:[%s11888_s0 + $0x9b0] sm:$0xff]  ;;  %v1329_v2 = vmax.bf16 %v8531_v3, %v817_v31  ;;  %v1349_v25 = vmax.bf16 %v8531_v3, %v837_v48  ;;  %v910_v4 = vld [vmem:[%s11888_s0 + $0xcac] sm:$0xf] }
 0x1aa   : > { %5301 = vmatprep.subr.bf16.mxu0 %v7596_v35  ;;  %v1313_v35 = vmax.bf16 %v8531_v3, %v801_v33  ;;  %v833_v12 = vld [vmem:[%s11888_s0 + $0xa90] sm:$0xff]  ;;  %v1346_v37 = vmax.bf16 %v8531_v3, %v834_v32  ;;  %v858_v32 = vld [vmem:[%s11888_s0 + $0xb40] sm:$0xf] }
 0x1ab   : > { %8043 = vmatpush3.bf16.msra.mxu1 %v7590_v13  ;;  %v7631_v52 = vcombine.high %v1305_v63, %v1309_v9  ;;  %v7630_v51 = vcombine.low %v1305_v63, %v1309_v9  ;;  %v1345_v39 = vmax.bf16 %v8531_v3, %v833_v12  ;;  %v11969_v12 = vld [vmem:[#allocation5_spill] sm:$0xff] }
 0x1ac   : > { %5239 = vmatmul.mubr.bf16.gmra.mrb[44].mxu0 %v9378_v30  ;;  %8044 = vmatprep.subr.bf16.mxu1 %v7653_v20 }
 0x1ad   : > { %5669 = vmatmul.mubr.bf16.gmra.mrb[76].mxu1 %v9378_v30  ;;  %5302 = vmatpush1.bf16.msra.mxu0 %v7595_v60  ;;  %v789_v30 = vld [vmem:[%s11888_s0 + $0x95c] sm:$0xff]  ;;  %v7666_v62 = vcombine.high %v1345_v39, %v1349_v25  ;;  %v7665_v47 = vcombine.low %v1345_v39, %v1349_v25 }
 0x1ae   : > { %5303 = vmatprep.subr.bf16.mxu0 %v7603_v18  ;;  %5248 = vmatprep.mubr.bf16.mxu0 %v9389_v44  ;;  %v1341_v18 = vmax.bf16 %v8531_v3, %v829_v57 }
 0x1af   : > { %5676 = vmatprep.mubr.bf16.mxu1 %v9389_v44  ;;  %8045 = vmatpush3.bf16.msra.mxu1 %v7597_v55  ;;  %v1301_v44 = vmax.bf16 %v8531_v3, %v789_v30  ;;  %v849_v30 = vld [vmem:[%s11888_s0 + $0xb00] sm:$0xff] }
 0x1b0   : > { %8046 = vmatprep.subr.bf16.mxu1 %v7660_v24  ;;  %v845_v24 = vld [vmem:[%s11888_s0 + $0xae4] sm:$0xff]  ;;  %v10886_v1 = vmax.bf16 %v8531_v3, %v849_v30 }
 0x1b1   : > { %5304 = vmatpush1.bf16.msra.mxu0 %v7602_v41  ;;  %v7624_v23 = vcombine.high %v1297_v40, %v1301_v44  ;;  %v7623_v17 = vcombine.low %v1297_v40, %v1301_v44  ;;  %v10852_v41 = vmax.bf16 %v8531_v3, %v841_v5  ;;  %v1357_v7 = vmax.bf16 %v8531_v3, %v845_v24  ;;  %v914_v44 = vld [vmem:[%s11888_s0 + $0xcc8] sm:$0xf] }
 0x1b2   : > { %5305 = vmatprep.subr.bf16.mxu0 %v7610_v29  ;;  %v906_v29 = vld [vmem:[%s11888_s0 + $0xc90] sm:$0xf]  ;;  %v1422_v40 = vmax.bf16 %v8531_v3, %v910_v4  ;;  %v934_v4 = vld [vmem:[%s11888_s0 + $0xd54] sm:$0xf] }
 0x1b3   : > { %8047 = vmatpush3.bf16.msra.mxu1 %v7604_v50  ;;  %v853_v50 = vld [vmem:[%s11888_s0 + $0xb1c] sm:$0xff]  ;;  %v7673_v63 = vcombine.high %v10852_v41, %v1357_v7 }
 0x1b4   : > { %5249 = vmatmul.mubr.bf16.gmra.mrb[48].mxu0 %v9420_v14  ;;  %8096 = vmatprep.subr.bf16.mxu1 %v7723_v42  ;;  %v842_v42 = vld [vmem:[%s11888_s0 + $0xad0] sm:$0xf] }
 0x1b5   : > { %5677 = vmatmul.mubr.bf16.gmra.mrb[80].mxu1 %v9420_v14  ;;  %5306 = vmatpush1.bf16.msra.mxu0 %v7609_v19  ;;  %v805_v14 = vld [vmem:[%s11888_s0 + $0x9cc] sm:$0xff]  ;;  %v1354_v9 = vmax.bf16 %v8531_v3, %v842_v42 }
 0x1b6   : > { %5307 = vmatprep.subr.bf16.mxu0 %v7617_v36  ;;  %5258 = vmatprep.mubr.bf16.mxu0 %v9431_v28  ;;  %v1317_v53 = vmax.bf16 %v8531_v3, %v805_v14  ;;  %v846_v19 = vld [vmem:[%s11888_s0 + $0xaec] sm:$0xf]  ;;  %v1418_v36 = vmax.bf16 %v8531_v3, %v906_v29  ;;  %v857_v14 = vld [vmem:[%s11888_s0 + $0xb38] sm:$0xff] }
 0x1b7   : > { %5684 = vmatprep.mubr.bf16.mxu1 %v9431_v28  ;;  %v809_v28 = vld [vmem:[%s11888_s0 + $0x9e8] sm:$0xff]  ;;  %v1358_v33 = vmax.bf16 %v8531_v3, %v846_v19  ;;  %v930_v29 = vld [vmem:[%s11888_s0 + $0xd38] sm:$0xf] }
 0x1b8   : > { %v7638_v46 = vcombine.high %v1313_v35, %v1317_v53  ;;  %v1321_v13 = vmax.bf16 %v8531_v3, %v809_v28  ;;  %v7637_v20 = vcombine.low %v1313_v35, %v1317_v53  ;;  %v869_v35 = vld [vmem:[%s11888_s0 + $0xb8c] sm:$0xff]  ;;  %v1426_v53 = vmax.bf16 %v8531_v3, %v914_v44  ;;  %v866_v19 = vld [vmem:[%s11888_s0 + $0xb78] sm:$0xf] }
 0x1b9   : > { %5308 = vmatpush1.bf16.msra.mxu0 %v7616_v45  ;;  %v10889_v45 = vmax.bf16 %v8531_v3, %v853_v50  ;;  %v1370_v50 = vmax.bf16 %v8531_v3, %v858_v32  ;;  %v950_v32 = vld [vmem:[%s11888_s0 + $0xdc4] sm:$0xf] }
 0x1ba   : > { %5309 = vmatprep.subr.bf16.mxu0 %v7624_v23  ;;  %v7645_v56 = vcombine.high %v1321_v13, %v1325_v16  ;;  %v7644_v60 = vcombine.low %v1321_v13, %v1325_v16  ;;  %v850_v13 = vld [vmem:[%s11888_s0 + $0xb08] sm:$0xf]  ;;  %v854_v16 = vld [vmem:[%s11888_s0 + $0xb24] sm:$0xf] }
 0x1bb   : > { %v7680_v31 = vcombine.high %v10886_v1, %v10889_v45  ;;  %v1366_v39 = vmax.bf16 %v8531_v3, %v854_v16  ;;  %v7679_v25 = vcombine.low %v10886_v1, %v10889_v45  ;;  %v1442_v1 = vmax.bf16 %v8531_v3, %v930_v29  ;;  %v913_v16 = vld [vmem:[%s11888_s0 + $0xcc0] sm:$0xff] }
 0x1bc   : > { %5259 = vmatmul.mubr.bf16.gmra.mrb[52].mxu0 %v9462_v58  ;;  %v1446_v45 = vmax.bf16 %v8531_v3, %v934_v4  ;;  %v886_v29 = vld [vmem:[%s11888_s0 + $0xc04] sm:$0xf] }
 0x1bd   : > { %5685 = vmatmul.mubr.bf16.gmra.mrb[84].mxu1 %v9462_v58  ;;  %5310 = vmatpush1.bf16.msra.mxu0 %v7623_v17  ;;  %v821_v58 = vld [vmem:[%s11888_s0 + $0xa3c] sm:$0xff]  ;;  %v861_v17 = vld [vmem:[%s11888_s0 + $0xb54] sm:$0xff] }
 0x1be   : > { %5311 = vmatprep.subr.bf16.mxu0 %v7631_v52  ;;  %5268 = vmatprep.mubr.bf16.mxu0 %v9473_v15  ;;  %v1333_v26 = vmax.bf16 %v8531_v3, %v821_v58  ;;  %v865_v52 = vld [vmem:[%s11888_s0 + $0xb70] sm:$0xff]  ;;  %v10920_v58 = vmax.bf16 %v8531_v3, %v857_v14 }
 0x1bf   : > { %5692 = vmatprep.mubr.bf16.mxu1 %v9473_v15  ;;  %v825_v15 = vld [vmem:[%s11888_s0 + $0xa58] sm:$0xff]  ;;  %v10935_v57 = vmax.bf16 %v8531_v3, %v865_v52  ;;  %v897_v52 = vld [vmem:[%s11888_s0 + $0xc50] sm:$0xff] }
 0x1c0   : > { %v7652_v59 = vcombine.high %v1329_v2, %v1333_v26  ;;  %v1337_v6 = vmax.bf16 %v8531_v3, %v825_v15  ;;  %v7674_v15 = vcombine.low %v1354_v9, %v1358_v33 }
 0x1c1   : > { %5312 = vmatpush1.bf16.msra.mxu0 %v7630_v51  ;;  %v7672_v51 = vcombine.low %v10852_v41, %v1357_v7 }
 0x1c2   : > { %5313 = vmatprep.subr.bf16.mxu0 %v7638_v46  ;;  %v7659_v55 = vcombine.high %v1337_v6, %v1341_v18  ;;  %v7658_v27 = vcombine.low %v1337_v6, %v1341_v18  ;;  %v7730_v46 = vcombine.low %v1418_v36, %v1422_v40  ;;  %v881_v6 = vld [vmem:[%s11888_s0 + $0xbe0] sm:$0xff]  ;;  %v870_v36 = vld [vmem:[%s11888_s0 + $0xb94] sm:$0xf] }
 0x1c3   : > { %v885_v18 = vld [vmem:[%s11888_s0 + $0xbfc] sm:$0xff]  ;;  %v11970_v40 = vld [vmem:[#allocation6_spill] sm:$0xff] }
 0x1c4   : > { %5269 = vmatmul.mubr.bf16.gmra.mrb[56].mxu0 %v9504_v43  ;;  %v10973_v41 = vmax.bf16 %v8531_v3, %v885_v18  ;;  %v7751_v18 = vcombine.low %v1442_v1, %v1446_v45 }
 0x1c5   : > { %5693 = vmatmul.mubr.bf16.gmra.mrb[88].mxu1 %v9504_v43  ;;  %5314 = vmatpush1.bf16.msra.mxu0 %v7637_v20  ;;  %v7651_v43 = vcombine.low %v1329_v2, %v1333_v26  ;;  %v10923_v20 = vmax.bf16 %v8531_v3, %v861_v17  ;;  %v922_v2 = vld [vmem:[%s11888_s0 + $0xd00] sm:$0xf]  ;;  %v926_v26 = vld [vmem:[%s11888_s0 + $0xd1c] sm:$0xf]  ;;  %v893_v17 = vld [vmem:[%s11888_s0 + $0xc34] sm:$0xff] }
 0x1c6   : > { %5315 = vmatprep.subr.bf16.mxu0 %v7645_v56  ;;  %5278 = vmatprep.mubr.bf16.mxu0 %v9515_v0  ;;  %v873_v56 = vld [vmem:[%s11888_s0 + $0xba8] sm:$0xff]  ;;  %v1438_v5 = vmax.bf16 %v8531_v3, %v926_v26  ;;  %v925_v26 = vld [vmem:[%s11888_s0 + $0xd14] sm:$0xff] }
 0x1c7   : > { %5700 = vmatprep.mubr.bf16.mxu1 %v9515_v0  ;;  %v838_v0 = vld [vmem:[%s11888_s0 + $0xab4] sm:$0xf]  ;;  %v10964_v24 = vmax.bf16 %v8531_v3, %v873_v56 }
 0x1c9   : > { %5316 = vmatpush1.bf16.msra.mxu0 %v7644_v60  ;;  %v10938_v60 = vmax.bf16 %v8531_v3, %v869_v35  ;;  %v901_v35 = vld [vmem:[%s11888_s0 + $0xc6c] sm:$0xff] }
 0x1ca   : > { %5317 = vmatprep.subr.bf16.mxu0 %v7652_v59  ;;  %v877_v59 = vld [vmem:[%s11888_s0 + $0xbc4] sm:$0xff] }
 0x1cb   : > { %v7694_v7 = vcombine.high %v10935_v57, %v10938_v60  ;;  %v7693_v44 = vcombine.low %v10935_v57, %v10938_v60  ;;  %v954_v60 = vld [vmem:[%s11888_s0 + $0xde0] sm:$0xf] }
 0x1cc   : > { %5279 = vmatmul.mubr.bf16.gmra.mrb[60].mxu0 %v9546_v34 }
 0x1cd   : > { %5701 = vmatmul.mubr.bf16.gmra.mrb[92].mxu1 %v9546_v34  ;;  %5318 = vmatpush1.bf16.msra.mxu0 %v7651_v43  ;;  %v1350_v34 = vmax.bf16 %v8531_v3, %v838_v0  ;;  %v1362_v43 = vmax.bf16 %v8531_v3, %v850_v13  ;;  %v862_v0 = vld [vmem:[%s11888_s0 + $0xb5c] sm:$0xf]  ;;  %v909_v13 = vld [vmem:[%s11888_s0 + $0xca4] sm:$0xff] }
 0x1ce   : > { %5319 = vmatprep.subr.bf16.mxu0 %v7659_v55  ;;  %5321 = vmatprep.mubr.bf16.mxu0 %v9557_v54  ;;  %v1434_v55 = vmax.bf16 %v8531_v3, %v922_v2  ;;  %v1374_v42 = vmax.bf16 %v8531_v3, %v862_v0  ;;  %v921_v2 = vld [vmem:[%s11888_s0 + $0xcf8] sm:$0xff]  ;;  %v882_v0 = vld [vmem:[%s11888_s0 + $0xbe8] sm:$0xf] }
 0x1cf   : > { %5741 = vmatprep.mubr.bf16.mxu1 %v9557_v54  ;;  %v918_v54 = vld [vmem:[%s11888_s0 + $0xce4] sm:$0xf]  ;;  %v7667_v23 = vcombine.low %v1346_v37, %v1350_v34  ;;  %v7687_v37 = vcombine.high %v10920_v58, %v10923_v20  ;;  %v7686_v34 = vcombine.low %v10920_v58, %v10923_v20  ;;  %v7681_v30 = vcombine.low %v1362_v43, %v1366_v39  ;;  %v917_v58 = vld [vmem:[%s11888_s0 + $0xcdc] sm:$0xff]  ;;  %v946_v43 = vld [vmem:[%s11888_s0 + $0xda8] sm:$0xf] }
 0x1d0   : > { %v1430_v28 = vmax.bf16 %v8531_v3, %v918_v54  ;;  %v7744_v54 = vcombine.low %v1434_v55, %v1438_v5  ;;  %v11070_v39 = vmax.bf16 %v8531_v3, %v901_v35  ;;  %v11076_v55 = vmax.bf16 %v8531_v3, %v909_v13 }
 0x1d1   : > { %5320 = vmatpush1.bf16.msra.mxu0 %v7658_v27  ;;  %v10967_v27 = vmax.bf16 %v8531_v3, %v877_v59  ;;  %v11055_v59 = vmax.bf16 %v8531_v3, %v893_v17  ;;  %v11079_v5 = vmax.bf16 %v8531_v3, %v913_v16 }
 0x1d2   : > { %5402 = vmatprep.subr.bf16.mxu0 %v7666_v62  ;;  %v7737_v48 = vcombine.low %v1426_v53, %v1430_v28  ;;  %v10970_v62 = vmax.bf16 %v8531_v3, %v881_v6  ;;  %v11971_v53 = vld [vmem:[#allocation7_spill] sm:$0xff]  ;;  %v11058_v6 = vmax.bf16 %v8531_v3, %v897_v52 }
 0x1d3   : > { %v7701_v9 = vcombine.high %v10964_v24, %v10967_v27  ;;  %v7700_v33 = vcombine.low %v10964_v24, %v10967_v27 }
 0x1d4   : > { %5322 = vmatmul.mubr.bf16.vlgmr.msra.gmra.mrb[32].mxu0 %v11968_v11  ;;  %v7708_v14 = vcombine.high %v10970_v62, %v10973_v41  ;;  %v7707_v28 = vcombine.low %v10970_v62, %v10973_v41  ;;  %v7721_v17 = vcombine.low %v11058_v6, %v11070_v39 }
 0x1d5   : > { %5742 = vmatmul.mubr.bf16.vlgmr.msra.gmra.mrb[96].mxu1 %v11968_v11  ;;  %5403 = vmatpush1.bf16.msra.mxu0 %v7665_v47  ;;  %v889_v47 = vld [vmem:[%s11888_s0 + $0xc18] sm:$0xff]  ;;  %v1378_v11 = vmax.bf16 %v8531_v3, %v866_v19 }
 0x1d6   : > { %8097 = vmatpush3.bf16.msra.mxu1 %v7667_v23  ;;  %5404 = vmatprep.subr.bf16.mxu0 %v7673_v63  ;;  %v938_v23 = vld [vmem:[%s11888_s0 + $0xd70] sm:$0xf]  ;;  %v942_v63 = vld [vmem:[%s11888_s0 + $0xd8c] sm:$0xf] }
 0x1d7   : > { %5331 = vmatprep.mubr.bf16.mxu0 %v11969_v12  ;;  %5749 = vmatprep.mubr.bf16.mxu1 %v11969_v12  ;;  %v1450_v20 = vmax.bf16 %v8531_v3, %v938_v23  ;;  %v1454_v56 = vmax.bf16 %v8531_v3, %v942_v63  ;;  %v874_v12 = vld [vmem:[%s11888_s0 + $0xbb0] sm:$0xf]  ;;  %v7722_v23 = vcombine.high %v11058_v6, %v11070_v39  ;;  %v11973_v63 = vld [vmem:[#allocation9_spill] sm:$0xff] }
 0x1d8   : > { %8098 = vmatprep.subr.bf16.mxu1 %v7730_v46  ;;  %v905_v46 = vld [vmem:[%s11888_s0 + $0xc88] sm:$0xff] }
 0x1d9   : > { %5405 = vmatpush1.bf16.msra.mxu0 %v7672_v51  ;;  %v1382_v51 = vmax.bf16 %v8531_v3, %v870_v36  ;;  %v11102_v36 = vmax.bf16 %v8531_v3, %v946_v43  ;;  %v894_v43 = vld [vmem:[%s11888_s0 + $0xc3c] sm:$0xf] }
 0x1da   : > { %5406 = vmatprep.subr.bf16.mxu0 %v7680_v31  ;;  %8099 = vmatpush3.bf16.msra.mxu1 %v7674_v15  ;;  %v7688_v31 = vcombine.low %v1370_v50, %v1374_v42  ;;  %v11052_v15 = vmax.bf16 %v8531_v3, %v889_v47  ;;  %v7758_v50 = vcombine.low %v1450_v20, %v1454_v56 }
 0x1db   : > { %8100 = vmatprep.subr.bf16.mxu1 %v7737_v48  ;;  %v878_v48 = vld [vmem:[%s11888_s0 + $0xbcc] sm:$0xf]  ;;  %v7695_v4 = vcombine.low %v1378_v11, %v1382_v51  ;;  %v1386_v42 = vmax.bf16 %v8531_v3, %v874_v12  ;;  %v11113_v47 = vmax.bf16 %v8531_v3, %v886_v29  ;;  %v958_v11 = vld [vmem:[%s11888_s0 + $0xdfc] sm:$0xf]  ;;  %v890_v51 = vld [vmem:[%s11888_s0 + $0xc20] sm:$0xf] }
 0x1dc   : > { %5332 = vmatmul.mubr.bf16.gmra.mrb[36].mxu0 %v11970_v40  ;;  %v1390_v19 = vmax.bf16 %v8531_v3, %v878_v48  ;;  %v7715_v1 = vcombine.high %v11052_v15, %v11055_v59  ;;  %v7714_v45 = vcombine.low %v11052_v15, %v11055_v59  ;;  %v11161_v48 = vmax.bf16 %v8531_v3, %v954_v60 }
 0x1dd   : > { %5750 = vmatmul.mubr.bf16.gmra.mrb[100].mxu1 %v11970_v40  ;;  %5407 = vmatpush1.bf16.msra.mxu0 %v7679_v25  ;;  %v11073_v25 = vmax.bf16 %v8531_v3, %v905_v46  ;;  %v11107_v40 = vmax.bf16 %v8531_v3, %v950_v32  ;;  %v11171_v24 = vmax.bf16 %v8531_v3, %v890_v51 }
 0x1de   : > { %5408 = vmatprep.subr.bf16.mxu0 %v7687_v37  ;;  %5341 = vmatprep.mubr.bf16.mxu0 %v11971_v53  ;;  %v11091_v37 = vmax.bf16 %v8531_v3, %v917_v58 }
 0x1df   : > { %5757 = vmatprep.mubr.bf16.mxu1 %v11971_v53  ;;  %8101 = vmatpush3.bf16.msra.mxu1 %v7681_v30  ;;  %v11097_v30 = vmax.bf16 %v8531_v3, %v925_v26  ;;  %v7729_v52 = vcombine.high %v11073_v25, %v11076_v55  ;;  %v7728_v57 = vcombine.low %v11073_v25, %v11076_v55 }
 0x1e0   : > { %8102 = vmatprep.subr.bf16.mxu1 %v7744_v54  ;;  %v11110_v54 = vmax.bf16 %v8531_v3, %v882_v0  ;;  %v7735_v35 = vcombine.low %v11079_v5, %v11091_v37  ;;  %v7702_v53 = vcombine.low %v1386_v42, %v1390_v19  ;;  %v7765_v58 = vcombine.low %v11102_v36, %v11107_v40 }
 0x1e1   : > { %5409 = vmatpush1.bf16.msra.mxu0 %v7686_v34  ;;  %v11094_v34 = vmax.bf16 %v8531_v3, %v921_v2 }
 0x1e2   : > { %5410 = vmatprep.subr.bf16.mxu0 %v7694_v7  ;;  %v11972_v7 = vld [vmem:[#allocation8_spill] sm:$0xff]  ;;  %v7709_v20 = vcombine.low %v11110_v54, %v11113_v47  ;;  %v11974_v47 = vld [vmem:[#allocation10_spill] sm:$0xff] }
 0x1e3   : > { %8103 = vmatpush3.bf16.msra.mxu1 %v7688_v31  ;;  %v7743_v31 = vcombine.high %v11094_v34, %v11097_v30 }
 0x1e4   : > { %5342 = vmatmul.mubr.bf16.gmra.mrb[40].mxu0 %v11972_v7  ;;  %8104 = vmatprep.subr.bf16.mxu1 %v7751_v18 }
 0x1e5   : > { %5758 = vmatmul.mubr.bf16.gmra.mrb[104].mxu1 %v11972_v7  ;;  %5411 = vmatpush1.bf16.msra.mxu0 %v7693_v44 }
 0x1e6   : > { %5412 = vmatprep.subr.bf16.mxu0 %v7701_v9  ;;  %5351 = vmatprep.mubr.bf16.mxu0 %v11973_v63  ;;  %v7736_v9 = vcombine.high %v11079_v5, %v11091_v37 }
 0x1e7   : > { %v4532_v44 = vpop.f32.mrb[0].mxu0  ;;  %5765 = vmatprep.mubr.bf16.mxu1 %v11973_v63  ;;  %8105 = vmatpush3.bf16.msra.mxu1 %v7695_v4  ;;  %v4984_v13 = vpop.f32.mrb[0].mxu1  ;;  %v11180_v63 = vmax.bf16 %v8531_v3, %v894_v43 }
 0x1e8   : > { %v6512_v46 = vmul.f32 %v4532_v44, %v4532_v44  ;;  %v4534_v16 = vpop.f32.mrb[1].mxu0  ;;  %8106 = vmatprep.subr.bf16.mxu1 %v7758_v50  ;;  %v4986_v18 = vpop.f32.mrb[1].mxu1  ;;  %v1470_v50 = vmax.bf16 %v8531_v3, %v958_v11  ;;  %v6514_v27 = vmul.f32 %v4984_v13, %v4984_v13 }
 0x1e9   : > { %v7840_v56 = vpack.c.bf16 %v4534_v16, %v4532_v44  ;;  %v6335_v2 = vadd.f32 %v4534_v16, %v4532_v44  ;;  %v6513_v26 = vmul.f32 %v4534_v16, %v4534_v16  ;;  %v4536_v12 = vpop.f32.mrb[2].mxu0  ;;  %5413 = vmatpush1.bf16.msra.mxu0 %v7700_v33  ;;  %v7841_v32 = vpack.c.bf16 %v4986_v18, %v4984_v13  ;;  %v4988_v29 = vpop.f32.mrb[2].mxu1  ;;  %v933_v16 = vld [vmem:[%s11888_s0 + $0xd4c] sm:$0xff] }
 0x1ea   : > { %v6519_v0 = vmul.f32 %v4536_v12, %v4536_v12  ;;  %v4538_v4 = vpop.f32.mrb[3].mxu0  ;;  %5414 = vmatprep.subr.bf16.mxu0 %v7708_v14  ;;  %v4990_v36 = vpop.f32.mrb[3].mxu1  ;;  %v929_v14 = vld [vmem:[%s11888_s0 + $0xd30] sm:$0xff]  ;;  %v6515_v44 = vmul.f32 %v4986_v18, %v4986_v18  ;;  %v7772_v41 = vcombine.low %v11161_v48, %v1470_v50 }
 0x1eb   : > { %6255 = vst [vmem:[%s11149_s29] sm:$0xff] %v7840_v56  ;;  %v6624_v33 = vadd.f32 %v6513_v26, %v6512_v46  ;;  %v6336_v42 = vadd.f32 %v6335_v2, %v4984_v13  ;;  %v7844_v19 = vpack.c.bf16 %v4538_v4, %v4536_v12  ;;  %8107 = vmatpush3.bf16.msra.mxu1 %v7702_v53  ;;  %6256 = vst [vmem:[%s11149_s29 + $0x8] sm:$0xff] %v7841_v32  ;;  %v11975_v13 = vld [vmem:[#allocation11_spill] sm:$0xff] }
 0x1ec   : > { %v6343_v7 = vadd.f32 %v4538_v4, %v4536_v12  ;;  %v6520_v40 = vmul.f32 %v4538_v4, %v4538_v4  ;;  %v7845_v54 = vpack.c.bf16 %v4990_v36, %v4988_v29  ;;  %5352 = vmatmul.mubr.bf16.gmra.mrb[44].mxu0 %v11974_v47  ;;  %v6521_v53 = vmul.f32 %v4988_v29, %v4988_v29 }
 0x1ed   : > { %v11182_v60 = vadd.f32 %v6336_v42, %v4986_v18  ;;  %v6625_v11 = vadd.f32 %v6624_v33, %v6514_v27  ;;  %6259 = vst [vmem:[%s11149_s29 + $0x1c] sm:$0xff] %v7844_v19  ;;  %5766 = vmatmul.mubr.bf16.gmra.mrb[108].mxu1 %v11974_v47  ;;  %5415 = vmatpush1.bf16.msra.mxu0 %v7707_v28 }
 0x1ee   : > { %v6632_v51 = vadd.f32 %v6520_v40, %v6519_v0  ;;  %6260 = vst [vmem:[%s11149_s29 + $0x24] sm:$0xff] %v7845_v54  ;;  %v6344_v46 = vadd.f32 %v6343_v7, %v4988_v29  ;;  %5416 = vmatprep.subr.bf16.mxu0 %v7715_v1  ;;  %5361 = vmatprep.mubr.bf16.mxu0 %v11975_v13 }
 0x1ef   : > { %v11197_v56 = vadd.f32 %v6625_v11, %v6515_v44  ;;  %v4542_v2 = vpop.f32.mrb[4].mxu0  ;;  %5773 = vmatprep.mubr.bf16.mxu1 %v11975_v13  ;;  %v11201_v62 = vmax.bf16 %v8531_v3, %v929_v14  ;;  %8108 = vmatprep.subr.bf16.mxu1 %v7765_v58  ;;  %v6522_v1 = vmul.f32 %v4990_v36, %v4990_v36  ;;  %v4994_v12 = vpop.f32.mrb[4].mxu1  ;;  %v11976_v14 = vld [vmem:[#allocation12_spill] sm:$0xff]  ;;  %v11977_v13 = vld [vmem:[#allocation13_spill] sm:$0xff] }
 0x1f0   : > { %v11204_v28 = vadd.f32 %v6344_v46, %v4990_v36  ;;  %v6633_v26 = vadd.f32 %v6632_v51, %v6521_v53  ;;  %v6526_v18 = vmul.f32 %v4542_v2, %v4542_v2  ;;  %v4544_v43 = vpop.f32.mrb[5].mxu0  ;;  %8109 = vmatpush3.bf16.msra.mxu1 %v7709_v20  ;;  %v4996_v4 = vpop.f32.mrb[5].mxu1  ;;  %v11210_v58 = vmax.bf16 %v8531_v3, %v933_v16  ;;  %v941_v16 = vld [vmem:[%s11888_s0 + $0xd84] sm:$0xff] }
 0x1f1   : > { %v7848_v32 = vpack.c.bf16 %v4544_v43, %v4542_v2  ;;  %v6351_v0 = vadd.f32 %v4544_v43, %v4542_v2  ;;  %v6527_v29 = vmul.f32 %v4544_v43, %v4544_v43  ;;  %v4546_v27 = vpop.f32.mrb[6].mxu0  ;;  %5417 = vmatpush1.bf16.msra.mxu0 %v7714_v45  ;;  %v7849_v50 = vpack.c.bf16 %v4996_v4, %v4994_v12  ;;  %v4998_v42 = vpop.f32.mrb[6].mxu1 }
 0x1f2   : > { %v11212_v48 = vadd.f32 %v6633_v26, %v6522_v1  ;;  %v6533_v33 = vmul.f32 %v4546_v27, %v4546_v27  ;;  %v4548_v20 = vpop.f32.mrb[7].mxu0  ;;  %5418 = vmatprep.subr.bf16.mxu0 %v7722_v23  ;;  %v7716_v19 = vcombine.low %v11171_v24, %v11180_v63  ;;  %v6528_v36 = vmul.f32 %v4994_v12, %v4994_v12  ;;  %v5000_v7 = vpop.f32.mrb[7].mxu1  ;;  %v937_v24 = vld [vmem:[%s11888_s0 + $0xd68] sm:$0xff] }
 0x1f3   : > { %6263 = vst [vmem:[%s11149_s29 + $0x38] sm:$0xff] %v7848_v32  ;;  %v6640_v15 = vadd.f32 %v6527_v29, %v6526_v18  ;;  %v6352_v59 = vadd.f32 %v6351_v0, %v4994_v12  ;;  %v7852_v45 = vpack.c.bf16 %v4548_v20, %v4546_v27  ;;  %8110 = vmatprep.subr.bf16.mxu1 %v7772_v41  ;;  %6264 = vst [vmem:[%s11149_s29 + $0x40] sm:$0xff] %v7849_v50 }
 0x1f4   : > { %v6359_v40 = vadd.f32 %v4548_v20, %v4546_v27  ;;  %v6534_v54 = vmul.f32 %v4548_v20, %v4548_v20  ;;  %v7853_v47 = vpack.c.bf16 %v5000_v7, %v4998_v42  ;;  %5362 = vmatmul.mubr.bf16.gmra.mrb[48].mxu0 %v11976_v14  ;;  %v7742_v23 = vcombine.low %v11094_v34, %v11097_v30 }
 0x1f5   : > { %v11227_v63 = vadd.f32 %v6352_v59, %v4996_v4  ;;  %v6529_v44 = vmul.f32 %v4996_v4, %v4996_v4  ;;  %v6641_v11 = vadd.f32 %v6640_v15, %v6528_v36  ;;  %6267 = vst [vmem:[%s11149_s29 + $0x54] sm:$0xff] %v7852_v45  ;;  %5774 = vmatmul.mubr.bf16.gmra.mrb[112].mxu1 %v11976_v14  ;;  %v11978_v14 = vld [vmem:[#allocation14_spill] sm:$0xff] }
 0x1f6   : > { %5419 = vmatpush1.bf16.msra.mxu0 %v7721_v17  ;;  %v6535_v53 = vmul.f32 %v4998_v42, %v4998_v42  ;;  %v6648_v51 = vadd.f32 %v6534_v54, %v6533_v33  ;;  %6268 = vst [vmem:[%s11149_s29 + $0x5c] sm:$0xff] %v7853_v47  ;;  %v6360_v46 = vadd.f32 %v6359_v40, %v4998_v42  ;;  %v945_v17 = vld [vmem:[%s11888_s0 + $0xda0] sm:$0xff] }
 0x1f7   : > { %5420 = vmatprep.subr.bf16.mxu0 %v7729_v52  ;;  %5371 = vmatprep.mubr.bf16.mxu0 %v11977_v13  ;;  %v11242_v2 = vadd.f32 %v6641_v11, %v6529_v44  ;;  %v4552_v41 = vpop.f32.mrb[8].mxu0  ;;  %v7750_v6 = vcombine.high %v11201_v62, %v11210_v58  ;;  %v11248_v39 = vmax.bf16 %v8531_v3, %v937_v24  ;;  %v949_v33 = vld [vmem:[%s11888_s0 + $0xdbc] sm:$0xff] }
 0x1f8   : > { %5781 = vmatprep.mubr.bf16.mxu1 %v11977_v13  ;;  %8111 = vmatpush3.bf16.msra.mxu1 %v7716_v19  ;;  %v11253_v52 = vadd.f32 %v6360_v46, %v5000_v7  ;;  %v6536_v1 = vmul.f32 %v5000_v7, %v5000_v7  ;;  %v6649_v26 = vadd.f32 %v6648_v51, %v6535_v53  ;;  %v5004_v12 = vpop.f32.mrb[8].mxu1  ;;  %v4554_v43 = vpop.f32.mrb[9].mxu0  ;;  %v11979_v13 = vld [vmem:[#allocation15_spill] sm:$0xff] }
 0x1f9   : > { %v6540_v18 = vmul.f32 %v4552_v41, %v4552_v41  ;;  %v7856_v32 = vpack.c.bf16 %v4554_v43, %v4552_v41  ;;  %v6367_v0 = vadd.f32 %v4554_v43, %v4552_v41  ;;  %v6541_v29 = vmul.f32 %v4554_v43, %v4554_v43  ;;  %v5006_v4 = vpop.f32.mrb[9].mxu1  ;;  %v4556_v27 = vpop.f32.mrb[10].mxu0 }
 0x1fa   : > { %5421 = vmatpush1.bf16.msra.mxu0 %v7728_v57  ;;  %v11259_v50 = vmax.bf16 %v8531_v3, %v941_v16  ;;  %v11264_v42 = vadd.f32 %v6649_v26, %v6536_v1  ;;  %v7857_v20 = vpack.c.bf16 %v5006_v4, %v5004_v12  ;;  %v6547_v19 = vmul.f32 %v4556_v27, %v4556_v27  ;;  %v5008_v36 = vpop.f32.mrb[10].mxu1  ;;  %v4558_v15 = vpop.f32.mrb[11].mxu0 }
 0x1fb   : > { %5422 = vmatprep.subr.bf16.mxu0 %v7736_v9  ;;  %v11270_v25 = vmax.bf16 %v8531_v3, %v945_v17  ;;  %v6542_v55 = vmul.f32 %v5004_v12, %v5004_v12  ;;  %6271 = vst [vmem:[%s11149_s29 + $0x70] sm:$0xff] %v7856_v32  ;;  %v6656_v57 = vadd.f32 %v6541_v29, %v6540_v18  ;;  %v5010_v7 = vpop.f32.mrb[11].mxu1 }
 0x1fc   : > { %v6368_v59 = vadd.f32 %v6367_v0, %v5004_v12  ;;  %v7860_v45 = vpack.c.bf16 %v4558_v15, %v4556_v27  ;;  %6272 = vst [vmem:[%s11149_s29 + $0x78] sm:$0xff] %v7857_v20  ;;  %v6375_v40 = vadd.f32 %v4558_v15, %v4556_v27  ;;  %v6548_v54 = vmul.f32 %v4558_v15, %v4558_v15 }
 0x1fd   : > { %v7861_v47 = vpack.c.bf16 %v5010_v7, %v5008_v36  ;;  %5372 = vmatmul.mubr.bf16.gmra.mrb[52].mxu0 %v11978_v14  ;;  %v11276_v24 = vmax.bf16 %v8531_v3, %v949_v33  ;;  %v6543_v44 = vmul.f32 %v5006_v4, %v5006_v4  ;;  %v6657_v11 = vadd.f32 %v6656_v57, %v6542_v55 }
 0x1fe   : > { %v11278_v9 = vadd.f32 %v6368_v59, %v5006_v4  ;;  %6275 = vst [vmem:[%s11149_s29 + $0x8c] sm:$0xff] %v7860_v45  ;;  %5782 = vmatmul.mubr.bf16.gmra.mrb[116].mxu1 %v11978_v14  ;;  %5423 = vmatpush1.bf16.msra.mxu0 %v7735_v35  ;;  %v6549_v53 = vmul.f32 %v5008_v36, %v5008_v36  ;;  %v953_v35 = vld [vmem:[%s11888_s0 + $0xdd8] sm:$0xff] }
 0x1ff   : > { %v6664_v51 = vadd.f32 %v6548_v54, %v6547_v19  ;;  %6276 = vst [vmem:[%s11149_s29 + $0x94] sm:$0xff] %v7861_v47  ;;  %v6376_v46 = vadd.f32 %v6375_v40, %v5008_v36  ;;  %5424 = vmatprep.subr.bf16.mxu0 %v7743_v31  ;;  %5381 = vmatprep.mubr.bf16.mxu0 %v11979_v13  ;;  %v4562_v41 = vpop.f32.mrb[12].mxu0  ;;  %v11980_v54 = vld [vmem:[#allocation16_spill] sm:$0xff] }
 0x200   : > { %v11290_v16 = vadd.f32 %v6657_v11, %v6543_v44  ;;  %5789 = vmatprep.mubr.bf16.mxu1 %v11979_v13  ;;  %v7749_v17 = vcombine.low %v11201_v62, %v11210_v58  ;;  %v7757_v5 = vcombine.high %v11248_v39, %v11259_v50  ;;  %v7756_v37 = vcombine.low %v11248_v39, %v11259_v50  ;;  %v5014_v12 = vpop.f32.mrb[12].mxu1  ;;  %v4564_v43 = vpop.f32.mrb[13].mxu0  ;;  %v957_v50 = vld [vmem:[%s11888_s0 + $0xdf4] sm:$0xff] }
 0x201   : > { %v11302_v31 = vadd.f32 %v6376_v46, %v5010_v7  ;;  %v6550_v1 = vmul.f32 %v5010_v7, %v5010_v7  ;;  %v6665_v26 = vadd.f32 %v6664_v51, %v6549_v53  ;;  %v6554_v18 = vmul.f32 %v4562_v41, %v4562_v41  ;;  %v5016_v4 = vpop.f32.mrb[13].mxu1  ;;  %v4566_v27 = vpop.f32.mrb[14].mxu0  ;;  %v11981_v53 = vld [vmem:[#allocation17_spill] sm:$0xff] }
 0x202   : > { %v7864_v32 = vpack.c.bf16 %v4564_v43, %v4562_v41  ;;  %v6383_v0 = vadd.f32 %v4564_v43, %v4562_v41  ;;  %v6555_v29 = vmul.f32 %v4564_v43, %v4564_v43  ;;  %5425 = vmatpush1.bf16.msra.mxu0 %v7742_v23  ;;  %v7764_v39 = vcombine.high %v11270_v25, %v11276_v24  ;;  %v5018_v36 = vpop.f32.mrb[14].mxu1  ;;  %v4568_v15 = vpop.f32.mrb[15].mxu0 }
 0x203   : > { %v11312_v33 = vadd.f32 %v6665_v26, %v6550_v1  ;;  %v7865_v20 = vpack.c.bf16 %v5016_v4, %v5014_v12  ;;  %v6561_v19 = vmul.f32 %v4566_v27, %v4566_v27  ;;  %5426 = vmatprep.subr.bf16.mxu0 %v7750_v6  ;;  %v11318_v34 = vmax.bf16 %v8531_v3, %v953_v35  ;;  %v5020_v59 = vpop.f32.mrb[15].mxu1 }
 0x204   : > { %v6556_v30 = vmul.f32 %v5014_v12, %v5014_v12  ;;  %6279 = vst [vmem:[%s11149_s29 + $0xa8] sm:$0xff] %v7864_v32  ;;  %v6672_v23 = vadd.f32 %v6555_v29, %v6554_v18  ;;  %v6384_v55 = vadd.f32 %v6383_v0, %v5014_v12  ;;  %v7868_v57 = vpack.c.bf16 %v4568_v15, %v4566_v27 }
 0x205   : > { %6280 = vst [vmem:[%s11149_s29 + $0xb0] sm:$0xff] %v7865_v20  ;;  %v6391_v45 = vadd.f32 %v4568_v15, %v4566_v27  ;;  %v6562_v7 = vmul.f32 %v4568_v15, %v4568_v15  ;;  %v7869_v40 = vpack.c.bf16 %v5020_v59, %v5018_v36  ;;  %5382 = vmatmul.mubr.bf16.gmra.mrb[56].mxu0 %v11980_v54 }
 0x206   : > { %v11324_v62 = vmax.bf16 %v8531_v3, %v957_v50  ;;  %v11326_v58 = vadd.f32 %v6384_v55, %v5016_v4  ;;  %v6557_v6 = vmul.f32 %v5016_v4, %v5016_v4  ;;  %v6673_v47 = vadd.f32 %v6672_v23, %v6556_v30  ;;  %6283 = vst [vmem:[%s11149_s29 + $0xc4] sm:$0xff] %v7868_v57  ;;  %v11982_v55 = vld [vmem:[#allocation18_spill] sm:$0xff] }
 0x207   : > { %5790 = vmatmul.mubr.bf16.gmra.mrb[120].mxu1 %v11980_v54  ;;  %5427 = vmatpush1.bf16.msra.mxu0 %v7749_v17  ;;  %v6563_v14 = vmul.f32 %v5018_v36, %v5018_v36  ;;  %v6680_v44 = vadd.f32 %v6562_v7, %v6561_v19  ;;  %6284 = vst [vmem:[%s11149_s29 + $0xcc] sm:$0xff] %v7869_v40  ;;  %v4572_v46 = vpop.f32.mrb[16].mxu0 }
 0x208   : > { %v6392_v11 = vadd.f32 %v6391_v45, %v5018_v36  ;;  %5428 = vmatprep.subr.bf16.mxu0 %v7757_v5  ;;  %5391 = vmatprep.mubr.bf16.mxu0 %v11981_v53  ;;  %v11332_v51 = vadd.f32 %v6673_v47, %v6557_v6  ;;  %v6564_v13 = vmul.f32 %v5020_v59, %v5020_v59  ;;  %v5024_v1 = vpop.f32.mrb[16].mxu1  ;;  %v4574_v26 = vpop.f32.mrb[17].mxu0  ;;  %v11983_v6 = vld [vmem:[#allocation19_spill] sm:$0xff] }
 0x209   : > { %5797 = vmatprep.mubr.bf16.mxu1 %v11981_v53  ;;  %v6681_v41 = vadd.f32 %v6680_v44, %v6563_v14  ;;  %v6568_v35 = vmul.f32 %v4572_v46, %v4572_v46  ;;  %v7872_v17 = vpack.c.bf16 %v4574_v26, %v4572_v46  ;;  %v6399_v18 = vadd.f32 %v4574_v26, %v4572_v46  ;;  %v5026_v43 = vpop.f32.mrb[17].mxu1  ;;  %v4576_v5 = vpop.f32.mrb[18].mxu0 }
 0x20a   : > { %v11335_v3 = vadd.f32 %v6392_v11, %v5020_v59  ;;  %v6569_v12 = vmul.f32 %v4574_v26, %v4574_v26  ;;  %v7763_v32 = vcombine.low %v11270_v25, %v11276_v24  ;;  %v7873_v29 = vpack.c.bf16 %v5026_v43, %v5024_v1  ;;  %v5028_v27 = vpop.f32.mrb[18].mxu1  ;;  %v4578_v50 = vpop.f32.mrb[19].mxu0 }
 0x20b   : > { %5429 = vmatpush1.bf16.msra.mxu0 %v7756_v37  ;;  %v11339_v0 = vadd.f32 %v6681_v41, %v6564_v13  ;;  %v6575_v4 = vmul.f32 %v4576_v5, %v4576_v5  ;;  %v7771_v20 = vcombine.high %v11318_v34, %v11324_v62  ;;  %v6570_v19 = vmul.f32 %v5024_v1, %v5024_v1  ;;  %v5030_v37 = vpop.f32.mrb[19].mxu1 }
 0x20c   : > { %5430 = vmatprep.subr.bf16.mxu0 %v7764_v39  ;;  %6287 = vst [vmem:[%s11149_s29 + $0xe0] sm:$0xff] %v7872_v17  ;;  %v6688_v36 = vadd.f32 %v6569_v12, %v6568_v35  ;;  %v6400_v15 = vadd.f32 %v6399_v18, %v5024_v1  ;;  %v7876_v30 = vpack.c.bf16 %v4578_v50, %v4576_v5  ;;  %6288 = vst [vmem:[%s11149_s29 + $0xe8] sm:$0xff] %v7873_v29 }
 0x20d   : > { %v6407_v25 = vadd.f32 %v4578_v50, %v4576_v5  ;;  %v6576_v24 = vmul.f32 %v4578_v50, %v4578_v50  ;;  %v7877_v23 = vpack.c.bf16 %v5030_v37, %v5028_v27  ;;  %5392 = vmatmul.mubr.bf16.gmra.mrb[60].mxu0 %v11982_v55  ;;  %v7770_v39 = vcombine.low %v11318_v34, %v11324_v62 }
 0x20e   : > { %v11348_v57 = vadd.f32 %v6400_v15, %v5026_v43  ;;  %v6571_v59 = vmul.f32 %v5026_v43, %v5026_v43  ;;  %v6689_v45 = vadd.f32 %v6688_v36, %v6570_v19  ;;  %6291 = vst [vmem:[%s11149_s29 + $0xfc] sm:$0xff] %v7876_v30  ;;  %v6577_v7 = vmul.f32 %v5028_v27, %v5028_v27  ;;  %v11984_v15 = vld [vmem:[#allocation20_spill] sm:$0xff] }
 0x20f   : > { %5798 = vmatmul.mubr.bf16.gmra.mrb[124].mxu1 %v11982_v55  ;;  %5431 = vmatpush1.bf16.msra.mxu0 %v7763_v32  ;;  %v6696_v40 = vadd.f32 %v6576_v24, %v6575_v4  ;;  %6292 = vst [vmem:[%s11149_s29 + $0x104] sm:$0xff] %v7877_v23  ;;  %v6408_v54 = vadd.f32 %v6407_v25, %v5028_v27  ;;  %v4582_v14 = vpop.f32.mrb[20].mxu0  ;;  %v11985_v24 = vld [vmem:[#allocation21_spill] sm:$0xff] }
 0x210   : > { %5432 = vmatprep.subr.bf16.mxu0 %v7771_v20  ;;  %5434 = vmatprep.mubr.bf16.mxu0 %v11983_v6  ;;  %v11354_v47 = vadd.f32 %v6689_v45, %v6571_v59  ;;  %v6578_v62 = vmul.f32 %v5030_v37, %v5030_v37  ;;  %v6582_v11 = vmul.f32 %v4582_v14, %v4582_v14  ;;  %v5034_v53 = vpop.f32.mrb[20].mxu1  ;;  %v4584_v46 = vpop.f32.mrb[21].mxu0 }
 0x211   : > { %5838 = vmatprep.mubr.bf16.mxu1 %v11983_v6  ;;  %v11357_v34 = vadd.f32 %v6408_v54, %v5030_v37  ;;  %v6697_v44 = vadd.f32 %v6696_v40, %v6577_v7  ;;  %v7880_v13 = vpack.c.bf16 %v4584_v46, %v4582_v14  ;;  %v6415_v41 = vadd.f32 %v4584_v46, %v4582_v14  ;;  %v5036_v1 = vpop.f32.mrb[21].mxu1  ;;  %v4586_v26 = vpop.f32.mrb[22].mxu0 }
 0x212   : > { %v6583_v35 = vmul.f32 %v4584_v46, %v4584_v46  ;;  %v7881_v18 = vpack.c.bf16 %v5036_v1, %v5034_v53  ;;  %v6589_v12 = vmul.f32 %v4586_v26, %v4586_v26  ;;  %v5038_v43 = vpop.f32.mrb[22].mxu1  ;;  %v4588_v5 = vpop.f32.mrb[23].mxu0  ;;  %v6584_v32 = vmul.f32 %v5034_v53, %v5034_v53 }
 0x213   : > { %5433 = vmatpush1.bf16.msra.mxu0 %v7770_v39  ;;  %v11359_v17 = vadd.f32 %v6697_v44, %v6578_v62  ;;  %6295 = vst [vmem:[%s11149_s29 + $0x118] sm:$0xff] %v7880_v13  ;;  %v6416_v4 = vadd.f32 %v6415_v41, %v5034_v53  ;;  %v7884_v27 = vpack.c.bf16 %v4588_v5, %v4586_v26  ;;  %v5040_v50 = vpop.f32.mrb[23].mxu1 }
 0x214   : > { %v6704_v29 = vadd.f32 %v6583_v35, %v6582_v11  ;;  %6296 = vst [vmem:[%s11149_s29 + $0x120] sm:$0xff] %v7881_v18  ;;  %v6423_v20 = vadd.f32 %v4588_v5, %v4586_v26  ;;  %v6590_v19 = vmul.f32 %v4588_v5, %v4588_v5  ;;  %v7885_v36 = vpack.c.bf16 %v5040_v50, %v5038_v43 }
 0x215   : > { %v11364_v30 = vadd.f32 %v6416_v4, %v5036_v1  ;;  %v6585_v37 = vmul.f32 %v5036_v1, %v5036_v1  ;;  %6299 = vst [vmem:[%s11149_s29 + $0x134] sm:$0xff] %v7884_v27  ;;  %v6591_v23 = vmul.f32 %v5038_v43, %v5038_v43  ;;  %v6592_v40 = vmul.f32 %v5040_v50, %v5040_v50 }
 0x216   : > { %5435 = vmatmul.mubr.bf16.vlgmr.msra.gmra.mrb[32].mxu0 %v11984_v15  ;;  %v6705_v25 = vadd.f32 %v6704_v29, %v6584_v32  ;;  %v6712_v55 = vadd.f32 %v6590_v19, %v6589_v12  ;;  %6300 = vst [vmem:[%s11149_s29 + $0x13c] sm:$0xff] %v7885_v36  ;;  %v6424_v39 = vadd.f32 %v6423_v20, %v5038_v43  ;;  %v11986_v20 = vld [vmem:[#allocation22_spill] sm:$0xff] }
 0x217   : > { %5839 = vmatmul.mubr.bf16.vlgmr.msra.gmra.mrb[128].mxu1 %v11984_v15  ;;  %5444 = vmatprep.mubr.bf16.mxu0 %v11985_v24  ;;  %v4592_v45 = vpop.f32.mrb[24].mxu0 }
 0x218   : > { %5846 = vmatprep.mubr.bf16.mxu1 %v11985_v24  ;;  %v11371_v59 = vadd.f32 %v6705_v25, %v6585_v37  ;;  %v11373_v7 = vadd.f32 %v6424_v39, %v5040_v50  ;;  %v6713_v54 = vadd.f32 %v6712_v55, %v6591_v23  ;;  %v6596_v6 = vmul.f32 %v4592_v45, %v4592_v45  ;;  %v5044_v14 = vpop.f32.mrb[24].mxu1  ;;  %v4594_v62 = vpop.f32.mrb[25].mxu0  ;;  %v11987_v37 = vld [vmem:[#allocation23_spill] sm:$0xff] }
 0x219   : > { %v7888_v44 = vpack.c.bf16 %v4594_v62, %v4592_v45  ;;  %v6431_v11 = vadd.f32 %v4594_v62, %v4592_v45  ;;  %v6597_v53 = vmul.f32 %v4594_v62, %v4594_v62  ;;  %v5046_v46 = vpop.f32.mrb[25].mxu1  ;;  %v4596_v13 = vpop.f32.mrb[26].mxu0  ;;  %v6598_v12 = vmul.f32 %v5044_v14, %v5044_v14 }
 0x21a   : > { %v11375_v41 = vadd.f32 %v6713_v54, %v6592_v40  ;;  %v7889_v35 = vpack.c.bf16 %v5046_v46, %v5044_v14  ;;  %v6603_v1 = vmul.f32 %v4596_v13, %v4596_v13  ;;  %v5048_v26 = vpop.f32.mrb[26].mxu1  ;;  %v4598_v18 = vpop.f32.mrb[27].mxu0  ;;  %v6599_v36 = vmul.f32 %v5046_v46, %v5046_v46 }
 0x21b   : > { %6303 = vst [vmem:[%s11149_s29 + $0x150] sm:$0xff] %v7888_v44  ;;  %v6720_v43 = vadd.f32 %v6597_v53, %v6596_v6  ;;  %v6432_v5 = vadd.f32 %v6431_v11, %v5044_v14  ;;  %v7892_v32 = vpack.c.bf16 %v4598_v18, %v4596_v13  ;;  %v5050_v29 = vpop.f32.mrb[27].mxu1  ;;  %v6439_v4 = vadd.f32 %v4598_v18, %v4596_v13 }
 0x21c   : > { %6304 = vst [vmem:[%s11149_s29 + $0x158] sm:$0xff] %v7889_v35  ;;  %v6604_v27 = vmul.f32 %v4598_v18, %v4598_v18  ;;  %v7893_v50 = vpack.c.bf16 %v5050_v29, %v5048_v26  ;;  %v6605_v25 = vmul.f32 %v5048_v26, %v5048_v26  ;;  %v6606_v40 = vmul.f32 %v5050_v29, %v5050_v29 }
 0x21d   : > { %v11380_v19 = vadd.f32 %v6432_v5, %v5046_v46  ;;  %v6721_v15 = vadd.f32 %v6720_v43, %v6598_v12  ;;  %6307 = vst [vmem:[%s11149_s29 + $0x16c] sm:$0xff] %v7892_v32  ;;  %v6440_v23 = vadd.f32 %v6439_v4, %v5048_v26 }
 0x21e   : > { %5445 = vmatmul.mubr.bf16.gmra.mrb[36].mxu0 %v11986_v20  ;;  %v6728_v24 = vadd.f32 %v6604_v27, %v6603_v1  ;;  %6308 = vst [vmem:[%s11149_s29 + $0x174] sm:$0xff] %v7893_v50 }
 0x21f   : > { %5847 = vmatmul.mubr.bf16.gmra.mrb[132].mxu1 %v11986_v20  ;;  %5454 = vmatprep.mubr.bf16.mxu0 %v11987_v37  ;;  %v11387_v55 = vadd.f32 %v6721_v15, %v6599_v36  ;;  %v4602_v39 = vpop.f32.mrb[28].mxu0  ;;  %v11389_v45 = vadd.f32 %v6440_v23, %v5050_v29  ;;  %v11988_v36 = vld [vmem:[#allocation24_spill] sm:$0xff] }
 0x220   : > { %5854 = vmatprep.mubr.bf16.mxu1 %v11987_v37  ;;  %v6729_v54 = vadd.f32 %v6728_v24, %v6605_v25  ;;  %v6610_v6 = vmul.f32 %v4602_v39, %v4602_v39  ;;  %v5054_v14 = vpop.f32.mrb[28].mxu1  ;;  %v4604_v62 = vpop.f32.mrb[29].mxu0  ;;  %v11990_v24 = vld [vmem:[#allocation25_spill] sm:$0xff] }
 0x221   : > { %v7896_v44 = vpack.c.bf16 %v4604_v62, %v4602_v39  ;;  %v6447_v11 = vadd.f32 %v4604_v62, %v4602_v39  ;;  %v6611_v53 = vmul.f32 %v4604_v62, %v4604_v62  ;;  %v5056_v46 = vpop.f32.mrb[29].mxu1  ;;  %v4606_v13 = vpop.f32.mrb[30].mxu0  ;;  %v6612_v43 = vmul.f32 %v5054_v14, %v5054_v14 }
 0x222   : > { %v11391_v35 = vadd.f32 %v6729_v54, %v6606_v40  ;;  %v7897_v1 = vpack.c.bf16 %v5056_v46, %v5054_v14  ;;  %v6617_v26 = vmul.f32 %v4606_v13, %v4606_v13  ;;  %v5058_v18 = vpop.f32.mrb[30].mxu1  ;;  %v4608_v12 = vpop.f32.mrb[31].mxu0  ;;  %v6613_v37 = vmul.f32 %v5056_v46, %v5056_v46 }
 0x223   : > { %6311 = vst [vmem:[%s11149_s29 + $0x188] sm:$0xff] %v7896_v44  ;;  %v6736_v5 = vadd.f32 %v6611_v53, %v6610_v6  ;;  %v6448_v32 = vadd.f32 %v6447_v11, %v5054_v14  ;;  %v7900_v29 = vpack.c.bf16 %v4608_v12, %v4606_v13  ;;  %v5060_v4 = vpop.f32.mrb[31].mxu1  ;;  %v6455_v27 = vadd.f32 %v4608_v12, %v4606_v13 }
 0x224   : > { %6312 = vst [vmem:[%s11149_s29 + $0x190] sm:$0xff] %v7897_v1  ;;  %v6618_v50 = vmul.f32 %v4608_v12, %v4608_v12  ;;  %v7901_v20 = vpack.c.bf16 %v5060_v4, %v5058_v18  ;;  %v6619_v23 = vmul.f32 %v5058_v18, %v5058_v18  ;;  %v6620_v14 = vmul.f32 %v5060_v4, %v5060_v4 }
 0x225   : > { %v11396_v15 = vadd.f32 %v6448_v32, %v5056_v46  ;;  %v6737_v25 = vadd.f32 %v6736_v5, %v6612_v43  ;;  %6315 = vst [vmem:[%s11149_s29 + $0x1a4] sm:$0xff] %v7900_v29  ;;  %v6456_v40 = vadd.f32 %v6455_v27, %v5058_v18 }
 0x226   : > { %5455 = vmatmul.mubr.bf16.gmra.mrb[40].mxu0 %v11988_v36  ;;  %v6744_v39 = vadd.f32 %v6618_v50, %v6617_v26  ;;  %6316 = vst [vmem:[%s11149_s29 + $0x1ac] sm:$0xff] %v7901_v20 }
 0x227   : > { %11989 = vst [vmem:[#allocation4_spill] sm:$0xff] %v11396_v15  ;;  %5855 = vmatmul.mubr.bf16.gmra.mrb[136].mxu1 %v11988_v36  ;;  %5464 = vmatprep.mubr.bf16.mxu0 %v11990_v24  ;;  %v11403_v54 = vadd.f32 %v6737_v25, %v6613_v37  ;;  %v11405_v6 = vadd.f32 %v6456_v40, %v5060_v4 }
 0x228   : > { %5862 = vmatprep.mubr.bf16.mxu1 %v11990_v24  ;;  %v6745_v62 = vadd.f32 %v6744_v39, %v6619_v23  ;;  %v7920_v44 = vpop.f32.mrb[32].mxu1  ;;  %v11994_v23 = vld [vmem:[#allocation26_spill] sm:$0xff] }
 0x229   : > { %11991 = vst [vmem:[#allocation5_spill] sm:$0xff] %v11403_v54  ;;  %11992 = vst [vmem:[#allocation6_spill] sm:$0xff] %v11405_v6  ;;  %v7921_v11 = vpop.f32.mrb[33].mxu1 }
 0x22a   : > { %v11407_v53 = vadd.f32 %v6745_v62, %v6620_v14  ;;  %v11409_v46 = vadd.f32 %v7921_v11, %v7920_v44  ;;  %v7923_v13 = vpop.f32.mrb[34].mxu1  ;;  %v11995_v44 = vld [vmem:[#allocation27_spill] sm:$0xff] }
 0x22b   : > { %v7924_v1 = vpop.f32.mrb[35].mxu1 }
 0x22c   : > { %11993 = vst [vmem:[#allocation7_spill] sm:$0xff] %v11407_v53  ;;  %v11411_v12 = vadd.f32 %v7924_v1, %v7923_v13 }
 0x22e   : > { %5465 = vmatmul.mubr.bf16.gmra.mrb[44].mxu0 %v10137_v10 }
 0x22f   : > { %5863 = vmatmul.mubr.bf16.gmra.mrb[140].mxu1 %v10137_v10  ;;  %5474 = vmatprep.mubr.bf16.mxu0 %v10153_v21 }
 0x230   : > { %5870 = vmatprep.mubr.bf16.mxu1 %v10153_v21  ;;  %v7926_v26 = vpop.f32.mrb[36].mxu1 }
 0x231   : > { %v7927_v18 = vpop.f32.mrb[37].mxu1 }
 0x232   : > { %v11417_v43 = vadd.f32 %v7927_v18, %v7926_v26  ;;  %v7929_v5 = vpop.f32.mrb[38].mxu1 }
 0x233   : > { %v7930_v32 = vpop.f32.mrb[39].mxu1 }
 0x234   : > { %v11419_v29 = vadd.f32 %v7930_v32, %v7929_v5 }
 0x236   : > { %5475 = vmatmul.mubr.bf16.gmra.mrb[48].mxu0 %v10181_v61 }
 0x237   : > { %5871 = vmatmul.mubr.bf16.gmra.mrb[144].mxu1 %v10181_v61  ;;  %5484 = vmatprep.mubr.bf16.mxu0 %v10183_v49 }
 0x238   : > { %5878 = vmatprep.mubr.bf16.mxu1 %v10183_v49  ;;  %v7932_v10 = vpop.f32.mrb[40].mxu1 }
 0x239   : > { %v7933_v4 = vpop.f32.mrb[41].mxu1 }
 0x23a   : > { %v11425_v27 = vadd.f32 %v7933_v4, %v7932_v10  ;;  %v7935_v21 = vpop.f32.mrb[42].mxu1 }
 0x23b   : > { %v7936_v50 = vpop.f32.mrb[43].mxu1 }
 0x23c   : > { %v11427_v20 = vadd.f32 %v7936_v50, %v7935_v21 }
 0x23e   : > { %5485 = vmatmul.mubr.bf16.gmra.mrb[52].mxu0 %v10207_v8 }
 0x23f   : > { %5879 = vmatmul.mubr.bf16.gmra.mrb[148].mxu1 %v10207_v8  ;;  %5494 = vmatprep.mubr.bf16.mxu0 %v10209_v22 }
 0x240   : > { %5886 = vmatprep.mubr.bf16.mxu1 %v10209_v22  ;;  %v7938_v61 = vpop.f32.mrb[44].mxu1 }
 0x241   : > { %v7939_v36 = vpop.f32.mrb[45].mxu1 }
 0x242   : > { %v11433_v37 = vadd.f32 %v7939_v36, %v7938_v61  ;;  %v7941_v49 = vpop.f32.mrb[46].mxu1 }
 0x243   : > { %v7942_v25 = vpop.f32.mrb[47].mxu1 }
 0x244   : > { %v7943_v24 = vadd.f32 %v7942_v25, %v7941_v49 }
 0x246   : > { %5495 = vmatmul.mubr.bf16.gmra.mrb[56].mxu0 %v10233_v38 }
 0x247   : > { %5887 = vmatmul.mubr.bf16.gmra.mrb[152].mxu1 %v10233_v38  ;;  %5504 = vmatprep.mubr.bf16.mxu0 %v11994_v23 }
 0x248   : > { %5894 = vmatprep.mubr.bf16.mxu1 %v11994_v23  ;;  %v7944_v8 = vpop.f32.mrb[48].mxu1 }
 0x249   : > { %v7945_v39 = vpop.f32.mrb[49].mxu1 }
 0x24a   : > { %v7946_v40 = vadd.f32 %v7945_v39, %v7944_v8  ;;  %v7947_v14 = vpop.f32.mrb[50].mxu1 }
 0x24b   : > { %v7948_v22 = vpop.f32.mrb[51].mxu1 }
 0x24c   : > { %v7949_v62 = vadd.f32 %v7948_v22, %v7947_v14 }
 0x24e   : > { %5505 = vmatmul.mubr.bf16.gmra.mrb[60].mxu0 %v11995_v44 }
 0x24f   : > { %5895 = vmatmul.mubr.bf16.gmra.mrb[156].mxu1 %v11995_v44 }
 0x250   : > { %v7950_v11 = vpop.f32.mrb[52].mxu1 }
 0x251   : > { %v7951_v13 = vpop.f32.mrb[53].mxu1 }
 0x252   : > { %v7952_v1 = vadd.f32 %v7951_v13, %v7950_v11  ;;  %v7953_v26 = vpop.f32.mrb[54].mxu1 }
 0x253   : > { %v7954_v18 = vpop.f32.mrb[55].mxu1 }
 0x254   : > { %v7955_v38 = vadd.f32 %v7954_v18, %v7953_v26 }
 0x258   : > { %v7956_v5 = vpop.f32.mrb[56].mxu1 }
 0x259   : > { %v7957_v32 = vpop.f32.mrb[57].mxu1 }
 0x25a   : > { %v11441_v10 = vadd.f32 %v7957_v32, %v7956_v5  ;;  %v7959_v4 = vpop.f32.mrb[58].mxu1 }
 0x25b   : > { %v7960_v21 = vpop.f32.mrb[59].mxu1 }
 0x25c   : > { %v7961_v50 = vadd.f32 %v7960_v21, %v7959_v4 }
 0x260   : > { %v7962_v61 = vpop.f32.mrb[60].mxu1 }
 0x261   : > { %v7963_v36 = vpop.f32.mrb[61].mxu1 }
 0x262   : > { %v11443_v49 = vadd.f32 %v7963_v36, %v7962_v61  ;;  %v7965_v25 = vpop.f32.mrb[62].mxu1 }
 0x263   : > { %v7966_v23 = vpop.f32.mrb[63].mxu1 }
 0x264   : > { %v11445_v8 = vadd.f32 %v7966_v23, %v7965_v25 }
 0x268   : > { %v7984_v39 = vpop.f32.mrb[64].mxu1 }
 0x269   : > { %v7985_v14 = vpop.f32.mrb[65].mxu1 }
 0x26a   : > { %v7986_v22 = vadd.f32 %v7985_v14, %v7984_v39  ;;  %v7987_v44 = vpop.f32.mrb[66].mxu1 }
 0x26b   : > { %v7988_v11 = vpop.f32.mrb[67].mxu1 }
 0x26c   : > { %v11448_v13 = vadd.f32 %v7986_v22, %v11409_v46  ;;  %v7989_v26 = vadd.f32 %v7988_v11, %v7987_v44 }
 0x26e   : > { %v11451_v18 = vadd.f32 %v7989_v26, %v11411_v12 }
 0x270   : > { %v7990_v5 = vpop.f32.mrb[68].mxu1 }
 0x271   : > { %v7991_v32 = vpop.f32.mrb[69].mxu1 }
 0x272   : > { %v7992_v4 = vadd.f32 %v7991_v32, %v7990_v5  ;;  %v7993_v21 = vpop.f32.mrb[70].mxu1 }
 0x273   : > { %v7994_v61 = vpop.f32.mrb[71].mxu1 }
 0x274   : > { %v11454_v36 = vadd.f32 %v7992_v4, %v11417_v43  ;;  %v7995_v25 = vadd.f32 %v7994_v61, %v7993_v21 }
 0x276   : > { %v11457_v23 = vadd.f32 %v7995_v25, %v11419_v29 }
 0x278   : > { %v7996_v39 = vpop.f32.mrb[72].mxu1 }
 0x279   : > { %v7997_v14 = vpop.f32.mrb[73].mxu1 }
 0x27a   : > { %v7998_v46 = vadd.f32 %v7997_v14, %v7996_v39  ;;  %v7999_v22 = vpop.f32.mrb[74].mxu1 }
 0x27b   : > { %v8000_v44 = vpop.f32.mrb[75].mxu1 }
 0x27c   : > { %v11460_v12 = vadd.f32 %v7998_v46, %v11425_v27  ;;  %v8001_v11 = vadd.f32 %v8000_v44, %v7999_v22 }
 0x27e   : > { %v11463_v26 = vadd.f32 %v8001_v11, %v11427_v20 }
 0x280   : > { %v8002_v5 = vpop.f32.mrb[76].mxu1 }
 0x281   : > { %v8003_v32 = vpop.f32.mrb[77].mxu1 }
 0x282   : > { %v8004_v43 = vadd.f32 %v8003_v32, %v8002_v5  ;;  %v8005_v4 = vpop.f32.mrb[78].mxu1 }
 0x283   : > { %v8006_v21 = vpop.f32.mrb[79].mxu1 }
 0x284   : > { %v11466_v29 = vadd.f32 %v8004_v43, %v11433_v37  ;;  %v8007_v61 = vadd.f32 %v8006_v21, %v8005_v4 }
 0x286   : > { %v11468_v25 = vadd.f32 %v8007_v61, %v7943_v24 }
 0x288   : > { %v8008_v39 = vpop.f32.mrb[80].mxu1 }
 0x289   : > { %v8009_v14 = vpop.f32.mrb[81].mxu1 }
 0x28a   : > { %v8010_v53 = vadd.f32 %v8009_v14, %v8008_v39  ;;  %v8011_v27 = vpop.f32.mrb[82].mxu1 }
 0x28b   : > { %v8012_v46 = vpop.f32.mrb[83].mxu1 }
 0x28c   : > { %v11470_v22 = vadd.f32 %v8010_v53, %v7946_v40  ;;  %v8013_v20 = vadd.f32 %v8012_v46, %v8011_v27 }
 0x28e   : > { %v11472_v44 = vadd.f32 %v8013_v20, %v7949_v62 }
 0x290   : > { %v8014_v11 = vpop.f32.mrb[84].mxu1 }
 0x291   : > { %v8015_v5 = vpop.f32.mrb[85].mxu1 }
 0x292   : > { %v8016_v32 = vadd.f32 %v8015_v5, %v8014_v11  ;;  %v8017_v54 = vpop.f32.mrb[86].mxu1 }
 0x293   : > { %v8018_v6 = vpop.f32.mrb[87].mxu1 }
 0x294   : > { %v11474_v37 = vadd.f32 %v8016_v32, %v7952_v1  ;;  %v8019_v43 = vadd.f32 %v8018_v6, %v8017_v54 }
 0x296   : > { %v11476_v24 = vadd.f32 %v8019_v43, %v7955_v38 }
 0x298   : > { %v8020_v4 = vpop.f32.mrb[88].mxu1 }
 0x299   : > { %v8021_v21 = vpop.f32.mrb[89].mxu1 }
 0x29a   : > { %v8022_v61 = vadd.f32 %v8021_v21, %v8020_v4  ;;  %v8023_v39 = vpop.f32.mrb[90].mxu1 }
 0x29b   : > { %v8024_v14 = vpop.f32.mrb[91].mxu1 }
 0x29c   : > { %v11479_v53 = vadd.f32 %v8022_v61, %v11441_v10  ;;  %v8025_v40 = vadd.f32 %v8024_v14, %v8023_v39  ;;  %v8532_v14 = vmov 0.0  }
 0x29d   : > { %415 = vst.msk [vmem:[#allocation2] sm:$0xff] %vm414_vm0, %v8532_v14  ;;  %416 = vst.msk [vmem:[#allocation2 + $0x8] sm:$0xff] %vm414_vm0, %v8532_v14 }
 0x29e   : > { %v11481_v62 = vadd.f32 %v8025_v40, %v7961_v50  ;;  %417 = vst.msk [vmem:[#allocation2 + $0x10] sm:$0xff] %vm414_vm0, %v8532_v14  ;;  %418 = vst.msk [vmem:[#allocation2 + $0x18] sm:$0xff] %vm414_vm0, %v8532_v14 }
 0x29f   : > { %419 = vst.msk [vmem:[#allocation2 + $0x20] sm:$0xff] %vm414_vm0, %v8532_v14  ;;  %420 = vst.msk [vmem:[#allocation2 + $0x28] sm:$0xff] %vm414_vm0, %v8532_v14 }
 0x2a0   : > { %v8026_v27 = vpop.f32.mrb[92].mxu1  ;;  %421 = vst.msk [vmem:[#allocation2 + $0x30] sm:$0xff] %vm414_vm0, %v8532_v14  ;;  %422 = vst.msk [vmem:[#allocation2 + $0x38] sm:$0xff] %vm414_vm0, %v8532_v14 }
 0x2a1   : > { %v8027_v46 = vpop.f32.mrb[93].mxu1  ;;  %423 = vst.msk [vmem:[#allocation2 + $0x40] sm:$0xff] %vm414_vm0, %v8532_v14  ;;  %424 = vst.msk [vmem:[#allocation2 + $0x48] sm:$0xff] %vm414_vm0, %v8532_v14 }
 0x2a2   : > { %v8028_v20 = vadd.f32 %v8027_v46, %v8026_v27  ;;  %v8029_v11 = vpop.f32.mrb[94].mxu1  ;;  %425 = vst.msk [vmem:[#allocation2 + $0x50] sm:$0xff] %vm414_vm0, %v8532_v14  ;;  %426 = vst.msk [vmem:[#allocation2 + $0x58] sm:$0xff] %vm414_vm0, %v8532_v14 }
 0x2a3   : > { %v8030_v1 = vpop.f32.mrb[95].mxu1  ;;  %427 = vst.msk [vmem:[#allocation2 + $0x60] sm:$0xff] %vm414_vm0, %v8532_v14  ;;  %428 = vst.msk [vmem:[#allocation2 + $0x68] sm:$0xff] %vm414_vm0, %v8532_v14 }
 0x2a4   : > { %v11484_v54 = vadd.f32 %v8028_v20, %v11443_v49  ;;  %v8031_v6 = vadd.f32 %v8030_v1, %v8029_v11  ;;  %429 = vst.msk [vmem:[#allocation2 + $0x70] sm:$0xff] %vm414_vm0, %v8532_v14  ;;  %430 = vst.msk [vmem:[#allocation2 + $0x78] sm:$0xff] %vm414_vm0, %v8532_v14 }
 0x2a5   : > { %431 = vst.msk [vmem:[#allocation3] sm:$0xff] %vm414_vm0, %v8532_v14  ;;  %432 = vst.msk [vmem:[#allocation3 + $0x8] sm:$0xff] %vm414_vm0, %v8532_v14 }
 0x2a6   : > { %v11487_v38 = vadd.f32 %v8031_v6, %v11445_v8  ;;  %433 = vst.msk [vmem:[#allocation3 + $0x10] sm:$0xff] %vm414_vm0, %v8532_v14  ;;  %434 = vst.msk [vmem:[#allocation3 + $0x18] sm:$0xff] %vm414_vm0, %v8532_v14 }
 0x2a7   : > { %435 = vst.msk [vmem:[#allocation3 + $0x20] sm:$0xff] %vm414_vm0, %v8532_v14  ;;  %436 = vst.msk [vmem:[#allocation3 + $0x28] sm:$0xff] %vm414_vm0, %v8532_v14 }
 0x2a8   : > { %v8048_v5 = vpop.f32.mrb[96].mxu1  ;;  %437 = vst.msk [vmem:[#allocation3 + $0x30] sm:$0xff] %vm414_vm0, %v8532_v14  ;;  %438 = vst.msk [vmem:[#allocation3 + $0x38] sm:$0xff] %vm414_vm0, %v8532_v14 }
 0x2a9   : > { %v8049_v32 = vpop.f32.mrb[97].mxu1  ;;  %439 = vst.msk [vmem:[#allocation3 + $0x40] sm:$0xff] %vm414_vm0, %v8532_v14  ;;  %440 = vst.msk [vmem:[#allocation3 + $0x48] sm:$0xff] %vm414_vm0, %v8532_v14 }
 0x2aa   : > { %v8050_v43 = vadd.f32 %v8049_v32, %v8048_v5  ;;  %v8051_v10 = vpop.f32.mrb[98].mxu1  ;;  %441 = vst.msk [vmem:[#allocation3 + $0x50] sm:$0xff] %vm414_vm0, %v8532_v14  ;;  %442 = vst.msk [vmem:[#allocation3 + $0x58] sm:$0xff] %vm414_vm0, %v8532_v14 }
 0x2ab   : > { %v8052_v4 = vpop.f32.mrb[99].mxu1  ;;  %443 = vst.msk [vmem:[#allocation3 + $0x60] sm:$0xff] %vm414_vm0, %v8532_v14  ;;  %444 = vst.msk [vmem:[#allocation3 + $0x68] sm:$0xff] %vm414_vm0, %v8532_v14 }
 0x2ac   : > { %v11490_v50 = vadd.f32 %v8050_v43, %v11448_v13  ;;  %v8053_v21 = vadd.f32 %v8052_v4, %v8051_v10  ;;  %445 = vst.msk [vmem:[#allocation3 + $0x70] sm:$0xff] %vm414_vm0, %v8532_v14  ;;  %446 = vst.msk [vmem:[#allocation3 + $0x78] sm:$0xff] %vm414_vm0, %v8532_v14 }
 0x2ae   : > { %v11493_v61 = vadd.f32 %v8053_v21, %v11451_v18 }
 0x2b0   : > { %v8054_v39 = vpop.f32.mrb[100].mxu1 }
 0x2b1   : > { %v8055_v49 = vpop.f32.mrb[101].mxu1 }
 0x2b2   : > { %v8056_v8 = vadd.f32 %v8055_v49, %v8054_v39  ;;  %v8057_v13 = vpop.f32.mrb[102].mxu1 }
 0x2b3   : > { %v8058_v18 = vpop.f32.mrb[103].mxu1 }
 0x2b4   : > { %v11528_v40 = vadd.f32 %v8056_v8, %v11454_v36  ;;  %v8059_v27 = vadd.f32 %v8058_v18, %v8057_v13 }
 0x2b6   : > { %v11531_v46 = vadd.f32 %v8059_v27, %v11457_v23 }
 0x2b8   : > { %v8060_v20 = vpop.f32.mrb[104].mxu1 }
 0x2b9   : > { %v8061_v11 = vpop.f32.mrb[105].mxu1 }
 0x2ba   : > { %v8062_v1 = vadd.f32 %v8061_v11, %v8060_v20  ;;  %v8063_v6 = vpop.f32.mrb[106].mxu1 }
 0x2bb   : > { %v8064_v5 = vpop.f32.mrb[107].mxu1 }
 0x2bc   : > { %v11534_v32 = vadd.f32 %v8062_v1, %v11460_v12  ;;  %v8065_v43 = vadd.f32 %v8064_v5, %v8063_v6 }
 0x2be   : > { %v11537_v10 = vadd.f32 %v8065_v43, %v11463_v26 }
 0x2c0   : > { %v8066_v4 = vpop.f32.mrb[108].mxu1 }
 0x2c1   : > { %v8067_v21 = vpop.f32.mrb[109].mxu1 }
 0x2c2   : > { %v8068_v36 = vadd.f32 %v8067_v21, %v8066_v4  ;;  %v8069_v39 = vpop.f32.mrb[110].mxu1 }
 0x2c3   : > { %v8070_v49 = vpop.f32.mrb[111].mxu1 }
 0x2c4   : > { %v11540_v23 = vadd.f32 %v8068_v36, %v11466_v29  ;;  %v8071_v14 = vadd.f32 %v8070_v49, %v8069_v39 }
 0x2c6   : > { %v11543_v8 = vadd.f32 %v8071_v14, %v11468_v25 }
 0x2c8   : > { %v8072_v13 = vpop.f32.mrb[112].mxu1 }
 0x2c9   : > { %v8073_v18 = vpop.f32.mrb[113].mxu1 }
 0x2ca   : > { %v8074_v12 = vadd.f32 %v8073_v18, %v8072_v13  ;;  %v8075_v27 = vpop.f32.mrb[114].mxu1 }
 0x2cb   : > { %v8076_v20 = vpop.f32.mrb[115].mxu1 }
 0x2cc   : > { %v11546_v26 = vadd.f32 %v8074_v12, %v11470_v22  ;;  %v8077_v11 = vadd.f32 %v8076_v20, %v8075_v27 }
 0x2ce   : > { %v11549_v1 = vadd.f32 %v8077_v11, %v11472_v44 }
 0x2d1   : > { %v8078_v6 = vpop.f32.mrb[116].mxu1 }
 0x2d2   : > { %v8079_v5 = vpop.f32.mrb[117].mxu1 }
 0x2d3   : > { %v8080_v29 = vadd.f32 %v8079_v5, %v8078_v6  ;;  %v8081_v43 = vpop.f32.mrb[118].mxu1 }
 0x2d4   : > { %v8082_v4 = vpop.f32.mrb[119].mxu1 }
 0x2d5   : > { %v11552_v25 = vadd.f32 %v8080_v29, %v11474_v37  ;;  %v8083_v21 = vadd.f32 %v8082_v4, %v8081_v43 }
 0x2d7   : > { %v11555_v36 = vadd.f32 %v8083_v21, %v11476_v24 }
 0x2da   : > { %v8084_v39 = vpop.f32.mrb[120].mxu1 }
 0x2db   : > { %v8085_v49 = vpop.f32.mrb[121].mxu1 }
 0x2dc   : > { %v8086_v22 = vadd.f32 %v8085_v49, %v8084_v39  ;;  %v8087_v14 = vpop.f32.mrb[122].mxu1 }
 0x2dd   : > { %v8088_v13 = vpop.f32.mrb[123].mxu1 }
 0x2de   : > { %v11558_v44 = vadd.f32 %v8086_v22, %v11479_v53  ;;  %v8089_v18 = vadd.f32 %v8088_v13, %v8087_v14 }
 0x2e0   : > { %v11561_v12 = vadd.f32 %v8089_v18, %v11481_v62 }
 0x2e2   : > { %11996 = vst [vmem:[#allocation8_spill] sm:$0xff] %v11561_v12  ;;  %v8090_v27 = vpop.f32.mrb[124].mxu1 }
 0x2e3   : > { %v8091_v20 = vpop.f32.mrb[125].mxu1 }
 0x2e4   : > { %v8092_v37 = vadd.f32 %v8091_v20, %v8090_v27  ;;  %v8093_v11 = vpop.f32.mrb[126].mxu1 }
 0x2e5   : > { %v8094_v6 = vpop.f32.mrb[127].mxu1 }
 0x2e6   : > { %v11564_v24 = vadd.f32 %v8092_v37, %v11484_v54  ;;  %v8095_v5 = vadd.f32 %v8094_v6, %v8093_v11 }
 0x2e8   : > { %11997 = vst [vmem:[#allocation9_spill] sm:$0xff] %v11564_v24  ;;  %v11567_v29 = vadd.f32 %v8095_v5, %v11487_v38 }
 0x2e9   : > { %v5436_v43 = vpop.f32.mrb[32].mxu0 }
 0x2ea   : > { %11998 = vst [vmem:[#allocation10_spill] sm:$0xff] %v11567_v29  ;;  %v6338_v53 = vadd.f32 %v11182_v60, %v5436_v43  ;;  %v6516_v4 = vmul.f32 %v5436_v43, %v5436_v43  ;;  %v8112_v21 = vpop.f32.mrb[128].mxu1  ;;  %v5438_v62 = vpop.f32.mrb[33].mxu0 }
 0x2eb   : > { %v7842_v39 = vpack.c.bf16 %v5438_v62, %v5436_v43  ;;  %v6517_v49 = vmul.f32 %v5438_v62, %v5438_v62  ;;  %v8113_v22 = vpop.f32.mrb[129].mxu1  ;;  %v5440_v14 = vpop.f32.mrb[34].mxu0 }
 0x2ec   : > { %v8114_v13 = vadd.f32 %v8113_v22, %v8112_v21  ;;  %v6346_v54 = vadd.f32 %v11204_v28, %v5440_v14  ;;  %v6523_v18 = vmul.f32 %v5440_v14, %v5440_v14  ;;  %v8115_v27 = vpop.f32.mrb[130].mxu1  ;;  %v5442_v20 = vpop.f32.mrb[35].mxu0  ;;  %v6339_v38 = vadd.f32 %v6338_v53, %v5438_v62 }
 0x2ed   : > { %6257 = vst [vmem:[%s11149_s29 + $0x10] sm:$0xff] %v7842_v39  ;;  %v7846_v37 = vpack.c.bf16 %v5442_v20, %v5440_v14  ;;  %v6524_v11 = vmul.f32 %v5442_v20, %v5442_v20  ;;  %v8116_v60 = vpop.f32.mrb[131].mxu1  ;;  %v6627_v6 = vadd.f32 %v11197_v56, %v6516_v4 }
 0x2ee   : > { %v5841_v5 = vadd.f32 %v8114_v13, %v11490_v50  ;;  %v8117_v43 = vadd.f32 %v8116_v60, %v8115_v27  ;;  %v6635_v29 = vadd.f32 %v11212_v48, %v6523_v18  ;;  %v6347_v24 = vadd.f32 %v6346_v54, %v5442_v20 }
 0x2ef   : > { %6261 = vst [vmem:[%s11149_s29 + $0x2c] sm:$0xff] %v7846_v37  ;;  %v6628_v21 = vadd.f32 %v6627_v6, %v6517_v49 }
 0x2f0   : > { %v7843_v28 = vpack.c.bf16 %v5841_v5, %v5841_v5  ;;  %v5844_v22 = vadd.f32 %v8117_v43, %v11493_v61  ;;  %v6340_v15 = vadd.f32 %v6339_v38, %v5841_v5  ;;  %v6636_v53 = vadd.f32 %v6635_v29, %v6524_v11 }
 0x2f1   : > { %v5446_v62 = vpop.f32.mrb[36].mxu0  ;;  %v6518_v39 = vmul.f32 %v5841_v5, %v5841_v5 }
 0x2f2   : > { %6258 = vst [vmem:[%s11149_s29 + $0x18] sm:$0xf] %v7843_v28  ;;  %v7847_v14 = vpack.c.bf16 %v5844_v22, %v5844_v22  ;;  %v8118_v12 = vpop.f32.mrb[132].mxu1  ;;  %6341 = vadd.xlane.f32.xlu0 %v6340_v15  ;;  %v6354_v56 = vadd.f32 %v11227_v63, %v5446_v62  ;;  %v6530_v50 = vmul.f32 %v5446_v62, %v5446_v62  ;;  %v5448_v48 = vpop.f32.mrb[37].mxu0 }
 0x2f3   : > { %v6525_v4 = vmul.f32 %v5844_v22, %v5844_v22  ;;  %v7850_v13 = vpack.c.bf16 %v5448_v48, %v5446_v62  ;;  %v6531_v49 = vmul.f32 %v5448_v48, %v5448_v48  ;;  %v8119_v54 = vpop.f32.mrb[133].mxu1  ;;  %v5450_v18 = vpop.f32.mrb[38].mxu0  ;;  %v6348_v61 = vadd.f32 %v6347_v24, %v5844_v22 }
 0x2f4   : > { %v6629_v27 = vadd.f32 %v6628_v21, %v6518_v39  ;;  %6262 = vst [vmem:[%s11149_s29 + $0x34] sm:$0xf] %v7847_v14  ;;  %v8120_v29 = vadd.f32 %v8119_v54, %v8118_v12  ;;  %v6362_v20 = vadd.f32 %v11253_v52, %v5450_v18  ;;  %v6537_v38 = vmul.f32 %v5450_v18, %v5450_v18  ;;  %v8121_v37 = vpop.f32.mrb[134].mxu1  ;;  %v5452_v15 = vpop.f32.mrb[39].mxu0 }
 0x2f5   : > { %v6637_v11 = vadd.f32 %v6636_v53, %v6525_v4  ;;  %6265 = vst [vmem:[%s11149_s29 + $0x48] sm:$0xff] %v7850_v13  ;;  %v7854_v63 = vpack.c.bf16 %v5452_v15, %v5450_v18  ;;  %v6538_v60 = vmul.f32 %v5452_v15, %v5452_v15  ;;  %v8122_v6 = vpop.f32.mrb[135].mxu1  ;;  %v6355_v5 = vadd.f32 %v6354_v56, %v5448_v48 }
 0x2f6   : > { %v6643_v43 = vadd.f32 %v11242_v2, %v6530_v50  ;;  %v5849_v24 = vadd.f32 %v8120_v29, %v11528_v40  ;;  %v8123_v21 = vadd.f32 %v8122_v6, %v8121_v37  ;;  %6349 = vadd.xlane.f32.xlu0 %v6348_v61  ;;  %v6363_v12 = vadd.f32 %v6362_v20, %v5452_v15 }
 0x2f7   : > { %6638 = vadd.xlane.f32.xlu1 %v6637_v11  ;;  %6269 = vst [vmem:[%s11149_s29 + $0x64] sm:$0xff] %v7854_v63  ;;  %v6651_v28 = vadd.f32 %v11264_v42, %v6537_v38 }
 0x2f8   : > { %v6644_v52 = vadd.f32 %v6643_v43, %v6531_v49  ;;  %v7851_v22 = vpack.c.bf16 %v5849_v24, %v5849_v24  ;;  %v5852_v53 = vadd.f32 %v8123_v21, %v11531_v46  ;;  %v6356_v62 = vadd.f32 %v6355_v5, %v5849_v24 }
 0x2f9   : > { %v6532_v39 = vmul.f32 %v5849_v24, %v5849_v24  ;;  %v5456_v14 = vpop.f32.mrb[40].mxu0  ;;  %v6652_v56 = vadd.f32 %v6651_v28, %v6538_v60 }
 0x2fa   : > { %6266 = vst [vmem:[%s11149_s29 + $0x50] sm:$0xf] %v7851_v22  ;;  %v7855_v2 = vpack.c.bf16 %v5852_v53, %v5852_v53  ;;  %v8124_v50 = vpop.f32.mrb[136].mxu1  ;;  %6630 = vadd.xlane.f32.xlu0 %v6629_v27  ;;  %v6370_v40 = vadd.f32 %v11278_v9, %v5456_v14  ;;  %v6544_v48 = vmul.f32 %v5456_v14, %v5456_v14  ;;  %v5458_v4 = vpop.f32.mrb[41].mxu0 }
 0x2fb   : > { %6357 = vadd.xlane.f32.xlu1 %v6356_v62  ;;  %v7858_v13 = vpack.c.bf16 %v5458_v4, %v5456_v14  ;;  %v6545_v42 = vmul.f32 %v5458_v4, %v5458_v4  ;;  %v8125_v49 = vpop.f32.mrb[137].mxu1  ;;  %v5460_v54 = vpop.f32.mrb[42].mxu0  ;;  %v6645_v46 = vadd.f32 %v6644_v52, %v6532_v39  ;;  %v6364_v18 = vadd.f32 %v6363_v12, %v5852_v53 }
 0x2fc   : > { %6270 = vst [vmem:[%s11149_s29 + $0x6c] sm:$0xf] %v7855_v2  ;;  %v8126_v61 = vadd.f32 %v8125_v49, %v8124_v50  ;;  %v6378_v29 = vadd.f32 %v11302_v31, %v5460_v54  ;;  %v6551_v20 = vmul.f32 %v5460_v54, %v5460_v54  ;;  %v8127_v38 = vpop.f32.mrb[138].mxu1  ;;  %v5462_v27 = vpop.f32.mrb[43].mxu0  ;;  %v6539_v37 = vmul.f32 %v5852_v53, %v5852_v53 }
 0x2fd   : > { %6273 = vst [vmem:[%s11149_s29 + $0x80] sm:$0xff] %v7858_v13  ;;  %v7862_v9 = vpack.c.bf16 %v5462_v27, %v5460_v54  ;;  %v6552_v15 = vmul.f32 %v5462_v27, %v5462_v27  ;;  %v8128_v11 = vpop.f32.mrb[139].mxu1  ;;  %v6371_v63 = vadd.f32 %v6370_v40, %v5458_v4  ;;  %v6659_v60 = vadd.f32 %v11290_v16, %v6544_v48 }
 0x2fe   : > { %v5857_v6 = vadd.f32 %v8126_v61, %v11534_v32  ;;  %v8129_v5 = vadd.f32 %v8128_v11, %v8127_v38  ;;  %6646 = vadd.xlane.f32.xlu0 %v6645_v46  ;;  %v6653_v43 = vadd.f32 %v6652_v56, %v6539_v37  ;;  %v6379_v24 = vadd.f32 %v6378_v29, %v5462_v27 }
 0x2ff   : > { %6365 = vadd.xlane.f32.xlu1 %v6364_v18  ;;  %6277 = vst [vmem:[%s11149_s29 + $0x9c] sm:$0xff] %v7862_v9  ;;  %v6660_v31 = vadd.f32 %v6659_v60, %v6545_v42  ;;  %v6667_v21 = vadd.f32 %v11312_v33, %v6551_v20 }
 0x300   : > { %v7859_v12 = vpack.c.bf16 %v5857_v6, %v5857_v6  ;;  %v5860_v52 = vadd.f32 %v8129_v5, %v11537_v10  ;;  %v6372_v28 = vadd.f32 %v6371_v63, %v5857_v6  ;;  %v6546_v22 = vmul.f32 %v5857_v6, %v5857_v6 }
 0x301   : > { %v5466_v53 = vpop.f32.mrb[44].mxu0  ;;  %v6668_v16 = vadd.f32 %v6667_v21, %v6552_v15 }
 0x302   : > { %6274 = vst [vmem:[%s11149_s29 + $0x88] sm:$0xf] %v7859_v12  ;;  %v7863_v62 = vpack.c.bf16 %v5860_v52, %v5860_v52  ;;  %v8130_v32 = vpop.f32.mrb[140].mxu1  ;;  %6373 = vadd.xlane.f32.xlu0 %v6372_v28  ;;  %v6386_v39 = vadd.f32 %v11326_v58, %v5466_v53  ;;  %v6558_v14 = vmul.f32 %v5466_v53, %v5466_v53  ;;  %v5468_v56 = vpop.f32.mrb[45].mxu0 }
 0x303   : > { %6654 = vadd.xlane.f32.xlu1 %v6653_v43  ;;  %v7866_v2 = vpack.c.bf16 %v5468_v56, %v5466_v53  ;;  %v6559_v33 = vmul.f32 %v5468_v56, %v5468_v56  ;;  %v8131_v50 = vpop.f32.mrb[141].mxu1  ;;  %v5470_v40 = vpop.f32.mrb[46].mxu0  ;;  %v6661_v10 = vadd.f32 %v6660_v31, %v6546_v22  ;;  %v6380_v48 = vadd.f32 %v6379_v24, %v5860_v52 }
 0x304   : > { %6278 = vst [vmem:[%s11149_s29 + $0xa4] sm:$0xf] %v7863_v62  ;;  %v8132_v4 = vadd.f32 %v8131_v50, %v8130_v32  ;;  %v6394_v13 = vadd.f32 %v11335_v3, %v5470_v40  ;;  %v6565_v42 = vmul.f32 %v5470_v40, %v5470_v40  ;;  %v8133_v49 = vpop.f32.mrb[142].mxu1  ;;  %v5472_v54 = vpop.f32.mrb[47].mxu0  ;;  %v6553_v46 = vmul.f32 %v5860_v52, %v5860_v52 }
 0x305   : > { %6281 = vst [vmem:[%s11149_s29 + $0xb8] sm:$0xff] %v7866_v2  ;;  %v7870_v58 = vpack.c.bf16 %v5472_v54, %v5470_v40  ;;  %v6566_v18 = vmul.f32 %v5472_v54, %v5472_v54  ;;  %v8134_v61 = vpop.f32.mrb[143].mxu1  ;;  %v6387_v29 = vadd.f32 %v6386_v39, %v5468_v56  ;;  %v6675_v20 = vadd.f32 %v11332_v51, %v6558_v14 }
 0x306   : > { %v5865_v38 = vadd.f32 %v8132_v4, %v11540_v23  ;;  %v8135_v27 = vadd.f32 %v8134_v61, %v8133_v49  ;;  %6662 = vadd.xlane.f32.xlu0 %v6661_v10  ;;  %v6669_v37 = vadd.f32 %v6668_v16, %v6553_v46  ;;  %v6395_v9 = vadd.f32 %v6394_v13, %v5472_v54 }
 0x307   : > { %6381 = vadd.xlane.f32.xlu1 %v6380_v48  ;;  %6285 = vst [vmem:[%s11149_s29 + $0xd4] sm:$0xff] %v7870_v58  ;;  %v6676_v3 = vadd.f32 %v6675_v20, %v6559_v33  ;;  %v6683_v15 = vadd.f32 %v11339_v0, %v6565_v42 }
 0x308   : > { %v7867_v11 = vpack.c.bf16 %v5865_v38, %v5865_v38  ;;  %v5868_v63 = vadd.f32 %v8135_v27, %v11543_v8  ;;  %v6388_v60 = vadd.f32 %v6387_v29, %v5865_v38  ;;  %v6560_v6 = vmul.f32 %v5865_v38, %v5865_v38 }
 0x309   : > { %v5476_v5 = vpop.f32.mrb[48].mxu0  ;;  %v6684_v51 = vadd.f32 %v6683_v15, %v6566_v18 }
 0x30a   : > { %6282 = vst [vmem:[%s11149_s29 + $0xc0] sm:$0xf] %v7867_v11  ;;  %v7871_v43 = vpack.c.bf16 %v5868_v63, %v5868_v63  ;;  %v8136_v23 = vpop.f32.mrb[144].mxu1  ;;  %6389 = vadd.xlane.f32.xlu0 %v6388_v60  ;;  %v6402_v31 = vadd.f32 %v11348_v57, %v5476_v5  ;;  %v6572_v24 = vmul.f32 %v5476_v5, %v5476_v5  ;;  %v5478_v21 = vpop.f32.mrb[49].mxu0 }
 0x30b   : > { %6670 = vadd.xlane.f32.xlu1 %v6669_v37  ;;  %v7874_v12 = vpack.c.bf16 %v5478_v21, %v5476_v5  ;;  %v6573_v0 = vmul.f32 %v5478_v21, %v5478_v21  ;;  %v8137_v52 = vpop.f32.mrb[145].mxu1  ;;  %v5480_v28 = vpop.f32.mrb[50].mxu0  ;;  %v6677_v8 = vadd.f32 %v6676_v3, %v6560_v6  ;;  %v6396_v22 = vadd.f32 %v6395_v9, %v5868_v63 }
 0x30c   : > { %6286 = vst [vmem:[%s11149_s29 + $0xdc] sm:$0xf] %v7871_v43  ;;  %v8138_v53 = vadd.f32 %v8137_v52, %v8136_v23  ;;  %v6410_v16 = vadd.f32 %v11357_v34, %v5480_v28  ;;  %v6579_v62 = vmul.f32 %v5480_v28, %v5480_v28  ;;  %v8139_v32 = vpop.f32.mrb[146].mxu1  ;;  %v5482_v39 = vpop.f32.mrb[51].mxu0  ;;  %v6567_v14 = vmul.f32 %v5868_v63, %v5868_v63 }
 0x30d   : > { %6289 = vst [vmem:[%s11149_s29 + $0xf0] sm:$0xff] %v7874_v12  ;;  %v7878_v57 = vpack.c.bf16 %v5482_v39, %v5480_v28  ;;  %v6580_v56 = vmul.f32 %v5482_v39, %v5482_v39  ;;  %v8140_v2 = vpop.f32.mrb[147].mxu1  ;;  %v6403_v33 = vadd.f32 %v6402_v31, %v5478_v21  ;;  %v6691_v50 = vadd.f32 %v11354_v47, %v6572_v24 }
 0x30e   : > { %v5873_v40 = vadd.f32 %v8138_v53, %v11546_v26  ;;  %v8141_v10 = vadd.f32 %v8140_v2, %v8139_v32  ;;  %6678 = vadd.xlane.f32.xlu0 %v6677_v8  ;;  %v6685_v48 = vadd.f32 %v6684_v51, %v6567_v14  ;;  %v6411_v4 = vadd.f32 %v6410_v16, %v5482_v39 }
 0x30f   : > { %6397 = vadd.xlane.f32.xlu1 %v6396_v22  ;;  %6293 = vst [vmem:[%s11149_s29 + $0x10c] sm:$0xff] %v7878_v57  ;;  %v6692_v34 = vadd.f32 %v6691_v50, %v6573_v0  ;;  %v6699_v13 = vadd.f32 %v11359_v17, %v6579_v62 }
 0x310   : > { %v7875_v42 = vpack.c.bf16 %v5873_v40, %v5873_v40  ;;  %v5876_v49 = vadd.f32 %v8141_v10, %v11549_v1  ;;  %v6404_v54 = vadd.f32 %v6403_v33, %v5873_v40  ;;  %v6574_v46 = vmul.f32 %v5873_v40, %v5873_v40 }
 0x311   : > { %v5486_v58 = vpop.f32.mrb[52].mxu0  ;;  %v6700_v47 = vadd.f32 %v6699_v13, %v6580_v56 }
 0x312   : > { %6290 = vst [vmem:[%s11149_s29 + $0xf8] sm:$0xf] %v7875_v42  ;;  %v7879_v18 = vpack.c.bf16 %v5876_v49, %v5876_v49  ;;  %v8142_v26 = vpop.f32.mrb[148].mxu1  ;;  %6405 = vadd.xlane.f32.xlu0 %v6404_v54  ;;  %v6418_v61 = vadd.f32 %v11364_v30, %v5486_v58  ;;  %v6586_v29 = vmul.f32 %v5486_v58, %v5486_v58  ;;  %v5488_v20 = vpop.f32.mrb[53].mxu0 }
 0x313   : > { %6686 = vadd.xlane.f32.xlu1 %v6685_v48  ;;  %v7882_v38 = vpack.c.bf16 %v5488_v20, %v5486_v58  ;;  %v6587_v17 = vmul.f32 %v5488_v20, %v5488_v20  ;;  %v8143_v27 = vpop.f32.mrb[149].mxu1  ;;  %v5490_v37 = vpop.f32.mrb[54].mxu0  ;;  %v6693_v1 = vadd.f32 %v6692_v34, %v6574_v46  ;;  %v6412_v3 = vadd.f32 %v6411_v4, %v5876_v49 }
 0x314   : > { %6294 = vst [vmem:[%s11149_s29 + $0x114] sm:$0xf] %v7879_v18  ;;  %v8144_v9 = vadd.f32 %v8143_v27, %v8142_v26  ;;  %v6426_v15 = vadd.f32 %v11373_v7, %v5490_v37  ;;  %v6593_v11 = vmul.f32 %v5490_v37, %v5490_v37  ;;  %v8145_v63 = vpop.f32.mrb[150].mxu1  ;;  %v5492_v60 = vpop.f32.mrb[55].mxu0  ;;  %v6581_v6 = vmul.f32 %v5876_v49, %v5876_v49 }
 0x315   : > { %6297 = vst [vmem:[%s11149_s29 + $0x128] sm:$0xff] %v7882_v38  ;;  %v7886_v30 = vpack.c.bf16 %v5492_v60, %v5490_v37  ;;  %v6594_v5 = vmul.f32 %v5492_v60, %v5492_v60  ;;  %v8146_v51 = vpop.f32.mrb[151].mxu1  ;;  %v6419_v43 = vadd.f32 %v6418_v61, %v5488_v20  ;;  %v6707_v23 = vadd.f32 %v11371_v59, %v6586_v29  ;;  %v11999_v61 = vld [vmem:[#allocation8_spill] sm:$0xff] }
 0x316   : > { %v5881_v31 = vadd.f32 %v8144_v9, %v11552_v25  ;;  %v8147_v24 = vadd.f32 %v8146_v51, %v8145_v63  ;;  %6694 = vadd.xlane.f32.xlu0 %v6693_v1  ;;  %v6701_v21 = vadd.f32 %v6700_v47, %v6581_v6  ;;  %v6427_v12 = vadd.f32 %v6426_v15, %v5492_v60  ;;  %v12000_v37 = vld [vmem:[#allocation4_spill] sm:$0xff] }
 0x317   : > { %6413 = vadd.xlane.f32.xlu1 %v6412_v3  ;;  %6301 = vst [vmem:[%s11149_s29 + $0x144] sm:$0xff] %v7886_v30  ;;  %v6708_v7 = vadd.f32 %v6707_v23, %v6587_v17  ;;  %v6715_v0 = vadd.f32 %v11375_v41, %v6593_v11 }
 0x318   : > { %v7883_v52 = vpack.c.bf16 %v5881_v31, %v5881_v31  ;;  %v5884_v28 = vadd.f32 %v8147_v24, %v11555_v36  ;;  %v6420_v8 = vadd.f32 %v6419_v43, %v5881_v31  ;;  %v6588_v22 = vmul.f32 %v5881_v31, %v5881_v31 }
 0x319   : > { %v5496_v53 = vpop.f32.mrb[56].mxu0  ;;  %v6716_v59 = vadd.f32 %v6715_v0, %v6594_v5  ;;  %v12001_v5 = vld [vmem:[#allocation6_spill] sm:$0xff] }
 0x31a   : > { %6298 = vst [vmem:[%s11149_s29 + $0x130] sm:$0xf] %v7883_v52  ;;  %v7887_v16 = vpack.c.bf16 %v5884_v28, %v5884_v28  ;;  %v8148_v25 = vpop.f32.mrb[152].mxu1  ;;  %6421 = vadd.xlane.f32.xlu0 %v6420_v8  ;;  %v6434_v62 = vadd.f32 %v11380_v19, %v5496_v53  ;;  %v6600_v32 = vmul.f32 %v5496_v53, %v5496_v53  ;;  %v5498_v39 = vpop.f32.mrb[57].mxu0  ;;  %v12002_v52 = vld [vmem:[#allocation5_spill] sm:$0xff] }
 0x31b   : > { %6702 = vadd.xlane.f32.xlu1 %v6701_v21  ;;  %v7890_v14 = vpack.c.bf16 %v5498_v39, %v5496_v53  ;;  %v6601_v41 = vmul.f32 %v5498_v39, %v5498_v39  ;;  %v8149_v57 = vpop.f32.mrb[153].mxu1  ;;  %v5500_v56 = vpop.f32.mrb[58].mxu0  ;;  %v6709_v36 = vadd.f32 %v6708_v7, %v6588_v22  ;;  %v6428_v2 = vadd.f32 %v6427_v12, %v5884_v28  ;;  %v12003_v8 = vld [vmem:[#allocation9_spill] sm:$0xff] }
 0x31c   : > { %6302 = vst [vmem:[%s11149_s29 + $0x14c] sm:$0xf] %v7887_v16  ;;  %v8150_v33 = vadd.f32 %v8149_v57, %v8148_v25  ;;  %v6442_v50 = vadd.f32 %v11389_v45, %v5500_v56  ;;  %v6607_v40 = vmul.f32 %v5500_v56, %v5500_v56  ;;  %v8151_v10 = vpop.f32.mrb[154].mxu1  ;;  %v5502_v48 = vpop.f32.mrb[59].mxu0  ;;  %v6595_v34 = vmul.f32 %v5884_v28, %v5884_v28 }
 0x31d   : > { %6305 = vst [vmem:[%s11149_s29 + $0x160] sm:$0xff] %v7890_v14  ;;  %v7894_v19 = vpack.c.bf16 %v5502_v48, %v5500_v56  ;;  %v6608_v4 = vmul.f32 %v5502_v48, %v5502_v48  ;;  %v8152_v13 = vpop.f32.mrb[155].mxu1  ;;  %v6435_v42 = vadd.f32 %v6434_v62, %v5498_v39  ;;  %v6723_v49 = vadd.f32 %v11387_v55, %v6600_v32  ;;  %v12004_v62 = vld [vmem:[#allocation7_spill] sm:$0xff]  ;;  %v12005_v14 = vld [vmem:[#allocation10_spill] sm:$0xff] }
 0x31e   : > { %v5889_v54 = vadd.f32 %v8150_v33, %v11558_v44  ;;  %v8153_v46 = vadd.f32 %v8152_v13, %v8151_v10  ;;  %6710 = vadd.xlane.f32.xlu0 %v6709_v36  ;;  %v6717_v58 = vadd.f32 %v6716_v59, %v6595_v34  ;;  %v6443_v47 = vadd.f32 %v6442_v50, %v5502_v48  ;;  %v6319_v48 = vld [vmem:[#allocation2] sm:$0xff]  ;;  %v6320_v13 = vld [vmem:[#allocation2 + $0x8] sm:$0xff] }
 0x31f   : > { %6429 = vadd.xlane.f32.xlu1 %v6428_v2  ;;  %6309 = vst [vmem:[%s11149_s29 + $0x17c] sm:$0xff] %v7894_v19  ;;  %v6724_v45 = vadd.f32 %v6723_v49, %v6601_v41  ;;  %v6731_v18 = vadd.f32 %v11391_v35, %v6607_v40 }
 0x320   : > { %v7891_v26 = vpack.c.bf16 %v5889_v54, %v5889_v54  ;;  %v5892_v29 = vadd.f32 %v8153_v46, %v11999_v61  ;;  %v6436_v20 = vadd.f32 %v6435_v42, %v5889_v54  ;;  %v6602_v38 = vmul.f32 %v5889_v54, %v5889_v54 }
 0x321   : > { %v5506_v17 = vpop.f32.mrb[60].mxu0  ;;  %v6732_v55 = vadd.f32 %v6731_v18, %v6608_v4  ;;  %v6497_v4 = vld [vmem:[#allocation3 + $0x8] sm:$0xff] }
 0x322   : > { %6306 = vst [vmem:[%s11149_s29 + $0x168] sm:$0xf] %v7891_v26  ;;  %v7895_v27 = vpack.c.bf16 %v5892_v29, %v5892_v29  ;;  %v8154_v44 = vpop.f32.mrb[156].mxu1  ;;  %6437 = vadd.xlane.f32.xlu0 %v6436_v20  ;;  %v6450_v1 = vadd.f32 %v12000_v37, %v5506_v17  ;;  %v6614_v3 = vmul.f32 %v5506_v17, %v5506_v17  ;;  %v5508_v9 = vpop.f32.mrb[61].mxu0  ;;  %v6322_v20 = vld [vmem:[#allocation2 + $0x18] sm:$0xff] }
 0x323   : > { %6718 = vadd.xlane.f32.xlu1 %v6717_v58  ;;  %v7898_v15 = vpack.c.bf16 %v5508_v9, %v5506_v17  ;;  %v6615_v35 = vmul.f32 %v5508_v9, %v5508_v9  ;;  %v8155_v11 = vpop.f32.mrb[157].mxu1  ;;  %v5510_v63 = vpop.f32.mrb[62].mxu0  ;;  %v6725_v60 = vadd.f32 %v6724_v45, %v6602_v38  ;;  %v6444_v6 = vadd.f32 %v6443_v47, %v5892_v29  ;;  %v6496_v58 = vld [vmem:[#allocation3] sm:$0xff]  ;;  %v6321_v45 = vld [vmem:[#allocation2 + $0x10] sm:$0xff]  ;;  %v6499_v37 = vld [vmem:[#allocation3 + $0x18] sm:$0xff] }
 0x324   : > { %6310 = vst [vmem:[%s11149_s29 + $0x184] sm:$0xf] %v7895_v27  ;;  %v8156_v30 = vadd.f32 %v8155_v11, %v8154_v44  ;;  %v6458_v51 = vadd.f32 %v12001_v5, %v5510_v63  ;;  %v6621_v43 = vmul.f32 %v5510_v63, %v5510_v63  ;;  %v8157_v23 = vpop.f32.mrb[158].mxu1  ;;  %v5512_v31 = vpop.f32.mrb[63].mxu0  ;;  %v6609_v24 = vmul.f32 %v5892_v29, %v5892_v29  ;;  %v6498_v29 = vld [vmem:[#allocation3 + $0x10] sm:$0xff] }
 0x325   : > { %6313 = vst [vmem:[%s11149_s29 + $0x198] sm:$0xff] %v7898_v15  ;;  %v7902_v21 = vpack.c.bf16 %v5512_v31, %v5510_v63  ;;  %v6622_v7 = vmul.f32 %v5512_v31, %v5512_v31  ;;  %v8158_v12 = vpop.f32.mrb[159].mxu1  ;;  %v6451_v0 = vadd.f32 %v6450_v1, %v5508_v9  ;;  %v6739_v28 = vadd.f32 %v12002_v52, %v6614_v3  ;;  %v6323_v9 = vld [vmem:[#allocation2 + $0x20] sm:$0xff] }
 0x326   : > { %v5897_v22 = vadd.f32 %v8156_v30, %v12003_v8  ;;  %v6459_v53 = vadd.f32 %v6458_v51, %v5512_v31  ;;  %v8159_v59 = vadd.f32 %v8158_v12, %v8157_v23  ;;  %6726 = vadd.xlane.f32.xlu0 %v6725_v60  ;;  %v6733_v16 = vadd.f32 %v6732_v55, %v6609_v24  ;;  %v6500_v23 = vld [vmem:[#allocation3 + $0x20] sm:$0xff]  ;;  %v6324_v12 = vld [vmem:[#allocation2 + $0x28] sm:$0xff] }
 0x327   : > { %6445 = vadd.xlane.f32.xlu1 %v6444_v6  ;;  %6317 = vst [vmem:[%s11149_s29 + $0x1b4] sm:$0xff] %v7902_v21  ;;  %v6740_v25 = vadd.f32 %v6739_v28, %v6615_v35  ;;  %v6747_v32 = vadd.f32 %v12004_v62, %v6621_v43 }
 0x328   : > { %v7899_v39 = vpack.c.bf16 %v5897_v22, %v5897_v22  ;;  %v5900_v41 = vadd.f32 %v8159_v59, %v12005_v14  ;;  %v6452_v57 = vadd.f32 %v6451_v0, %v5897_v22  ;;  %v6616_v56 = vmul.f32 %v5897_v22, %v5897_v22 }
 0x329   : > { %v6748_v36 = vadd.f32 %v6747_v32, %v6622_v7  ;;  %v6325_v32 = vld [vmem:[#allocation2 + $0x30] sm:$0xff] }
 0x32a   : > { %6314 = vst [vmem:[%s11149_s29 + $0x1a0] sm:$0xf] %v7899_v39  ;;  %v7903_v2 = vpack.c.bf16 %v5900_v41, %v5900_v41  ;;  %6453 = vadd.xlane.f32.xlu0 %v6452_v57  ;;  %v6741_v33 = vadd.f32 %v6740_v25, %v6616_v56  ;;  %v6460_v50 = vadd.f32 %v6459_v53, %v5900_v41  ;;  %v6501_v53 = vld [vmem:[#allocation3 + $0x28] sm:$0xff] }
 0x32b   : > { %6734 = vadd.xlane.f32.xlu1 %v6733_v16  ;;  %v6623_v40 = vmul.f32 %v5900_v41, %v5900_v41 }
 0x32c   : > { %6318 = vst [vmem:[%s11149_s29 + $0x1bc] sm:$0xf] %v7903_v2 }
 0x32d   : > { %v6749_v10 = vadd.f32 %v6748_v36, %v6623_v40 }
 0x32e   : > { %6742 = vadd.xlane.f32.xlu0 %v6741_v33  ;;  %v6502_v33 = vld [vmem:[#allocation3 + $0x30] sm:$0xff] }
 0x32f   : > { %6461 = vadd.xlane.f32.xlu1 %v6460_v50 }
 0x333   : > { %6750 = vadd.xlane.f32.xlu1 %v6749_v10 }
 0x37f   : > { %v6342_v34 = vpop.xlane.xlu0 %6341 }
 0x380   : > { %v6463_v19 = vadd.f32 %v6342_v34, %v6319_v48  ;;  %v6326_v48 = vld [vmem:[#allocation2 + $0x38] sm:$0xff] }
 0x382   : > { %6480 = vst.msk [vmem:[#allocation2] sm:$0xff] %vm414_vm0, %v6463_v19 }
 0x383   : > { %v6350_v49 = vpop.xlane.xlu0 %6349 }
 0x384   : > { %v6639_v42 = vpop.xlane.xlu1 %6638  ;;  %v6464_v46 = vadd.f32 %v6350_v49, %v6320_v13 }
 0x385   : > { %v6753_v54 = vadd.f32 %v6639_v42, %v6497_v4 }
 0x386   : > { %6481 = vst.msk [vmem:[#allocation2 + $0x8] sm:$0xff] %vm414_vm0, %v6464_v46 }
 0x387   : > { %6769 = vst.msk [vmem:[#allocation3 + $0x8] sm:$0xff] %vm414_vm0, %v6753_v54  ;;  %v6631_v47 = vpop.xlane.xlu0 %6630 }
 0x388   : > { %v6358_v18 = vpop.xlane.xlu1 %6357  ;;  %v6752_v26 = vadd.f32 %v6631_v47, %v6496_v58  ;;  %v6503_v47 = vld [vmem:[#allocation3 + $0x38] sm:$0xff] }
 0x389   : > { %v6465_v61 = vadd.f32 %v6358_v18, %v6321_v45  ;;  %v6786_v38 = vld [vmem:[#allocation2] sm:$0xff] }
 0x38a   : > { %6768 = vst.msk [vmem:[#allocation3] sm:$0xff] %vm414_vm0, %v6752_v26  ;;  %v11654_v15 = vmul.f32 0.0012755102, %v6786_v38  ;;  %v6327_v18 = vld [vmem:[#allocation2 + $0x40] sm:$0xff]  ;;  %v6915_v26 = vld [vmem:[%s11686_s30 + $0x8] sm:$0xff] }
 0x38b   : > { %6482 = vst.msk [vmem:[#allocation2 + $0x10] sm:$0xff] %vm414_vm0, %v6465_v61  ;;  %v6647_v17 = vpop.xlane.xlu0 %6646 }
 0x38c   : > { %v6366_v55 = vpop.xlane.xlu1 %6365  ;;  %v6754_v27 = vadd.f32 %v6647_v17, %v6498_v29  ;;  %v6850_v31 = vmul.f32 %v11654_v15, %v11654_v15 }
 0x38d   : > { %v6466_v44 = vadd.f32 %v6366_v55, %v6322_v20  ;;  %v6787_v3 = vld [vmem:[#allocation2 + $0x8] sm:$0xff] }
 0x38e   : > { %v6819_v1 = vld [vmem:[#allocation3 + $0x8] sm:$0xff]  ;;  %v11656_v35 = vmul.f32 0.0012755102, %v6787_v3  ;;  %6770 = vst.msk [vmem:[#allocation3 + $0x10] sm:$0xff] %vm414_vm0, %v6754_v27 }
 0x38f   : > { %6483 = vst.msk [vmem:[#allocation2 + $0x18] sm:$0xff] %vm414_vm0, %v6466_v44  ;;  %v6374_v63 = vpop.xlane.xlu0 %6373  ;;  %v6835_v60 = vmul.f32 0.0012755102, %v6819_v1 }
 0x390   : > { %v6655_v11 = vpop.xlane.xlu1 %6654  ;;  %v6851_v6 = vmul.f32 %v11656_v35, %v11656_v35  ;;  %v6467_v5 = vadd.f32 %v6374_v63, %v6323_v9 }
 0x391   : > { %v6755_v30 = vadd.f32 %v6655_v11, %v6499_v37  ;;  %v6818_v51 = vld [vmem:[#allocation3] sm:$0xff] }
 0x392   : > { %v6788_v43 = vld [vmem:[#allocation2 + $0x10] sm:$0xff]  ;;  %v6867_v24 = vsub.f32 %v6835_v60, %v6851_v6  ;;  %v6834_v21 = vmul.f32 0.0012755102, %v6818_v51  ;;  %6484 = vst.msk [vmem:[#allocation2 + $0x20] sm:$0xff] %vm414_vm0, %v6467_v5  ;;  %v6914_v37 = vld [vmem:[%s11686_s30] sm:$0xff]  ;;  %v6328_v6 = vld [vmem:[#allocation2 + $0x48] sm:$0xff] }
 0x393   : > { %v11664_v7 = vmul.f32 0.0012755102, %v6788_v43  ;;  %6771 = vst.msk [vmem:[#allocation3 + $0x18] sm:$0xff] %vm414_vm0, %v6755_v30  ;;  %v6663_v0 = vpop.xlane.xlu0 %6662  ;;  %v6504_v60 = vld [vmem:[#allocation3 + $0x40] sm:$0xff]  ;;  %v6963_v5 = vld [vmem:[%s11697_s8 + $0x8] sm:$0xff] }
 0x394   : > { %v6382_v52 = vpop.xlane.xlu1 %6381  ;;  %v6883_v28 = vadd.f32 1e-05, %v6867_v24  ;;  %v6866_v8 = vsub.f32 %v6834_v21, %v6850_v31  ;;  %v6756_v22 = vadd.f32 %v6663_v0, %v6500_v23 }
 0x395   : > { %v6852_v59 = vmul.f32 %v11664_v7, %v11664_v7  ;;  %v6820_v16 = vld [vmem:[#allocation3 + $0x10] sm:$0xff]  ;;  %v6468_v62 = vadd.f32 %v6382_v52, %v6324_v12 }
 0x396   : > { %v6789_v25 = vld [vmem:[#allocation2 + $0x18] sm:$0xff]  ;;  %8475 = vrsqrt.f32 %v6883_v28  ;;  %v6882_v39 = vadd.f32 1e-05, %v6866_v8  ;;  %v6836_v14 = vmul.f32 0.0012755102, %v6820_v16  ;;  %6772 = vst.msk [vmem:[#allocation3 + $0x20] sm:$0xff] %vm414_vm0, %v6756_v22 }
 0x397   : > { %v11670_v41 = vmul.f32 0.0012755102, %v6789_v25  ;;  %6485 = vst.msk [vmem:[#allocation2 + $0x28] sm:$0xff] %vm414_vm0, %v6468_v62  ;;  %v6390_v56 = vpop.xlane.xlu0 %6389  ;;  %v6962_v28 = vld [vmem:[%s11697_s8] sm:$0xff]  ;;  %v6916_v8 = vld [vmem:[%s11686_s30 + $0x10] sm:$0xff]  ;;  %v6505_v62 = vld [vmem:[#allocation3 + $0x48] sm:$0xff] }
 0x398   : > { %v6671_v57 = vpop.xlane.xlu1 %6670  ;;  %8477 = vrsqrt.f32 %v6882_v39  ;;  %v6868_v36 = vsub.f32 %v6836_v14, %v6852_v59  ;;  %v6469_v10 = vadd.f32 %v6390_v56, %v6325_v32  ;;  %v6329_v32 = vld [vmem:[#allocation2 + $0x50] sm:$0xff] }
 0x399   : > { %v6757_v2 = vadd.f32 %v6671_v57, %v6501_v53  ;;  %v6790_v40 = vld [vmem:[#allocation2 + $0x20] sm:$0xff]  ;;  %v6853_v19 = vmul.f32 %v11670_v41, %v11670_v41 }
 0x39a   : > { %v6821_v50 = vld [vmem:[#allocation3 + $0x18] sm:$0xff]  ;;  %v6884_v34 = vadd.f32 1e-05, %v6868_v36  ;;  %v11679_v13 = vmul.f32 0.0012755102, %v6790_v40  ;;  %6486 = vst.msk [vmem:[#allocation2 + $0x30] sm:$0xff] %vm414_vm0, %v6469_v10 }
 0x39b   : > { %v6837_v4 = vmul.f32 0.0012755102, %v6821_v50  ;;  %6773 = vst.msk [vmem:[#allocation3 + $0x28] sm:$0xff] %vm414_vm0, %v6757_v2  ;;  %v6679_v42 = vpop.xlane.xlu0 %6678  ;;  %v6964_v10 = vld [vmem:[%s11697_s8 + $0x10] sm:$0xff] }
 0x39c   : > { %v6398_v49 = vpop.xlane.xlu1 %6397  ;;  %8479 = vrsqrt.f32 %v6884_v34  ;;  %v6758_v46 = vadd.f32 %v6679_v42, %v6502_v33  ;;  %v6854_v29 = vmul.f32 %v11679_v13, %v11679_v13  ;;  %v6506_v42 = vld [vmem:[#allocation3 + $0x50] sm:$0xff] }
 0x39d   : > { %v6869_v54 = vsub.f32 %v6837_v4, %v6853_v19  ;;  %v6822_v58 = vld [vmem:[#allocation3 + $0x20] sm:$0xff]  ;;  %v6470_v45 = vadd.f32 %v6398_v49, %v6326_v48  ;;  %v6917_v48 = vld [vmem:[%s11686_s30 + $0x18] sm:$0xff] }
 0x39e   : > { %v6838_v20 = vmul.f32 0.0012755102, %v6822_v58  ;;  %v6791_v38 = vld [vmem:[#allocation2 + $0x28] sm:$0xff]  ;;  %6774 = vst.msk [vmem:[#allocation3 + $0x30] sm:$0xff] %vm414_vm0, %v6758_v46  ;;  %v6330_v58 = vld [vmem:[#allocation2 + $0x58] sm:$0xff] }
 0x39f   : > { %v6885_v61 = vadd.f32 1e-05, %v6869_v54  ;;  %v11699_v17 = vmul.f32 0.0012755102, %v6791_v38  ;;  %6487 = vst.msk [vmem:[#allocation2 + $0x38] sm:$0xff] %vm414_vm0, %v6470_v45  ;;  %v6406_v27 = vpop.xlane.xlu0 %6405 }
 0x3a0   : > { %v6687_v55 = vpop.xlane.xlu1 %6686  ;;  %v8476_v44 = vpop.eup %8475  ;;  %v6870_v1 = vsub.f32 %v6838_v20, %v6854_v29  ;;  %v6471_v9 = vadd.f32 %v6406_v27, %v6327_v18  ;;  %v6918_v27 = vld [vmem:[%s11686_s30 + $0x20] sm:$0xff] }
 0x3a1   : > { %8481 = vrsqrt.f32 %v6885_v61  ;;  %v6759_v3 = vadd.f32 %v6687_v55, %v6503_v47  ;;  %v6931_v11 = vmul.f32 %v8476_v44, %v6915_v26  ;;  %v6855_v43 = vmul.f32 %v11699_v17, %v11699_v17  ;;  %v6792_v31 = vld [vmem:[#allocation2 + $0x30] sm:$0xff]  ;;  %v6965_v55 = vld [vmem:[%s11697_s8 + $0x18] sm:$0xff] }
 0x3a2   : > { %v6823_v63 = vld [vmem:[#allocation3 + $0x28] sm:$0xff]  ;;  %v8478_v30 = vpop.eup %8477  ;;  %v6886_v51 = vadd.f32 1e-05, %v6870_v1  ;;  %6488 = vst.msk [vmem:[#allocation2 + $0x40] sm:$0xff] %vm414_vm0, %v6471_v9  ;;  %v11717_v12 = vmul.f32 0.0012755102, %v6792_v31 }
 0x3a3   : > { %v6839_v23 = vmul.f32 0.0012755102, %v6823_v63  ;;  %6775 = vst.msk [vmem:[#allocation3 + $0x38] sm:$0xff] %vm414_vm0, %v6759_v3  ;;  %6947 = vst.msk [vmem:[%s11706_s12 + $0x8] sm:$0xff] %vm414_vm0, %v6931_v11  ;;  %v6979_v24 = vmul.f32 %v6931_v11, %v11656_v35  ;;  %v6930_v21 = vmul.f32 %v8478_v30, %v6914_v37  ;;  %v6695_v0 = vpop.xlane.xlu0 %6694  ;;  %v6507_v1 = vld [vmem:[#allocation3 + $0x58] sm:$0xff] }
 0x3a4   : > { %v6414_v52 = vpop.xlane.xlu1 %6413  ;;  %8483 = vrsqrt.f32 %v6886_v51  ;;  %v6760_v53 = vadd.f32 %v6695_v0, %v6504_v60  ;;  %v6856_v57 = vmul.f32 %v11717_v12, %v11717_v12  ;;  %v6331_v60 = vld [vmem:[#allocation2 + $0x60] sm:$0xff]  ;;  %v6919_v0 = vld [vmem:[%s11686_s30 + $0x28] sm:$0xff] }
 0x3a5   : > { %v6871_v22 = vsub.f32 %v6839_v23, %v6855_v43  ;;  %v6472_v59 = vadd.f32 %v6414_v52, %v6328_v6  ;;  %v6995_v16 = vsub.f32 %v6963_v5, %v6979_v24  ;;  %6946 = vst.msk [vmem:[%s11706_s12] sm:$0xff] %vm414_vm0, %v6930_v21  ;;  %v6978_v35 = vmul.f32 %v6930_v21, %v11654_v15  ;;  %v6824_v25 = vld [vmem:[#allocation3 + $0x30] sm:$0xff]  ;;  %v6966_v21 = vld [vmem:[%s11697_s8 + $0x20] sm:$0xff] }
 0x3a6   : > { %v8480_v39 = vpop.eup %8479  ;;  %v6840_v56 = vmul.f32 0.0012755102, %v6824_v25  ;;  %v6793_v36 = vld [vmem:[#allocation2 + $0x38] sm:$0xff]  ;;  %6776 = vst.msk [vmem:[#allocation3 + $0x40] sm:$0xff] %vm414_vm0, %v6760_v53 }
 0x3a7   : > { %v6887_v14 = vadd.f32 1e-05, %v6871_v22  ;;  %6489 = vst.msk [vmem:[#allocation2 + $0x48] sm:$0xff] %vm414_vm0, %v6472_v59  ;;  %7011 = vst.msk [vmem:[%s11723_s15 + $0x8] sm:$0xff] %vm414_vm0, %v6995_v16  ;;  %v6994_v15 = vsub.f32 %v6962_v28, %v6978_v35  ;;  %v6932_v2 = vmul.f32 %v8480_v39, %v6916_v8  ;;  %v11736_v33 = vmul.f32 0.0012755102, %v6793_v36  ;;  %v6422_v40 = vpop.xlane.xlu0 %6421 }
 0x3a8   : > { %v6703_v50 = vpop.xlane.xlu1 %6702  ;;  %v6872_v34 = vsub.f32 %v6840_v56, %v6856_v57  ;;  %v6473_v4 = vadd.f32 %v6422_v40, %v6329_v32  ;;  %v6508_v8 = vld [vmem:[#allocation3 + $0x60] sm:$0xff]  ;;  %v6332_v35 = vld [vmem:[#allocation2 + $0x68] sm:$0xff] }
 0x3a9   : > { %8485 = vrsqrt.f32 %v6887_v14  ;;  %v6761_v19 = vadd.f32 %v6703_v50, %v6505_v62  ;;  %7010 = vst.msk [vmem:[%s11723_s15] sm:$0xff] %vm414_vm0, %v6994_v15  ;;  %6948 = vst.msk [vmem:[%s11706_s12 + $0x10] sm:$0xff] %vm414_vm0, %v6932_v2  ;;  %v6980_v49 = vmul.f32 %v6932_v2, %v11664_v7  ;;  %v6794_v46 = vld [vmem:[#allocation2 + $0x40] sm:$0xff]  ;;  %v6857_v18 = vmul.f32 %v11736_v33, %v11736_v33  ;;  %v6967_v15 = vld [vmem:[%s11697_s8 + $0x28] sm:$0xff] }
 0x3aa   : > { %v6825_v54 = vld [vmem:[#allocation3 + $0x38] sm:$0xff]  ;;  %v6888_v47 = vadd.f32 1e-05, %v6872_v34  ;;  %v11747_v61 = vmul.f32 0.0012755102, %v6794_v46  ;;  %6490 = vst.msk [vmem:[#allocation2 + $0x50] sm:$0xff] %vm414_vm0, %v6473_v4 }
 0x3ab   : > { %v8482_v45 = vpop.eup %8481  ;;  %v6841_v26 = vmul.f32 0.0012755102, %v6825_v54  ;;  %6777 = vst.msk [vmem:[#allocation3 + $0x48] sm:$0xff] %vm414_vm0, %v6761_v19  ;;  %v6996_v29 = vsub.f32 %v6964_v10, %v6980_v49  ;;  %v6711_v20 = vpop.xlane.xlu0 %6710  ;;  %v6920_v2 = vld [vmem:[%s11686_s30 + $0x30] sm:$0xff]  ;;  %v6509_v19 = vld [vmem:[#allocation3 + $0x68] sm:$0xff] }
 0x3ac   : > { %v6933_v7 = vmul.f32 %v8482_v45, %v6917_v48  ;;  %v6430_v38 = vpop.xlane.xlu1 %6429  ;;  %8487 = vrsqrt.f32 %v6888_v47  ;;  %v6762_v37 = vadd.f32 %v6711_v20, %v6506_v42  ;;  %v6858_v5 = vmul.f32 %v11747_v61, %v11747_v61  ;;  %v6333_v4 = vld [vmem:[#allocation2 + $0x70] sm:$0xff] }
 0x3ad   : > { %v6873_v44 = vsub.f32 %v6841_v26, %v6857_v18  ;;  %7012 = vst.msk [vmem:[%s11723_s15 + $0x10] sm:$0xff] %vm414_vm0, %v6996_v29  ;;  %v6826_v9 = vld [vmem:[#allocation3 + $0x40] sm:$0xff]  ;;  %v6474_v63 = vadd.f32 %v6430_v38, %v6330_v58  ;;  %v6968_v29 = vld [vmem:[%s11697_s8 + $0x30] sm:$0xff] }
 0x3ae   : > { %6949 = vst.msk [vmem:[%s11706_s12 + $0x18] sm:$0xff] %vm414_vm0, %v6933_v7  ;;  %v6981_v3 = vmul.f32 %v6933_v7, %v11670_v41  ;;  %v6795_v11 = vld [vmem:[#allocation2 + $0x48] sm:$0xff]  ;;  %v8484_v6 = vpop.eup %8483  ;;  %v6842_v51 = vmul.f32 0.0012755102, %v6826_v9  ;;  %6778 = vst.msk [vmem:[#allocation3 + $0x50] sm:$0xff] %vm414_vm0, %v6762_v37  ;;  %v6921_v7 = vld [vmem:[%s11686_s30 + $0x38] sm:$0xff] }
 0x3af   : > { %v6889_v30 = vadd.f32 1e-05, %v6873_v44  ;;  %v11760_v43 = vmul.f32 0.0012755102, %v6795_v11  ;;  %v6934_v41 = vmul.f32 %v8484_v6, %v6918_v27  ;;  %6491 = vst.msk [vmem:[#allocation2 + $0x58] sm:$0xff] %vm414_vm0, %v6474_v63  ;;  %v6438_v24 = vpop.xlane.xlu0 %6437  ;;  %v6510_v37 = vld [vmem:[#allocation3 + $0x70] sm:$0xff] }
 0x3b0   : > { %v6997_v23 = vsub.f32 %v6965_v55, %v6981_v3  ;;  %v6719_v31 = vpop.xlane.xlu1 %6718  ;;  %v6874_v52 = vsub.f32 %v6842_v51, %v6858_v5  ;;  %v6475_v16 = vadd.f32 %v6438_v24, %v6331_v60 }
 0x3b1   : > { %8489 = vrsqrt.f32 %v6889_v30  ;;  %v6763_v28 = vadd.f32 %v6719_v31, %v6507_v1  ;;  %6950 = vst.msk [vmem:[%s11706_s12 + $0x20] sm:$0xff] %vm414_vm0, %v6934_v41  ;;  %v6982_v22 = vmul.f32 %v6934_v41, %v11679_v13  ;;  %v6796_v59 = vld [vmem:[#allocation2 + $0x50] sm:$0xff]  ;;  %v6859_v32 = vmul.f32 %v11760_v43, %v11760_v43  ;;  %v6334_v1 = vld [vmem:[#allocation2 + $0x78] sm:$0xff]  ;;  %v6922_v41 = vld [vmem:[%s11686_s30 + $0x40] sm:$0xff] }
 0x3b2   : > { %7013 = vst.msk [vmem:[%s11723_s15 + $0x18] sm:$0xff] %vm414_vm0, %v6997_v23  ;;  %v6827_v53 = vld [vmem:[#allocation3 + $0x48] sm:$0xff]  ;;  %v6890_v62 = vadd.f32 1e-05, %v6874_v52  ;;  %v11773_v14 = vmul.f32 0.0012755102, %v6796_v59 }
 0x3b3   : > { %v8486_v25 = vpop.eup %8485  ;;  %v6843_v39 = vmul.f32 0.0012755102, %v6827_v53  ;;  %6779 = vst.msk [vmem:[#allocation3 + $0x58] sm:$0xff] %vm414_vm0, %v6763_v28  ;;  %v6998_v57 = vsub.f32 %v6966_v21, %v6982_v22  ;;  %6492 = vst.msk [vmem:[#allocation2 + $0x60] sm:$0xff] %vm414_vm0, %v6475_v16  ;;  %v6727_v56 = vpop.xlane.xlu0 %6726  ;;  %v6969_v23 = vld [vmem:[%s11697_s8 + $0x38] sm:$0xff] }
 0x3b4   : > { %v6935_v13 = vmul.f32 %v8486_v25, %v6919_v0  ;;  %v6446_v36 = vpop.xlane.xlu1 %6445  ;;  %8491 = vrsqrt.f32 %v6890_v62  ;;  %v6764_v40 = vadd.f32 %v6727_v56, %v6508_v8  ;;  %v6860_v54 = vmul.f32 %v11773_v14, %v11773_v14  ;;  %v6511_v28 = vld [vmem:[#allocation3 + $0x78] sm:$0xff] }
 0x3b5   : > { %v6875_v50 = vsub.f32 %v6843_v39, %v6859_v32  ;;  %7014 = vst.msk [vmem:[%s11723_s15 + $0x20] sm:$0xff] %vm414_vm0, %v6998_v57  ;;  %v6828_v48 = vld [vmem:[#allocation3 + $0x50] sm:$0xff]  ;;  %v6476_v34 = vadd.f32 %v6446_v36, %v6332_v35  ;;  %v6970_v32 = vld [vmem:[%s11697_s8 + $0x40] sm:$0xff]  ;;  %v6923_v39 = vld [vmem:[%s11686_s30 + $0x48] sm:$0xff] }
 0x3b6   : > { %6951 = vst.msk [vmem:[%s11706_s12 + $0x28] sm:$0xff] %vm414_vm0, %v6935_v13  ;;  %v6983_v10 = vmul.f32 %v6935_v13, %v11699_v17  ;;  %v8488_v42 = vpop.eup %8487  ;;  %v6844_v46 = vmul.f32 0.0012755102, %v6828_v48  ;;  %v6797_v58 = vld [vmem:[#allocation2 + $0x58] sm:$0xff]  ;;  %6780 = vst.msk [vmem:[#allocation3 + $0x60] sm:$0xff] %vm414_vm0, %v6764_v40 }
 0x3b7   : > { %v6891_v49 = vadd.f32 1e-05, %v6875_v50  ;;  %v6936_v47 = vmul.f32 %v8488_v42, %v6920_v2  ;;  %v11787_v17 = vmul.f32 0.0012755102, %v6797_v58  ;;  %6493 = vst.msk [vmem:[#allocation2 + $0x68] sm:$0xff] %vm414_vm0, %v6476_v34  ;;  %v6454_v26 = vpop.xlane.xlu0 %6453  ;;  %v6924_v42 = vld [vmem:[%s11686_s30 + $0x50] sm:$0xff] }
 0x3b8   : > { %v6999_v45 = vsub.f32 %v6967_v15, %v6983_v10  ;;  %v6735_v18 = vpop.xlane.xlu1 %6734  ;;  %v6876_v20 = vsub.f32 %v6844_v46, %v6860_v54  ;;  %v6477_v55 = vadd.f32 %v6454_v26, %v6333_v4  ;;  %v6971_v4 = vld [vmem:[%s11697_s8 + $0x48] sm:$0xff] }
 0x3b9   : > { %8493 = vrsqrt.f32 %v6891_v49  ;;  %v6765_v38 = vadd.f32 %v6735_v18, %v6509_v19  ;;  %6952 = vst.msk [vmem:[%s11706_s12 + $0x30] sm:$0xff] %vm414_vm0, %v6936_v47  ;;  %v6984_v27 = vmul.f32 %v6936_v47, %v11717_v12  ;;  %v6861_v11 = vmul.f32 %v11787_v17, %v11787_v17 }
 0x3ba   : > { %7015 = vst.msk [vmem:[%s11723_s15 + $0x28] sm:$0xff] %vm414_vm0, %v6999_v45  ;;  %v6829_v44 = vld [vmem:[#allocation3 + $0x58] sm:$0xff]  ;;  %v6892_v9 = vadd.f32 1e-05, %v6876_v20  ;;  %v6798_v60 = vld [vmem:[#allocation2 + $0x60] sm:$0xff]  ;;  %6494 = vst.msk [vmem:[#allocation2 + $0x70] sm:$0xff] %vm414_vm0, %v6477_v55 }
 0x3bb   : > { %v8490_v3 = vpop.eup %8489  ;;  %v6845_v63 = vmul.f32 0.0012755102, %v6829_v44  ;;  %6781 = vst.msk [vmem:[#allocation3 + $0x68] sm:$0xff] %vm414_vm0, %v6765_v38  ;;  %v7000_v6 = vsub.f32 %v6968_v29, %v6984_v27  ;;  %v11801_v30 = vmul.f32 0.0012755102, %v6798_v60  ;;  %v6743_v5 = vpop.xlane.xlu0 %6742  ;;  %v6972_v20 = vld [vmem:[%s11697_s8 + $0x50] sm:$0xff] }
 0x3bc   : > { %v6937_v12 = vmul.f32 %v8490_v3, %v6921_v7  ;;  %v6462_v51 = vpop.xlane.xlu1 %6461  ;;  %8495 = vrsqrt.f32 %v6892_v9  ;;  %v6766_v24 = vadd.f32 %v6743_v5, %v6510_v37  ;;  %v6925_v38 = vld [vmem:[%s11686_s30 + $0x58] sm:$0xff]  ;;  %v6926_v60 = vld [vmem:[%s11686_s30 + $0x60] sm:$0xff] }
 0x3bd   : > { %v6877_v31 = vsub.f32 %v6845_v63, %v6861_v11  ;;  %v6478_v21 = vadd.f32 %v6462_v51, %v6334_v1  ;;  %7016 = vst.msk [vmem:[%s11723_s15 + $0x30] sm:$0xff] %vm414_vm0, %v7000_v6  ;;  %v6830_v52 = vld [vmem:[#allocation3 + $0x60] sm:$0xff]  ;;  %v6862_v53 = vmul.f32 %v11801_v30, %v11801_v30  ;;  %v6973_v63 = vld [vmem:[%s11697_s8 + $0x58] sm:$0xff] }
 0x3be   : > { %6953 = vst.msk [vmem:[%s11706_s12 + $0x38] sm:$0xff] %vm414_vm0, %v6937_v12  ;;  %v6985_v0 = vmul.f32 %v6937_v12, %v11736_v33  ;;  %v8492_v8 = vpop.eup %8491  ;;  %v6846_v59 = vmul.f32 0.0012755102, %v6830_v52  ;;  %v6799_v16 = vld [vmem:[#allocation2 + $0x68] sm:$0xff]  ;;  %6782 = vst.msk [vmem:[#allocation3 + $0x70] sm:$0xff] %vm414_vm0, %v6766_v24 }
 0x3bf   : > { %v6893_v22 = vadd.f32 1e-05, %v6877_v31  ;;  %6495 = vst.msk [vmem:[#allocation2 + $0x78] sm:$0xff] %vm414_vm0, %v6478_v21  ;;  %v6938_v25 = vmul.f32 %v8492_v8, %v6922_v41  ;;  %v11814_v62 = vmul.f32 0.0012755102, %v6799_v16  ;;  %v6974_v41 = vld [vmem:[%s11697_s8 + $0x60] sm:$0xff] }
 0x3c0   : > { %v7001_v35 = vsub.f32 %v6969_v23, %v6985_v0  ;;  %v6751_v33 = vpop.xlane.xlu1 %6750  ;;  %v6878_v57 = vsub.f32 %v6846_v59, %v6862_v53  ;;  %v6927_v31 = vld [vmem:[%s11686_s30 + $0x68] sm:$0xff]  ;;  %v6976_v16 = vld [vmem:[%s11697_s8 + $0x70] sm:$0xff] }
 0x3c1   : > { %8497 = vrsqrt.f32 %v6893_v22  ;;  %v6767_v13 = vadd.f32 %v6751_v33, %v6511_v28  ;;  %6954 = vst.msk [vmem:[%s11706_s12 + $0x40] sm:$0xff] %vm414_vm0, %v6938_v25  ;;  %v6986_v56 = vmul.f32 %v6938_v25, %v11747_v61  ;;  %v6800_v15 = vld [vmem:[#allocation2 + $0x70] sm:$0xff]  ;;  %v6863_v40 = vmul.f32 %v11814_v62, %v11814_v62  ;;  %v6975_v52 = vld [vmem:[%s11697_s8 + $0x68] sm:$0xff] }
 0x3c2   : > { %7017 = vst.msk [vmem:[%s11723_s15 + $0x38] sm:$0xff] %vm414_vm0, %v7001_v35  ;;  %v6831_v36 = vld [vmem:[#allocation3 + $0x68] sm:$0xff]  ;;  %v6894_v50 = vadd.f32 1e-05, %v6878_v57  ;;  %v11825_v48 = vmul.f32 0.0012755102, %v6800_v15 }
 0x3c3   : > { %v8494_v2 = vpop.eup %8493  ;;  %v6847_v10 = vmul.f32 0.0012755102, %v6831_v36  ;;  %6783 = vst.msk [vmem:[#allocation3 + $0x78] sm:$0xff] %vm414_vm0, %v6767_v13  ;;  %v7002_v34 = vsub.f32 %v6970_v32, %v6986_v56  ;;  %v6928_v28 = vld [vmem:[%s11686_s30 + $0x70] sm:$0xff] }
 0x3c4   : > { %v6939_v19 = vmul.f32 %v8494_v2, %v6923_v39  ;;  %8499 = vrsqrt.f32 %v6894_v50  ;;  %v6864_v47 = vmul.f32 %v11825_v48, %v11825_v48  ;;  %v6977_v39 = vld [vmem:[%s11697_s8 + $0x78] sm:$0xff] }
 0x3c5   : > { %v6879_v61 = vsub.f32 %v6847_v10, %v6863_v40  ;;  %7018 = vst.msk [vmem:[%s11723_s15 + $0x40] sm:$0xff] %vm414_vm0, %v7002_v34  ;;  %v6832_v54 = vld [vmem:[#allocation3 + $0x70] sm:$0xff] }
 0x3c6   : > { %6955 = vst.msk [vmem:[%s11706_s12 + $0x48] sm:$0xff] %vm414_vm0, %v6939_v19  ;;  %v6987_v49 = vmul.f32 %v6939_v19, %v11760_v43  ;;  %v6801_v46 = vld [vmem:[#allocation2 + $0x78] sm:$0xff]  ;;  %v8496_v58 = vpop.eup %8495  ;;  %v6848_v18 = vmul.f32 0.0012755102, %v6832_v54 }
 0x3c7   : > { %v6895_v45 = vadd.f32 1e-05, %v6879_v61  ;;  %v6817_v26 = vmul.f32 0.0012755102, %v6801_v46  ;;  %v6940_v7 = vmul.f32 %v8496_v58, %v6924_v42 }
 0x3c8   : > { %v7003_v29 = vsub.f32 %v6971_v4, %v6987_v49  ;;  %v6880_v55 = vsub.f32 %v6848_v18, %v6864_v47 }
 0x3c9   : > { %8501 = vrsqrt.f32 %v6895_v45  ;;  %6956 = vst.msk [vmem:[%s11706_s12 + $0x50] sm:$0xff] %vm414_vm0, %v6940_v7  ;;  %v6988_v43 = vmul.f32 %v6940_v7, %v11773_v14  ;;  %v6865_v1 = vmul.f32 %v6817_v26, %v6817_v26 }
 0x3ca   : > { %7019 = vst.msk [vmem:[%s11723_s15 + $0x48] sm:$0xff] %vm414_vm0, %v7003_v29  ;;  %v6833_v27 = vld [vmem:[#allocation3 + $0x78] sm:$0xff]  ;;  %v6896_v37 = vadd.f32 1e-05, %v6880_v55 }
 0x3cb   : > { %v8498_v44 = vpop.eup %8497  ;;  %v6849_v3 = vmul.f32 0.0012755102, %v6833_v27  ;;  %v7004_v9 = vsub.f32 %v6972_v20, %v6988_v43 }
 0x3cc   : > { %v6941_v11 = vmul.f32 %v8498_v44, %v6925_v38  ;;  %8503 = vrsqrt.f32 %v6896_v37 }
 0x3cd   : > { %v6881_v6 = vsub.f32 %v6849_v3, %v6865_v1  ;;  %7020 = vst.msk [vmem:[%s11723_s15 + $0x50] sm:$0xff] %vm414_vm0, %v7004_v9 }
 0x3ce   : > { %6957 = vst.msk [vmem:[%s11706_s12 + $0x58] sm:$0xff] %vm414_vm0, %v6941_v11  ;;  %v6989_v14 = vmul.f32 %v6941_v11, %v11787_v17  ;;  %v8500_v12 = vpop.eup %8499 }
 0x3cf   : > { %v6897_v5 = vadd.f32 1e-05, %v6881_v6  ;;  %v6942_v23 = vmul.f32 %v8500_v12, %v6926_v60 }
 0x3d0   : > { %v7005_v51 = vsub.f32 %v6973_v63, %v6989_v14 }
 0x3d1   : > { %8505 = vrsqrt.f32 %v6897_v5  ;;  %6958 = vst.msk [vmem:[%s11706_s12 + $0x60] sm:$0xff] %vm414_vm0, %v6942_v23  ;;  %v6990_v24 = vmul.f32 %v6942_v23, %v11801_v30  ;;  %v6929_v30 = vld [vmem:[%s11686_s30 + $0x78] sm:$0xff] }
 0x3d2   : > { %7021 = vst.msk [vmem:[%s11723_s15 + $0x58] sm:$0xff] %vm414_vm0, %v7005_v51 }
 0x3d3   : > { %v8502_v17 = vpop.eup %8501  ;;  %v7006_v21 = vsub.f32 %v6974_v41, %v6990_v24 }
 0x3d4   : > { %v6943_v0 = vmul.f32 %v8502_v17, %v6927_v31 }
 0x3d5   : > { %7022 = vst.msk [vmem:[%s11723_s15 + $0x60] sm:$0xff] %vm414_vm0, %v7006_v21 }
 0x3d6   : > { %6959 = vst.msk [vmem:[%s11706_s12 + $0x68] sm:$0xff] %vm414_vm0, %v6943_v0  ;;  %v6991_v8 = vmul.f32 %v6943_v0, %v11814_v62  ;;  %v8504_v22 = vpop.eup %8503 }
 0x3d7   : > { %v6944_v59 = vmul.f32 %v8504_v22, %v6928_v28 }
 0x3d8   : > { %v7007_v53 = vsub.f32 %v6975_v52, %v6991_v8 }
 0x3d9   : > { %6960 = vst.msk [vmem:[%s11706_s12 + $0x70] sm:$0xff] %vm414_vm0, %v6944_v59  ;;  %v6992_v35 = vmul.f32 %v6944_v59, %v11825_v48 }
 0x3da   : > { %7023 = vst.msk [vmem:[%s11723_s15 + $0x68] sm:$0xff] %vm414_vm0, %v7007_v53 }
 0x3db   : > { %v8506_v25 = vpop.eup %8505  ;;  %v7008_v33 = vsub.f32 %v6976_v16, %v6992_v35 }
 0x3dc   : > { %v6945_v32 = vmul.f32 %v8506_v25, %v6929_v30 }
 0x3dd   : > { %7024 = vst.msk [vmem:[%s11723_s15 + $0x70] sm:$0xff] %vm414_vm0, %v7008_v33 }
 0x3de   : > { %6961 = vst.msk [vmem:[%s11706_s12 + $0x78] sm:$0xff] %vm414_vm0, %v6945_v32  ;;  %v6993_v62 = vmul.f32 %v6945_v32, %v6817_v26 }
 0x3e0   : > { %v7009_v57 = vsub.f32 %v6977_v39, %v6993_v62 }
 0x3e2   : > { %7025 = vst.msk [vmem:[%s11723_s15 + $0x78] sm:$0xff] %vm414_vm0, %v7009_v57 }
 0x3e3 PF: > { %s17_s23 = sadd.s32 1, %s8529_s23   ;;  %s12006_s21 = smov %s8525_s22 }
 0x3e4   : > { %p14_p5 = scmp.ge.s32.totalorder %s17_s23, 4   ;;  %s12007_s22 = smov %s12009_s24 }
 0x3e6   :  { %16 = sbr.rel (!%p14_p5) target bundleno = 2 (0x2), region = 107 }

</bundles_post_ra>
